<compile_context>
chip_gen: v5e
topology: v5e:2x2
jax: 0.10.0
libtpu: 0.0.40
codegen_flags: <defaults>
</compile_context>

<pallas_src>
import functools

import jax
import jax.numpy as jnp
from jax.experimental import pallas as pl
from jax.experimental.pallas import tpu as pltpu


# ----------------------------------------------------------------------------
# Pallas kernel: one netchunk-sized chunk of voxels per grid step
# (mirrors batchify_query(..., chunk=netchunk, dim_batchify=1)).
# ----------------------------------------------------------------------------
def _predict_attr_kernel(slab_ref, bsel_ref, w1_ref, b1_ref, w2_ref, b2_ref,
                         w3_ref, b3_ref, out_ref, *, c_feat, k, attr_ch, kq):
    x = slab_ref[...]                                    # (T, 128) bf16
    w_lo = c_feat + k * attr_ch

    # guarded weight normalization in f32 (lanes >= k in the slice are 0-pad)
    w = x[:, w_lo:w_lo + kq].astype(jnp.float32)         # (T, Kq)
    wsum = jnp.sum(w, axis=-1, keepdims=True)
    wn = w * pl.reciprocal(jnp.maximum(wsum, 1e-8), approx=True)   # (T, Kq)

    # lane-broadcast wn over each view's attr lanes with a tiny 0/1 matmul;
    # feat lanes get scale 1, weight/pad lanes get 0 (their w1 rows are 0).
    scale = jnp.dot(wn.astype(jnp.bfloat16), bsel_ref[...],
                    preferred_element_type=jnp.float32)  # (T, 128)
    lane = jax.lax.broadcasted_iota(jnp.int32, (1, x.shape[1]), 1)
    scale = scale + (lane < c_feat).astype(jnp.float32)

    # scaled slab (f32 math, then one bf16 cast for the MXU)
    x1 = (x.astype(jnp.float32) * scale).astype(jnp.bfloat16)      # (T, 128)

    # fused 3-layer MLP: bf16 operands, f32 accumulation, lane-dense throughout
    h = jnp.dot(x1, w1_ref[...], preferred_element_type=jnp.float32) + b1_ref[...]
    h = jnp.maximum(h, 0.0)
    h = jnp.dot(h.astype(jnp.bfloat16), w2_ref[...],
                preferred_element_type=jnp.float32) + b2_ref[...]
    h = jnp.maximum(h, 0.0)
    out = jnp.dot(h.astype(jnp.bfloat16), w3_ref[...],
                  preferred_element_type=jnp.float32) + b3_ref[...]
    out_ref[...] = out.astype(out_ref.dtype)             # (T, 128) unmasked vst


def predict_attr_pallas(feats, attrs_flat, valid, params, *, k, netchunk=2048,
                        enable_sem=True):
    """Equivalent of RenderNetwork.predict_attr.

    feats      : (N, C)           volume features (sparse voxels)
    attrs_flat : (N, K * (A + 1)) back-projected per-view attrs + blend weight
    valid      : (N, K)           bool / {0,1} validity
    """
    n_vox, c_feat = feats.shape
    a_plus1 = attrs_flat.shape[1] // k
    attr_ch = a_plus1 - 1
    hidden = params["w2"].shape[0]

    LANES = 128
    kq = ((k + 7) // 8) * 8                    # padded weight-lane slice width
    w_lo = c_feat + k * attr_ch
    slab_used = w_lo + k
    if w_lo + kq > LANES:
        raise ValueError("feature + view-attr + weight lanes exceed 128")
    hidden_pad = ((hidden + LANES - 1) // LANES) * LANES
    out_pad = ((attr_ch + LANES - 1) // LANES) * LANES

    # --- one lane-dense bf16 slab: [feats | K*A attrs | w | zero pad] --------
    attrs3 = attrs_flat.reshape(n_vox, k, a_plus1)
    attrs2d = attrs3[..., :attr_ch].reshape(n_vox, k * attr_ch)     # (N, K*A)
    vw = attrs3[..., attr_ch]                                       # (N, K)
    w = valid.astype(attrs_flat.dtype) * vw                         # (N, K)
    slab = jnp.concatenate(
        [feats, attrs2d, w,
         jnp.zeros((n_vox, LANES - slab_used), feats.dtype)], axis=-1
    ).astype(jnp.bfloat16)                                          # (N, 128)

    # pad the voxel axis so the grid tiles evenly; padded rows have w == 0 and
    # are sliced off below.
    n_pad = (-n_vox) % netchunk
    if n_pad:
        slab = jnp.pad(slab, ((0, n_pad), (0, 0)))
    n_total = n_vox + n_pad
    grid = (n_total // netchunk,)

    # --- 0/1 select matrix: view kk -> its attr lanes -------------------------
    lane = jnp.arange(LANES)[None, :]
    view = jnp.arange(kq)[:, None]
    bsel = ((view < k)
            & (lane >= c_feat + view * attr_ch)
            & (lane < c_feat + (view + 1) * attr_ch)).astype(jnp.bfloat16)

    # --- weights, zero-padded to lane-dense shapes (bf16; biases f32) ---------
    f32 = jnp.float32
    w1_full = jnp.zeros((LANES, hidden_pad), f32)
    w1_full = w1_full.at[:c_feat, :hidden].set(params["w1f"])
    w1_full = w1_full.at[c_feat:w_lo, :hidden].set(
        jnp.concatenate([params["w1a"]] * k, axis=0))
    w1 = w1_full.astype(jnp.bfloat16)
    b1 = jnp.zeros((1, hidden_pad), f32).at[:, :hidden].set(params["b1"])
    w2 = jnp.zeros((hidden_pad, hidden_pad), f32).at[:hidden, :hidden].set(
        params["w2"]).astype(jnp.bfloat16)
    b2 = jnp.zeros((1, hidden_pad), f32).at[:, :hidden].set(params["b2"])
    w3 = jnp.zeros((hidden_pad, out_pad), f32).at[:hidden, :attr_ch].set(
        params["w3"]).astype(jnp.bfloat16)
    b3 = jnp.zeros((1, out_pad), f32).at[:, :attr_ch].set(params["b3"])

    flops = 2 * n_total * (kq * LANES + LANES * hidden_pad
                           + hidden_pad * hidden_pad + hidden_pad * out_pad)
    bytes_accessed = (n_total * (LANES * 2 + out_pad * 4)
                      + (w1.size + w2.size + w3.size + bsel.size) * 2
                      + (b1.size + b2.size + b3.size) * 4)
    cost = pl.CostEstimate(flops=int(flops), transcendentals=0,
                           bytes_accessed=int(bytes_accessed))

    def full_spec(arr):
        return pl.BlockSpec(arr.shape, lambda i: (0, 0))

    kernel = functools.partial(_predict_attr_kernel, c_feat=c_feat, k=k,
                               attr_ch=attr_ch, kq=kq)

    out = pl.pallas_call(
        kernel,
        out_shape=jax.ShapeDtypeStruct((n_total, out_pad), jnp.float32),
        grid_spec=pltpu.PrefetchScalarGridSpec(
            num_scalar_prefetch=0,
            grid=grid,
            in_specs=[
                pl.BlockSpec((netchunk, LANES), lambda i: (i, 0)),   # slab
                full_spec(bsel),
                full_spec(w1), full_spec(b1),
                full_spec(w2), full_spec(b2),
                full_spec(w3), full_spec(b3),
            ],
            out_specs=pl.BlockSpec((netchunk, out_pad), lambda i: (i, 0)),
        ),
        compiler_params=pltpu.CompilerParams(
            dimension_semantics=("parallel",)),
        cost_estimate=cost,
    )(slab, bsel, w1, b1, w2, b2, w3, b3)

    n_out = attr_ch if enable_sem else 3
    return out[:n_vox, :n_out]


# ----------------------------------------------------------------------------
# Pure-JAX reference (mirrors the kernel's bf16 rounding points)
# ----------------------------------------------------------------------------
def predict_attr_ref(feats, attrs_flat, valid, params, *, k):
    def b(v):
        return v.astype(jnp.bfloat16).astype(jnp.float32)

    n = feats.shape[0]
    a3 = attrs_flat.reshape(n, k, -1)
    attrs, vw = a3[..., :-1], a3[..., -1]
    attr_ch = attrs.shape[-1]
    w = b(valid.astype(jnp.float32) * vw)
    wn = b(w / jnp.maximum(w.sum(-1, keepdims=True), 1e-8))
    scaled = b(b(attrs) * wn[..., None])                       # (n, k, A)
    x1 = jnp.concatenate([b(feats), scaled.reshape(n, k * attr_ch)], axis=-1)
    w1 = jnp.concatenate([params["w1f"]] + [params["w1a"]] * k, axis=0)
    h = jnp.maximum(x1 @ b(w1) + params["b1"], 0.0)
    h = jnp.maximum(b(h) @ b(params["w2"]) + params["b2"], 0.0)
    return b(h) @ b(params["w3"]) + params["b3"]


# ----------------------------------------------------------------------------
# Plain-JAX glue reproducing the defined parts of RenderNetwork.forward()
# ----------------------------------------------------------------------------
def forward_preprocess(imgs, rays, origin, sem_seg):
    imgs = imgs / 255.0
    rays = rays.at[..., :3].add(-origin[:, None])
    sem_seg = sem_seg / sem_seg.sum(axis=2, keepdims=True)
    return imgs, rays, sem_seg


def _init_params(key, c_feat, attr_ch, hidden):
    ks = jax.random.split(key, 5)
    sc = 0.1
    return {
        "w1f": sc * jax.random.normal(ks[0], (c_feat, hidden), jnp.float32),
        "w1a": sc * jax.random.normal(ks[1], (attr_ch, hidden), jnp.float32),
        "b1": jnp.zeros((1, hidden), jnp.float32),
        "w2": sc * jax.random.normal(ks[2], (hidden, hidden), jnp.float32),
        "b2": jnp.zeros((1, hidden), jnp.float32),
        "w3": sc * jax.random.normal(ks[3], (hidden, attr_ch), jnp.float32),
        "b3": jnp.zeros((1, attr_ch), jnp.float32),
    }


if __name__ == "__main__":
    key = jax.random.PRNGKey(0)

    # small config consistent with the module
    N_VOX_SPARSE = 3968     # sparse voxels (not a multiple of NETCHUNK: tests pad+slice)
    C_FEAT = 32             # volume feature channels
    K = 4                   # cfg.NERF.K source views
    NUM_CLS = 13            # cfg.NUM_CLS
    ATTR_CH = 3 + NUM_CLS   # rgb + semantics = 16
    HIDDEN = 64
    NETCHUNK = 2048         # cfg.NERF.SAMPLE.NETCHUNK -> grid of 2 even steps here

    k0, k1, k2, k3, k4, k5, k6, k7, k8 = jax.random.split(key, 9)

    # forward() preprocessing inputs (glue only)
    imgs = jax.random.uniform(k4, (2, K, 3, 16, 16), jnp.float32) * 255.0
    rays = jax.random.normal(k5, (2, 64, 8), jnp.float32)
    origin = jax.random.normal(k6, (2, 3), jnp.float32)
    sem_seg = jax.random.uniform(k7, (2, K, NUM_CLS, 16, 16), jnp.float32) + 0.1
    imgs_n, rays_n, sem_n = forward_preprocess(imgs, rays, origin, sem_seg)

    # predict_attr inputs (the hot path). The per-view blend-weight channel is
    # positive (as in the real pipeline), keeping the normalization
    # well-conditioned.
    feats = jax.random.normal(k0, (N_VOX_SPARSE, C_FEAT), jnp.float32)
    attr_part = jax.random.normal(k1, (N_VOX_SPARSE, K, ATTR_CH), jnp.float32)
    weight_part = jax.random.uniform(k8, (N_VOX_SPARSE, K, 1), jnp.float32,
                                     minval=0.1, maxval=1.0)
    attrs_flat = jnp.concatenate([attr_part, weight_part], axis=-1).reshape(
        N_VOX_SPARSE, K * (ATTR_CH + 1))
    valid = (jax.random.uniform(k2, (N_VOX_SPARSE, K)) > 0.3)

    params = _init_params(k3, C_FEAT, ATTR_CH, HIDDEN)

    out = predict_attr_pallas(feats, attrs_flat, valid, params,
                              k=K, netchunk=NETCHUNK, enable_sem=True)
    out = jax.block_until_ready(out)

    ref = predict_attr_ref(feats, attrs_flat, valid, params, k=K)
    ref = jax.block_until_ready(ref)

    assert out.shape == (N_VOX_SPARSE, ATTR_CH)
    max_abs = float(jnp.max(jnp.abs(out - ref)))
    assert bool(jnp.allclose(out, ref, atol=1e-2, rtol=1e-2)), \
        f"mismatch: max abs err = {max_abs}"

    # touch the glue outputs so they are materialized too
    jax.block_until_ready((imgs_n, rays_n, sem_n))

    print("KERNEL_OK")
</pallas_src>

<mosaic_0001>
module attributes {stable_mosaic.version = 11 : i64} {
  func.func @_predict_attr_kernel(%arg0: i32, %arg1: memref<2048x128xbf16, #tpu.memory_space<vmem>>, %arg2: memref<8x128xbf16, #tpu.memory_space<vmem>>, %arg3: memref<128x128xbf16, #tpu.memory_space<vmem>>, %arg4: memref<1x128xf32, #tpu.memory_space<vmem>>, %arg5: memref<128x128xbf16, #tpu.memory_space<vmem>>, %arg6: memref<1x128xf32, #tpu.memory_space<vmem>>, %arg7: memref<128x128xbf16, #tpu.memory_space<vmem>>, %arg8: memref<1x128xf32, #tpu.memory_space<vmem>>, %arg9: memref<2048x128xf32, #tpu.memory_space<vmem>>) attributes {dimension_semantics = [#tpu.dimension_semantics<parallel>], iteration_bounds = array<i64: 2>, scalar_prefetch = 0 : i64, scratch_operands = 0 : i64, tpu.core_type = #tpu.core_type<tc>, window_params = [{transform_indices = @transform_0, window_bounds = array<i64: 2048, 128>}, {pipeline_mode = #tpu.pipeline_mode<synchronous>, transform_indices = @transform_1, window_bounds = array<i64: 8, 128>}, {pipeline_mode = #tpu.pipeline_mode<synchronous>, transform_indices = @transform_2, window_bounds = array<i64: 128, 128>}, {pipeline_mode = #tpu.pipeline_mode<synchronous>, transform_indices = @transform_3, window_bounds = array<i64: 1, 128>}, {pipeline_mode = #tpu.pipeline_mode<synchronous>, transform_indices = @transform_4, window_bounds = array<i64: 128, 128>}, {pipeline_mode = #tpu.pipeline_mode<synchronous>, transform_indices = @transform_5, window_bounds = array<i64: 1, 128>}, {pipeline_mode = #tpu.pipeline_mode<synchronous>, transform_indices = @transform_6, window_bounds = array<i64: 128, 128>}, {pipeline_mode = #tpu.pipeline_mode<synchronous>, transform_indices = @transform_7, window_bounds = array<i64: 1, 128>}, {transform_indices = @transform_8, window_bounds = array<i64: 2048, 128>}]} {
    %c0 = arith.constant 0 : index
    %c0_0 = arith.constant 0 : index
    %0 = vector.load %arg1[%c0, %c0_0] : memref<2048x128xbf16, #tpu.memory_space<vmem>>, vector<2048x128xbf16>
    %1 = vector.extract_strided_slice %0 {offsets = [0, 96], sizes = [2048, 8], strides = [1, 1]} : vector<2048x128xbf16> to vector<2048x8xbf16>
    %2 = arith.extf %1 : vector<2048x8xbf16> to vector<2048x8xf32>
    %cst = arith.constant dense<0.000000e+00> : vector<2048xf32>
    %3 = vector.multi_reduction <add>, %2, %cst [1] : vector<2048x8xf32> to vector<2048xf32>
    %4 = vector.shape_cast %3 : vector<2048xf32> to vector<2048x1xf32>
    %cst_1 = arith.constant 9.99999993E-9 : f32
    %5 = vector.broadcast %cst_1 : f32 to vector<2048x1xf32>
    %6 = arith.maximumf %4, %5 : vector<2048x1xf32>
    %7 = tpu.reciprocal %6 {approx = true} : vector<2048x1xf32> -> vector<2048x1xf32>
    %8 = vector.broadcast %7 : vector<2048x1xf32> to vector<2048x8xf32>
    %9 = arith.mulf %2, %8 : vector<2048x8xf32>
    %10 = arith.truncf %9 : vector<2048x8xf32> to vector<2048x8xbf16>
    %c0_2 = arith.constant 0 : index
    %c0_3 = arith.constant 0 : index
    %11 = vector.load %arg2[%c0_2, %c0_3] : memref<8x128xbf16, #tpu.memory_space<vmem>>, vector<8x128xbf16>
    %cst_4 = arith.constant dense<0.000000e+00> : vector<2048x128xf32>
    %12 = tpu.matmul %10, %11, %cst_4 {dimension_numbers = #tpu.dot_dimension_numbers<[1], [0], [0], [1], [0, 0, 1, 1], [], []>} : vector<2048x8xbf16>, vector<8x128xbf16>, vector<2048x128xf32> -> vector<2048x128xf32>
    %13 = tpu.iota {dimensions = array<i32: 1>} : vector<1x128xi32>
    %c32_i32 = arith.constant 32 : i32
    %14 = vector.broadcast %c32_i32 : i32 to vector<1x128xi32>
    %15 = arith.cmpi slt, %13, %14 : vector<1x128xi32>
    %16 = arith.extui %15 : vector<1x128xi1> to vector<1x128xi32>
    %17 = arith.sitofp %16 : vector<1x128xi32> to vector<1x128xf32>
    %18 = vector.broadcast %17 : vector<1x128xf32> to vector<2048x128xf32>
    %19 = arith.addf %12, %18 : vector<2048x128xf32>
    %20 = arith.extf %0 : vector<2048x128xbf16> to vector<2048x128xf32>
    %21 = arith.mulf %20, %19 : vector<2048x128xf32>
    %22 = arith.truncf %21 : vector<2048x128xf32> to vector<2048x128xbf16>
    %c0_5 = arith.constant 0 : index
    %c0_6 = arith.constant 0 : index
    %23 = vector.load %arg3[%c0_5, %c0_6] : memref<128x128xbf16, #tpu.memory_space<vmem>>, vector<128x128xbf16>
    %cst_7 = arith.constant dense<0.000000e+00> : vector<2048x128xf32>
    %24 = tpu.matmul %22, %23, %cst_7 {dimension_numbers = #tpu.dot_dimension_numbers<[1], [0], [0], [1], [0, 0, 1, 1], [], []>} : vector<2048x128xbf16>, vector<128x128xbf16>, vector<2048x128xf32> -> vector<2048x128xf32>
    %c0_8 = arith.constant 0 : index
    %c0_9 = arith.constant 0 : index
    %25 = vector.load %arg4[%c0_8, %c0_9] : memref<1x128xf32, #tpu.memory_space<vmem>>, vector<1x128xf32>
    %26 = vector.broadcast %25 : vector<1x128xf32> to vector<2048x128xf32>
    %27 = arith.addf %24, %26 : vector<2048x128xf32>
    %cst_10 = arith.constant 0.000000e+00 : f32
    %28 = vector.broadcast %cst_10 : f32 to vector<2048x128xf32>
    %29 = arith.maximumf %27, %28 : vector<2048x128xf32>
    %30 = arith.truncf %29 : vector<2048x128xf32> to vector<2048x128xbf16>
    %c0_11 = arith.constant 0 : index
    %c0_12 = arith.constant 0 : index
    %31 = vector.load %arg5[%c0_11, %c0_12] : memref<128x128xbf16, #tpu.memory_space<vmem>>, vector<128x128xbf16>
    %cst_13 = arith.constant dense<0.000000e+00> : vector<2048x128xf32>
    %32 = tpu.matmul %30, %31, %cst_13 {dimension_numbers = #tpu.dot_dimension_numbers<[1], [0], [0], [1], [0, 0, 1, 1], [], []>} : vector<2048x128xbf16>, vector<128x128xbf16>, vector<2048x128xf32> -> vector<2048x128xf32>
    %c0_14 = arith.constant 0 : index
    %c0_15 = arith.constant 0 : index
    %33 = vector.load %arg6[%c0_14, %c0_15] : memref<1x128xf32, #tpu.memory_space<vmem>>, vector<1x128xf32>
    %34 = vector.broadcast %33 : vector<1x128xf32> to vector<2048x128xf32>
    %35 = arith.addf %32, %34 : vector<2048x128xf32>
    %cst_16 = arith.constant 0.000000e+00 : f32
    %36 = vector.broadcast %cst_16 : f32 to vector<2048x128xf32>
    %37 = arith.maximumf %35, %36 : vector<2048x128xf32>
    %38 = arith.truncf %37 : vector<2048x128xf32> to vector<2048x128xbf16>
    %c0_17 = arith.constant 0 : index
    %c0_18 = arith.constant 0 : index
    %39 = vector.load %arg7[%c0_17, %c0_18] : memref<128x128xbf16, #tpu.memory_space<vmem>>, vector<128x128xbf16>
    %cst_19 = arith.constant dense<0.000000e+00> : vector<2048x128xf32>
    %40 = tpu.matmul %38, %39, %cst_19 {dimension_numbers = #tpu.dot_dimension_numbers<[1], [0], [0], [1], [0, 0, 1, 1], [], []>} : vector<2048x128xbf16>, vector<128x128xbf16>, vector<2048x128xf32> -> vector<2048x128xf32>
    %c0_20 = arith.constant 0 : index
    %c0_21 = arith.constant 0 : index
    %41 = vector.load %arg8[%c0_20, %c0_21] : memref<1x128xf32, #tpu.memory_space<vmem>>, vector<1x128xf32>
    %42 = vector.broadcast %41 : vector<1x128xf32> to vector<2048x128xf32>
    %43 = arith.addf %40, %42 : vector<2048x128xf32>
    %c0_22 = arith.constant 0 : index
    %c0_23 = arith.constant 0 : index
    %44 = vector.load %arg9[%c0_22, %c0_23] : memref<2048x128xf32, #tpu.memory_space<vmem>>, vector<2048x128xf32>
    tpu.vector_store %arg9[%c0_22, %c0_23], %43 {strides = array<i32>} : memref<2048x128xf32, #tpu.memory_space<vmem>>, vector<2048x128xf32>,
    return
  }
  func.func @transform_0(%arg0: i32) -> (i32, i32) {
    %c0_i32 = arith.constant 0 : i32
    %c0_i32_0 = arith.constant 0 : i32
    return %arg0, %c0_i32 : i32, i32
  }
  func.func @transform_1(%arg0: i32) -> (i32, i32) {
    %c0_i32 = arith.constant 0 : i32
    %c0_i32_0 = arith.constant 0 : i32
    %c0_i32_1 = arith.constant 0 : i32
    return %c0_i32, %c0_i32_0 : i32, i32
  }
  func.func @transform_2(%arg0: i32) -> (i32, i32) {
    %c0_i32 = arith.constant 0 : i32
    %c0_i32_0 = arith.constant 0 : i32
    %c0_i32_1 = arith.constant 0 : i32
    return %c0_i32, %c0_i32_0 : i32, i32
  }
  func.func @transform_3(%arg0: i32) -> (i32, i32) {
    %c0_i32 = arith.constant 0 : i32
    %c0_i32_0 = arith.constant 0 : i32
    %c0_i32_1 = arith.constant 0 : i32
    return %c0_i32, %c0_i32_0 : i32, i32
  }
  func.func @transform_4(%arg0: i32) -> (i32, i32) {
    %c0_i32 = arith.constant 0 : i32
    %c0_i32_0 = arith.constant 0 : i32
    %c0_i32_1 = arith.constant 0 : i32
    return %c0_i32, %c0_i32_0 : i32, i32
  }
  func.func @transform_5(%arg0: i32) -> (i32, i32) {
    %c0_i32 = arith.constant 0 : i32
    %c0_i32_0 = arith.constant 0 : i32
    %c0_i32_1 = arith.constant 0 : i32
    return %c0_i32, %c0_i32_0 : i32, i32
  }
  func.func @transform_6(%arg0: i32) -> (i32, i32) {
    %c0_i32 = arith.constant 0 : i32
    %c0_i32_0 = arith.constant 0 : i32
    %c0_i32_1 = arith.constant 0 : i32
    return %c0_i32, %c0_i32_0 : i32, i32
  }
  func.func @transform_7(%arg0: i32) -> (i32, i32) {
    %c0_i32 = arith.constant 0 : i32
    %c0_i32_0 = arith.constant 0 : i32
    %c0_i32_1 = arith.constant 0 : i32
    return %c0_i32, %c0_i32_0 : i32, i32
  }
  func.func @transform_8(%arg0: i32) -> (i32, i32) {
    %c0_i32 = arith.constant 0 : i32
    %c0_i32_0 = arith.constant 0 : i32
    return %arg0, %c0_i32 : i32, i32
  }
}

</mosaic_0001>

<bundles_post_ra>
// kernel: tpu_custom_call.1
= control target key start
LH: loop header
LB: loop body
LE: loop exit
PB: predicated region body
PF: predicated region fallthrough
CT: control target
= control target key end

     0   :  { %s15005_s0 = inlined_call_operand.hbm [shape: bf16[4096,128], index: 0, kind: input, shape index: {}]   ;;  %s15006_s1 = inlined_call_operand.hbm [shape: bf16[8,128], index: 1, kind: input, shape index: {}]   ;;  %s15007_s2 = inlined_call_operand.hbm [shape: bf16[128,128], index: 2, kind: input, shape index: {}]   ;;  %s15008_s3 = inlined_call_operand.hbm [shape: f32[1,128], index: 3, kind: input, shape index: {}]   ;;  %s15009_s4 = inlined_call_operand.hbm [shape: bf16[128,128], index: 4, kind: input, shape index: {}]   ;;  %s15010_s5 = inlined_call_operand.hbm [shape: f32[1,128], index: 5, kind: input, shape index: {}]   ;;  %s15011_s6 = inlined_call_operand.hbm [shape: bf16[128,128], index: 6, kind: input, shape index: {}]   ;;  %s15012_s7 = inlined_call_operand.hbm [shape: f32[1,128], index: 7, kind: input, shape index: {}]   ;;  %s15013_s8 = inlined_call_operand.hbm [shape: f32[4096,128], index: 8, kind: output, shape index: {}]  }
   0x1   :  { %15016 = sst [smem:[#allocation23_spill]] %s15006_s1 }
   0x2   :  { %15017 = sst [smem:[#allocation24_spill]] %s15007_s2 }
   0x3   :  { %13 = vsyncpa [#allocation3], 0 }
   0x4   :  { %15 = vsyncpa [#allocation3 + $0x1], 0 }
   0x5   :  { %16 = vsyncpa [#allocation6], 0 }
   0x6   :  { %17 = vsyncpa [#allocation9], 0 }
   0x7   :  { %18 = vsyncpa [#allocation12], 0 }
   0x8   :  { %19 = vsyncpa [#allocation15], 0 }
   0x9   :  { %20 = vsyncpa [#allocation4], 0 }
   0xa   :  { %22 = vsyncpa [#allocation4 + $0x1], 0  ;;  %s11393_s27 = smov 0   ;;  %s11395_s28 = smov 0  }
   0xb   :  { %s11397_s29 = smov 0   ;;  %s11399_s30 = smov 0  }
   0xc LB: > { %s15018_s1 = sld [smem:[#allocation23_spill]]  ;;  %s11417_s12 = sadd.s32 4294967295, %s11333_s30   ;;  %s11333_s30 = sphi %s11399_s30, %s15032_s30   ;;  %s11329_s29 = sphi %s11397_s29, %s15031_s29   ;;  %s11325_s28 = sphi %s11395_s28, %s15030_s28   ;;  %s11321_s27 = sphi %s11393_s27, %s15029_s27  }
   0xd   : > { %p8781_p0 = scmp.ge.s32.totalorder %s11333_s30, 1  ;;  %p49_p1 = scmp.eq.s32.totalorder %s11417_s12, 0 }
   0xe   : > { %p232_p2 = scmp.lt.s32.totalorder %s11333_s30, 3  ;;  %s11335_s14 = smov [#allocation5]  }
   0xf   : > { %s246_s15 = sshll.u32 %s11335_s14, 4  ;;  %s270_s18 = sshll.u32 %s15008_s3, 4  ;;  %s247_s15 = int_to_ptr.vmem [resolvable:$true] %s246_s15  ;;  %s271_s18 = int_to_ptr.hbm [resolvable:$true] %s270_s18 }
  0x10   : > { %p11422_p3 = pnand %p8781_p0, %p232_p2  ;;  %s11336_s20 = smov [#allocation8]  }
  0x11   : > { %s272_s21 = sshll.u32 %s11336_s20, 4  ;;  %s296_s24 = sshll.u32 %s15010_s5, 4  ;;  %s273_s21 = int_to_ptr.vmem [resolvable:$true] %s272_s21  ;;  %s297_s24 = int_to_ptr.hbm [resolvable:$true] %s296_s24 }
  0x12   : > { %s244_s11 = sshll.u32 %s15018_s1, 4  ;;  %p9730_p5 = pneg %p11422_p3  ;;  %s245_s11 = int_to_ptr.hbm [resolvable:$true] %s244_s11 }
  0x13   : > { %s15021_s2 = sld [smem:[#allocation24_spill]]  ;;  %s11337_s10 = smov [#allocation11]  }
  0x14   : > { %p11434_p6 = pnand %p9730_p5, %p49_p1  ;;  %s298_s14 = sshll.u32 %s11337_s10, 4  ;;  %s299_s14 = int_to_ptr.vmem [resolvable:$true] %s298_s14 }
  0x15   : > { %s11338_s16 = smov [#allocation7]   ;;  %s15014_s20 = smov 64  }
  0x16   : > { %9733 = dma.hbm_to_vmem [thread:$0]  (!%p11434_p6), %s245_s11, 64, %s247_s15, [#allocation6]  }
  0x17   : > { %9739 = dma.hbm_to_vmem [thread:$0]  (!%p11434_p6), %s271_s18, 16, %s273_s21, [#allocation9]  }
  0x18   : > { %9745 = dma.hbm_to_vmem [thread:$0]  (!%p11434_p6), %s297_s24, 16, %s299_s14, [#allocation12]  }
  0x19   : > { %s255_s9 = sshll.u32 %s15021_s2, 4  ;;  %s257_s17 = sshll.u32 %s11338_s16, 4  ;;  %s256_s9 = int_to_ptr.hbm [resolvable:$true] %s255_s9  ;;  %s258_s17 = int_to_ptr.vmem [resolvable:$true] %s257_s17 }
  0x1a   : > { %s15015_s22 = smov 4   ;;  %s281_s18 = sshll.u32 %s15009_s4, 4  ;;  %s282_s18 = int_to_ptr.hbm [resolvable:$true] %s281_s18 }
  0x1b   : > { %9736 = dma.hbm_to_vmem [thread:$0]  (!%p11434_p6), %s256_s9, 1024, %s258_s17, [#allocation6], %s15014_s20, %s15014_s20, %s15015_s22  }
  0x1c   : > { %s11341_s21 = smov [#allocation10]   ;;  %s307_s26 = sshll.u32 %s15011_s6, 4  ;;  %s308_s26 = int_to_ptr.hbm [resolvable:$true] %s307_s26 }
  0x1d   : > { %s283_s23 = sshll.u32 %s11341_s21, 4  ;;  %s11342_s9 = smov [#allocation13]   ;;  %s284_s23 = int_to_ptr.vmem [resolvable:$true] %s283_s23 }
  0x1e   : > { %9742 = dma.hbm_to_vmem [thread:$0]  (!%p11434_p6), %s282_s18, 1024, %s284_s23, [#allocation9], %s15014_s20, %s15014_s20, %s15015_s22  }
  0x1f   : > { %s309_s10 = sshll.u32 %s11342_s9, 4  ;;  %s322_s17 = sshll.u32 %s15012_s7, 4  ;;  %s310_s10 = int_to_ptr.vmem [resolvable:$true] %s309_s10  ;;  %s323_s17 = int_to_ptr.hbm [resolvable:$true] %s322_s17 }
  0x20   : > { %9748 = dma.hbm_to_vmem [thread:$0]  (!%p11434_p6), %s308_s26, 1024, %s310_s10, [#allocation12], %s15014_s20, %s15014_s20, %s15015_s22  }
  0x21   : > { %s11343_s11 = smov [#allocation14]   ;;  %s8780_s18 = sadd.s32 4294967294, %s11333_s30  }
  0x22   : > { %s324_s15 = sshll.u32 %s11343_s11, 4  ;;  %s11478_s21 = sadd.s32 1, %s11333_s30   ;;  %s325_s15 = int_to_ptr.vmem [resolvable:$true] %s324_s15 }
  0x23   : > { %9751 = dma.hbm_to_vmem [thread:$0]  (!%p11434_p6), %s323_s17, 16, %s325_s15, [#allocation15]  }
  0x24   : > { %s35_s23 = sadd.s32 1, %s11329_s29  ;;  %s32_s24 = ssub.s32 %s11333_s30, %s11478_s21 }
  0x25   : > { %p42_p7 = scmp.ne.s32.totalorder %s11329_s29, %s11325_s28  ;;  %p33_p8 = scmp.eq.s32.totalorder %s32_s24, 0 }
  0x26   : > { %p43_p9 = scmp.eq.s32.totalorder %s11333_s30, 0  ;;  %p48_p10 = scmp.ne.s32.totalorder %s11325_s28, %s11321_s27 }
  0x27   : > { %p219_p11 = scmp.eq.s32.totalorder %s11417_s12, 1  ;;  %p225_p0 = scmp.eq.s32.totalorder %s8780_s18, 1 }
  0x28   : > { %s11490_s25 = scalar_select %p33_p8, %s11329_s29, %s35_s23  }
  0x29   : > { %p11494_p12 = por %p49_p1, %p48_p10  ;;  %p11498_p13 = por %p219_p11, %p42_p7 }
  0x2a   : > { %p44_p2 = por %p43_p9, %p42_p7  ;;  %s335_s9 = sand.u32 1, %s11329_s29  }
  0x2b   : > { %p11503_p5 = por %p225_p0, %p48_p10  ;;  %p9767_p6 = scmp.lt.s32.totalorder %s11333_s30, 2 }
  0x2c   : > { %s8790_s14 = sshll.u32 %s335_s9, 10  ;;  %s9033_s16 = sshll.u32 %s11333_s30, 10 }
  0x2d   : > { %s344_s15 = scalar_lea.hbm %s15005_s0, %s9033_s16  ;;  %s339_s24 = scalar_lea.vmem [#allocation2], %s8790_s14 }
  0x2e   : > { %s345_s23 = sshll.u32 %s344_s15, 4  ;;  %s347_s20 = sshll.u32 %s339_s24, 4  ;;  %s346_s23 = int_to_ptr.hbm [resolvable:$true] %s345_s23  ;;  %s348_s20 = int_to_ptr.vmem [resolvable:$true] %s347_s20 }
  0x2f   : > { %p11512_p8 = pnand %p9767_p6, %p44_p2  ;;  %s336_s22 = scalar_lea.sflag [#allocation3], %s335_s9 }
  0x30   : > { %s11221_s1 = sshra.s32 %s346_s23, 4  ;;  %s11228_s14 = scalar_lea.hbm %s15005_s0, 2048  ;;  %s11222_s1 = int_to_ptr.hbm [resolvable:$true] %s11221_s1 }
  0x31   : > { %s11223_s2 = scalar_lea.hbm %s11222_s1, 1024  ;;  %p11225_p9 = pneg %p11512_p8 }
  0x32   : > { %p11224_p7 = scmp.ne.s32.totalorder %s11222_s1, %s11223_s2  ;;  %p11229_p0 = scmp.lt.s32.totalorder %s11222_s1, %s15005_s0 }
  0x33   : > { %p11230_p2 = scmp.lt.s32.totalorder %s11228_s14, %s11223_s2 }
  0x34   : > { %p11226_p10 = pnand %p11225_p9, %p11224_p7 }
  0x35   : > { %p11231_p6 = por %p11230_p2, %p11229_p0 }
  0x36   : > { %p11227_p11 = pneg %p11226_p10 }
  0x38   : > { %p11232_p4 = pnand %p11231_p6, %p11227_p11 }
  0x3a   : > { %11235 = shalt.err (!%p11232_p4)
}
  0x3b   : > { %s15026_s9 = smov 4   ;;  %s15027_s24 = smov 64  }
  0x3c   : > { %9755 = dma.hbm_to_vmem [thread:$0]  (!%p11512_p8), %s346_s23, 16384, %s348_s20, %s336_s22, %s15027_s24, %s15027_s24, %s15026_s9  }
  0x3d   : > { %359 = sbr.rel (%p11422_p3) target bundleno = 6738 (0x1a52), region = 52  ;;  %s11532_s16 = sand.u32 (!%p11422_p3), 1, %s11325_s28  }
  0x3e   : > { %s8794_s1 = sshll.u32 (!%p11422_p3), %s11532_s16, 10  ;;  %s362_s2 = scalar_lea.sflag (!%p11422_p3), [#allocation3], %s11532_s16 }
  0x3f   : > { %s11536_s17 = scalar_lea.vmem (!%p11422_p3), [#allocation2], %s8794_s1 }
  0x42   : > { %11296 = dma.done.wait (%p11494_p12), %s362_s2, 16384  }
  0x43   : > { %11298 = vsyncadd (%p11494_p12), %s362_s2, 4294950912 }
  0x44   : > { %11300 = dma.done.wait (%p49_p1), [#allocation6], 1088  }
  0x45   : > { %11302 = vsyncadd (%p49_p1), [#allocation6], 4294966208 }
  0x46   : > { %11304 = dma.done.wait (%p49_p1), [#allocation9], 1040  }
  0x47   : > { %11306 = vsyncadd (%p49_p1), [#allocation9], 4294966256 }
  0x48   : > { %11308 = dma.done.wait (%p49_p1), [#allocation12], 1040  }
  0x49   : > { %11310 = vsyncadd (%p49_p1), [#allocation12], 4294966256 }
  0x4a   : > { %11312 = dma.done.wait (%p49_p1), [#allocation15], 16  }
  0x4b   : > { %11314 = vsyncadd (%p49_p1), [#allocation15], 4294967280  ;;  %v9060_v0 = vld [vmem:[%s11536_s17] sm:$0xff]   ;;  %v9572_v1 = vld [vmem:[%s11536_s17 + $0x10] sm:$0xff]   ;;  %s11344_s13 = smov 32   ;;  %vm1973_vm0 = vcmask 64512  }
  0x4c   : > { %v11560_v2 = vunpack.c.l.bf16 %v9060_v0  ;;  %v11562_v3 = vunpack.c.h.bf16 %v9060_v0  ;;  %v9573_v4 = vld [vmem:[%s11536_s17 + $0x18] sm:$0xff]   ;;  %v9571_v5 = vld [vmem:[%s11536_s17 + $0x8] sm:$0xff]   ;;  %v11566_v6 = vunpack.c.l.bf16 %v9572_v1  ;;  %v11568_v7 = vunpack.c.h.bf16 %v9572_v1  ;;  %v9574_v11 = vld [vmem:[%s11536_s17 + $0x20] sm:$0xff]   ;;  %s8802_s20 = sshll.u32 %s11532_s16, 11  ;;  %s9058_s19 = sshll.u32 %s11417_s12, 11 }
  0x4d   : > { %v11570_v8 = vunpack.c.l.bf16 %v9573_v4  ;;  %v11572_v9 = vunpack.c.h.bf16 %v9573_v4  ;;  %v9575_v12 = vld [vmem:[%s11536_s17 + $0x28] sm:$0xff]   ;;  %v11583_v15 = vunpack.c.l.bf16 %v9571_v5  ;;  %v11585_v16 = vunpack.c.h.bf16 %v9571_v5  ;;  %v9576_v24 = vld [vmem:[%s11536_s17 + $0x30] sm:$0xff]   ;;  %v9577_v51 = vld [vmem:[%s11536_s17 + $0x38] sm:$0xff]   ;;  %s11979_s22 = scalar_lea.vmem [#allocation16], %s8802_s20  ;;  %s8636_s14 = scalar_lea.hbm %s15013_s8, %s9058_s19 }
  0x4e   : > { %v9821_v10 = vpack.i.bf16 %v11562_v3, %v11560_v2  ;;  %v9831_v13 = vpack.i.bf16 %v11568_v7, %v11566_v6  ;;  %v11589_v17 = vunpack.c.l.bf16 %v9574_v11  ;;  %v11591_v18 = vunpack.c.h.bf16 %v9574_v11  ;;  %v9578_v1 = vld [vmem:[%s11536_s17 + $0x40] sm:$0xff]   ;;  %v9579_v11 = vld [vmem:[%s11536_s17 + $0x48] sm:$0xff]   ;;  %s8637_s11 = sshll.u32 %s11979_s22, 4  ;;  %s8639_s15 = sshll.u32 %s8636_s14, 4  ;;  %s8638_s11 = int_to_ptr.vmem [resolvable:$true] %s8637_s11  ;;  %s8640_s15 = int_to_ptr.hbm [resolvable:$true] %s8639_s15 }
  0x4f   : > { %v9836_v14 = vpack.i.bf16 %v11572_v9, %v11570_v8  ;;  %v11593_v19 = vunpack.c.l.bf16 %v9575_v12  ;;  %v11595_v20 = vunpack.c.h.bf16 %v9575_v12  ;;  %v9826_v21 = vpack.i.bf16 %v11585_v16, %v11583_v15  ;;  %s8625_s9 = scalar_lea.sflag [#allocation4], %s11532_s16  ;;  %s11265_s24 = sshra.s32 %s8640_s15, 4  ;;  %s11266_s24 = int_to_ptr.hbm [resolvable:$true] %s11265_s24 }
  0x50   : > { %9822 = vrot.lane.b32.xlu0 %v9821_v10, %s11344_s13  ;;  %9832 = vrot.lane.b32.xlu1 %v9831_v13, %s11344_s13  ;;  %v9841_v22 = vpack.i.bf16 %v11591_v18, %v11589_v17  ;;  %v11607_v25 = vunpack.c.l.bf16 %v9576_v24  ;;  %v11609_v26 = vunpack.c.h.bf16 %v9576_v24  ;;  %v11624_v53 = vunpack.c.l.bf16 %v9577_v51  ;;  %s11267_s12 = scalar_lea.hbm %s11266_s24, 2048  ;;  %p11272_p12 = scmp.lt.s32.totalorder %s11266_s24, %s15013_s8 }
  0x51   : > { %9837 = vrot.lane.b32.xlu2 %v9836_v14, %s11344_s13  ;;  %v9846_v23 = vpack.i.bf16 %v11595_v20, %v11593_v19  ;;  %v11626_v54 = vunpack.c.h.bf16 %v9577_v51  ;;  %v11636_v4 = vunpack.c.l.bf16 %v9578_v1  ;;  %v11638_v5 = vunpack.c.h.bf16 %v9578_v1  ;;  %p11268_p1 = scmp.ne.s32.totalorder %s11266_s24, %s11267_s12 }
  0x52   : > { %v9851_v27 = vpack.i.bf16 %v11609_v26, %v11607_v25  ;;  %v11644_v12 = vunpack.c.l.bf16 %v9579_v11  ;;  %v11646_v13 = vunpack.c.h.bf16 %v9579_v11  ;;  %vm4412_vm1 = vcmask 1043456  }
  0x53   : > { %v9856_v56 = vpack.i.bf16 %v11626_v54, %v11624_v53  ;;  %v9861_v10 = vpack.i.bf16 %v11638_v5, %v11636_v4  ;;  %p11269_p3 = pnand %p11268_p1, %p11498_p13 }
  0x55   : > { %p11270_p4 = pneg %p11269_p3 }
  0x58   : > { %9827 = vrot.lane.b32.xlu0 %v9826_v21, %s11344_s13  ;;  %9842 = vrot.lane.b32.xlu1 %v9841_v22, %s11344_s13  ;;  %v9866_v21 = vpack.i.bf16 %v11646_v13, %v11644_v12 }
  0x59   : > { %9847 = vrot.lane.b32.xlu2 %v9846_v23, %s11344_s13 }
  0x61   : > { %9852 = vrot.lane.b32.xlu2 %v9851_v27, %s11344_s13 }
  0xab   : > { %v9838_v31 = vpop.permute.xlu2 %9837 }
  0xac   : > { %v9840_v35 = vunpack.i.h.bf16 %v9838_v31  ;;  %v9839_v55 = vunpack.i.l.bf16 %v9838_v31 }
  0xae   : > { %v1995_v38 = vsel %vm1973_vm0, %v9840_v35, 0.0  ;;  %v1992_v57 = vsel %vm1973_vm0, %v9839_v55, 0.0 }
  0xb3   : > { %v9848_v47 = vpop.permute.xlu2 %9847 }
  0xb4   : > { %v9850_v49 = vunpack.i.h.bf16 %v9848_v47  ;;  %v9849_v60 = vunpack.i.l.bf16 %v9848_v47 }
  0xb6   : > { %v2007_v52 = vsel %vm1973_vm0, %v9850_v49, 0.0  ;;  %v2004_v63 = vsel %vm1973_vm0, %v9849_v60, 0.0 }
  0xbb   : > { %v9853_v61 = vpop.permute.xlu2 %9852 }
  0xbc   : > { %v9854_v62 = vunpack.i.l.bf16 %v9853_v61  ;;  %v9855_v14 = vunpack.i.h.bf16 %v9853_v61 }
  0xbe   : > { %v2010_v0 = vsel %vm1973_vm0, %v9854_v62, 0.0  ;;  %v2013_v22 = vsel %vm1973_vm0, %v9855_v14, 0.0 }
  0xc2   : > { %v9823_v28 = vpop.permute.xlu0 %9822  ;;  %v9833_v34 = vpop.permute.xlu1 %9832 }
  0xc3   : > { %v9825_v29 = vunpack.i.h.bf16 %v9823_v28  ;;  %v9824_v30 = vunpack.i.l.bf16 %v9823_v28  ;;  %v9834_v43 = vunpack.i.l.bf16 %v9833_v34  ;;  %v9835_v48 = vunpack.i.h.bf16 %v9833_v34 }
  0xc5   : > { %v1977_v32 = vsel %vm1973_vm0, %v9825_v29, 0.0  ;;  %v1974_v33 = vsel %vm1973_vm0, %v9824_v30, 0.0  ;;  %v1986_v45 = vsel %vm1973_vm0, %v9834_v43, 0.0  ;;  %v1989_v50 = vsel %vm1973_vm0, %v9835_v48, 0.0 }
  0xc6   : > { %1978 = vadd.xlane.f32.xlu2 %v1977_v32  ;;  %1975 = vadd.xlane.f32.xlu1 %v1974_v33 }
  0xca   : > { %v9828_v36 = vpop.permute.xlu0 %9827  ;;  %v9843_v42 = vpop.permute.xlu1 %9842 }
  0xcb   : > { %v9829_v37 = vunpack.i.l.bf16 %v9828_v36  ;;  %v9830_v39 = vunpack.i.h.bf16 %v9828_v36  ;;  %v9845_v44 = vunpack.i.h.bf16 %v9843_v42  ;;  %v9844_v58 = vunpack.i.l.bf16 %v9843_v42 }
  0xcd   : > { %v1980_v40 = vsel %vm1973_vm0, %v9829_v37, 0.0  ;;  %v1983_v41 = vsel %vm1973_vm0, %v9830_v39, 0.0  ;;  %v2001_v46 = vsel %vm1973_vm0, %v9845_v44, 0.0  ;;  %v1998_v59 = vsel %vm1973_vm0, %v9844_v58, 0.0 }
  0xce   : > { %1981 = vadd.xlane.f32.xlu0 %v1980_v40  ;;  %1996 = vadd.xlane.f32.xlu1 %v1995_v38 }
  0xcf   : > { %1984 = vadd.xlane.f32.xlu2 %v1983_v41 }
  0xd6   : > { %1987 = vadd.xlane.f32.xlu0 %v1986_v45 }
  0xd7   : > { %2002 = vadd.xlane.f32.xlu2 %v2001_v46 }
  0xde   : > { %1990 = vadd.xlane.f32.xlu0 %v1989_v50 }
  0xdf   : > { %2008 = vadd.xlane.f32.xlu2 %v2007_v52 }
  0xe6   : > { %1993 = vadd.xlane.f32.xlu0 %v1992_v57 }
  0xe7   : > { %9857 = vrot.lane.b32.xlu1 %v9856_v56, %s11344_s13  ;;  %2011 = vadd.xlane.f32.xlu2 %v2010_v0 }
  0xee   : > { %1999 = vadd.xlane.f32.xlu0 %v1998_v59 }
  0xf6   : > { %2005 = vadd.xlane.f32.xlu0 %v2004_v63  ;;  %v9580_v63 = vld [vmem:[%s11536_s17 + $0x50] sm:$0xff]  }
  0xf7   : > { %v11661_v0 = vunpack.c.l.bf16 %v9580_v63  ;;  %v11663_v1 = vunpack.c.h.bf16 %v9580_v63 }
 0x10a   : > { %9862 = vrot.lane.b32.xlu0 %v9861_v10, %s11344_s13 }
 0x111   : > { %2014 = vadd.xlane.f32.xlu1 %v2013_v22  ;;  %v9871_v22 = vpack.i.bf16 %v11663_v1, %v11661_v0 }
 0x112   : > { %9867 = vrot.lane.b32.xlu0 %v9866_v21, %s11344_s13 }
 0x139   : > { %v1979_v23 = vpop.xlane.xlu2 %1978  ;;  %v1976_v30 = vpop.xlane.xlu1 %1975 }
 0x13a   : > { %v2743_v60 = vmax.f32 %v1979_v23, 1e-08  ;;  %v2742_v62 = vmax.f32 %v1976_v30, 1e-08 }
 0x141   : > { %v1982_v24 = vpop.xlane.xlu0 %1981  ;;  %v1997_v38 = vpop.xlane.xlu1 %1996 }
 0x142   : > { %v2744_v27 = vmax.f32 %v1982_v24, 1e-08  ;;  %v1985_v28 = vpop.xlane.xlu2 %1984  ;;  %v2749_v59 = vmax.f32 %v1997_v38, 1e-08 }
 0x143   : > { %v2745_v29 = vmax.f32 %v1985_v28, 1e-08 }
 0x144   : > { %10464 = vrcp.f32 %v2744_v27 }
 0x145   : > { %10466 = vrcp.f32 %v2745_v29 }
 0x149   : > { %v1988_v31 = vpop.xlane.xlu0 %1987 }
 0x14a   : > { %v10465_v32 = vpop.eup %10464  ;;  %v2746_v35 = vmax.f32 %v1988_v31, 1e-08  ;;  %v2003_v42 = vpop.xlane.xlu2 %2002 }
 0x14b   : > { %v3256_v33 = vmul.f32 %v10465_v32, %v11583_v15  ;;  %v10467_v34 = vpop.eup %10466  ;;  %v2751_v52 = vmax.f32 %v2003_v42, 1e-08 }
 0x14c   : > { %v3257_v36 = vmul.f32 %v10467_v34, %v11585_v16  ;;  %10468 = vrcp.f32 %v2746_v35  ;;  %v9581_v34 = vld [vmem:[%s11536_s17 + $0x58] sm:$0xff]  }
 0x14e   : > { %v3511_v37 = vpack.c.bf16 %v3257_v36, %v3256_v33  ;;  %v11678_v36 = vunpack.c.l.bf16 %v9581_v34 }
 0x150   : > { %3774 = vrot.lane.b32.xlu1 %v3511_v37, %s11344_s13  ;;  %v11680_v37 = vunpack.c.h.bf16 %v9581_v34 }
 0x151   : > { %v1991_v39 = vpop.xlane.xlu0 %1990 }
 0x152   : > { %v2747_v40 = vmax.f32 %v1991_v39, 1e-08  ;;  %v10469_v41 = vpop.eup %10468  ;;  %v9876_v38 = vpack.i.bf16 %v11680_v37, %v11678_v36 }
 0x153   : > { %v3258_v45 = vmul.f32 %v10469_v41, %v11566_v6  ;;  %v2009_v41 = vpop.xlane.xlu2 %2008 }
 0x154   : > { %10470 = vrcp.f32 %v2747_v40 }
 0x155   : > { %10472 = vrcp.f32 %v2751_v52 }
 0x159   : > { %v1994_v43 = vpop.xlane.xlu0 %1993  ;;  %v9858_v44 = vpop.permute.xlu1 %9857 }
 0x15a   : > { %v10471_v46 = vpop.eup %10470  ;;  %v9860_v47 = vunpack.i.h.bf16 %v9858_v44  ;;  %v9859_v48 = vunpack.i.l.bf16 %v9858_v44  ;;  %v2748_v57 = vmax.f32 %v1994_v43, 1e-08 }
 0x15b   : > { %v3259_v49 = vmul.f32 %v10471_v46, %v11568_v7  ;;  %v10473_v61 = vpop.eup %10472 }
 0x15c   : > { %v2019_v50 = vsel %vm1973_vm0, %v9860_v47, 0.0  ;;  %v2016_v51 = vsel %vm1973_vm0, %v9859_v48, 0.0  ;;  %v3263_v10 = vmul.f32 %v10473_v61, %v11591_v18 }
 0x15d   : > { %2020 = vadd.xlane.f32.xlu2 %v2019_v50  ;;  %2017 = vadd.xlane.f32.xlu0 %v2016_v51  ;;  %v3512_v55 = vpack.c.bf16 %v3259_v49, %v3258_v45  ;;  %v2012_v45 = vpop.xlane.xlu2 %2011  ;;  %v2753_v51 = vmax.f32 %v2009_v41, 1e-08 }
 0x15e   : > { %v2754_v48 = vmax.f32 %v2012_v45, 1e-08 }
 0x15f   : > { %3776 = vrot.lane.b32.xlu1 %v3512_v55, %s11344_s13 }
 0x161   : > { %v2000_v56 = vpop.xlane.xlu0 %1999 }
 0x162   : > { %v2750_v58 = vmax.f32 %v2000_v56, 1e-08 }
 0x164   : > { %10474 = vrcp.f32 %v2750_v58 }
 0x165   : > { %10476 = vrcp.f32 %v2748_v57 }
 0x166   : > { %10478 = vrcp.f32 %v2749_v59 }
 0x167   : > { %10480 = vrcp.f32 %v2743_v60 }
 0x168   : > { %10482 = vrcp.f32 %v2742_v62 }
 0x169   : > { %v2006_v39 = vpop.xlane.xlu0 %2005  ;;  %10484 = vrcp.f32 %v2754_v48 }
 0x16a   : > { %v10475_v11 = vpop.eup %10474  ;;  %v2752_v52 = vmax.f32 %v2006_v39, 1e-08 }
 0x16b   : > { %v3262_v14 = vmul.f32 %v10475_v11, %v11589_v17  ;;  %v10477_v21 = vpop.eup %10476 }
 0x16c   : > { %v10479_v24 = vpop.eup %10478  ;;  %v3260_v28 = vmul.f32 %v10477_v21, %v11570_v8  ;;  %v9582_v21 = vld [vmem:[%s11536_s17 + $0x60] sm:$0xff]  }
 0x16d   : > { %v3514_v23 = vpack.c.bf16 %v3263_v10, %v3262_v14  ;;  %v10481_v27 = vpop.eup %10480  ;;  %v3261_v30 = vmul.f32 %v10479_v24, %v11572_v9 }
 0x16e   : > { %v10483_v29 = vpop.eup %10482  ;;  %v3255_v33 = vmul.f32 %v10481_v27, %v11562_v3  ;;  %v9583_v27 = vld [vmem:[%s11536_s17 + $0x68] sm:$0xff]  }
 0x16f   : > { %3780 = vrot.lane.b32.xlu1 %v3514_v23, %s11344_s13  ;;  %v3513_v31 = vpack.c.bf16 %v3261_v30, %v3260_v28  ;;  %v3254_v32 = vmul.f32 %v10483_v29, %v11560_v2  ;;  %v10485_v56 = vpop.eup %10484  ;;  %v11697_v23 = vunpack.c.h.bf16 %v9582_v21  ;;  %v11703_v28 = vunpack.c.l.bf16 %v9583_v27 }
 0x170   : > { %v3266_v59 = vmul.f32 %v10485_v56, %v11607_v25  ;;  %v11705_v29 = vunpack.c.h.bf16 %v9583_v27  ;;  %v9584_v27 = vld [vmem:[%s11536_s17 + $0x70] sm:$0xff]  }
 0x171   : > { %9872 = vrot.lane.b32.xlu0 %v9871_v22, %s11344_s13  ;;  %v3510_v35 = vpack.c.bf16 %v3255_v33, %v3254_v32  ;;  %v11695_v22 = vunpack.c.l.bf16 %v9582_v21 }
 0x172   : > { %v9886_v30 = vpack.i.bf16 %v11705_v29, %v11703_v28 }
 0x173   : > { %v9881_v24 = vpack.i.bf16 %v11697_v23, %v11695_v22 }
 0x175   : > { %3778 = vrot.lane.b32.xlu2 %v3513_v31, %s11344_s13  ;;  %v3638_v31 = vld [vmem:[#allocation5] sm:$0xf] }
 0x176   : > { %v4414_v32 = vsel %vm4412_vm1, %v3638_v31, 0  ;;  %v11725_v31 = vunpack.c.l.bf16 %v9584_v27 }
 0x177   : > { %4423 = vmatpush.bf16.msra.mxu0 %v4414_v32  ;;  %v11727_v32 = vunpack.c.h.bf16 %v9584_v27 }
 0x179   : > { %3772 = vrot.lane.b32.xlu0 %v3510_v35, %s11344_s13 }
 0x17c   : > { %v9863_v40 = vpop.permute.xlu0 %9862 }
 0x17d   : > { %v9864_v42 = vunpack.i.l.bf16 %v9863_v40  ;;  %v9865_v44 = vunpack.i.h.bf16 %v9863_v40 }
 0x17f   : > { %v2022_v43 = vsel %vm1973_vm0, %v9864_v42, 0.0  ;;  %v2025_v47 = vsel %vm1973_vm0, %v9865_v44, 0.0 }
 0x181   : > { %9877 = vrot.lane.b32.xlu0 %v9876_v38, %s11344_s13 }
 0x184   : > { %v2015_v46 = vpop.xlane.xlu1 %2014  ;;  %v9868_v50 = vpop.permute.xlu0 %9867 }
 0x185   : > { %v2755_v49 = vmax.f32 %v2015_v46, 1e-08  ;;  %v9869_v55 = vunpack.i.l.bf16 %v9868_v50  ;;  %v9870_v33 = vunpack.i.h.bf16 %v9868_v50 }
 0x187   : > { %10486 = vrcp.f32 %v2755_v49  ;;  %v2028_v58 = vsel %vm1973_vm0, %v9869_v55, 0.0  ;;  %v2031_v35 = vsel %vm1973_vm0, %v9870_v33, 0.0  ;;  %v9891_v33 = vpack.i.bf16 %v11727_v32, %v11725_v31 }
 0x188   : > { %10488 = vrcp.f32 %v2753_v51 }
 0x189   : > { %10490 = vrcp.f32 %v2752_v52 }
 0x18d   : > { %v10487_v57 = vpop.eup %10486 }
 0x18e   : > { %v3267_v60 = vmul.f32 %v10487_v57, %v11609_v26  ;;  %v10489_v61 = vpop.eup %10488 }
 0x18f   : > { %v10491_v62 = vpop.eup %10490  ;;  %v3265_v11 = vmul.f32 %v10489_v61, %v11595_v20 }
 0x190   : > { %v3516_v63 = vpack.c.bf16 %v3267_v60, %v3266_v59  ;;  %v3264_v10 = vmul.f32 %v10491_v62, %v11593_v19 }
 0x192   : > { %v3515_v14 = vpack.c.bf16 %v3265_v11, %v3264_v10 }
 0x199   : > { %2023 = vadd.xlane.f32.xlu1 %v2022_v43 }
 0x19e   : > { %2026 = vadd.xlane.f32.xlu2 %v2025_v47 }
 0x1ab   : > { %2029 = vadd.xlane.f32.xlu0 %v2028_v58 }
 0x1b2   : > { %3784 = vrot.lane.b32.xlu1 %v3516_v63, %s11344_s13 }
 0x1b6   : > { %3782 = vrot.lane.b32.xlu2 %v3515_v14, %s11344_s13 }
 0x1bf   : > { %9882 = vrot.lane.b32.xlu0 %v9881_v24, %s11344_s13 }
 0x1c2   : > { %v3775_v47 = vpop.permute.xlu1 %3774 }
 0x1c7   : > { %9887 = vrot.lane.b32.xlu0 %v9886_v30, %s11344_s13 }
 0x1d0   : > { %v2018_v34 = vpop.xlane.xlu0 %2017  ;;  %v2021_v43 = vpop.xlane.xlu2 %2020 }
 0x1d1   : > { %v2757_v44 = vmax.f32 %v2021_v43, 1e-08  ;;  %v2756_v46 = vmax.f32 %v2018_v34, 1e-08  ;;  %v3777_v57 = vpop.permute.xlu1 %3776 }
 0x1d3   : > { %10492 = vrcp.f32 %v2757_v44  ;;  %v9040_v44 = vld [vmem:[#allocation7 + $0x30] sm:$0xff] }
 0x1d4   : > { %10494 = vrcp.f32 %v2756_v46 }
 0x1d8   : > { %v3779_v60 = vpop.permute.xlu2 %3778 }
 0x1d9   : > { %v10493_v50 = vpop.eup %10492 }
 0x1da   : > { %v10495_v51 = vpop.eup %10494  ;;  %v3269_v56 = vmul.f32 %v10493_v50, %v11626_v54  ;;  %v9038_v50 = vld [vmem:[#allocation7 + $0x20] sm:$0xff] }
 0x1db   : > { %v3268_v55 = vmul.f32 %v10495_v51, %v11624_v53  ;;  %v9037_v51 = vld [vmem:[#allocation7 + $0x18] sm:$0xff] }
 0x1dd   : > { %v3517_v58 = vpack.c.bf16 %v3269_v56, %v3268_v55  ;;  %v9036_v56 = vld [vmem:[#allocation7 + $0x10] sm:$0xff] }
 0x1df   : > { %2032 = vadd.xlane.f32.xlu2 %v2031_v35 }
 0x1e1   : > { %v3781_v59 = vpop.permute.xlu1 %3780 }
 0x1e3   : > { %v9873_v38 = vpop.permute.xlu0 %9872 }
 0x1e4   : > { %v9875_v39 = vunpack.i.h.bf16 %v9873_v38  ;;  %v9874_v40 = vunpack.i.l.bf16 %v9873_v38 }
 0x1e6   : > { %v2037_v41 = vsel %vm1973_vm0, %v9875_v39, 0.0  ;;  %v2034_v42 = vsel %vm1973_vm0, %v9874_v40, 0.0 }
 0x1e7   : > { %2038 = vadd.xlane.f32.xlu2 %v2037_v41  ;;  %2035 = vadd.xlane.f32.xlu1 %v2034_v42  ;;  %v9041_v42 = vld [vmem:[#allocation7 + $0x38] sm:$0xff] }
 0x1e8   : > { %5517 = vmatpush.bf16.msra.mxu1 %v9041_v42 }
 0x1eb   : > { %v3773_v45 = vpop.permute.xlu0 %3772 }
 0x1ec   : > { %8804 = vmatmul.msk.bf16.vlgmr.msra.gmra.mxu0 %vm1973_vm0, %v3773_v45  ;;  %v9585_v45 = vld [vmem:[%s11536_s17 + $0x78] sm:$0xff]   ;;  %5518 = vmatpush.bf16.msra.mxu1 %v9040_v44 }
 0x1ed   : > { %v11737_v46 = vunpack.c.l.bf16 %v9585_v45 }
 0x1f3   : > { %v9878_v48 = vpop.permute.xlu0 %9877 }
 0x1f4   : > { %v9879_v49 = vunpack.i.l.bf16 %v9878_v48  ;;  %v9880_v34 = vunpack.i.h.bf16 %v9878_v48  ;;  %v9039_v48 = vld [vmem:[#allocation7 + $0x28] sm:$0xff] }
 0x1f5   : > { %5519 = vmatpush.bf16.msra.mxu1 %v9039_v48 }
 0x1f6   : > { %v2040_v52 = vsel %vm1973_vm0, %v9879_v49, 0.0  ;;  %v2043_v35 = vsel %vm1973_vm0, %v9880_v34, 0.0 }
 0x1f7   : > { %2041 = vadd.xlane.f32.xlu0 %v2040_v52 }
 0x1f9   : > { %5520 = vmatpush.bf16.msra.mxu1 %v9038_v50  ;;  %v11345_v50 = vmov 0.0  }
 0x1fc   : > { %8805 = vmatmul.msk.bf16.gmra.mxu0 %vm1973_vm0, %v3775_v47  ;;  %v11739_v47 = vunpack.c.h.bf16 %v9585_v45 }
 0x1fd   : > { %5521 = vmatpush.bf16.msra.mxu1 %v9037_v51 }
 0x1fe   : > { %v9896_v49 = vpack.i.bf16 %v11739_v47, %v11737_v46 }
 0x1ff   : > { %3786 = vrot.lane.b32.xlu2 %v3517_v58, %s11344_s13 }
 0x201   : > { %5522 = vmatpush.bf16.msra.mxu1 %v9036_v56 }
 0x20c   : > { %8806 = vmatmul.msk.bf16.gmra.mxu0 %vm1973_vm0, %v3777_v57  ;;  %v2024_v61 = vpop.xlane.xlu1 %2023 }
 0x20d   : > { %v2758_v62 = vmax.f32 %v2024_v61, 1e-08  ;;  %v9034_v61 = vld [vmem:[#allocation7] sm:$0xff] }
 0x20f   : > { %10496 = vrcp.f32 %v2758_v62 }
 0x211   : > { %v2027_v63 = vpop.xlane.xlu2 %2026 }
 0x212   : > { %v2759_v10 = vmax.f32 %v2027_v63, 1e-08 }
 0x214   : > { %10498 = vrcp.f32 %v2759_v10 }
 0x215   : > { %v10497_v11 = vpop.eup %10496 }
 0x216   : > { %v3270_v14 = vmul.f32 %v10497_v11, %v11636_v4 }
 0x219   : > { %v3783_v43 = vpop.permute.xlu2 %3782 }
 0x21a   : > { %v10499_v21 = vpop.eup %10498 }
 0x21b   : > { %v3271_v24 = vmul.f32 %v10499_v21, %v11638_v5 }
 0x21c   : > { %8807 = vmatmul.msk.bf16.gmra.mxu0 %vm1973_vm0, %v3779_v60 }
 0x21d   : > { %v3518_v30 = vpack.c.bf16 %v3271_v24, %v3270_v14 }
 0x21e   : > { %v2030_v38 = vpop.xlane.xlu0 %2029 }
 0x21f   : > { %3788 = vrot.lane.b32.xlu1 %v3518_v30, %s11344_s13  ;;  %v2760_v57 = vmax.f32 %v2030_v38, 1e-08 }
 0x221   : > { %10500 = vrcp.f32 %v2760_v57 }
 0x224   : > { %v3785_v52 = vpop.permute.xlu1 %3784 }
 0x227   : > { %9892 = vrot.lane.b32.xlu1 %v9891_v33, %s11344_s13  ;;  %v10501_v63 = vpop.eup %10500 }
 0x228   : > { %2044 = vadd.xlane.f32.xlu2 %v2043_v35  ;;  %v3272_v27 = vmul.f32 %v10501_v63, %v11644_v12  ;;  %v3639_v35 = vlaneseq }
 0x22a   : > { %v3640_v42 = vand.u32 127, %v3639_v35 }
 0x22c   : > { %8808 = vmatmul.msk.bf16.gmra.mxu0 %vm1973_vm0, %v3781_v59  ;;  %v9035_v59 = vld [vmem:[#allocation7 + $0x8] sm:$0xff]  ;;  %vm3641_vm2 = vcmp.lt.s32.totalorder %v3640_v42, 32 }
 0x22d   : > { %5523 = vmatpush.bf16.msra.mxu1 %v9035_v59  ;;  %v11754_v51 = vsel %vm3641_vm2, 1.0, %v11345_v50 }
 0x231   : > { %v9883_v39 = vpop.permute.xlu0 %9882  ;;  %5524 = vmatpush.bf16.msra.mxu1 %v9034_v61 }
 0x232   : > { %v9884_v40 = vunpack.i.l.bf16 %v9883_v39  ;;  %v9885_v55 = vunpack.i.h.bf16 %v9883_v39 }
 0x234   : > { %v2046_v41 = vsel %vm1973_vm0, %v9884_v40, 0.0  ;;  %v2049_v58 = vsel %vm1973_vm0, %v9885_v55, 0.0 }
 0x235   : > { %2047 = vadd.xlane.f32.xlu0 %v2046_v41 }
 0x239   : > { %v9888_v44 = vpop.permute.xlu0 %9887 }
 0x23a   : > { %v9890_v45 = vunpack.i.h.bf16 %v9888_v44 }
 0x23c   : > { %8809 = vmatmul.msk.bf16.gmra.mxu0 %vm1973_vm0, %v3783_v43 }
 0x240   : > { %9897 = vrot.lane.b32.xlu2 %v9896_v49, %s11344_s13  ;;  %v2055_v49 = vsel %vm1973_vm0, %v9890_v45, 0.0  ;;  %v9587_v45 = vld [vmem:[%s11536_s17 + $0x88] sm:$0xff]  }
 0x24c   : > { %8810 = vmatmul.msk.bf16.gmra.mxu0 %vm1973_vm0, %v3785_v52 }
 0x251   : > { %2050 = vadd.xlane.f32.xlu1 %v2049_v58 }
 0x252   : > { %v2033_v60 = vpop.xlane.xlu2 %2032 }
 0x253   : > { %v2761_v62 = vmax.f32 %v2033_v60, 1e-08 }
 0x255   : > { %10502 = vrcp.f32 %v2761_v62 }
 0x25a   : > { %v2039_v10 = vpop.xlane.xlu2 %2038  ;;  %v2036_v11 = vpop.xlane.xlu1 %2035 }
 0x25b   : > { %v10503_v14 = vpop.eup %10502  ;;  %v2763_v21 = vmax.f32 %v2039_v10, 1e-08  ;;  %v2762_v24 = vmax.f32 %v2036_v11, 1e-08  ;;  %v9889_v10 = vunpack.i.l.bf16 %v9888_v44 }
 0x25c   : > { %v3273_v30 = vmul.f32 %v10503_v14, %v11646_v13 }
 0x25d   : > { %10504 = vrcp.f32 %v2763_v21 }
 0x25e   : > { %v3519_v33 = vpack.c.bf16 %v3273_v30, %v3272_v27  ;;  %10506 = vrcp.f32 %v2762_v24  ;;  %v2052_v24 = vsel %vm1973_vm0, %v9889_v10, 0.0 }
 0x260   : > { %3790 = vrot.lane.b32.xlu0 %v3519_v33, %s11344_s13 }
 0x262   : > { %v3787_v34 = vpop.permute.xlu2 %3786 }
 0x263   : > { %v10505_v38 = vpop.eup %10504  ;;  %8811 = vmatmul.msk.bf16.gmra.mxu0 %vm1973_vm0, %v3787_v34  ;;  %v9586_v34 = vld [vmem:[%s11536_s17 + $0x80] sm:$0xff]  }
 0x264   : > { %v10507_v39 = vpop.eup %10506  ;;  %v3275_v40 = vmul.f32 %v10505_v38, %v11663_v1  ;;  %v11771_v38 = vunpack.c.l.bf16 %v9586_v34 }
 0x265   : > { %v3274_v41 = vmul.f32 %v10507_v39, %v11661_v0  ;;  %v11773_v39 = vunpack.c.h.bf16 %v9586_v34 }
 0x267   : > { %v3520_v43 = vpack.c.bf16 %v3275_v40, %v3274_v41 }
 0x269   : > { %v4425_v48 = vpop.f32.mrf.mxu0  ;;  %2056 = vadd.xlane.f32.xlu2 %v2055_v49  ;;  %v11783_v49 = vunpack.c.h.bf16 %v9587_v45 }
 0x26a   : > { %3792 = vrot.lane.b32.xlu1 %v3520_v43, %s11344_s13  ;;  %v4426_v52 = vadd.f32 %v11754_v51, %v4425_v48  ;;  %v9901_v43 = vpack.i.bf16 %v11773_v39, %v11771_v38 }
 0x26c   : > { %v5065_v57 = vmul.f32 %v11560_v2, %v4426_v52 }
 0x271   : > { %v4427_v55 = vpop.f32.mrf.mxu0 }
 0x272   : > { %v4428_v56 = vadd.f32 %v11754_v51, %v4427_v55  ;;  %v2042_v55 = vpop.xlane.xlu0 %2041 }
 0x274   : > { %v5066_v58 = vmul.f32 %v11562_v3, %v4428_v56 }
 0x276   : > { %v5321_v59 = vpack.c.bf16 %v5066_v58, %v5065_v57 }
 0x278   : > { %5525 = vmatmul.bf16.vlgmr.msra.gmra.mxu1 %v5321_v59 }
 0x279   : > { %v4430_v60 = vpop.f32.mrf.mxu0 }
 0x27a   : > { %v4431_v61 = vadd.f32 %v11754_v51, %v4430_v60  ;;  %v2764_v60 = vmax.f32 %v2042_v55, 1e-08  ;;  %v9047_v55 = vld [vmem:[#allocation10 + $0x28] sm:$0xff] }
 0x27c   : > { %v5067_v11 = vmul.f32 %v11583_v15, %v4431_v61 }
 0x281   : > { %v4432_v62 = vpop.f32.mrf.mxu0 }
 0x282   : > { %v4433_v63 = vadd.f32 %v11754_v51, %v4432_v62 }
 0x284   : > { %v5068_v14 = vmul.f32 %v11585_v16, %v4433_v63 }
 0x286   : > { %v5322_v21 = vpack.c.bf16 %v5068_v14, %v5067_v11 }
 0x288   : > { %5530 = vmatmul.bf16.gmra.mxu1 %v5322_v21 }
 0x289   : > { %v4435_v2 = vpop.f32.mrf.mxu0 }
 0x28a   : > { %2053 = vadd.xlane.f32.xlu0 %v2052_v24  ;;  %v4436_v3 = vadd.f32 %v11754_v51, %v4435_v2 }
 0x28c   : > { %v5069_v15 = vmul.f32 %v11566_v6, %v4436_v3 }
 0x291   : > { %v4437_v27 = vpop.f32.mrf.mxu0  ;;  %v3789_v30 = vpop.permute.xlu1 %3788 }
 0x292   : > { %v4438_v33 = vadd.f32 %v11754_v51, %v4437_v27  ;;  %8812 = vmatmul.msk.bf16.gmra.mxu0 %vm1973_vm0, %v3789_v30 }
 0x294   : > { %v5070_v16 = vmul.f32 %v11568_v7, %v4438_v33  ;;  %v11781_v7 = vunpack.c.l.bf16 %v9587_v45 }
 0x296   : > { %v5323_v35 = vpack.c.bf16 %v5070_v16, %v5069_v15  ;;  %v9906_v59 = vpack.i.bf16 %v11783_v49, %v11781_v7 }
 0x298   : > { %5535 = vmatmul.bf16.gmra.mxu1 %v5323_v35 }
 0x299   : > { %v4440_v40 = vpop.f32.mrf.mxu0  ;;  %v9893_v41 = vpop.permute.xlu1 %9892 }
 0x29a   : > { %v9895_v42 = vunpack.i.h.bf16 %v9893_v41  ;;  %v9894_v44 = vunpack.i.l.bf16 %v9893_v41  ;;  %v4441_v52 = vadd.f32 %v11754_v51, %v4440_v40 }
 0x29b   : > { %v2045_v50 = vpop.xlane.xlu2 %2044 }
 0x29c   : > { %v2061_v48 = vsel %vm1973_vm0, %v9895_v42, 0.0  ;;  %v2058_v6 = vsel %vm1973_vm0, %v9894_v44, 0.0  ;;  %v2765_v57 = vmax.f32 %v2045_v50, 1e-08  ;;  %v5071_v61 = vmul.f32 %v11570_v8, %v4441_v52  ;;  %v9049_v42 = vld [vmem:[#allocation10 + $0x38] sm:$0xff] }
 0x29d   : > { %2062 = vadd.xlane.f32.xlu2 %v2061_v48  ;;  %2059 = vadd.xlane.f32.xlu1 %v2058_v6  ;;  %v9048_v6 = vld [vmem:[#allocation10 + $0x30] sm:$0xff] }
 0x29e   : > { %9902 = vrot.lane.b32.xlu0 %v9901_v43, %s11344_s13  ;;  %10508 = vrcp.f32 %v2765_v57  ;;  %6618 = vmatpush.bf16.msra.mxu2 %v9049_v42 }
 0x29f   : > { %10510 = vrcp.f32 %v2764_v60  ;;  %v9046_v60 = vld [vmem:[#allocation10 + $0x20] sm:$0xff] }
 0x2a1   : > { %v4442_v56 = vpop.f32.mrf.mxu0 }
 0x2a2   : > { %v4443_v58 = vadd.f32 %v11754_v51, %v4442_v56  ;;  %6619 = vmatpush.bf16.msra.mxu2 %v9048_v6 }
 0x2a3   : > { %v9898_v48 = vpop.permute.xlu2 %9897 }
 0x2a4   : > { %v5072_v62 = vmul.f32 %v11572_v9, %v4443_v58  ;;  %v10509_v11 = vpop.eup %10508  ;;  %v9899_v52 = vunpack.i.l.bf16 %v9898_v48 }
 0x2a5   : > { %v10511_v14 = vpop.eup %10510  ;;  %v3277_v21 = vmul.f32 %v10509_v11, %v11680_v37 }
 0x2a6   : > { %v5324_v63 = vpack.c.bf16 %v5072_v62, %v5071_v61  ;;  %9907 = vrot.lane.b32.xlu0 %v9906_v59, %s11344_s13  ;;  %v3276_v3 = vmul.f32 %v10511_v14, %v11678_v36  ;;  %6620 = vmatpush.bf16.msra.mxu2 %v9047_v55  ;;  %v9588_v59 = vld [vmem:[%s11536_s17 + $0x90] sm:$0xff]  }
 0x2a7   : > { %v11810_v14 = vunpack.c.l.bf16 %v9588_v59 }
 0x2a8   : > { %5540 = vmatmul.bf16.gmra.mxu1 %v5324_v63  ;;  %v3521_v27 = vpack.c.bf16 %v3277_v21, %v3276_v3  ;;  %v2048_v15 = vpop.xlane.xlu0 %2047  ;;  %v11812_v21 = vunpack.c.h.bf16 %v9588_v59  ;;  %v9045_v3 = vld [vmem:[#allocation10 + $0x18] sm:$0xff] }
 0x2a9   : > { %v4445_v10 = vpop.f32.mrf.mxu0  ;;  %v2766_v35 = vmax.f32 %v2048_v15, 1e-08  ;;  %v9042_v15 = vld [vmem:[#allocation10] sm:$0xff] }
 0x2aa   : > { %v4446_v24 = vadd.f32 %v11754_v51, %v4445_v10  ;;  %6621 = vmatpush.bf16.msra.mxu2 %v9046_v60 }
 0x2ab   : > { %10512 = vrcp.f32 %v2766_v35 }
 0x2ac   : > { %v5073_v9 = vmul.f32 %v11589_v17, %v4446_v24 }
 0x2ae   : > { %6622 = vmatpush.bf16.msra.mxu2 %v9045_v3 }
 0x2b1   : > { %v4447_v2 = vpop.f32.mrf.mxu0  ;;  %v10513_v56 = vpop.eup %10512 }
 0x2b2   : > { %v4448_v8 = vadd.f32 %v11754_v51, %v4447_v2  ;;  %v3278_v58 = vmul.f32 %v10513_v56, %v11695_v22 }
 0x2b4   : > { %v5074_v30 = vmul.f32 %v11591_v18, %v4448_v8 }
 0x2b5   : > { %3794 = vrot.lane.b32.xlu2 %v3521_v27, %s11344_s13  ;;  %v9911_v27 = vpack.i.bf16 %v11812_v21, %v11810_v14 }
 0x2b6   : > { %v5325_v33 = vpack.c.bf16 %v5074_v30, %v5073_v9  ;;  %v9044_v9 = vld [vmem:[#allocation10 + $0x10] sm:$0xff]  ;;  %v9900_v30 = vunpack.i.h.bf16 %v9898_v48 }
 0x2b7   : > { %6623 = vmatpush.bf16.msra.mxu2 %v9044_v9 }
 0x2b8   : > { %5545 = vmatmul.bf16.gmra.mxu1 %v5325_v33  ;;  %v9043_v33 = vld [vmem:[#allocation10 + $0x8] sm:$0xff] }
 0x2b9   : > { %v4450_v34 = vpop.f32.mrf.mxu0 }
 0x2ba   : > { %v4451_v16 = vadd.f32 %v11754_v51, %v4450_v34  ;;  %v2067_v34 = vsel %vm1973_vm0, %v9900_v30, 0.0 }
 0x2bb   : > { %6624 = vmatpush.bf16.msra.mxu2 %v9043_v33 }
 0x2bc   : > { %v5075_v43 = vmul.f32 %v11593_v19, %v4451_v16  ;;  %v2064_v19 = vsel %vm1973_vm0, %v9899_v52, 0.0 }
 0x2bf   : > { %6625 = vmatpush.bf16.msra.mxu2 %v9042_v15 }
 0x2c1   : > { %v4452_v40 = vpop.f32.mrf.mxu0 }
 0x2c2   : > { %v4453_v41 = vadd.f32 %v11754_v51, %v4452_v40 }
 0x2c4   : > { %v2051_v44 = vpop.xlane.xlu1 %2050  ;;  %v5076_v17 = vmul.f32 %v11595_v20, %v4453_v41 }
 0x2c5   : > { %v2767_v18 = vmax.f32 %v2051_v44, 1e-08 }
 0x2c6   : > { %v5326_v45 = vpack.c.bf16 %v5076_v17, %v5075_v43  ;;  %v11826_v17 = vld [vmem:[#allocation8] ss:$0 sm:$0xff] }
 0x2c7   : > { %10514 = vrcp.f32 %v2767_v18  ;;  %v9589_v18 = vld [vmem:[%s11536_s17 + $0x98] sm:$0xff]  }
 0x2c8   : > { %5550 = vmatmul.bf16.gmra.mxu1 %v5326_v45  ;;  %v11830_v48 = vunpack.c.l.bf16 %v9589_v18  ;;  %v11832_v6 = vunpack.c.h.bf16 %v9589_v18 }
 0x2c9   : > { %v4455_v50 = vpop.f32.mrf.mxu0 }
 0x2ca   : > { %v4456_v61 = vadd.f32 %v11754_v51, %v4455_v50 }
 0x2cc   : > { %v5077_v24 = vmul.f32 %v11607_v25, %v4456_v61 }
 0x2cd   : > { %v10515_v57 = vpop.eup %10514 }
 0x2ce   : > { %v3279_v20 = vmul.f32 %v10515_v57, %v11697_v23 }
 0x2d0   : > { %v3522_v62 = vpack.c.bf16 %v3279_v20, %v3278_v58  ;;  %2065 = vadd.xlane.f32.xlu0 %v2064_v19 }
 0x2d1   : > { %v4457_v63 = vpop.f32.mrf.mxu0 }
 0x2d2   : > { %v4458_v10 = vadd.f32 %v11754_v51, %v4457_v63  ;;  %v3791_v11 = vpop.permute.xlu0 %3790  ;;  %3796 = vrot.lane.b32.xlu1 %v3522_v62, %s11344_s13 }
 0x2d3   : > { %8813 = vmatmul.msk.bf16.gmra.mxu0 %vm1973_vm0, %v3791_v11 }
 0x2d4   : > { %v5078_v2 = vmul.f32 %v11609_v26, %v4458_v10 }
 0x2d6   : > { %v5327_v8 = vpack.c.bf16 %v5078_v2, %v5077_v24 }
 0x2d8   : > { %5555 = vmatmul.bf16.gmra.mxu1 %v5327_v8 }
 0x2da   : > { %9912 = vrot.lane.b32.xlu1 %v9911_v27, %s11344_s13 }
 0x2dc   : > { %v3793_v26 = vpop.permute.xlu1 %3792  ;;  %v2057_v58 = vpop.xlane.xlu2 %2056 }
 0x2dd   : > { %v2769_v9 = vmax.f32 %v2057_v58, 1e-08 }
 0x2de   : > { %2068 = vadd.xlane.f32.xlu2 %v2067_v34 }
 0x2df   : > { %10516 = vrcp.f32 %v2769_v9 }
 0x2e0   : > { %v4460_v25 = vpop.f32.mrf.mxu0 }
 0x2e1   : > { %v4461_v16 = vadd.f32 %v11754_v51, %v4460_v25 }
 0x2e3   : > { %8814 = vmatmul.msk.bf16.gmra.mxu0 %vm1973_vm0, %v3793_v26  ;;  %v5079_v41 = vmul.f32 %v11624_v53, %v4461_v16  ;;  %v9916_v53 = vpack.i.bf16 %v11832_v6, %v11830_v48 }
 0x2e8   : > { %v4462_v35 = vpop.f32.mrf.mxu0 }
 0x2e9   : > { %v4463_v40 = vadd.f32 %v11754_v51, %v4462_v35 }
 0x2eb   : > { %v5080_v42 = vmul.f32 %v11626_v54, %v4463_v40 }
 0x2ed   : > { %v5328_v43 = vpack.c.bf16 %v5080_v42, %v5079_v41 }
 0x2ef   : > { %5560 = vmatmul.bf16.gmra.mxu1 %v5328_v43 }
 0x2f5   : > { %v5526_v44 = vpop.f32.mrf.mxu1 }
 0x2f6   : > { %v5527_v45 = vadd.f32 %v11826_v17, %v5526_v44  ;;  %9917 = vrot.lane.b32.xlu2 %v9916_v53, %s11344_s13 }
 0x2f8   : > { %v6166_v55 = vmax.f32 %v5527_v45, 0.0  ;;  %v10517_v45 = vpop.eup %10516 }
 0x2fd   : > { %v5528_v50 = vpop.f32.mrf.mxu1  ;;  %v2054_v19 = vpop.xlane.xlu0 %2053 }
 0x2fe   : > { %v5529_v52 = vadd.f32 %v11826_v17, %v5528_v50  ;;  %v2768_v30 = vmax.f32 %v2054_v19, 1e-08 }
 0x300   : > { %v6167_v54 = vmax.f32 %v5529_v52, 0.0  ;;  %10518 = vrcp.f32 %v2768_v30 }
 0x302   : > { %v6422_v56 = vpack.c.bf16 %v6167_v54, %v6166_v55 }
 0x304   : > { %6626 = vmatmul.bf16.vlgmr.msra.gmra.mxu2 %v6422_v56 }
 0x305   : > { %v5531_v57 = vpop.f32.mrf.mxu1 }
 0x306   : > { %v5532_v20 = vadd.f32 %v11826_v17, %v5531_v57  ;;  %v10519_v52 = vpop.eup %10518 }
 0x307   : > { %v3280_v57 = vmul.f32 %v10519_v52, %v11703_v28 }
 0x308   : > { %v6168_v62 = vmax.f32 %v5532_v20, 0.0 }
 0x30d   : > { %v5533_v59 = vpop.f32.mrf.mxu1 }
 0x30e   : > { %v5534_v60 = vadd.f32 %v11826_v17, %v5533_v59 }
 0x30f   : > { %v4465_v61 = vpop.f32.mrf.mxu0 }
 0x310   : > { %v6169_v63 = vmax.f32 %v5534_v60, 0.0  ;;  %v9903_v10 = vpop.permute.xlu0 %9902  ;;  %v2063_v11 = vpop.xlane.xlu2 %2062  ;;  %v4466_v34 = vadd.f32 %v11754_v51, %v4465_v61 }
 0x311   : > { %v9904_v24 = vunpack.i.l.bf16 %v9903_v10  ;;  %v9905_v2 = vunpack.i.h.bf16 %v9903_v10  ;;  %v2060_v25 = vpop.xlane.xlu1 %2059  ;;  %v2771_v15 = vmax.f32 %v2063_v11, 1e-08 }
 0x312   : > { %v6423_v3 = vpack.c.bf16 %v6169_v63, %v6168_v62  ;;  %v2770_v40 = vmax.f32 %v2060_v25, 1e-08  ;;  %v5081_v41 = vmul.f32 %v11636_v4, %v4466_v34  ;;  %v3281_v4 = vmul.f32 %v10517_v45, %v11705_v29 }
 0x313   : > { %v2070_v8 = vsel %vm1973_vm0, %v9904_v24, 0.0  ;;  %v2073_v27 = vsel %vm1973_vm0, %v9905_v2, 0.0  ;;  %10520 = vrcp.f32 %v2771_v15 }
 0x314   : > { %6631 = vmatmul.bf16.gmra.mxu2 %v6423_v3  ;;  %2071 = vadd.xlane.f32.xlu0 %v2070_v8  ;;  %10522 = vrcp.f32 %v2770_v40  ;;  %v3523_v20 = vpack.c.bf16 %v3281_v4, %v3280_v57 }
 0x315   : > { %2074 = vadd.xlane.f32.xlu1 %v2073_v27  ;;  %v5536_v33 = vpop.f32.mrf.mxu1 }
 0x316   : > { %v5537_v43 = vadd.f32 %v11826_v17, %v5536_v33 }
 0x317   : > { %v4467_v26 = vpop.f32.mrf.mxu0 }
 0x318   : > { %v4468_v16 = vadd.f32 %v11754_v51, %v4467_v26  ;;  %v3795_v35 = vpop.permute.xlu2 %3794  ;;  %v6170_v53 = vmax.f32 %v5537_v43, 0.0  ;;  %v9908_v19 = vpop.permute.xlu0 %9907 }
 0x319   : > { %8815 = vmatmul.msk.bf16.gmra.mxu0 %vm1973_vm0, %v3795_v35  ;;  %v10521_v54 = vpop.eup %10520  ;;  %v9910_v61 = vunpack.i.h.bf16 %v9908_v19  ;;  %v9909_v35 = vunpack.i.l.bf16 %v9908_v19 }
 0x31a   : > { %v5082_v42 = vmul.f32 %v11638_v5, %v4468_v16  ;;  %v10523_v5 = vpop.eup %10522  ;;  %v3283_v60 = vmul.f32 %v10521_v54, %v11727_v32 }
 0x31b   : > { %v3282_v59 = vmul.f32 %v10523_v5, %v11725_v31  ;;  %v2079_v62 = vsel %vm1973_vm0, %v9910_v61, 0.0  ;;  %v2076_v45 = vsel %vm1973_vm0, %v9909_v35, 0.0 }
 0x31c   : > { %v5329_v44 = vpack.c.bf16 %v5082_v42, %v5081_v41 }
 0x31d   : > { %v5538_v18 = vpop.f32.mrf.mxu1  ;;  %v3524_v63 = vpack.c.bf16 %v3283_v60, %v3282_v59 }
 0x31e   : > { %v5539_v50 = vadd.f32 %v11826_v17, %v5538_v18  ;;  %5565 = vmatmul.bf16.gmra.mxu1 %v5329_v44 }
 0x31f   : > { %2080 = vadd.xlane.f32.xlu2 %v2079_v62  ;;  %v9056_v62 = vld [vmem:[#allocation13 + $0x30] sm:$0xff] }
 0x320   : > { %v6171_v55 = vmax.f32 %v5539_v50, 0.0 }
 0x322   : > { %v6424_v56 = vpack.c.bf16 %v6171_v55, %v6170_v53 }
 0x324   : > { %6636 = vmatmul.bf16.gmra.mxu2 %v6424_v56 }
 0x325   : > { %v5541_v58 = vpop.f32.mrf.mxu1 }
 0x326   : > { %v5542_v10 = vadd.f32 %v11826_v17, %v5541_v58  ;;  %v9057_v58 = vld [vmem:[#allocation13 + $0x38] sm:$0xff] }
 0x327   : > { %7719 = vmatpush.bf16.msra.mxu3 %v9057_v58 }
 0x328   : > { %3798 = vrot.lane.b32.xlu0 %v3523_v20, %s11344_s13  ;;  %v6172_v2 = vmax.f32 %v5542_v10, 0.0 }
 0x32b   : > { %7720 = vmatpush.bf16.msra.mxu3 %v9056_v62 }
 0x32d   : > { %v5543_v11 = vpop.f32.mrf.mxu1 }
 0x32e   : > { %v5544_v24 = vadd.f32 %v11826_v17, %v5543_v11  ;;  %3800 = vrot.lane.b32.xlu1 %v3524_v63, %s11344_s13  ;;  %v9590_v11 = vld [vmem:[%s11536_s17 + $0xa0] sm:$0xff]  }
 0x330   : > { %v6173_v3 = vmax.f32 %v5544_v24, 0.0 }
 0x332   : > { %v6425_v8 = vpack.c.bf16 %v6173_v3, %v6172_v2  ;;  %v9055_v2 = vld [vmem:[#allocation13 + $0x28] sm:$0xff] }
 0x333   : > { %7721 = vmatpush.bf16.msra.mxu3 %v9055_v2  ;;  %v11897_v2 = vld [vmem:[#allocation11] ss:$0 sm:$0xff] }
 0x334   : > { %6641 = vmatmul.bf16.gmra.mxu2 %v6425_v8 }
 0x335   : > { %v5546_v27 = vpop.f32.mrf.mxu1 }
 0x336   : > { %v5547_v9 = vadd.f32 %v11826_v17, %v5546_v27 }
 0x338   : > { %v6174_v34 = vmax.f32 %v5547_v9, 0.0  ;;  %v11873_v9 = vunpack.c.l.bf16 %v9590_v11 }
 0x33d   : > { %v5548_v30 = vpop.f32.mrf.mxu1 }
 0x33e   : > { %v5549_v33 = vadd.f32 %v11826_v17, %v5548_v30  ;;  %v11875_v30 = vunpack.c.h.bf16 %v9590_v11 }
 0x340   : > { %v6175_v25 = vmax.f32 %v5549_v33, 0.0 }
 0x342   : > { %v6426_v26 = vpack.c.bf16 %v6175_v25, %v6174_v34 }
 0x343   : > { %v2066_v57 = vpop.xlane.xlu0 %2065 }
 0x344   : > { %6646 = vmatmul.bf16.gmra.mxu2 %v6426_v26  ;;  %v3797_v15 = vpop.permute.xlu1 %3796  ;;  %v2772_v20 = vmax.f32 %v2066_v57, 1e-08 }
 0x345   : > { %8816 = vmatmul.msk.bf16.gmra.mxu0 %vm1973_vm0, %v3797_v15  ;;  %v5551_v16 = vpop.f32.mrf.mxu1 }
 0x346   : > { %v5552_v40 = vadd.f32 %v11826_v17, %v5551_v16  ;;  %v9921_v16 = vpack.i.bf16 %v11875_v30, %v11873_v9 }
 0x348   : > { %v6176_v50 = vmax.f32 %v5552_v40, 0.0  ;;  %v9591_v40 = vld [vmem:[%s11536_s17 + $0xa8] sm:$0xff]  }
 0x34c   : > { %v9913_v41 = vpop.permute.xlu1 %9912 }
 0x34d   : > { %v5553_v42 = vpop.f32.mrf.mxu1  ;;  %v9915_v43 = vunpack.i.h.bf16 %v9913_v41  ;;  %v9914_v56 = vunpack.i.l.bf16 %v9913_v41 }
 0x34e   : > { %v5554_v44 = vadd.f32 %v11826_v17, %v5553_v42 }
 0x34f   : > { %v2085_v18 = vsel %vm1973_vm0, %v9915_v43, 0.0  ;;  %v2082_v19 = vsel %vm1973_vm0, %v9914_v56, 0.0 }
 0x350   : > { %v6177_v52 = vmax.f32 %v5554_v44, 0.0  ;;  %v4470_v53 = vpop.f32.mrf.mxu0  ;;  %2086 = vadd.xlane.f32.xlu2 %v2085_v18  ;;  %v11884_v44 = vunpack.c.l.bf16 %v9591_v40  ;;  %v11886_v18 = vunpack.c.h.bf16 %v9591_v40 }
 0x351   : > { %v2069_v55 = vpop.xlane.xlu2 %2068  ;;  %v4471_v59 = vadd.f32 %v11754_v51, %v4470_v53 }
 0x352   : > { %2077 = vadd.xlane.f32.xlu0 %v2076_v45  ;;  %v6427_v54 = vpack.c.bf16 %v6177_v52, %v6176_v50  ;;  %v2773_v4 = vmax.f32 %v2069_v55, 1e-08  ;;  %v9053_v45 = vld [vmem:[#allocation13 + $0x18] sm:$0xff]  ;;  %v9926_v55 = vpack.i.bf16 %v11886_v18, %v11884_v44 }
 0x353   : > { %v5083_v63 = vmul.f32 %v11644_v12, %v4471_v59 }
 0x354   : > { %6651 = vmatmul.bf16.gmra.mxu2 %v6427_v54  ;;  %10524 = vrcp.f32 %v2773_v4  ;;  %v9052_v54 = vld [vmem:[#allocation13 + $0x10] sm:$0xff] }
 0x355   : > { %v5556_v5 = vpop.f32.mrf.mxu1  ;;  %10526 = vrcp.f32 %v2772_v20 }
 0x356   : > { %v5557_v24 = vadd.f32 %v11826_v17, %v5556_v5  ;;  %v9051_v5 = vld [vmem:[#allocation13 + $0x8] sm:$0xff] }
 0x358   : > { %v4472_v60 = vpop.f32.mrf.mxu0  ;;  %2083 = vadd.xlane.f32.xlu1 %v2082_v19  ;;  %v6178_v34 = vmax.f32 %v5557_v24, 0.0  ;;  %v9050_v19 = vld [vmem:[#allocation13] sm:$0xff] }
 0x359   : > { %v4473_v61 = vadd.f32 %v11754_v51, %v4472_v60  ;;  %v9918_v24 = vpop.permute.xlu2 %9917 }
 0x35a   : > { %v10525_v33 = vpop.eup %10524 }
 0x35b   : > { %v5084_v10 = vmul.f32 %v11646_v13, %v4473_v61  ;;  %v9054_v13 = vld [vmem:[#allocation13 + $0x20] sm:$0xff]  ;;  %v10527_v26 = vpop.eup %10526  ;;  %v3285_v35 = vmul.f32 %v10525_v33, %v11739_v47 }
 0x35c   : > { %v3284_v41 = vmul.f32 %v10527_v26, %v11737_v46  ;;  %7722 = vmatpush.bf16.msra.mxu3 %v9054_v13  ;;  %v9919_v26 = vunpack.i.l.bf16 %v9918_v24 }
 0x35d   : > { %v5558_v3 = vpop.f32.mrf.mxu1  ;;  %v5330_v8 = vpack.c.bf16 %v5084_v10, %v5083_v63 }
 0x35e   : > { %v5559_v27 = vadd.f32 %v11826_v17, %v5558_v3  ;;  %v3525_v43 = vpack.c.bf16 %v3285_v35, %v3284_v41  ;;  %v9920_v3 = vunpack.i.h.bf16 %v9918_v24 }
 0x35f   : > { %5570 = vmatmul.bf16.gmra.mxu1 %v5330_v8 }
 0x360   : > { %v6179_v12 = vmax.f32 %v5559_v27, 0.0  ;;  %v4475_v25 = vpop.f32.mrf.mxu0  ;;  %7723 = vmatpush.bf16.msra.mxu3 %v9053_v45  ;;  %v2091_v27 = vsel %vm1973_vm0, %v9920_v3, 0.0 }
 0x361   : > { %v4476_v42 = vadd.f32 %v11754_v51, %v4475_v25 }
 0x362   : > { %v6428_v15 = vpack.c.bf16 %v6179_v12, %v6178_v34 }
 0x363   : > { %v5085_v52 = vmul.f32 %v11661_v0, %v4476_v42  ;;  %v2088_v42 = vsel %vm1973_vm0, %v9919_v26, 0.0 }
 0x364   : > { %6656 = vmatmul.bf16.gmra.mxu2 %v6428_v15  ;;  %7724 = vmatpush.bf16.msra.mxu3 %v9052_v54 }
 0x366   : > { %9922 = vrot.lane.b32.xlu0 %v9921_v16, %s11344_s13 }
 0x368   : > { %v4477_v50 = vpop.f32.mrf.mxu0  ;;  %3802 = vrot.lane.b32.xlu2 %v3525_v43, %s11344_s13  ;;  %7725 = vmatpush.bf16.msra.mxu3 %v9051_v5 }
 0x369   : > { %v4478_v53 = vadd.f32 %v11754_v51, %v4477_v50 }
 0x36b   : > { %v5086_v56 = vmul.f32 %v11663_v1, %v4478_v53 }
 0x36c   : > { %v5561_v57 = vpop.f32.mrf.mxu1  ;;  %7726 = vmatpush.bf16.msra.mxu3 %v9050_v19 }
 0x36d   : > { %v5331_v4 = vpack.c.bf16 %v5086_v56, %v5085_v52  ;;  %v5562_v58 = vadd.f32 %v11826_v17, %v5561_v57 }
 0x36e   : > { %9927 = vrot.lane.b32.xlu0 %v9926_v55, %s11344_s13 }
 0x36f   : > { %5575 = vmatmul.bf16.gmra.mxu1 %v5331_v4  ;;  %v6180_v59 = vmax.f32 %v5562_v58, 0.0  ;;  %v9592_v58 = vld [vmem:[%s11536_s17 + $0xb0] sm:$0xff]  }
 0x374   : > { %v5563_v0 = vpop.f32.mrf.mxu1 }
 0x375   : > { %v5564_v20 = vadd.f32 %v11826_v17, %v5563_v0 }
 0x377   : > { %v6181_v60 = vmax.f32 %v5564_v20, 0.0 }
 0x379   : > { %v6429_v61 = vpack.c.bf16 %v6181_v60, %v6180_v59 }
 0x37b   : > { %6661 = vmatmul.bf16.gmra.mxu2 %v6429_v61 }
 0x387   : > { %v6627_v1 = vpop.f32.mrf.mxu2  ;;  %v2072_v62 = vpop.xlane.xlu0 %2071 }
 0x388   : > { %v2774_v63 = vmax.f32 %v2072_v62, 1e-08  ;;  %v2075_v10 = vpop.xlane.xlu1 %2074  ;;  %v6628_v8 = vadd.f32 %v11897_v2, %v6627_v1 }
 0x389   : > { %v2775_v11 = vmax.f32 %v2075_v10, 1e-08  ;;  %v11918_v10 = vunpack.c.h.bf16 %v9592_v58 }
 0x38a   : > { %10528 = vrcp.f32 %v2774_v63  ;;  %v7267_v15 = vmax.f32 %v6628_v8, 0.0  ;;  %v11916_v63 = vunpack.c.l.bf16 %v9592_v58 }
 0x38b   : > { %10530 = vrcp.f32 %v2775_v11 }
 0x38c   : > { %v9931_v8 = vpack.i.bf16 %v11918_v10, %v11916_v63 }
 0x38f   : > { %v6629_v33 = vpop.f32.mrf.mxu2 }
 0x390   : > { %v10529_v34 = vpop.eup %10528  ;;  %v6630_v12 = vadd.f32 %v11897_v2, %v6629_v33 }
 0x391   : > { %v10531_v25 = vpop.eup %10530  ;;  %v3286_v13 = vmul.f32 %v10529_v34, %v11771_v38  ;;  %2092 = vadd.xlane.f32.xlu2 %v2091_v27  ;;  %v9593_v27 = vld [vmem:[%s11536_s17 + $0xb8] sm:$0xff]  }
 0x392   : > { %v7268_v16 = vmax.f32 %v6630_v12, 0.0  ;;  %v3287_v35 = vmul.f32 %v10531_v25, %v11773_v39  ;;  %v11925_v33 = vunpack.c.l.bf16 %v9593_v27  ;;  %v11927_v34 = vunpack.c.h.bf16 %v9593_v27 }
 0x394   : > { %v3526_v40 = vpack.c.bf16 %v3287_v35, %v3286_v13  ;;  %v7523_v41 = vpack.c.bf16 %v7268_v16, %v7267_v15  ;;  %v9936_v26 = vpack.i.bf16 %v11927_v34, %v11925_v33 }
 0x396   : > { %3804 = vrot.lane.b32.xlu1 %v3526_v40, %s11344_s13  ;;  %v4480_v43 = vpop.f32.mrf.mxu0  ;;  %7727 = vmatmul.bf16.vlgmr.msra.gmra.mxu3 %v7523_v41  ;;  %v2081_v41 = vpop.xlane.xlu2 %2080 }
 0x397   : > { %v6632_v45 = vpop.f32.mrf.mxu2  ;;  %v4481_v53 = vadd.f32 %v11754_v51, %v4480_v43 }
 0x398   : > { %2089 = vadd.xlane.f32.xlu0 %v2088_v42  ;;  %v6633_v55 = vadd.f32 %v11897_v2, %v6632_v45 }
 0x399   : > { %v5087_v5 = vmul.f32 %v11678_v36, %v4481_v53 }
 0x39a   : > { %v3799_v50 = vpop.permute.xlu0 %3798  ;;  %v7269_v0 = vmax.f32 %v6633_v55, 0.0 }
 0x39b   : > { %8817 = vmatmul.msk.bf16.gmra.mxu0 %vm1973_vm0, %v3799_v50  ;;  %v5566_v52 = vpop.f32.mrf.mxu1 }
 0x39c   : > { %v5567_v20 = vadd.f32 %v11826_v17, %v5566_v52 }
 0x39e   : > { %v4482_v54 = vpop.f32.mrf.mxu0  ;;  %v6182_v11 = vmax.f32 %v5567_v20, 0.0 }
 0x39f   : > { %v4483_v56 = vadd.f32 %v11754_v51, %v4482_v54  ;;  %v6634_v57 = vpop.f32.mrf.mxu2 }
 0x3a0   : > { %v6635_v4 = vadd.f32 %v11897_v2, %v6634_v57  ;;  %v3801_v3 = vpop.permute.xlu1 %3800 }
 0x3a1   : > { %v5088_v19 = vmul.f32 %v11680_v37, %v4483_v56 }
 0x3a2   : > { %v7270_v59 = vmax.f32 %v6635_v4, 0.0 }
 0x3a3   : > { %v5568_v60 = vpop.f32.mrf.mxu1  ;;  %v5332_v61 = vpack.c.bf16 %v5088_v19, %v5087_v5 }
 0x3a4   : > { %v5569_v1 = vadd.f32 %v11826_v17, %v5568_v60  ;;  %v7524_v62 = vpack.c.bf16 %v7270_v59, %v7269_v0 }
 0x3a5   : > { %5580 = vmatmul.bf16.gmra.mxu1 %v5332_v61 }
 0x3a6   : > { %v6183_v36 = vmax.f32 %v5569_v1, 0.0  ;;  %7732 = vmatmul.bf16.gmra.mxu3 %v7524_v62 }
 0x3a7   : > { %v6637_v37 = vpop.f32.mrf.mxu2 }
 0x3a8   : > { %v6430_v24 = vpack.c.bf16 %v6183_v36, %v6182_v11  ;;  %v6638_v12 = vadd.f32 %v11897_v2, %v6637_v37 }
 0x3aa   : > { %6666 = vmatmul.bf16.gmra.mxu2 %v6430_v24  ;;  %v7271_v15 = vmax.f32 %v6638_v12, 0.0 }
 0x3ab   : > { %8818 = vmatmul.msk.bf16.gmra.mxu0 %vm1973_vm0, %v3801_v3 }
 0x3ac   : > { %9932 = vrot.lane.b32.xlu0 %v9931_v8, %s11344_s13 }
 0x3af   : > { %v6639_v25 = vpop.f32.mrf.mxu2 }
 0x3b0   : > { %v6640_v13 = vadd.f32 %v11897_v2, %v6639_v25  ;;  %v2777_v25 = vmax.f32 %v2081_v41, 1e-08 }
 0x3b2   : > { %v7272_v16 = vmax.f32 %v6640_v13, 0.0  ;;  %10532 = vrcp.f32 %v2777_v25 }
 0x3b4   : > { %v7525_v35 = vpack.c.bf16 %v7272_v16, %v7271_v15  ;;  %9937 = vrot.lane.b32.xlu0 %v9936_v26, %s11344_s13 }
 0x3b6   : > { %7737 = vmatmul.bf16.gmra.mxu3 %v7525_v35 }
 0x3b7   : > { %v6642_v40 = vpop.f32.mrf.mxu2 }
 0x3b8   : > { %v6643_v42 = vadd.f32 %v11897_v2, %v6642_v40 }
 0x3ba   : > { %v7273_v50 = vmax.f32 %v6643_v42, 0.0 }
 0x3bf   : > { %v6644_v43 = vpop.f32.mrf.mxu2 }
 0x3c0   : > { %v6645_v45 = vadd.f32 %v11897_v2, %v6644_v43 }
 0x3c2   : > { %v7274_v52 = vmax.f32 %v6645_v45, 0.0  ;;  %v4485_v53 = vpop.f32.mrf.mxu0 }
 0x3c3   : > { %v2087_v55 = vpop.xlane.xlu2 %2086  ;;  %v4486_v57 = vadd.f32 %v11754_v51, %v4485_v53 }
 0x3c4   : > { %v7526_v54 = vpack.c.bf16 %v7274_v52, %v7273_v50  ;;  %v2779_v26 = vmax.f32 %v2087_v55, 1e-08 }
 0x3c5   : > { %v5089_v58 = vmul.f32 %v11695_v22, %v4486_v57  ;;  %v2078_v61 = vpop.xlane.xlu0 %2077 }
 0x3c6   : > { %7742 = vmatmul.bf16.gmra.mxu3 %v7526_v54  ;;  %v2776_v42 = vmax.f32 %v2078_v61, 1e-08  ;;  %10534 = vrcp.f32 %v2779_v26 }
 0x3c7   : > { %v6647_v56 = vpop.f32.mrf.mxu2 }
 0x3c8   : > { %v6648_v20 = vadd.f32 %v11897_v2, %v6647_v56 }
 0x3ca   : > { %v4487_v4 = vpop.f32.mrf.mxu0  ;;  %v7275_v62 = vmax.f32 %v6648_v20, 0.0 }
 0x3cb   : > { %v4488_v5 = vadd.f32 %v11754_v51, %v4487_v4  ;;  %v3803_v19 = vpop.permute.xlu2 %3802  ;;  %v2084_v12 = vpop.xlane.xlu1 %2083 }
 0x3cc   : > { %8819 = vmatmul.msk.bf16.gmra.mxu0 %vm1973_vm0, %v3803_v19  ;;  %v2778_v40 = vmax.f32 %v2084_v12, 1e-08 }
 0x3cd   : > { %v5090_v0 = vmul.f32 %v11697_v23, %v4488_v5  ;;  %v10533_v5 = vpop.eup %10532 }
 0x3ce   : > { %10536 = vrcp.f32 %v2778_v40  ;;  %v10535_v19 = vpop.eup %10534 }
 0x3cf   : > { %v6649_v59 = vpop.f32.mrf.mxu2  ;;  %v5333_v60 = vpack.c.bf16 %v5090_v0, %v5089_v58  ;;  %10538 = vrcp.f32 %v2776_v42  ;;  %v3291_v61 = vmul.f32 %v10535_v19, %v11812_v21 }
 0x3d0   : > { %v6650_v1 = vadd.f32 %v11897_v2, %v6649_v59 }
 0x3d1   : > { %5585 = vmatmul.bf16.gmra.mxu1 %v5333_v60 }
 0x3d2   : > { %v7276_v11 = vmax.f32 %v6650_v1, 0.0 }
 0x3d4   : > { %v7527_v36 = vpack.c.bf16 %v7276_v11, %v7275_v62  ;;  %v10537_v0 = vpop.eup %10536  ;;  %v3289_v11 = vmul.f32 %v10533_v5, %v11783_v49 }
 0x3d5   : > { %v10539_v20 = vpop.eup %10538  ;;  %v3290_v60 = vmul.f32 %v10537_v0, %v11810_v14 }
 0x3d6   : > { %7747 = vmatmul.bf16.gmra.mxu3 %v7527_v36  ;;  %v3288_v62 = vmul.f32 %v10539_v20, %v11781_v7 }
 0x3d7   : > { %v6652_v37 = vpop.f32.mrf.mxu2 }
 0x3d8   : > { %v9923_v24 = vpop.permute.xlu0 %9922  ;;  %v6653_v13 = vadd.f32 %v11897_v2, %v6652_v37 }
 0x3d9   : > { %v9925_v3 = vunpack.i.h.bf16 %v9923_v24  ;;  %v9924_v8 = vunpack.i.l.bf16 %v9923_v24 }
 0x3da   : > { %v7277_v45 = vmax.f32 %v6653_v13, 0.0 }
 0x3db   : > { %v2097_v22 = vsel %vm1973_vm0, %v9925_v3, 0.0  ;;  %v2094_v23 = vsel %vm1973_vm0, %v9924_v8, 0.0  ;;  %v3528_v3 = vpack.c.bf16 %v3291_v61, %v3290_v60 }
 0x3dc   : > { %v5571_v27 = vpop.f32.mrf.mxu1  ;;  %2098 = vadd.xlane.f32.xlu2 %v2097_v22  ;;  %2095 = vadd.xlane.f32.xlu1 %v2094_v23  ;;  %v3527_v23 = vpack.c.bf16 %v3289_v11, %v3288_v62 }
 0x3dd   : > { %v5572_v52 = vadd.f32 %v11826_v17, %v5571_v27  ;;  %v9594_v27 = vld [vmem:[%s11536_s17 + $0xc0] sm:$0xff]  }
 0x3df   : > { %v6654_v15 = vpop.f32.mrf.mxu2  ;;  %v6184_v56 = vmax.f32 %v5572_v52, 0.0 }
 0x3e0   : > { %v6655_v16 = vadd.f32 %v11897_v2, %v6654_v15  ;;  %v11947_v35 = vpop.permute.xlu0 %9927  ;;  %v11964_v15 = vunpack.c.l.bf16 %v9594_v27 }
 0x3e1   : > { %v9929_v43 = vunpack.i.l.bf16 %v11947_v35  ;;  %v9930_v19 = vunpack.i.h.bf16 %v11947_v35 }
 0x3e2   : > { %v7278_v50 = vmax.f32 %v6655_v16, 0.0  ;;  %v11966_v16 = vunpack.c.h.bf16 %v9594_v27 }
 0x3e3   : > { %v2100_v41 = vsel %vm1973_vm0, %v9929_v43, 0.0  ;;  %v2103_v20 = vsel %vm1973_vm0, %v9930_v19, 0.0 }
 0x3e4   : > { %v5573_v53 = vpop.f32.mrf.mxu1  ;;  %v7528_v54 = vpack.c.bf16 %v7278_v50, %v7277_v45  ;;  %2101 = vadd.xlane.f32.xlu0 %v2100_v41  ;;  %v9941_v43 = vpack.i.bf16 %v11966_v16, %v11964_v15 }
 0x3e5   : > { %v5574_v55 = vadd.f32 %v11826_v17, %v5573_v53 }
 0x3e6   : > { %7752 = vmatmul.bf16.gmra.mxu3 %v7528_v54 }
 0x3e7   : > { %v6185_v57 = vmax.f32 %v5574_v55, 0.0  ;;  %v6657_v4 = vpop.f32.mrf.mxu2 }
 0x3e8   : > { %v6658_v1 = vadd.f32 %v11897_v2, %v6657_v4  ;;  %v11975_v4 = vld [vmem:[#allocation14] ss:$0 sm:$0xff] }
 0x3e9   : > { %v6431_v58 = vpack.c.bf16 %v6185_v57, %v6184_v56 }
 0x3ea   : > { %v7279_v8 = vmax.f32 %v6658_v1, 0.0 }
 0x3eb   : > { %6671 = vmatmul.bf16.gmra.mxu2 %v6431_v58 }
 0x3ec   : > { %v5576_v59 = vpop.f32.mrf.mxu1 }
 0x3ed   : > { %v5577_v24 = vadd.f32 %v11826_v17, %v5576_v59 }
 0x3ef   : > { %v6659_v36 = vpop.f32.mrf.mxu2  ;;  %v6186_v13 = vmax.f32 %v5577_v24, 0.0 }
 0x3f0   : > { %v6660_v37 = vadd.f32 %v11897_v2, %v6659_v36 }
 0x3f2   : > { %v7280_v22 = vmax.f32 %v6660_v37, 0.0 }
 0x3f4   : > { %v5578_v12 = vpop.f32.mrf.mxu1  ;;  %3806 = vrot.lane.b32.xlu2 %v3527_v23, %s11344_s13  ;;  %v7529_v25 = vpack.c.bf16 %v7280_v22, %v7279_v8 }
 0x3f5   : > { %v5579_v26 = vadd.f32 %v11826_v17, %v5578_v12  ;;  %3808 = vrot.lane.b32.xlu1 %v3528_v3, %s11344_s13 }
 0x3f6   : > { %7757 = vmatmul.bf16.gmra.mxu3 %v7529_v25 }
 0x3f7   : > { %v6187_v40 = vmax.f32 %v5579_v26, 0.0 }
 0x3f9   : > { %v6432_v42 = vpack.c.bf16 %v6187_v40, %v6186_v13 }
 0x3fb   : > { %6676 = vmatmul.bf16.gmra.mxu2 %v6432_v42  ;;  %v9595_v42 = vld [vmem:[%s11536_s17 + $0xc8] sm:$0xff]  }
 0x3fd   : > { %9942 = vrot.lane.b32.xlu1 %v9941_v43, %s11344_s13 }
 0x3fe   : > { %v6662_v45 = vpop.f32.mrf.mxu2 }
 0x3ff   : > { %v6663_v50 = vadd.f32 %v11897_v2, %v6662_v45 }
 0x401   : > { %v7281_v54 = vmax.f32 %v6663_v50, 0.0  ;;  %v11996_v50 = vunpack.c.l.bf16 %v9595_v42 }
 0x404   : > { %v2093_v60 = vpop.xlane.xlu2 %2092 }
 0x405   : > { %v2781_v24 = vmax.f32 %v2093_v60, 1e-08 }
 0x406   : > { %v6664_v52 = vpop.f32.mrf.mxu2 }
 0x407   : > { %v6665_v41 = vadd.f32 %v11897_v2, %v6664_v52  ;;  %10540 = vrcp.f32 %v2781_v24 }
 0x408   : > { %v3805_v53 = vpop.permute.xlu1 %3804 }
 0x409   : > { %v7282_v55 = vmax.f32 %v6665_v41, 0.0  ;;  %8820 = vmatmul.msk.bf16.gmra.mxu0 %vm1973_vm0, %v3805_v53 }
 0x40b   : > { %v7530_v56 = vpack.c.bf16 %v7282_v55, %v7281_v54  ;;  %v2090_v57 = vpop.xlane.xlu0 %2089 }
 0x40c   : > { %v2780_v22 = vmax.f32 %v2090_v57, 1e-08 }
 0x40d   : > { %7762 = vmatmul.bf16.gmra.mxu3 %v7530_v56  ;;  %v11999_v56 = vunpack.c.h.bf16 %v9595_v42 }
 0x40e   : > { %10542 = vrcp.f32 %v2780_v22 }
 0x40f   : > { %v9946_v60 = vpack.i.bf16 %v11999_v56, %v11996_v50 }
 0x418   : > { %v4490_v5 = vpop.f32.mrf.mxu0 }
 0x419   : > { %v7728_v58 = vpop.f32.mrf.mxu3  ;;  %v4491_v61 = vadd.f32 %v11754_v51, %v4490_v5 }
 0x41a   : > { %v7729_v0 = vadd.f32 %v11975_v4, %v7728_v58 }
 0x41b   : > { %v5091_v23 = vmul.f32 %v11703_v28, %v4491_v61 }
 0x41c   : > { %8368 = vst [vmem:[%s11979_s22] sm:$0xff] %v7729_v0 }
 0x41d   : > { %2104 = vadd.xlane.f32.xlu2 %v2103_v20 }
 0x41e   : > { %v9933_v59 = vpop.permute.xlu0 %9932 }
 0x41f   : > { %v9934_v1 = vunpack.i.l.bf16 %v9933_v59  ;;  %v9935_v11 = vunpack.i.h.bf16 %v9933_v59 }
 0x420   : > { %v4492_v62 = vpop.f32.mrf.mxu0 }
 0x421   : > { %v4493_v35 = vadd.f32 %v11754_v51, %v4492_v62  ;;  %v7730_v36 = vpop.f32.mrf.mxu3  ;;  %v2106_v37 = vsel %vm1973_vm0, %v9934_v1, 0.0  ;;  %v2109_v12 = vsel %vm1973_vm0, %v9935_v11, 0.0 }
 0x422   : > { %v7731_v3 = vadd.f32 %v11975_v4, %v7730_v36  ;;  %v5581_v8 = vpop.f32.mrf.mxu1  ;;  %2107 = vadd.xlane.f32.xlu0 %v2106_v37 }
 0x423   : > { %v5092_v27 = vmul.f32 %v11705_v29, %v4493_v35  ;;  %v5582_v26 = vadd.f32 %v11826_v17, %v5581_v8  ;;  %v10541_v29 = vpop.eup %10540 }
 0x424   : > { %8369 = vst [vmem:[%s11979_s22 + $0x8] sm:$0xff] %v7731_v3  ;;  %v10543_v52 = vpop.eup %10542  ;;  %v3293_v58 = vmul.f32 %v10541_v29, %v11832_v6 }
 0x425   : > { %v5334_v25 = vpack.c.bf16 %v5092_v27, %v5091_v23  ;;  %v6188_v41 = vmax.f32 %v5582_v26, 0.0  ;;  %v3292_v19 = vmul.f32 %v10543_v52, %v11830_v48 }
 0x427   : > { %5590 = vmatmul.bf16.gmra.mxu1 %v5334_v25  ;;  %2110 = vadd.xlane.f32.xlu1 %v2109_v12  ;;  %v3529_v11 = vpack.c.bf16 %v3293_v58, %v3292_v19 }
 0x428   : > { %v4495_v13 = vpop.f32.mrf.mxu0 }
 0x429   : > { %v7733_v40 = vpop.f32.mrf.mxu3  ;;  %v4496_v53 = vadd.f32 %v11754_v51, %v4495_v13 }
 0x42a   : > { %v7734_v43 = vadd.f32 %v11975_v4, %v7733_v40  ;;  %v5583_v45 = vpop.f32.mrf.mxu1 }
 0x42b   : > { %v5584_v28 = vadd.f32 %v11826_v17, %v5583_v45  ;;  %v5093_v0 = vmul.f32 %v11725_v31, %v4496_v53 }
 0x42c   : > { %8370 = vst [vmem:[%s11979_s22 + $0x10] sm:$0xff] %v7734_v43 }
 0x42d   : > { %v6189_v54 = vmax.f32 %v5584_v28, 0.0  ;;  %v6667_v55 = vpop.f32.mrf.mxu2 }
 0x42e   : > { %v6668_v62 = vadd.f32 %v11897_v2, %v6667_v55 }
 0x42f   : > { %v6433_v57 = vpack.c.bf16 %v6189_v54, %v6188_v41 }
 0x430   : > { %v4497_v5 = vpop.f32.mrf.mxu0  ;;  %v7283_v37 = vmax.f32 %v6668_v62, 0.0 }
 0x431   : > { %v4498_v20 = vadd.f32 %v11754_v51, %v4497_v5  ;;  %6681 = vmatmul.bf16.gmra.mxu2 %v6433_v57  ;;  %v7735_v59 = vpop.f32.mrf.mxu3  ;;  %v9938_v57 = vpop.permute.xlu0 %9937 }
 0x432   : > { %v7736_v61 = vadd.f32 %v11975_v4, %v7735_v59  ;;  %v9939_v62 = vunpack.i.l.bf16 %v9938_v57 }
 0x433   : > { %v5094_v1 = vmul.f32 %v11727_v32, %v4498_v20  ;;  %v9940_v20 = vunpack.i.h.bf16 %v9938_v57 }
 0x434   : > { %8371 = vst [vmem:[%s11979_s22 + $0x18] sm:$0xff] %v7736_v61 }
 0x435   : > { %v6669_v35 = vpop.f32.mrf.mxu2  ;;  %v5335_v36 = vpack.c.bf16 %v5094_v1, %v5093_v0  ;;  %9947 = vrot.lane.b32.xlu2 %v9946_v60, %s11344_s13 }
 0x436   : > { %v6670_v31 = vadd.f32 %v11897_v2, %v6669_v35  ;;  %3810 = vrot.lane.b32.xlu0 %v3529_v11, %s11344_s13 }
 0x437   : > { %5595 = vmatmul.bf16.gmra.mxu1 %v5335_v36  ;;  %v2115_v36 = vsel %vm1973_vm0, %v9940_v20, 0.0 }
 0x438   : > { %v7284_v24 = vmax.f32 %v6670_v31, 0.0 }
 0x439   : > { %v7738_v3 = vpop.f32.mrf.mxu3 }
 0x43a   : > { %v7739_v32 = vadd.f32 %v11975_v4, %v7738_v3  ;;  %v7531_v8 = vpack.c.bf16 %v7284_v24, %v7283_v37  ;;  %v2112_v37 = vsel %vm1973_vm0, %v9939_v62, 0.0 }
 0x43c   : > { %8372 = vst [vmem:[%s11979_s22 + $0x20] sm:$0xff] %v7739_v32  ;;  %7767 = vmatmul.bf16.gmra.mxu3 %v7531_v8 }
 0x441   : > { %v7740_v22 = vpop.f32.mrf.mxu3 }
 0x442   : > { %v7741_v23 = vadd.f32 %v11975_v4, %v7740_v22  ;;  %v9596_v22 = vld [vmem:[%s11536_s17 + $0xd0] sm:$0xff]  }
 0x444   : > { %8373 = vst [vmem:[%s11979_s22 + $0x28] sm:$0xff] %v7741_v23 }
 0x449   : > { %v4500_v27 = vpop.f32.mrf.mxu0  ;;  %v7743_v12 = vpop.f32.mrf.mxu3 }
 0x44a   : > { %v7744_v25 = vadd.f32 %v11975_v4, %v7743_v12  ;;  %v4501_v42 = vadd.f32 %v11754_v51, %v4500_v27  ;;  %v12042_v27 = vunpack.c.l.bf16 %v9596_v22  ;;  %v12044_v12 = vunpack.c.h.bf16 %v9596_v22 }
 0x44c   : > { %8374 = vst [vmem:[%s11979_s22 + $0x30] sm:$0xff] %v7744_v25  ;;  %v5095_v53 = vmul.f32 %v11737_v46, %v4501_v42 }
 0x44e   : > { %v5586_v13 = vpop.f32.mrf.mxu1 }
 0x44f   : > { %v2099_v26 = vpop.xlane.xlu2 %2098  ;;  %v2096_v40 = vpop.xlane.xlu1 %2095  ;;  %v5587_v55 = vadd.f32 %v11826_v17, %v5586_v13 }
 0x450   : > { %v2783_v43 = vmax.f32 %v2099_v26, 1e-08  ;;  %v2782_v45 = vmax.f32 %v2096_v40, 1e-08  ;;  %v9951_v26 = vpack.i.bf16 %v12044_v12, %v12042_v27 }
 0x451   : > { %v4502_v28 = vpop.f32.mrf.mxu0  ;;  %v7745_v29 = vpop.f32.mrf.mxu3  ;;  %v6190_v61 = vmax.f32 %v5587_v55, 0.0 }
 0x452   : > { %10544 = vrcp.f32 %v2783_v43  ;;  %v4503_v52 = vadd.f32 %v11754_v51, %v4502_v28  ;;  %v7746_v41 = vadd.f32 %v11975_v4, %v7745_v29  ;;  %v9597_v43 = vld [vmem:[%s11536_s17 + $0xd8] sm:$0xff]  }
 0x453   : > { %10546 = vrcp.f32 %v2782_v45  ;;  %v12053_v29 = vunpack.c.l.bf16 %v9597_v43 }
 0x454   : > { %v5096_v54 = vmul.f32 %v11739_v47, %v4503_v52  ;;  %8375 = vst [vmem:[%s11979_s22 + $0x38] sm:$0xff] %v7746_v41  ;;  %v12055_v52 = vunpack.c.h.bf16 %v9597_v43 }
 0x456   : > { %v5588_v5 = vpop.f32.mrf.mxu1  ;;  %v5336_v19 = vpack.c.bf16 %v5096_v54, %v5095_v53  ;;  %v9956_v55 = vpack.i.bf16 %v12055_v52, %v12053_v29 }
 0x457   : > { %v5589_v58 = vadd.f32 %v11826_v17, %v5588_v5  ;;  %v3807_v0 = vpop.permute.xlu2 %3806 }
 0x458   : > { %v10545_v59 = vpop.eup %10544  ;;  %8821 = vmatmul.msk.bf16.gmra.mxu0 %vm1973_vm0, %v3807_v0  ;;  %5600 = vmatmul.bf16.gmra.mxu1 %v5336_v19 }
 0x459   : > { %v10547_v60 = vpop.eup %10546  ;;  %v6191_v46 = vmax.f32 %v5589_v58, 0.0  ;;  %v7748_v1 = vpop.f32.mrf.mxu3  ;;  %v3295_v47 = vmul.f32 %v10545_v59, %v11875_v30 }
 0x45a   : > { %v7749_v11 = vadd.f32 %v11975_v4, %v7748_v1  ;;  %v3294_v35 = vmul.f32 %v10547_v60, %v11873_v9 }
 0x45b   : > { %v6434_v17 = vpack.c.bf16 %v6191_v46, %v6190_v61 }
 0x45c   : > { %8376 = vst [vmem:[%s11979_s22 + $0x40] sm:$0xff] %v7749_v11  ;;  %v3530_v31 = vpack.c.bf16 %v3295_v47, %v3294_v35  ;;  %v2102_v35 = vpop.xlane.xlu0 %2101 }
 0x45d   : > { %6686 = vmatmul.bf16.gmra.mxu2 %v6434_v17 }
 0x45e   : > { %3812 = vrot.lane.b32.xlu1 %v3530_v31, %s11344_s13  ;;  %2116 = vadd.xlane.f32.xlu2 %v2115_v36 }
 0x460   : > { %2113 = vadd.xlane.f32.xlu0 %v2112_v37  ;;  %v2784_v37 = vmax.f32 %v2102_v35, 1e-08 }
 0x461   : > { %v7750_v24 = vpop.f32.mrf.mxu3 }
 0x462   : > { %v7751_v3 = vadd.f32 %v11975_v4, %v7750_v24  ;;  %10548 = vrcp.f32 %v2784_v37 }
 0x464   : > { %8377 = vst [vmem:[%s11979_s22 + $0x48] sm:$0xff] %v7751_v3 }
 0x467   : > { %v3809_v32 = vpop.permute.xlu1 %3808 }
 0x468   : > { %8822 = vmatmul.msk.bf16.gmra.mxu0 %vm1973_vm0, %v3809_v32  ;;  %v10549_v43 = vpop.eup %10548 }
 0x469   : > { %v7753_v8 = vpop.f32.mrf.mxu3 }
 0x46a   : > { %v7754_v23 = vadd.f32 %v11975_v4, %v7753_v8 }
 0x46c   : > { %8378 = vst [vmem:[%s11979_s22 + $0x50] sm:$0xff] %v7754_v23 }
 0x46e   : > { %v6672_v25 = vpop.f32.mrf.mxu2 }
 0x46f   : > { %v9943_v13 = vpop.permute.xlu1 %9942  ;;  %v6673_v41 = vadd.f32 %v11897_v2, %v6672_v25 }
 0x470   : > { %v9945_v40 = vunpack.i.h.bf16 %v9943_v13  ;;  %v9944_v60 = vunpack.i.l.bf16 %v9943_v13 }
 0x471   : > { %v7755_v42 = vpop.f32.mrf.mxu3  ;;  %v7285_v57 = vmax.f32 %v6673_v41, 0.0 }
 0x472   : > { %v7756_v45 = vadd.f32 %v11975_v4, %v7755_v42  ;;  %v2121_v28 = vsel %vm1973_vm0, %v9945_v40, 0.0  ;;  %v2118_v1 = vsel %vm1973_vm0, %v9944_v60, 0.0 }
 0x473   : > { %2122 = vadd.xlane.f32.xlu2 %v2121_v28 }
 0x474   : > { %8379 = vst [vmem:[%s11979_s22 + $0x58] sm:$0xff] %v7756_v45  ;;  %9952 = vrot.lane.b32.xlu0 %v9951_v26, %s11344_s13 }
 0x476   : > { %v6674_v53 = vpop.f32.mrf.mxu2 }
 0x477   : > { %v6675_v54 = vadd.f32 %v11897_v2, %v6674_v53 }
 0x479   : > { %v7286_v5 = vmax.f32 %v6675_v54, 0.0  ;;  %v7758_v19 = vpop.f32.mrf.mxu3 }
 0x47a   : > { %v7759_v58 = vadd.f32 %v11975_v4, %v7758_v19 }
 0x47b   : > { %v7532_v0 = vpack.c.bf16 %v7286_v5, %v7285_v57 }
 0x47c   : > { %8380 = vst [vmem:[%s11979_s22 + $0x60] sm:$0xff] %v7759_v58  ;;  %9957 = vrot.lane.b32.xlu0 %v9956_v55, %s11344_s13 }
 0x47d   : > { %7772 = vmatmul.bf16.gmra.mxu3 %v7532_v0 }
 0x47e   : > { %v6677_v20 = vpop.f32.mrf.mxu2 }
 0x47f   : > { %v6678_v46 = vadd.f32 %v11897_v2, %v6677_v20 }
 0x481   : > { %v7760_v59 = vpop.f32.mrf.mxu3  ;;  %v7287_v17 = vmax.f32 %v6678_v46, 0.0 }
 0x482   : > { %v7761_v61 = vadd.f32 %v11975_v4, %v7760_v59 }
 0x484   : > { %8381 = vst [vmem:[%s11979_s22 + $0x68] sm:$0xff] %v7761_v61 }
 0x486   : > { %v4505_v47 = vpop.f32.mrf.mxu0  ;;  %v6679_v62 = vpop.f32.mrf.mxu2 }
 0x487   : > { %v6680_v11 = vadd.f32 %v11897_v2, %v6679_v62  ;;  %v4506_v24 = vadd.f32 %v11754_v51, %v4505_v47  ;;  %v12085_v47 = vld [vmem:[#allocation8] ss:$0 sm:$0xff] }
 0x488   : > { %2119 = vadd.xlane.f32.xlu1 %v2118_v1 }
 0x489   : > { %v7288_v36 = vmax.f32 %v6680_v11, 0.0  ;;  %v5097_v23 = vmul.f32 %v11771_v38, %v4506_v24  ;;  %v3296_v38 = vmul.f32 %v10549_v43, %v11884_v44 }
 0x48b   : > { %v7533_v31 = vpack.c.bf16 %v7288_v36, %v7287_v17 }
 0x48d   : > { %7777 = vmatmul.bf16.gmra.mxu3 %v7533_v31  ;;  %v9598_v31 = vld [vmem:[%s11536_s17 + $0xe0] sm:$0xff]  }
 0x48e   : > { %v4507_v3 = vpop.f32.mrf.mxu0  ;;  %v12090_v24 = vunpack.c.l.bf16 %v9598_v31 }
 0x48f   : > { %v4508_v32 = vadd.f32 %v11754_v51, %v4507_v3  ;;  %v12092_v3 = vunpack.c.h.bf16 %v9598_v31 }
 0x490   : > { %v7763_v8 = vpop.f32.mrf.mxu3  ;;  %v2105_v22 = vpop.xlane.xlu2 %2104 }
 0x491   : > { %v5098_v25 = vmul.f32 %v11773_v39, %v4508_v32  ;;  %v7764_v13 = vadd.f32 %v11975_v4, %v7763_v8  ;;  %v2785_v26 = vmax.f32 %v2105_v22, 1e-08  ;;  %v9961_v22 = vpack.i.bf16 %v12092_v3, %v12090_v24 }
 0x493   : > { %8382 = vst [vmem:[%s11979_s22 + $0x70] sm:$0xff] %v7764_v13  ;;  %10550 = vrcp.f32 %v2785_v26  ;;  %v5337_v40 = vpack.c.bf16 %v5098_v25, %v5097_v23  ;;  %v9599_v23 = vld [vmem:[%s11536_s17 + $0xe8] sm:$0xff]  }
 0x494   : > { %v12098_v25 = vunpack.c.l.bf16 %v9599_v23  ;;  %v12100_v13 = vunpack.c.h.bf16 %v9599_v23 }
 0x495   : > { %5605 = vmatmul.bf16.gmra.mxu1 %v5337_v40  ;;  %v2108_v42 = vpop.xlane.xlu0 %2107 }
 0x496   : > { %v2786_v45 = vmax.f32 %v2108_v42, 1e-08 }
 0x498   : > { %v7765_v28 = vpop.f32.mrf.mxu3  ;;  %10552 = vrcp.f32 %v2786_v45  ;;  %v9948_v5 = vpop.permute.xlu2 %9947 }
 0x499   : > { %v10551_v41 = vpop.eup %10550  ;;  %v7766_v53 = vadd.f32 %v11975_v4, %v7765_v28  ;;  %v9949_v58 = vunpack.i.l.bf16 %v9948_v5 }
 0x49a   : > { %v2111_v54 = vpop.xlane.xlu1 %2110  ;;  %v3297_v39 = vmul.f32 %v10551_v41, %v11886_v18  ;;  %v9966_v41 = vpack.i.bf16 %v12100_v13, %v12098_v25 }
 0x49b   : > { %8383 = vst [vmem:[%s11979_s22 + $0x78] sm:$0xff] %v7766_v53  ;;  %v2787_v55 = vmax.f32 %v2111_v54, 1e-08  ;;  %v2124_v59 = vsel %vm1973_vm0, %v9949_v58, 0.0 }
 0x49c   : > { %v3531_v57 = vpack.c.bf16 %v3297_v39, %v3296_v38 }
 0x49d   : > { %10554 = vrcp.f32 %v2787_v55 }
 0x49e   : > { %3814 = vrot.lane.b32.xlu2 %v3531_v57, %s11344_s13  ;;  %v10553_v19 = vpop.eup %10552 }
 0x49f   : > { %v3298_v0 = vmul.f32 %v10553_v19, %v11916_v63 }
 0x4a3   : > { %v10555_v20 = vpop.eup %10554 }
 0x4a4   : > { %v5591_v60 = vpop.f32.mrf.mxu1  ;;  %v3299_v61 = vmul.f32 %v10555_v20, %v11918_v10 }
 0x4a5   : > { %v5592_v62 = vadd.f32 %v12085_v47, %v5591_v60 }
 0x4a6   : > { %v3532_v46 = vpack.c.bf16 %v3299_v61, %v3298_v0  ;;  %2125 = vadd.xlane.f32.xlu0 %v2124_v59  ;;  %v9950_v0 = vunpack.i.h.bf16 %v9948_v5 }
 0x4a7   : > { %v6192_v17 = vmax.f32 %v5592_v62, 0.0 }
 0x4a8   : > { %v3811_v1 = vpop.permute.xlu0 %3810  ;;  %3816 = vrot.lane.b32.xlu1 %v3532_v46, %s11344_s13  ;;  %v2127_v20 = vsel %vm1973_vm0, %v9950_v0, 0.0 }
 0x4a9   : > { %8823 = vmatmul.msk.bf16.gmra.mxu0 %vm1973_vm0, %v3811_v1 }
 0x4ac   : > { %v5593_v11 = vpop.f32.mrf.mxu1 }
 0x4ad   : > { %v5594_v35 = vadd.f32 %v12085_v47, %v5593_v11 }
 0x4af   : > { %v6193_v36 = vmax.f32 %v5594_v35, 0.0 }
 0x4b1   : > { %v6435_v37 = vpack.c.bf16 %v6193_v36, %v6192_v17 }
 0x4b3   : > { %6691 = vmatmul.bf16.gmra.mxu2 %v6435_v37 }
 0x4b4   : > { %v5596_v32 = vpop.f32.mrf.mxu1  ;;  %v6682_v8 = vpop.f32.mrf.mxu2 }
 0x4b5   : > { %v5597_v26 = vadd.f32 %v12085_v47, %v5596_v32  ;;  %v6683_v40 = vadd.f32 %v11897_v2, %v6682_v8 }
 0x4b7   : > { %v6194_v53 = vmax.f32 %v5597_v26, 0.0  ;;  %v7289_v54 = vmax.f32 %v6683_v40, 0.0 }
 0x4ba   : > { %9962 = vrot.lane.b32.xlu0 %v9961_v22, %s11344_s13 }
 0x4bc   : > { %v5598_v42 = vpop.f32.mrf.mxu1  ;;  %v6684_v43 = vpop.f32.mrf.mxu2 }
 0x4bd   : > { %v5599_v45 = vadd.f32 %v12085_v47, %v5598_v42  ;;  %v6685_v28 = vadd.f32 %v11897_v2, %v6684_v43 }
 0x4bf   : > { %v6195_v38 = vmax.f32 %v5599_v45, 0.0  ;;  %v7290_v39 = vmax.f32 %v6685_v28, 0.0  ;;  %v7768_v55 = vpop.f32.mrf.mxu3 }
 0x4c0   : > { %v7769_v57 = vadd.f32 %v11975_v4, %v7768_v55 }
 0x4c1   : > { %v6436_v19 = vpack.c.bf16 %v6195_v38, %v6194_v53  ;;  %v7534_v58 = vpack.c.bf16 %v7290_v39, %v7289_v54 }
 0x4c2   : > { %8384 = vst [vmem:[%s11979_s22 + $0x80] sm:$0xff] %v7769_v57  ;;  %9967 = vrot.lane.b32.xlu0 %v9966_v41, %s11344_s13 }
 0x4c3   : > { %6696 = vmatmul.bf16.gmra.mxu2 %v6436_v19  ;;  %7782 = vmatmul.bf16.gmra.mxu3 %v7534_v58 }
 0x4c7   : > { %v7770_v59 = vpop.f32.mrf.mxu3  ;;  %2128 = vadd.xlane.f32.xlu2 %v2127_v20 }
 0x4c8   : > { %v7771_v60 = vadd.f32 %v11975_v4, %v7770_v59 }
 0x4ca   : > { %8385 = vst [vmem:[%s11979_s22 + $0x88] sm:$0xff] %v7771_v60 }
 0x4d0   : > { %v3813_v61 = vpop.permute.xlu1 %3812 }
 0x4d1   : > { %8824 = vmatmul.msk.bf16.gmra.mxu0 %vm1973_vm0, %v3813_v61  ;;  %v2117_v43 = vpop.xlane.xlu2 %2116 }
 0x4d2   : > { %v2789_v0 = vmax.f32 %v2117_v43, 1e-08  ;;  %v9600_v43 = vld [vmem:[%s11536_s17 + $0xf0] sm:$0xff]  }
 0x4d3   : > { %v2114_v17 = vpop.xlane.xlu0 %2113 }
 0x4d4   : > { %v2788_v61 = vmax.f32 %v2114_v17, 1e-08  ;;  %10556 = vrcp.f32 %v2789_v0 }
 0x4d5   : > { %v4510_v46 = vpop.f32.mrf.mxu0  ;;  %v5601_v1 = vpop.f32.mrf.mxu1 }
 0x4d6   : > { %v4511_v62 = vadd.f32 %v11754_v51, %v4510_v46  ;;  %v5602_v5 = vadd.f32 %v12085_v47, %v5601_v1  ;;  %10558 = vrcp.f32 %v2788_v61 }
 0x4d8   : > { %v5099_v37 = vmul.f32 %v11781_v7, %v4511_v62  ;;  %v6196_v32 = vmax.f32 %v5602_v5, 0.0 }
 0x4dd   : > { %v4512_v11 = vpop.f32.mrf.mxu0  ;;  %v5603_v35 = vpop.f32.mrf.mxu1 }
 0x4de   : > { %v4513_v36 = vadd.f32 %v11754_v51, %v4512_v11  ;;  %v5604_v31 = vadd.f32 %v12085_v47, %v5603_v35  ;;  %v10557_v35 = vpop.eup %10556 }
 0x4e0   : > { %v5100_v8 = vmul.f32 %v11783_v49, %v4513_v36  ;;  %v6197_v22 = vmax.f32 %v5604_v31, 0.0  ;;  %v6687_v23 = vpop.f32.mrf.mxu2  ;;  %v10559_v31 = vpop.eup %10558 }
 0x4e1   : > { %v6688_v28 = vadd.f32 %v11897_v2, %v6687_v23 }
 0x4e2   : > { %v5338_v26 = vpack.c.bf16 %v5100_v8, %v5099_v37  ;;  %v6437_v40 = vpack.c.bf16 %v6197_v22, %v6196_v32  ;;  %v3301_v37 = vmul.f32 %v10557_v35, %v11927_v34 }
 0x4e3   : > { %v7291_v39 = vmax.f32 %v6688_v28, 0.0 }
 0x4e4   : > { %5610 = vmatmul.bf16.gmra.mxu1 %v5338_v26  ;;  %6701 = vmatmul.bf16.gmra.mxu2 %v6437_v40 }
 0x4e5   : > { %v4515_v42 = vpop.f32.mrf.mxu0 }
 0x4e6   : > { %v9953_v45 = vpop.permute.xlu0 %9952  ;;  %v4516_v57 = vadd.f32 %v11754_v51, %v4515_v42  ;;  %v2123_v59 = vpop.xlane.xlu2 %2122 }
 0x4e7   : > { %v9955_v41 = vunpack.i.h.bf16 %v9953_v45  ;;  %v9954_v53 = vunpack.i.l.bf16 %v9953_v45  ;;  %v2791_v11 = vmax.f32 %v2123_v59, 1e-08 }
 0x4e8   : > { %v6689_v54 = vpop.f32.mrf.mxu2  ;;  %v5101_v46 = vmul.f32 %v11810_v14, %v4516_v57 }
 0x4e9   : > { %v6690_v38 = vadd.f32 %v11897_v2, %v6689_v54  ;;  %v2133_v7 = vsel %vm1973_vm0, %v9955_v41, 0.0  ;;  %v2130_v49 = vsel %vm1973_vm0, %v9954_v53, 0.0  ;;  %10560 = vrcp.f32 %v2791_v11 }
 0x4ea   : > { %2134 = vadd.xlane.f32.xlu2 %v2133_v7  ;;  %2131 = vadd.xlane.f32.xlu1 %v2130_v49  ;;  %v12141_v53 = vunpack.c.l.bf16 %v9600_v43  ;;  %v12143_v54 = vunpack.c.h.bf16 %v9600_v43 }
 0x4eb   : > { %v7292_v55 = vmax.f32 %v6690_v38, 0.0 }
 0x4ec   : > { %v9971_v38 = vpack.i.bf16 %v12143_v54, %v12141_v53 }
 0x4ed   : > { %v4517_v19 = vpop.f32.mrf.mxu0  ;;  %v7535_v58 = vpack.c.bf16 %v7292_v55, %v7291_v39 }
 0x4ee   : > { %v4518_v20 = vadd.f32 %v11754_v51, %v4517_v19  ;;  %v9958_v60 = vpop.permute.xlu0 %9957 }
 0x4ef   : > { %7787 = vmatmul.bf16.gmra.mxu3 %v7535_v58  ;;  %v9959_v2 = vunpack.i.l.bf16 %v9958_v60  ;;  %v10561_v32 = vpop.eup %10560 }
 0x4f0   : > { %v5102_v1 = vmul.f32 %v11812_v21, %v4518_v20  ;;  %v3300_v21 = vmul.f32 %v10559_v31, %v11925_v33  ;;  %v3303_v26 = vmul.f32 %v10561_v32, %v11966_v16 }
 0x4f1   : > { %v2136_v62 = vsel %vm1973_vm0, %v9959_v2, 0.0 }
 0x4f2   : > { %v5339_v5 = vpack.c.bf16 %v5102_v1, %v5101_v46  ;;  %2137 = vadd.xlane.f32.xlu0 %v2136_v62  ;;  %v3533_v22 = vpack.c.bf16 %v3301_v37, %v3300_v21  ;;  %v9960_v62 = vunpack.i.h.bf16 %v9958_v60 }
 0x4f4   : > { %5615 = vmatmul.bf16.gmra.mxu1 %v5339_v5  ;;  %v2139_v5 = vsel %vm1973_vm0, %v9960_v62, 0.0 }
 0x4f8   : > { %v3815_v36 = vpop.permute.xlu2 %3814 }
 0x4f9   : > { %8825 = vmatmul.msk.bf16.gmra.mxu0 %vm1973_vm0, %v3815_v36 }
 0x4fb   : > { %v2120_v17 = vpop.xlane.xlu1 %2119 }
 0x4fc   : > { %v2790_v14 = vmax.f32 %v2120_v17, 1e-08 }
 0x4fe   : > { %10562 = vrcp.f32 %v2790_v14 }
 0x500   : > { %v7773_v8 = vpop.f32.mrf.mxu3 }
 0x501   : > { %v7774_v23 = vadd.f32 %v11975_v4, %v7773_v8 }
 0x502   : > { %3818 = vrot.lane.b32.xlu2 %v3533_v22, %s11344_s13 }
 0x503   : > { %8386 = vst [vmem:[%s11979_s22 + $0x90] sm:$0xff] %v7774_v23  ;;  %v9601_v23 = vld [vmem:[%s11536_s17 + $0xf8] sm:$0xff]  }
 0x504   : > { %v10563_v40 = vpop.eup %10562  ;;  %v12164_v43 = vunpack.c.l.bf16 %v9601_v23 }
 0x505   : > { %v3302_v42 = vmul.f32 %v10563_v40, %v11964_v15 }
 0x507   : > { %v3534_v45 = vpack.c.bf16 %v3303_v26, %v3302_v42 }
 0x508   : > { %v7775_v28 = vpop.f32.mrf.mxu3 }
 0x509   : > { %v7776_v41 = vadd.f32 %v11975_v4, %v7775_v28  ;;  %3820 = vrot.lane.b32.xlu1 %v3534_v45, %s11344_s13  ;;  %v12166_v45 = vunpack.c.h.bf16 %v9601_v23  ;;  %v12168_v28 = vld [vmem:[#allocation11] ss:$0 sm:$0xff] }
 0x50b   : > { %8387 = vst [vmem:[%s11979_s22 + $0x98] sm:$0xff] %v7776_v41 }
 0x510   : > { %v7778_v7 = vpop.f32.mrf.mxu3 }
 0x511   : > { %v7779_v49 = vadd.f32 %v11975_v4, %v7778_v7  ;;  %9972 = vrot.lane.b32.xlu1 %v9971_v38, %s11344_s13  ;;  %v9976_v38 = vpack.i.bf16 %v12166_v45, %v12164_v43 }
 0x512   : > { %v5606_v39 = vpop.f32.mrf.mxu1 }
 0x513   : > { %8388 = vst [vmem:[%s11979_s22 + $0xa0] sm:$0xff] %v7779_v49  ;;  %v5607_v57 = vadd.f32 %v12085_v47, %v5606_v39 }
 0x515   : > { %v6198_v59 = vmax.f32 %v5607_v57, 0.0 }
 0x518   : > { %v7780_v55 = vpop.f32.mrf.mxu3 }
 0x519   : > { %v7781_v19 = vadd.f32 %v11975_v4, %v7780_v55  ;;  %v2126_v46 = vpop.xlane.xlu0 %2125 }
 0x51a   : > { %v5608_v58 = vpop.f32.mrf.mxu1  ;;  %v3817_v0 = vpop.permute.xlu1 %3816  ;;  %v2792_v22 = vmax.f32 %v2126_v46, 1e-08 }
 0x51b   : > { %8389 = vst [vmem:[%s11979_s22 + $0xa8] sm:$0xff] %v7781_v19  ;;  %v5609_v20 = vadd.f32 %v12085_v47, %v5608_v58  ;;  %8826 = vmatmul.msk.bf16.gmra.mxu0 %vm1973_vm0, %v3817_v0 }
 0x51c   : > { %10564 = vrcp.f32 %v2792_v22 }
 0x51d   : > { %v6199_v61 = vmax.f32 %v5609_v20, 0.0 }
 0x51f   : > { %v6438_v2 = vpack.c.bf16 %v6199_v61, %v6198_v59 }
 0x521   : > { %6706 = vmatmul.bf16.gmra.mxu2 %v6438_v2 }
 0x522   : > { %v10565_v7 = vpop.eup %10564 }
 0x523   : > { %v3304_v19 = vmul.f32 %v10565_v7, %v11996_v50 }
 0x526   : > { %v4520_v1 = vpop.f32.mrf.mxu0 }
 0x527   : > { %v4521_v35 = vadd.f32 %v11754_v51, %v4520_v1 }
 0x529   : > { %v5103_v21 = vmul.f32 %v11830_v48, %v4521_v35 }
 0x52b   : > { %2140 = vadd.xlane.f32.xlu2 %v2139_v5 }
 0x52c   : > { %v9963_v11 = vpop.permute.xlu0 %9962 }
 0x52d   : > { %v9964_v36 = vunpack.i.l.bf16 %v9963_v11  ;;  %v9965_v8 = vunpack.i.h.bf16 %v9963_v11 }
 0x52e   : > { %v4522_v31 = vpop.f32.mrf.mxu0 }
 0x52f   : > { %v4523_v17 = vadd.f32 %v11754_v51, %v4522_v31  ;;  %v2142_v14 = vsel %vm1973_vm0, %v9964_v36, 0.0  ;;  %v2145_v40 = vsel %vm1973_vm0, %v9965_v8, 0.0 }
 0x530   : > { %2143 = vadd.xlane.f32.xlu0 %v2142_v14 }
 0x531   : > { %v5104_v37 = vmul.f32 %v11832_v6, %v4523_v17 }
 0x533   : > { %v5340_v32 = vpack.c.bf16 %v5104_v37, %v5103_v21 }
 0x535   : > { %5620 = vmatmul.bf16.gmra.mxu1 %v5340_v32 }
 0x536   : > { %v6692_v60 = vpop.f32.mrf.mxu2 }
 0x537   : > { %v6693_v48 = vadd.f32 %v12168_v28, %v6692_v60 }
 0x539   : > { %v7293_v49 = vmax.f32 %v6693_v48, 0.0 }
 0x53a   : > { %v2129_v26 = vpop.xlane.xlu2 %2128 }
 0x53b   : > { %v2793_v42 = vmax.f32 %v2129_v26, 1e-08  ;;  %2146 = vadd.xlane.f32.xlu1 %v2145_v40 }
 0x53d   : > { %10566 = vrcp.f32 %v2793_v42  ;;  %v9968_v42 = vpop.permute.xlu0 %9967 }
 0x53e   : > { %v6694_v6 = vpop.f32.mrf.mxu2 }
 0x53f   : > { %v6695_v41 = vadd.f32 %v12168_v28, %v6694_v6  ;;  %v9970_v6 = vunpack.i.h.bf16 %v9968_v42 }
 0x541   : > { %v7294_v39 = vmax.f32 %v6695_v41, 0.0 }
 0x543   : > { %v10567_v55 = vpop.eup %10566  ;;  %v7536_v57 = vpack.c.bf16 %v7294_v39, %v7293_v49  ;;  %9977 = vrot.lane.b32.xlu2 %v9976_v38, %s11344_s13 }
 0x544   : > { %v3305_v58 = vmul.f32 %v10567_v55, %v11999_v56  ;;  %v2151_v55 = vsel %vm1973_vm0, %v9970_v6, 0.0 }
 0x545   : > { %7792 = vmatmul.bf16.gmra.mxu3 %v7536_v57 }
 0x546   : > { %v6697_v0 = vpop.f32.mrf.mxu2  ;;  %v7783_v20 = vpop.f32.mrf.mxu3  ;;  %v3535_v59 = vpack.c.bf16 %v3305_v58, %v3304_v19  ;;  %v9969_v58 = vunpack.i.l.bf16 %v9968_v42 }
 0x547   : > { %v7784_v61 = vadd.f32 %v11975_v4, %v7783_v20  ;;  %v6698_v2 = vadd.f32 %v12168_v28, %v6697_v0 }
 0x548   : > { %3822 = vrot.lane.b32.xlu0 %v3535_v59, %s11344_s13 }
 0x549   : > { %8390 = vst [vmem:[%s11979_s22 + $0xb0] sm:$0xff] %v7784_v61  ;;  %v7295_v35 = vmax.f32 %v6698_v2, 0.0 }
 0x54e   : > { %v4525_v46 = vpop.f32.mrf.mxu0  ;;  %v6699_v1 = vpop.f32.mrf.mxu2 }
 0x54f   : > { %v6700_v62 = vadd.f32 %v12168_v28, %v6699_v1  ;;  %v7785_v5 = vpop.f32.mrf.mxu3  ;;  %v4526_v17 = vadd.f32 %v11754_v51, %v4525_v46  ;;  %v2148_v46 = vsel %vm1973_vm0, %v9969_v58, 0.0 }
 0x550   : > { %v7786_v11 = vadd.f32 %v11975_v4, %v7785_v5 }
 0x551   : > { %v7296_v36 = vmax.f32 %v6700_v62, 0.0  ;;  %v5105_v37 = vmul.f32 %v11873_v9, %v4526_v17 }
 0x552   : > { %8391 = vst [vmem:[%s11979_s22 + $0xb8] sm:$0xff] %v7786_v11 }
 0x553   : > { %v7537_v31 = vpack.c.bf16 %v7296_v36, %v7295_v35 }
 0x555   : > { %7797 = vmatmul.bf16.gmra.mxu3 %v7537_v31 }
 0x556   : > { %v4527_v14 = vpop.f32.mrf.mxu0 }
 0x557   : > { %v4528_v21 = vadd.f32 %v11754_v51, %v4527_v14 }
 0x559   : > { %v5106_v32 = vmul.f32 %v11875_v30, %v4528_v21 }
 0x55b   : > { %v5341_v60 = vpack.c.bf16 %v5106_v32, %v5105_v37 }
 0x55d   : > { %5625 = vmatmul.bf16.gmra.mxu1 %v5341_v60  ;;  %v2135_v8 = vpop.xlane.xlu2 %2134  ;;  %v2132_v22 = vpop.xlane.xlu1 %2131 }
 0x55e   : > { %v2795_v23 = vmax.f32 %v2135_v8, 1e-08  ;;  %v2794_v26 = vmax.f32 %v2132_v22, 1e-08  ;;  %v9602_v22 = vld [vmem:[%s11536_s17 + $0x100] sm:$0xff]  }
 0x55f   : > { %v12207_v6 = vunpack.c.l.bf16 %v9602_v22 }
 0x560   : > { %10568 = vrcp.f32 %v2795_v23 }
 0x561   : > { %10570 = vrcp.f32 %v2794_v26  ;;  %v5611_v40 = vpop.f32.mrf.mxu1 }
 0x562   : > { %v5612_v30 = vadd.f32 %v12085_v47, %v5611_v40 }
 0x564   : > { %v6200_v0 = vmax.f32 %v5612_v30, 0.0 }
 0x565   : > { %v3819_v48 = vpop.permute.xlu2 %3818 }
 0x566   : > { %v10569_v41 = vpop.eup %10568  ;;  %8827 = vmatmul.msk.bf16.gmra.mxu0 %vm1973_vm0, %v3819_v48 }
 0x567   : > { %v10571_v38 = vpop.eup %10570  ;;  %v6702_v7 = vpop.f32.mrf.mxu2  ;;  %v3307_v9 = vmul.f32 %v10569_v41, %v12044_v12  ;;  %v12209_v41 = vunpack.c.h.bf16 %v9602_v22 }
 0x568   : > { %v3306_v49 = vmul.f32 %v10571_v38, %v12042_v27  ;;  %v6703_v59 = vadd.f32 %v12168_v28, %v6702_v7 }
 0x569   : > { %v5613_v39 = vpop.f32.mrf.mxu1 }
 0x56a   : > { %v5614_v57 = vadd.f32 %v12085_v47, %v5613_v39  ;;  %v3536_v19 = vpack.c.bf16 %v3307_v9, %v3306_v49  ;;  %v7297_v5 = vmax.f32 %v6703_v59, 0.0  ;;  %v9981_v9 = vpack.i.bf16 %v12209_v41, %v12207_v6  ;;  %v9603_v39 = vld [vmem:[%s11536_s17 + $0x108] sm:$0xff]  }
 0x56b   : > { %v12221_v58 = vunpack.c.h.bf16 %v9603_v39 }
 0x56c   : > { %v6201_v20 = vmax.f32 %v5614_v57, 0.0  ;;  %3824 = vrot.lane.b32.xlu1 %v3536_v19, %s11344_s13  ;;  %2152 = vadd.xlane.f32.xlu2 %v2151_v55  ;;  %v12219_v19 = vunpack.c.l.bf16 %v9603_v39 }
 0x56e   : > { %v6439_v61 = vpack.c.bf16 %v6201_v20, %v6200_v0  ;;  %v2138_v20 = vpop.xlane.xlu0 %2137 }
 0x56f   : > { %v6704_v2 = vpop.f32.mrf.mxu2 }
 0x570   : > { %v6705_v1 = vadd.f32 %v12168_v28, %v6704_v2  ;;  %6711 = vmatmul.bf16.gmra.mxu2 %v6439_v61  ;;  %v2796_v61 = vmax.f32 %v2138_v20, 1e-08 }
 0x571   : > { %v5616_v62 = vpop.f32.mrf.mxu1 }
 0x572   : > { %v7298_v11 = vmax.f32 %v6705_v1, 0.0  ;;  %v7788_v35 = vpop.f32.mrf.mxu3  ;;  %2149 = vadd.xlane.f32.xlu0 %v2148_v46  ;;  %v5617_v14 = vadd.f32 %v12085_v47, %v5616_v62  ;;  %10572 = vrcp.f32 %v2796_v61 }
 0x573   : > { %v7789_v36 = vadd.f32 %v11975_v4, %v7788_v35 }
 0x574   : > { %v7538_v31 = vpack.c.bf16 %v7298_v11, %v7297_v5  ;;  %v6202_v23 = vmax.f32 %v5617_v14, 0.0 }
 0x575   : > { %8392 = vst [vmem:[%s11979_s22 + $0xc0] sm:$0xff] %v7789_v36 }
 0x576   : > { %v4530_v17 = vpop.f32.mrf.mxu0  ;;  %7802 = vmatmul.bf16.gmra.mxu3 %v7538_v31 }
 0x577   : > { %v4531_v40 = vadd.f32 %v11754_v51, %v4530_v17 }
 0x578   : > { %v10573_v31 = vpop.eup %10572 }
 0x579   : > { %v5618_v21 = vpop.f32.mrf.mxu1 }
 0x57a   : > { %v5619_v37 = vadd.f32 %v12085_v47, %v5618_v21  ;;  %v7790_v32 = vpop.f32.mrf.mxu3 }
 0x57b   : > { %v7791_v60 = vadd.f32 %v11975_v4, %v7790_v32  ;;  %v3821_v8 = vpop.permute.xlu1 %3820  ;;  %v5107_v4 = vmul.f32 %v11884_v44, %v4531_v40  ;;  %v9986_v44 = vpack.i.bf16 %v12221_v58, %v12219_v19 }
 0x57c   : > { %v6203_v26 = vmax.f32 %v5619_v37, 0.0  ;;  %8828 = vmatmul.msk.bf16.gmra.mxu0 %vm1973_vm0, %v3821_v8  ;;  %v3308_v37 = vmul.f32 %v10573_v31, %v12053_v29 }
 0x57d   : > { %8393 = vst [vmem:[%s11979_s22 + $0xc8] sm:$0xff] %v7791_v60 }
 0x57e   : > { %v4532_v42 = vpop.f32.mrf.mxu0  ;;  %v6440_v48 = vpack.c.bf16 %v6203_v26, %v6202_v23 }
 0x57f   : > { %v4533_v38 = vadd.f32 %v11754_v51, %v4532_v42 }
 0x580   : > { %6716 = vmatmul.bf16.gmra.mxu2 %v6440_v48 }
 0x581   : > { %v5108_v7 = vmul.f32 %v11886_v18, %v4533_v38 }
 0x583   : > { %v5342_v30 = vpack.c.bf16 %v5108_v7, %v5107_v4  ;;  %v9973_v49 = vpop.permute.xlu1 %9972 }
 0x584   : > { %v9975_v55 = vunpack.i.h.bf16 %v9973_v49  ;;  %v9974_v18 = vunpack.i.l.bf16 %v9973_v49 }
 0x585   : > { %5630 = vmatmul.bf16.gmra.mxu1 %v5342_v30 }
 0x586   : > { %9982 = vrot.lane.b32.xlu0 %v9981_v9, %s11344_s13  ;;  %v2157_v57 = vsel %vm1973_vm0, %v9975_v55, 0.0  ;;  %v2154_v0 = vsel %vm1973_vm0, %v9974_v18, 0.0 }
 0x587   : > { %2158 = vadd.xlane.f32.xlu2 %v2157_v57 }
 0x58e   : > { %9987 = vrot.lane.b32.xlu0 %v9986_v44, %s11344_s13  ;;  %v9604_v44 = vld [vmem:[%s11536_s17 + $0x110] sm:$0xff]  }
 0x58f   : > { %v12244_v61 = vunpack.c.l.bf16 %v9604_v44 }
 0x596   : > { %2155 = vadd.xlane.f32.xlu1 %v2154_v0 }
 0x598   : > { %v4535_v59 = vpop.f32.mrf.mxu0 }
 0x599   : > { %v4536_v46 = vadd.f32 %v11754_v51, %v4535_v59 }
 0x59b   : > { %v5109_v11 = vmul.f32 %v11916_v63, %v4536_v46 }
 0x59e   : > { %v2141_v2 = vpop.xlane.xlu2 %2140 }
 0x59f   : > { %v2797_v1 = vmax.f32 %v2141_v2, 1e-08  ;;  %v12246_v2 = vunpack.c.h.bf16 %v9604_v44 }
 0x5a0   : > { %v4537_v62 = vpop.f32.mrf.mxu0 }
 0x5a1   : > { %10574 = vrcp.f32 %v2797_v1  ;;  %v4538_v5 = vadd.f32 %v11754_v51, %v4537_v62 }
 0x5a3   : > { %v5110_v35 = vmul.f32 %v11918_v10, %v4538_v5  ;;  %v2144_v21 = vpop.xlane.xlu0 %2143  ;;  %v9991_v5 = vpack.i.bf16 %v12246_v2, %v12244_v61 }
 0x5a4   : > { %v6707_v36 = vpop.f32.mrf.mxu2  ;;  %v2798_v22 = vmax.f32 %v2144_v21, 1e-08 }
 0x5a5   : > { %v5343_v17 = vpack.c.bf16 %v5110_v35, %v5109_v11  ;;  %v6708_v8 = vadd.f32 %v12168_v28, %v6707_v36  ;;  %v12251_v35 = vld [vmem:[#allocation14] ss:$0 sm:$0xff] }
 0x5a6   : > { %v9978_v26 = vpop.permute.xlu2 %9977  ;;  %10576 = vrcp.f32 %v2798_v22 }
 0x5a7   : > { %v10575_v14 = vpop.eup %10574  ;;  %5635 = vmatmul.bf16.gmra.mxu1 %v5343_v17  ;;  %v7299_v40 = vmax.f32 %v6708_v8, 0.0  ;;  %v9979_v4 = vunpack.i.l.bf16 %v9978_v26  ;;  %v9980_v17 = vunpack.i.h.bf16 %v9978_v26 }
 0x5a8   : > { %v3309_v32 = vmul.f32 %v10575_v14, %v12055_v52 }
 0x5a9   : > { %v2160_v30 = vsel %vm1973_vm0, %v9979_v4, 0.0  ;;  %v2163_v21 = vsel %vm1973_vm0, %v9980_v17, 0.0 }
 0x5aa   : > { %v3537_v60 = vpack.c.bf16 %v3309_v32, %v3308_v37 }
 0x5ac   : > { %v6709_v23 = vpop.f32.mrf.mxu2  ;;  %3826 = vrot.lane.b32.xlu2 %v3537_v60, %s11344_s13  ;;  %v10577_v9 = vpop.eup %10576 }
 0x5ad   : > { %v6710_v63 = vadd.f32 %v12168_v28, %v6709_v23  ;;  %v3310_v39 = vmul.f32 %v10577_v9, %v12090_v24 }
 0x5ae   : > { %v2147_v10 = vpop.xlane.xlu1 %2146 }
 0x5af   : > { %v7300_v42 = vmax.f32 %v6710_v63, 0.0  ;;  %v2799_v48 = vmax.f32 %v2147_v10, 1e-08 }
 0x5b1   : > { %10578 = vrcp.f32 %v2799_v48  ;;  %v7539_v38 = vpack.c.bf16 %v7300_v42, %v7299_v40  ;;  %v9605_v42 = vld [vmem:[%s11536_s17 + $0x118] sm:$0xff]  }
 0x5b2   : > { %v5621_v7 = vpop.f32.mrf.mxu1  ;;  %v12266_v4 = vunpack.c.l.bf16 %v9605_v42 }
 0x5b3   : > { %7807 = vmatmul.bf16.gmra.mxu3 %v7539_v38  ;;  %v5622_v57 = vadd.f32 %v12085_v47, %v5621_v7  ;;  %v12268_v7 = vunpack.c.h.bf16 %v9605_v42 }
 0x5b5   : > { %v6204_v46 = vmax.f32 %v5622_v57, 0.0 }
 0x5b7   : > { %v10579_v49 = vpop.eup %10578 }
 0x5b8   : > { %v3311_v55 = vmul.f32 %v10579_v49, %v12092_v3  ;;  %2161 = vadd.xlane.f32.xlu0 %v2160_v30  ;;  %v9996_v30 = vpack.i.bf16 %v12268_v7, %v12266_v4 }
 0x5ba   : > { %v5623_v18 = vpop.f32.mrf.mxu1  ;;  %v3823_v0 = vpop.permute.xlu0 %3822  ;;  %v3538_v20 = vpack.c.bf16 %v3311_v55, %v3310_v39 }
 0x5bb   : > { %v5624_v59 = vadd.f32 %v12085_v47, %v5623_v18  ;;  %8829 = vmatmul.msk.bf16.gmra.mxu0 %vm1973_vm0, %v3823_v0 }
 0x5bc   : > { %3828 = vrot.lane.b32.xlu1 %v3538_v20, %s11344_s13 }
 0x5bd   : > { %v6205_v1 = vmax.f32 %v5624_v59, 0.0 }
 0x5bf   : > { %v6441_v62 = vpack.c.bf16 %v6205_v1, %v6204_v46 }
 0x5c1   : > { %6721 = vmatmul.bf16.gmra.mxu2 %v6441_v62 }
 0x5c4   : > { %9992 = vrot.lane.b32.xlu1 %v9991_v5, %s11344_s13 }
 0x5c8   : > { %v7793_v11 = vpop.f32.mrf.mxu3 }
 0x5c9   : > { %v7794_v36 = vadd.f32 %v12251_v35, %v7793_v11 }
 0x5cb   : > { %8394 = vst [vmem:[%s11979_s22 + $0xd0] sm:$0xff] %v7794_v36 }
 0x5d0   : > { %v7795_v31 = vpop.f32.mrf.mxu3 }
 0x5d1   : > { %v7796_v14 = vadd.f32 %v12251_v35, %v7795_v31 }
 0x5d3   : > { %8395 = vst [vmem:[%s11979_s22 + $0xd8] sm:$0xff] %v7796_v14 }
 0x5d5   : > { %2164 = vadd.xlane.f32.xlu2 %v2163_v21 }
 0x5d8   : > { %v7798_v37 = vpop.f32.mrf.mxu3 }
 0x5d9   : > { %v7799_v32 = vadd.f32 %v12251_v35, %v7798_v37 }
 0x5da   : > { %v5626_v60 = vpop.f32.mrf.mxu1 }
 0x5db   : > { %8396 = vst [vmem:[%s11979_s22 + $0xe0] sm:$0xff] %v7799_v32  ;;  %v5627_v23 = vadd.f32 %v12085_v47, %v5626_v60 }
 0x5dd   : > { %v6206_v48 = vmax.f32 %v5627_v23, 0.0 }
 0x5de   : > { %v3825_v8 = vpop.permute.xlu1 %3824 }
 0x5df   : > { %8830 = vmatmul.msk.bf16.gmra.mxu0 %vm1973_vm0, %v3825_v8  ;;  %v2153_v59 = vpop.xlane.xlu2 %2152 }
 0x5e0   : > { %v7800_v22 = vpop.f32.mrf.mxu3  ;;  %v2801_v14 = vmax.f32 %v2153_v59, 1e-08 }
 0x5e1   : > { %v7801_v63 = vadd.f32 %v12251_v35, %v7800_v22 }
 0x5e2   : > { %v5628_v10 = vpop.f32.mrf.mxu1  ;;  %10580 = vrcp.f32 %v2801_v14 }
 0x5e3   : > { %8397 = vst [vmem:[%s11979_s22 + $0xe8] sm:$0xff] %v7801_v63  ;;  %v5629_v26 = vadd.f32 %v12085_v47, %v5628_v10  ;;  %v4540_v40 = vpop.f32.mrf.mxu0 }
 0x5e4   : > { %v4541_v49 = vadd.f32 %v11754_v51, %v4540_v40 }
 0x5e5   : > { %v6207_v38 = vmax.f32 %v5629_v26, 0.0  ;;  %v2150_v18 = vpop.xlane.xlu0 %2149 }
 0x5e6   : > { %v5111_v57 = vmul.f32 %v11925_v33, %v4541_v49  ;;  %v2800_v32 = vmax.f32 %v2150_v18, 1e-08 }
 0x5e7   : > { %v6442_v9 = vpack.c.bf16 %v6207_v38, %v6206_v48 }
 0x5e8   : > { %10582 = vrcp.f32 %v2800_v32  ;;  %v10581_v49 = vpop.eup %10580 }
 0x5e9   : > { %6726 = vmatmul.bf16.gmra.mxu2 %v6442_v9 }
 0x5eb   : > { %v4542_v39 = vpop.f32.mrf.mxu0 }
 0x5ec   : > { %v4543_v55 = vadd.f32 %v11754_v51, %v4542_v39 }
 0x5ed   : > { %9997 = vrot.lane.b32.xlu2 %v9996_v30, %s11344_s13 }
 0x5ee   : > { %v5112_v44 = vmul.f32 %v11927_v34, %v4543_v55 }
 0x5f0   : > { %v5344_v0 = vpack.c.bf16 %v5112_v44, %v5111_v57  ;;  %v10583_v57 = vpop.eup %10582 }
 0x5f2   : > { %5640 = vmatmul.bf16.gmra.mxu1 %v5344_v0  ;;  %v3312_v0 = vmul.f32 %v10583_v57, %v12098_v25 }
 0x5f3   : > { %v6712_v20 = vpop.f32.mrf.mxu2 }
 0x5f4   : > { %v6713_v36 = vadd.f32 %v12168_v28, %v6712_v20  ;;  %v3313_v20 = vmul.f32 %v10581_v49, %v12100_v13 }
 0x5f6   : > { %v7301_v60 = vmax.f32 %v6713_v36, 0.0 }
 0x5f8   : > { %v9983_v46 = vpop.permute.xlu0 %9982 }
 0x5f9   : > { %v4545_v1 = vpop.f32.mrf.mxu0  ;;  %v7803_v62 = vpop.f32.mrf.mxu3  ;;  %v9984_v5 = vunpack.i.l.bf16 %v9983_v46  ;;  %v9985_v11 = vunpack.i.h.bf16 %v9983_v46 }
 0x5fa   : > { %v7804_v31 = vadd.f32 %v12251_v35, %v7803_v62  ;;  %v2159_v37 = vpop.xlane.xlu2 %2158  ;;  %v4546_v22 = vadd.f32 %v11754_v51, %v4545_v1 }
 0x5fb   : > { %v6714_v17 = vpop.f32.mrf.mxu2  ;;  %v2166_v33 = vsel %vm1973_vm0, %v9984_v5, 0.0  ;;  %v2169_v34 = vsel %vm1973_vm0, %v9985_v11, 0.0  ;;  %v2803_v9 = vmax.f32 %v2159_v37, 1e-08 }
 0x5fc   : > { %8398 = vst [vmem:[%s11979_s22 + $0xf0] sm:$0xff] %v7804_v31  ;;  %v6715_v21 = vadd.f32 %v12168_v28, %v6714_v17  ;;  %2167 = vadd.xlane.f32.xlu0 %v2166_v33  ;;  %2170 = vadd.xlane.f32.xlu1 %v2169_v34  ;;  %v5113_v38 = vmul.f32 %v11964_v15, %v4546_v22 }
 0x5fd   : > { %10584 = vrcp.f32 %v2803_v9  ;;  %v3539_v33 = vpack.c.bf16 %v3313_v20, %v3312_v0 }
 0x5fe   : > { %v7302_v8 = vmax.f32 %v6715_v21, 0.0 }
 0x600   : > { %v7540_v23 = vpack.c.bf16 %v7302_v8, %v7301_v60  ;;  %v9988_v34 = vpop.permute.xlu0 %9987 }
 0x601   : > { %v4547_v63 = vpop.f32.mrf.mxu0  ;;  %v7805_v10 = vpop.f32.mrf.mxu3  ;;  %v9990_v21 = vunpack.i.h.bf16 %v9988_v34 }
 0x602   : > { %v4548_v26 = vadd.f32 %v11754_v51, %v4547_v63  ;;  %v7806_v40 = vadd.f32 %v12251_v35, %v7805_v10  ;;  %v5631_v42 = vpop.f32.mrf.mxu1  ;;  %7812 = vmatmul.bf16.gmra.mxu3 %v7540_v23 }
 0x603   : > { %v6717_v48 = vpop.f32.mrf.mxu2  ;;  %v5632_v44 = vadd.f32 %v12085_v47, %v5631_v42  ;;  %v10585_v36 = vpop.eup %10584  ;;  %v2175_v22 = vsel %vm1973_vm0, %v9990_v21, 0.0 }
 0x604   : > { %v5114_v30 = vmul.f32 %v11966_v16, %v4548_v26  ;;  %8399 = vst [vmem:[%s11979_s22 + $0xf8] sm:$0xff] %v7806_v40  ;;  %v6718_v15 = vadd.f32 %v12168_v28, %v6717_v48  ;;  %v3315_v32 = vmul.f32 %v10585_v36, %v12143_v54  ;;  %v9606_v36 = vld [vmem:[%s11536_s17 + $0x120] sm:$0xff]  }
 0x605   : > { %v6208_v5 = vmax.f32 %v5632_v44, 0.0 }
 0x606   : > { %v3827_v39 = vpop.permute.xlu2 %3826  ;;  %v5345_v55 = vpack.c.bf16 %v5114_v30, %v5113_v38  ;;  %v7303_v31 = vmax.f32 %v6718_v15, 0.0  ;;  %v9989_v30 = vunpack.i.l.bf16 %v9988_v34  ;;  %v12316_v34 = vunpack.c.l.bf16 %v9606_v36 }
 0x607   : > { %8831 = vmatmul.msk.bf16.gmra.mxu0 %vm1973_vm0, %v3827_v39 }
 0x608   : > { %5645 = vmatmul.bf16.gmra.mxu1 %v5345_v55  ;;  %v2172_v44 = vsel %vm1973_vm0, %v9989_v30, 0.0 }
 0x609   : > { %v2156_v18 = vpop.xlane.xlu1 %2155 }
 0x60a   : > { %v5633_v59 = vpop.f32.mrf.mxu1  ;;  %v2802_v16 = vmax.f32 %v2156_v18, 1e-08 }
 0x60b   : > { %v5634_v46 = vadd.f32 %v12085_v47, %v5633_v59  ;;  %v6719_v1 = vpop.f32.mrf.mxu2 }
 0x60c   : > { %v6720_v62 = vadd.f32 %v12168_v28, %v6719_v1  ;;  %10586 = vrcp.f32 %v2802_v16 }
 0x60d   : > { %v6209_v11 = vmax.f32 %v5634_v46, 0.0 }
 0x60e   : > { %v7304_v17 = vmax.f32 %v6720_v62, 0.0 }
 0x60f   : > { %v6443_v14 = vpack.c.bf16 %v6209_v11, %v6208_v5 }
 0x610   : > { %3830 = vrot.lane.b32.xlu0 %v3539_v33, %s11344_s13  ;;  %v7541_v37 = vpack.c.bf16 %v7304_v17, %v7303_v31 }
 0x611   : > { %6731 = vmatmul.bf16.gmra.mxu2 %v6443_v14  ;;  %v12318_v14 = vunpack.c.h.bf16 %v9606_v36 }
 0x612   : > { %v10587_v60 = vpop.eup %10586  ;;  %7817 = vmatmul.bf16.gmra.mxu3 %v7541_v37 }
 0x613   : > { %v3314_v8 = vmul.f32 %v10587_v60, %v12141_v53 }
 0x615   : > { %v3540_v23 = vpack.c.bf16 %v3315_v32, %v3314_v8  ;;  %v10001_v32 = vpack.i.bf16 %v12318_v14, %v12316_v34 }
 0x616   : > { %2176 = vadd.xlane.f32.xlu2 %v2175_v22 }
 0x617   : > { %3832 = vrot.lane.b32.xlu1 %v3540_v23, %s11344_s13 }
 0x624   : > { %v5636_v63 = vpop.f32.mrf.mxu1 }
 0x625   : > { %v5637_v10 = vadd.f32 %v12085_v47, %v5636_v63 }
 0x627   : > { %v6210_v48 = vmax.f32 %v5637_v10, 0.0 }
 0x62b   : > { %v2162_v62 = vpop.xlane.xlu0 %2161 }
 0x62c   : > { %v5638_v26 = vpop.f32.mrf.mxu1  ;;  %v2804_v17 = vmax.f32 %v2162_v62, 1e-08 }
 0x62d   : > { %v5639_v40 = vadd.f32 %v12085_v47, %v5638_v26 }
 0x62e   : > { %v3829_v42 = vpop.permute.xlu1 %3828  ;;  %10588 = vrcp.f32 %v2804_v17 }
 0x62f   : > { %v6211_v38 = vmax.f32 %v5639_v40, 0.0  ;;  %8832 = vmatmul.msk.bf16.gmra.mxu0 %vm1973_vm0, %v3829_v42 }
 0x631   : > { %v6444_v9 = vpack.c.bf16 %v6211_v38, %v6210_v48 }
 0x633   : > { %6736 = vmatmul.bf16.gmra.mxu2 %v6444_v9 }
 0x634   : > { %v10589_v63 = vpop.eup %10588 }
 0x635   : > { %v3316_v38 = vmul.f32 %v10589_v63, %v12164_v43 }
 0x636   : > { %v7808_v49 = vpop.f32.mrf.mxu3  ;;  %v9993_v39 = vpop.permute.xlu1 %9992 }
 0x637   : > { %v7809_v55 = vadd.f32 %v12251_v35, %v7808_v49  ;;  %v9995_v57 = vunpack.i.h.bf16 %v9993_v39  ;;  %v9994_v0 = vunpack.i.l.bf16 %v9993_v39 }
 0x638   : > { %v4550_v18 = vpop.f32.mrf.mxu0 }
 0x639   : > { %8400 = vst [vmem:[%s11979_s22 + $0x100] sm:$0xff] %v7809_v55  ;;  %v2181_v47 = vsel %vm1973_vm0, %v9995_v57, 0.0  ;;  %v2178_v15 = vsel %vm1973_vm0, %v9994_v0, 0.0  ;;  %v4551_v59 = vadd.f32 %v11754_v51, %v4550_v18 }
 0x63a   : > { %2182 = vadd.xlane.f32.xlu2 %v2181_v47  ;;  %2173 = vadd.xlane.f32.xlu0 %v2172_v44 }
 0x63b   : > { %v5115_v5 = vmul.f32 %v11996_v50, %v4551_v59  ;;  %v9607_v50 = vld [vmem:[%s11536_s17 + $0x128] sm:$0xff]  }
 0x63c   : > { %v12326_v22 = vunpack.c.l.bf16 %v9607_v50  ;;  %v12328_v23 = vunpack.c.h.bf16 %v9607_v50 }
 0x63e   : > { %v7810_v20 = vpop.f32.mrf.mxu3  ;;  %v10006_v48 = vpack.i.bf16 %v12328_v23, %v12326_v22 }
 0x63f   : > { %v7811_v16 = vadd.f32 %v12251_v35, %v7810_v20 }
 0x640   : > { %v4552_v46 = vpop.f32.mrf.mxu0 }
 0x641   : > { %8401 = vst [vmem:[%s11979_s22 + $0x108] sm:$0xff] %v7811_v16  ;;  %v4553_v1 = vadd.f32 %v11754_v51, %v4552_v46  ;;  %2179 = vadd.xlane.f32.xlu1 %v2178_v15 }
 0x643   : > { %v5116_v11 = vmul.f32 %v11999_v56, %v4553_v1 }
 0x644   : > { %v6722_v31 = vpop.f32.mrf.mxu2 }
 0x645   : > { %v5346_v33 = vpack.c.bf16 %v5116_v11, %v5115_v5  ;;  %v6723_v60 = vadd.f32 %v12168_v28, %v6722_v31  ;;  %v12342_v11 = vld [vmem:[#allocation8] ss:$0 sm:$0xff] }
 0x647   : > { %5650 = vmatmul.bf16.gmra.mxu1 %v5346_v33  ;;  %v7305_v10 = vmax.f32 %v6723_v60, 0.0 }
 0x648   : > { %v2165_v21 = vpop.xlane.xlu2 %2164 }
 0x649   : > { %v2805_v37 = vmax.f32 %v2165_v21, 1e-08 }
 0x64b   : > { %10590 = vrcp.f32 %v2805_v37 }
 0x64c   : > { %v6724_v56 = vpop.f32.mrf.mxu2 }
 0x64d   : > { %v6725_v8 = vadd.f32 %v12168_v28, %v6724_v56 }
 0x64e   : > { %10002 = vrot.lane.b32.xlu0 %v10001_v32, %s11344_s13 }
 0x64f   : > { %v7306_v26 = vmax.f32 %v6725_v8, 0.0 }
 0x651   : > { %v10591_v40 = vpop.eup %10590  ;;  %v7542_v42 = vpack.c.bf16 %v7306_v26, %v7305_v10 }
 0x652   : > { %v3317_v9 = vmul.f32 %v10591_v40, %v12166_v45 }
 0x653   : > { %7822 = vmatmul.bf16.gmra.mxu3 %v7542_v42 }
 0x654   : > { %v3541_v30 = vpack.c.bf16 %v3317_v9, %v3316_v38 }
 0x656   : > { %10007 = vrot.lane.b32.xlu0 %v10006_v48, %s11344_s13  ;;  %3834 = vrot.lane.b32.xlu2 %v3541_v30, %s11344_s13 }
 0x65c   : > { %v4555_v49 = vpop.f32.mrf.mxu0 }
 0x65d   : > { %v4556_v39 = vadd.f32 %v11754_v51, %v4555_v49 }
 0x65f   : > { %v5117_v44 = vmul.f32 %v12042_v27, %v4556_v39 }
 0x664   : > { %v4557_v55 = vpop.f32.mrf.mxu0 }
 0x665   : > { %v4558_v57 = vadd.f32 %v11754_v51, %v4557_v55  ;;  %v9608_v55 = vld [vmem:[%s11536_s17 + $0x130] sm:$0xff]  }
 0x667   : > { %v5118_v18 = vmul.f32 %v12044_v12, %v4558_v57  ;;  %v9998_v12 = vpop.permute.xlu2 %9997 }
 0x668   : > { %v10000_v37 = vunpack.i.h.bf16 %v9998_v12  ;;  %v9999_v50 = vunpack.i.l.bf16 %v9998_v12 }
 0x669   : > { %v5347_v47 = vpack.c.bf16 %v5118_v18, %v5117_v44 }
 0x66a   : > { %v2187_v42 = vsel %vm1973_vm0, %v10000_v37, 0.0  ;;  %v2184_v48 = vsel %vm1973_vm0, %v9999_v50, 0.0 }
 0x66b   : > { %5655 = vmatmul.bf16.gmra.mxu1 %v5347_v47  ;;  %v12357_v47 = vunpack.c.l.bf16 %v9608_v55 }
 0x66c   : > { %v6727_v0 = vpop.f32.mrf.mxu2 }
 0x66d   : > { %v6728_v1 = vadd.f32 %v12168_v28, %v6727_v0  ;;  %v12359_v0 = vunpack.c.h.bf16 %v9608_v55 }
 0x66f   : > { %v2168_v20 = vpop.xlane.xlu0 %2167  ;;  %v5641_v15 = vpop.f32.mrf.mxu1  ;;  %v7307_v36 = vmax.f32 %v6728_v1, 0.0 }
 0x670   : > { %v2806_v59 = vmax.f32 %v2168_v20, 1e-08  ;;  %v2171_v16 = vpop.xlane.xlu1 %2170  ;;  %v5642_v27 = vadd.f32 %v12342_v11, %v5641_v15 }
 0x671   : > { %v2807_v46 = vmax.f32 %v2171_v16, 1e-08 }
 0x672   : > { %10592 = vrcp.f32 %v2806_v59  ;;  %v6212_v8 = vmax.f32 %v5642_v27, 0.0 }
 0x673   : > { %10594 = vrcp.f32 %v2807_v46 }
 0x674   : > { %v6729_v62 = vpop.f32.mrf.mxu2 }
 0x675   : > { %v6730_v5 = vadd.f32 %v12168_v28, %v6729_v62 }
 0x677   : > { %v7308_v31 = vmax.f32 %v6730_v5, 0.0  ;;  %v5643_v17 = vpop.f32.mrf.mxu1 }
 0x678   : > { %v10593_v33 = vpop.eup %10592  ;;  %v5644_v21 = vadd.f32 %v12342_v11, %v5643_v17  ;;  %v9609_v17 = vld [vmem:[%s11536_s17 + $0x138] sm:$0xff]  }
 0x679   : > { %v10595_v32 = vpop.eup %10594  ;;  %v7543_v60 = vpack.c.bf16 %v7308_v31, %v7307_v36  ;;  %v3318_v56 = vmul.f32 %v10593_v33, %v12207_v6  ;;  %v10011_v36 = vpack.i.bf16 %v12359_v0, %v12357_v47 }
 0x67a   : > { %v6213_v63 = vmax.f32 %v5644_v21, 0.0  ;;  %v3319_v10 = vmul.f32 %v10595_v32, %v12209_v41 }
 0x67b   : > { %7827 = vmatmul.bf16.gmra.mxu3 %v7543_v60 }
 0x67c   : > { %v3542_v26 = vpack.c.bf16 %v3319_v10, %v3318_v56  ;;  %v6445_v40 = vpack.c.bf16 %v6213_v63, %v6212_v8 }
 0x67e   : > { %3836 = vrot.lane.b32.xlu1 %v3542_v26, %s11344_s13  ;;  %6741 = vmatmul.bf16.gmra.mxu2 %v6445_v40 }
 0x67f   : > { %2188 = vadd.xlane.f32.xlu2 %v2187_v42 }
 0x680   : > { %2185 = vadd.xlane.f32.xlu0 %v2184_v48 }
 0x682   : > { %v3831_v38 = vpop.permute.xlu0 %3830 }
 0x683   : > { %8833 = vmatmul.msk.bf16.gmra.mxu0 %vm1973_vm0, %v3831_v38 }
 0x684   : > { %v4560_v9 = vpop.f32.mrf.mxu0 }
 0x685   : > { %v5646_v30 = vpop.f32.mrf.mxu1  ;;  %v7813_v49 = vpop.f32.mrf.mxu3  ;;  %v4561_v57 = vadd.f32 %v11754_v51, %v4560_v9 }
 0x686   : > { %v7814_v39 = vadd.f32 %v12251_v35, %v7813_v49  ;;  %v5647_v44 = vadd.f32 %v12342_v11, %v5646_v30 }
 0x687   : > { %v5119_v1 = vmul.f32 %v12053_v29, %v4561_v57  ;;  %v12372_v29 = vunpack.c.l.bf16 %v9609_v17 }
 0x688   : > { %8402 = vst [vmem:[%s11979_s22 + $0x110] sm:$0xff] %v7814_v39  ;;  %v6214_v5 = vmax.f32 %v5647_v44, 0.0 }
 0x689   : > { %v3833_v12 = vpop.permute.xlu1 %3832  ;;  %v2177_v48 = vpop.xlane.xlu2 %2176 }
 0x68c   : > { %v4562_v18 = vpop.f32.mrf.mxu0 }
 0x68d   : > { %v4563_v20 = vadd.f32 %v11754_v51, %v4562_v18  ;;  %v5648_v15 = vpop.f32.mrf.mxu1  ;;  %v7815_v59 = vpop.f32.mrf.mxu3 }
 0x68e   : > { %v5649_v16 = vadd.f32 %v12342_v11, %v5648_v15  ;;  %v7816_v46 = vadd.f32 %v12251_v35, %v7815_v59 }
 0x68f   : > { %v5120_v62 = vmul.f32 %v12055_v52, %v4563_v20  ;;  %v12374_v52 = vunpack.c.h.bf16 %v9609_v17 }
 0x690   : > { %v6215_v27 = vmax.f32 %v5649_v16, 0.0  ;;  %8403 = vst [vmem:[%s11979_s22 + $0x118] sm:$0xff] %v7816_v46 }
 0x691   : > { %v5348_v31 = vpack.c.bf16 %v5120_v62, %v5119_v1  ;;  %v10016_v60 = vpack.i.bf16 %v12374_v52, %v12372_v29 }
 0x692   : > { %v6446_v33 = vpack.c.bf16 %v6215_v27, %v6214_v5 }
 0x693   : > { %8834 = vmatmul.msk.bf16.gmra.mxu0 %vm1973_vm0, %v3833_v12  ;;  %5660 = vmatmul.bf16.gmra.mxu1 %v5348_v31 }
 0x694   : > { %6746 = vmatmul.bf16.gmra.mxu2 %v6446_v33  ;;  %v6732_v21 = vpop.f32.mrf.mxu2  ;;  %10012 = vrot.lane.b32.xlu0 %v10011_v36, %s11344_s13  ;;  %v2809_v33 = vmax.f32 %v2177_v48, 1e-08 }
 0x695   : > { %v7818_v37 = vpop.f32.mrf.mxu3  ;;  %v6733_v50 = vadd.f32 %v12168_v28, %v6732_v21 }
 0x696   : > { %v7819_v32 = vadd.f32 %v12251_v35, %v7818_v37  ;;  %10596 = vrcp.f32 %v2809_v33 }
 0x697   : > { %v7309_v26 = vmax.f32 %v6733_v50, 0.0 }
 0x698   : > { %8404 = vst [vmem:[%s11979_s22 + $0x120] sm:$0xff] %v7819_v32 }
 0x69c   : > { %v6734_v56 = vpop.f32.mrf.mxu2  ;;  %10017 = vrot.lane.b32.xlu0 %v10016_v60, %s11344_s13 }
 0x69d   : > { %v6735_v8 = vadd.f32 %v12168_v28, %v6734_v56  ;;  %v7820_v63 = vpop.f32.mrf.mxu3 }
 0x69e   : > { %v7821_v10 = vadd.f32 %v12251_v35, %v7820_v63 }
 0x69f   : > { %v7310_v40 = vmax.f32 %v6735_v8, 0.0 }
 0x6a0   : > { %8405 = vst [vmem:[%s11979_s22 + $0x128] sm:$0xff] %v7821_v10 }
 0x6a1   : > { %v7544_v42 = vpack.c.bf16 %v7310_v40, %v7309_v26  ;;  %v10597_v40 = vpop.eup %10596 }
 0x6a3   : > { %7832 = vmatmul.bf16.gmra.mxu3 %v7544_v42 }
 0x6ac   : > { %v4565_v38 = vpop.f32.mrf.mxu0 }
 0x6ad   : > { %v2183_v9 = vpop.xlane.xlu2 %2182  ;;  %v4566_v30 = vadd.f32 %v11754_v51, %v4565_v38  ;;  %v2174_v20 = vpop.xlane.xlu0 %2173 }
 0x6ae   : > { %v2811_v21 = vmax.f32 %v2183_v9, 1e-08 }
 0x6af   : > { %v5121_v44 = vmul.f32 %v12090_v24, %v4566_v30 }
 0x6b0   : > { %10598 = vrcp.f32 %v2811_v21 }
 0x6b4   : > { %v4567_v49 = vpop.f32.mrf.mxu0 }
 0x6b5   : > { %v4568_v39 = vadd.f32 %v11754_v51, %v4567_v49  ;;  %v3835_v55 = vpop.permute.xlu2 %3834 }
 0x6b6   : > { %8835 = vmatmul.msk.bf16.gmra.mxu0 %vm1973_vm0, %v3835_v55  ;;  %v6737_v57 = vpop.f32.mrf.mxu2  ;;  %v10599_v42 = vpop.eup %10598 }
 0x6b7   : > { %v5122_v18 = vmul.f32 %v12092_v3, %v4568_v39  ;;  %v6738_v59 = vadd.f32 %v12168_v28, %v6737_v57  ;;  %v2180_v3 = vpop.xlane.xlu1 %2179  ;;  %v3323_v49 = vmul.f32 %v10599_v42, %v12246_v2  ;;  %v3321_v57 = vmul.f32 %v10597_v40, %v12221_v58 }
 0x6b8   : > { %v2810_v32 = vmax.f32 %v2180_v3, 1e-08 }
 0x6b9   : > { %v5349_v15 = vpack.c.bf16 %v5122_v18, %v5121_v44  ;;  %v7311_v62 = vmax.f32 %v6738_v59, 0.0 }
 0x6ba   : > { %10600 = vrcp.f32 %v2810_v32 }
 0x6bb   : > { %5665 = vmatmul.bf16.gmra.mxu1 %v5349_v15  ;;  %v9610_v15 = vld [vmem:[%s11536_s17 + $0x140] sm:$0xff]  }
 0x6bc   : > { %v12406_v59 = vunpack.c.l.bf16 %v9610_v15 }
 0x6be   : > { %v6739_v16 = vpop.f32.mrf.mxu2 }
 0x6bf   : > { %v6740_v46 = vadd.f32 %v12168_v28, %v6739_v16  ;;  %v2808_v28 = vmax.f32 %v2174_v20, 1e-08  ;;  %v12408_v16 = vunpack.c.h.bf16 %v9610_v15 }
 0x6c0   : > { %v10003_v1 = vpop.permute.xlu0 %10002  ;;  %v10601_v38 = vpop.eup %10600 }
 0x6c1   : > { %v7312_v5 = vmax.f32 %v6740_v46, 0.0  ;;  %v10005_v27 = vunpack.i.h.bf16 %v10003_v1  ;;  %v10004_v12 = vunpack.i.l.bf16 %v10003_v1  ;;  %10602 = vrcp.f32 %v2808_v28 }
 0x6c2   : > { %v3322_v30 = vmul.f32 %v10601_v38, %v12244_v61 }
 0x6c3   : > { %v2193_v36 = vsel %vm1973_vm0, %v10005_v27, 0.0  ;;  %v2190_v31 = vsel %vm1973_vm0, %v10004_v12, 0.0  ;;  %v7545_v24 = vpack.c.bf16 %v7312_v5, %v7311_v62  ;;  %v10021_v62 = vpack.i.bf16 %v12408_v16, %v12406_v59 }
 0x6c4   : > { %v5651_v17 = vpop.f32.mrf.mxu1  ;;  %2194 = vadd.xlane.f32.xlu2 %v2193_v36  ;;  %2191 = vadd.xlane.f32.xlu1 %v2190_v31  ;;  %v3544_v18 = vpack.c.bf16 %v3323_v49, %v3322_v30 }
 0x6c5   : > { %7837 = vmatmul.bf16.gmra.mxu3 %v7545_v24  ;;  %v5652_v50 = vadd.f32 %v12342_v11, %v5651_v17 }
 0x6c7   : > { %v6216_v10 = vmax.f32 %v5652_v50, 0.0  ;;  %v10603_v9 = vpop.eup %10602 }
 0x6c8   : > { %v10008_v37 = vpop.permute.xlu0 %10007  ;;  %v3320_v55 = vmul.f32 %v10603_v9, %v12219_v19 }
 0x6c9   : > { %v10009_v60 = vunpack.i.l.bf16 %v10008_v37  ;;  %v10010_v28 = vunpack.i.h.bf16 %v10008_v37 }
 0x6ca   : > { %v3543_v20 = vpack.c.bf16 %v3321_v57, %v3320_v55 }
 0x6cb   : > { %v2196_v56 = vsel %vm1973_vm0, %v10009_v60, 0.0 }
 0x6cc   : > { %v5653_v8 = vpop.f32.mrf.mxu1  ;;  %2197 = vadd.xlane.f32.xlu0 %v2196_v56  ;;  %v2199_v56 = vsel %vm1973_vm0, %v10010_v28, 0.0 }
 0x6cd   : > { %v5654_v63 = vadd.f32 %v12342_v11, %v5653_v8 }
 0x6cf   : > { %v6217_v26 = vmax.f32 %v5654_v63, 0.0 }
 0x6d1   : > { %v6447_v48 = vpack.c.bf16 %v6217_v26, %v6216_v10 }
 0x6d3   : > { %6751 = vmatmul.bf16.gmra.mxu2 %v6447_v48  ;;  %v12423_v48 = vld [vmem:[#allocation11] ss:$0 sm:$0xff] }
 0x6d6   : > { %v7823_v39 = vpop.f32.mrf.mxu3 }
 0x6d7   : > { %v7824_v44 = vadd.f32 %v12251_v35, %v7823_v39 }
 0x6d9   : > { %8406 = vst [vmem:[%s11979_s22 + $0x130] sm:$0xff] %v7824_v44 }
 0x6dc   : > { %3838 = vrot.lane.b32.xlu2 %v3543_v20, %s11344_s13 }
 0x6dd   : > { %3840 = vrot.lane.b32.xlu1 %v3544_v18, %s11344_s13 }
 0x6de   : > { %v7825_v46 = vpop.f32.mrf.mxu3 }
 0x6df   : > { %v7826_v1 = vadd.f32 %v12251_v35, %v7825_v46 }
 0x6e1   : > { %8407 = vst [vmem:[%s11979_s22 + $0x138] sm:$0xff] %v7826_v1 }
 0x6e5   : > { %10022 = vrot.lane.b32.xlu1 %v10021_v62, %s11344_s13 }
 0x6e8   : > { %v5656_v5 = vpop.f32.mrf.mxu1 }
 0x6e9   : > { %v5657_v27 = vadd.f32 %v12342_v11, %v5656_v5 }
 0x6eb   : > { %v6218_v24 = vmax.f32 %v5657_v27, 0.0 }
 0x6f0   : > { %v5658_v12 = vpop.f32.mrf.mxu1  ;;  %v3837_v36 = vpop.permute.xlu1 %3836 }
 0x6f1   : > { %v5659_v31 = vadd.f32 %v12342_v11, %v5658_v12  ;;  %8836 = vmatmul.msk.bf16.gmra.mxu0 %vm1973_vm0, %v3837_v36  ;;  %v9611_v36 = vld [vmem:[%s11536_s17 + $0x148] sm:$0xff]  }
 0x6f2   : > { %v2189_v10 = vpop.xlane.xlu2 %2188 }
 0x6f3   : > { %v6219_v17 = vmax.f32 %v5659_v31, 0.0  ;;  %v2186_v33 = vpop.xlane.xlu0 %2185  ;;  %v2813_v55 = vmax.f32 %v2189_v10, 1e-08 }
 0x6f4   : > { %v2812_v44 = vmax.f32 %v2186_v33, 1e-08 }
 0x6f5   : > { %v6448_v3 = vpack.c.bf16 %v6219_v17, %v6218_v24  ;;  %10604 = vrcp.f32 %v2813_v55  ;;  %v12435_v17 = vunpack.c.l.bf16 %v9611_v36 }
 0x6f6   : > { %10606 = vrcp.f32 %v2812_v44 }
 0x6f7   : > { %6756 = vmatmul.bf16.gmra.mxu2 %v6448_v3 }
 0x6fb   : > { %v10605_v31 = vpop.eup %10604 }
 0x6fc   : > { %v10607_v24 = vpop.eup %10606 }
 0x6fe   : > { %v7828_v21 = vpop.f32.mrf.mxu3 }
 0x6ff   : > { %v7829_v32 = vadd.f32 %v12251_v35, %v7828_v21  ;;  %v3324_v21 = vmul.f32 %v10607_v24, %v12266_v4 }
 0x700   : > { %v4570_v60 = vpop.f32.mrf.mxu0 }
 0x701   : > { %8408 = vst [vmem:[%s11979_s22 + $0x140] sm:$0xff] %v7829_v32  ;;  %v6742_v50 = vpop.f32.mrf.mxu2  ;;  %v4571_v26 = vadd.f32 %v11754_v51, %v4570_v60  ;;  %v3325_v32 = vmul.f32 %v10605_v31, %v12268_v7 }
 0x702   : > { %v6743_v38 = vadd.f32 %v12423_v48, %v6742_v50 }
 0x703   : > { %v5123_v18 = vmul.f32 %v12098_v25, %v4571_v26 }
 0x704   : > { %v7313_v15 = vmax.f32 %v6743_v38, 0.0 }
 0x705   : > { %2200 = vadd.xlane.f32.xlu2 %v2199_v56 }
 0x706   : > { %v7830_v8 = vpop.f32.mrf.mxu3  ;;  %v10013_v63 = vpop.permute.xlu0 %10012 }
 0x707   : > { %v7831_v40 = vadd.f32 %v12251_v35, %v7830_v8  ;;  %v10014_v42 = vunpack.i.l.bf16 %v10013_v63  ;;  %v10015_v9 = vunpack.i.h.bf16 %v10013_v63 }
 0x708   : > { %v4572_v37 = vpop.f32.mrf.mxu0 }
 0x709   : > { %8409 = vst [vmem:[%s11979_s22 + $0x148] sm:$0xff] %v7831_v40  ;;  %v4573_v30 = vadd.f32 %v11754_v51, %v4572_v37  ;;  %v6744_v49 = vpop.f32.mrf.mxu2  ;;  %v2202_v39 = vsel %vm1973_vm0, %v10014_v42, 0.0  ;;  %v2205_v1 = vsel %vm1973_vm0, %v10015_v9, 0.0  ;;  %v3545_v42 = vpack.c.bf16 %v3325_v32, %v3324_v21 }
 0x70a   : > { %v6745_v57 = vadd.f32 %v12423_v48, %v6744_v49  ;;  %2203 = vadd.xlane.f32.xlu0 %v2202_v39 }
 0x70b   : > { %v5124_v20 = vmul.f32 %v12100_v13, %v4573_v30  ;;  %v12437_v13 = vunpack.c.h.bf16 %v9611_v36 }
 0x70c   : > { %v7314_v46 = vmax.f32 %v6745_v57, 0.0 }
 0x70d   : > { %v5350_v62 = vpack.c.bf16 %v5124_v20, %v5123_v18  ;;  %v10026_v63 = vpack.i.bf16 %v12437_v13, %v12435_v17 }
 0x70e   : > { %v7546_v5 = vpack.c.bf16 %v7314_v46, %v7313_v15 }
 0x70f   : > { %5670 = vmatmul.bf16.gmra.mxu1 %v5350_v62  ;;  %2206 = vadd.xlane.f32.xlu1 %v2205_v1 }
 0x710   : > { %v4575_v27 = vpop.f32.mrf.mxu0  ;;  %v5661_v12 = vpop.f32.mrf.mxu1  ;;  %7842 = vmatmul.bf16.gmra.mxu3 %v7546_v5 }
 0x711   : > { %v4576_v25 = vadd.f32 %v11754_v51, %v4575_v27  ;;  %v5662_v3 = vadd.f32 %v12342_v11, %v5661_v12 }
 0x713   : > { %v5125_v50 = vmul.f32 %v12141_v53, %v4576_v25  ;;  %v6220_v10 = vmax.f32 %v5662_v3, 0.0  ;;  %v10018_v25 = vpop.permute.xlu0 %10017 }
 0x717   : > { %v6747_v33 = vpop.f32.mrf.mxu2 }
 0x718   : > { %v4577_v28 = vpop.f32.mrf.mxu0  ;;  %v5663_v60 = vpop.f32.mrf.mxu1  ;;  %v6748_v53 = vadd.f32 %v12423_v48, %v6747_v33  ;;  %v10020_v33 = vunpack.i.h.bf16 %v10018_v25 }
 0x719   : > { %v4578_v56 = vadd.f32 %v11754_v51, %v4577_v28  ;;  %v5664_v8 = vadd.f32 %v12342_v11, %v5663_v60 }
 0x71a   : > { %v7315_v49 = vmax.f32 %v6748_v53, 0.0 }
 0x71b   : > { %v5126_v26 = vmul.f32 %v12143_v54, %v4578_v56  ;;  %v6221_v40 = vmax.f32 %v5664_v8, 0.0  ;;  %v10019_v56 = vunpack.i.l.bf16 %v10018_v25 }
 0x71d   : > { %v5351_v38 = vpack.c.bf16 %v5126_v26, %v5125_v50  ;;  %v6449_v37 = vpack.c.bf16 %v6221_v40, %v6220_v10  ;;  %10027 = vrot.lane.b32.xlu2 %v10026_v63, %s11344_s13  ;;  %v2211_v26 = vsel %vm1973_vm0, %v10020_v33, 0.0 }
 0x71e   : > { %3842 = vrot.lane.b32.xlu0 %v3545_v42, %s11344_s13 }
 0x71f   : > { %v6749_v9 = vpop.f32.mrf.mxu2  ;;  %5675 = vmatmul.bf16.gmra.mxu1 %v5351_v38  ;;  %6761 = vmatmul.bf16.gmra.mxu2 %v6449_v37  ;;  %v2208_v38 = vsel %vm1973_vm0, %v10019_v56, 0.0 }
 0x720   : > { %v6750_v30 = vadd.f32 %v12423_v48, %v6749_v9 }
 0x722   : > { %v7316_v39 = vmax.f32 %v6750_v30, 0.0 }
 0x724   : > { %v7547_v54 = vpack.c.bf16 %v7316_v39, %v7315_v49  ;;  %v9612_v39 = vld [vmem:[%s11536_s17 + $0x150] sm:$0xff]  }
 0x726   : > { %7847 = vmatmul.bf16.gmra.mxu3 %v7547_v54  ;;  %v7833_v55 = vpop.f32.mrf.mxu3  ;;  %v12474_v54 = vunpack.c.l.bf16 %v9612_v39 }
 0x727   : > { %v7834_v57 = vadd.f32 %v12251_v35, %v7833_v55  ;;  %v12476_v55 = vunpack.c.h.bf16 %v9612_v39 }
 0x729   : > { %8410 = vst [vmem:[%s11979_s22 + $0x150] sm:$0xff] %v7834_v57 }
 0x72e   : > { %v7835_v44 = vpop.f32.mrf.mxu3 }
 0x72f   : > { %v7836_v18 = vadd.f32 %v12251_v35, %v7835_v44 }
 0x731   : > { %8411 = vst [vmem:[%s11979_s22 + $0x158] sm:$0xff] %v7836_v18  ;;  %v10031_v18 = vpack.i.bf16 %v12476_v55, %v12474_v54 }
 0x733   : > { %v4580_v20 = vpop.f32.mrf.mxu0 }
 0x734   : > { %v4581_v27 = vadd.f32 %v11754_v51, %v4580_v20 }
 0x736   : > { %v5127_v31 = vmul.f32 %v12164_v43, %v4581_v27 }
 0x737   : > { %v2195_v15 = vpop.xlane.xlu2 %2194  ;;  %v2192_v46 = vpop.xlane.xlu1 %2191 }
 0x738   : > { %v5666_v1 = vpop.f32.mrf.mxu1  ;;  %v2815_v62 = vmax.f32 %v2195_v15, 1e-08  ;;  %v2814_v5 = vmax.f32 %v2192_v46, 1e-08  ;;  %v9613_v15 = vld [vmem:[%s11536_s17 + $0x158] sm:$0xff]  }
 0x739   : > { %v5667_v3 = vadd.f32 %v12342_v11, %v5666_v1  ;;  %v12483_v1 = vunpack.c.l.bf16 %v9613_v15 }
 0x73a   : > { %10608 = vrcp.f32 %v2815_v62 }
 0x73b   : > { %10610 = vrcp.f32 %v2814_v5  ;;  %v4582_v12 = vpop.f32.mrf.mxu0 }
 0x73c   : > { %v4583_v36 = vadd.f32 %v11754_v51, %v4582_v12 }
 0x73e   : > { %v5128_v24 = vmul.f32 %v12166_v45, %v4583_v36  ;;  %v6222_v45 = vmax.f32 %v5667_v3, 0.0 }
 0x73f   : > { %v3839_v21 = vpop.permute.xlu2 %3838 }
 0x740   : > { %v10609_v32 = vpop.eup %10608  ;;  %v5668_v28 = vpop.f32.mrf.mxu1  ;;  %8837 = vmatmul.msk.bf16.gmra.mxu0 %vm1973_vm0, %v3839_v21  ;;  %v5352_v60 = vpack.c.bf16 %v5128_v24, %v5127_v31 }
 0x741   : > { %v10611_v50 = vpop.eup %10610  ;;  %v5669_v8 = vadd.f32 %v12342_v11, %v5668_v28  ;;  %v3327_v63 = vmul.f32 %v10609_v32, %v12318_v14  ;;  %v2198_v21 = vpop.xlane.xlu0 %2197 }
 0x742   : > { %5680 = vmatmul.bf16.gmra.mxu1 %v5352_v60  ;;  %v3326_v43 = vmul.f32 %v10611_v50, %v12316_v34  ;;  %v2816_v32 = vmax.f32 %v2198_v21, 1e-08 }
 0x743   : > { %v6223_v10 = vmax.f32 %v5669_v8, 0.0 }
 0x744   : > { %v3546_v40 = vpack.c.bf16 %v3327_v63, %v3326_v43  ;;  %10612 = vrcp.f32 %v2816_v32 }
 0x745   : > { %v6450_v42 = vpack.c.bf16 %v6223_v10, %v6222_v45 }
 0x746   : > { %3844 = vrot.lane.b32.xlu1 %v3546_v40, %s11344_s13  ;;  %2212 = vadd.xlane.f32.xlu2 %v2211_v26 }
 0x747   : > { %6766 = vmatmul.bf16.gmra.mxu2 %v6450_v42 }
 0x748   : > { %v7838_v37 = vpop.f32.mrf.mxu3  ;;  %2209 = vadd.xlane.f32.xlu0 %v2208_v38 }
 0x749   : > { %v7839_v53 = vadd.f32 %v12251_v35, %v7838_v37 }
 0x74a   : > { %v10613_v42 = vpop.eup %10612 }
 0x74b   : > { %8412 = vst [vmem:[%s11979_s22 + $0x160] sm:$0xff] %v7839_v53  ;;  %v3328_v53 = vmul.f32 %v10613_v42, %v12326_v22  ;;  %v9615_v42 = vld [vmem:[%s11536_s17 + $0x168] sm:$0xff]  }
 0x74f   : > { %v3841_v9 = vpop.permute.xlu1 %3840 }
 0x750   : > { %8838 = vmatmul.msk.bf16.gmra.mxu0 %vm1973_vm0, %v3841_v9  ;;  %v7840_v30 = vpop.f32.mrf.mxu3 }
 0x751   : > { %v7841_v49 = vadd.f32 %v12251_v35, %v7840_v30  ;;  %v12485_v35 = vunpack.c.h.bf16 %v9613_v15 }
 0x753   : > { %8413 = vst [vmem:[%s11979_s22 + $0x168] sm:$0xff] %v7841_v49  ;;  %v10036_v12 = vpack.i.bf16 %v12485_v35, %v12483_v1 }
 0x756   : > { %v6752_v57 = vpop.f32.mrf.mxu2 }
 0x757   : > { %v10023_v44 = vpop.permute.xlu1 %10022  ;;  %v6753_v62 = vadd.f32 %v12423_v48, %v6752_v57 }
 0x758   : > { %v10025_v20 = vunpack.i.h.bf16 %v10023_v44  ;;  %v10024_v25 = vunpack.i.l.bf16 %v10023_v44 }
 0x759   : > { %v7317_v36 = vmax.f32 %v6753_v62, 0.0 }
 0x75a   : > { %v2217_v46 = vsel %vm1973_vm0, %v10025_v20, 0.0  ;;  %v2214_v3 = vsel %vm1973_vm0, %v10024_v25, 0.0 }
 0x75b   : > { %2218 = vadd.xlane.f32.xlu2 %v2217_v46 }
 0x75c   : > { %10032 = vrot.lane.b32.xlu0 %v10031_v18, %s11344_s13 }
 0x75e   : > { %v6754_v5 = vpop.f32.mrf.mxu2 }
 0x75f   : > { %v6755_v27 = vadd.f32 %v12423_v48, %v6754_v5 }
 0x761   : > { %v7318_v31 = vmax.f32 %v6755_v27, 0.0 }
 0x763   : > { %v7548_v24 = vpack.c.bf16 %v7318_v31, %v7317_v36 }
 0x764   : > { %10037 = vrot.lane.b32.xlu0 %v10036_v12, %s11344_s13 }
 0x765   : > { %7852 = vmatmul.bf16.gmra.mxu3 %v7548_v24 }
 0x76e   : > { %v4585_v33 = vpop.f32.mrf.mxu0 }
 0x76f   : > { %v4586_v28 = vadd.f32 %v11754_v51, %v4585_v33  ;;  %v12508_v33 = vld [vmem:[#allocation14] ss:$0 sm:$0xff] }
 0x770   : > { %2215 = vadd.xlane.f32.xlu1 %v2214_v3 }
 0x771   : > { %v5129_v8 = vmul.f32 %v12207_v6, %v4586_v28 }
 0x776   : > { %v4587_v60 = vpop.f32.mrf.mxu0 }
 0x777   : > { %v4588_v50 = vadd.f32 %v11754_v51, %v4587_v60 }
 0x778   : > { %v2201_v56 = vpop.xlane.xlu2 %2200 }
 0x779   : > { %v5130_v63 = vmul.f32 %v12209_v41, %v4588_v50  ;;  %v2817_v43 = vmax.f32 %v2201_v56, 1e-08  ;;  %v9614_v56 = vld [vmem:[%s11536_s17 + $0x160] sm:$0xff]  }
 0x77a   : > { %v6757_v45 = vpop.f32.mrf.mxu2 }
 0x77b   : > { %10614 = vrcp.f32 %v2817_v43  ;;  %v5353_v10 = vpack.c.bf16 %v5130_v63, %v5129_v8  ;;  %v6758_v37 = vadd.f32 %v12423_v48, %v6757_v45  ;;  %v12514_v63 = vunpack.c.l.bf16 %v9614_v56 }
 0x77c   : > { %v12516_v43 = vunpack.c.h.bf16 %v9614_v56 }
 0x77d   : > { %5685 = vmatmul.bf16.gmra.mxu1 %v5353_v10  ;;  %v2204_v26 = vpop.xlane.xlu0 %2203  ;;  %v7319_v44 = vmax.f32 %v6758_v37, 0.0  ;;  %v12524_v37 = vunpack.c.l.bf16 %v9615_v42 }
 0x77e   : > { %v2818_v40 = vmax.f32 %v2204_v26, 1e-08 }
 0x780   : > { %10616 = vrcp.f32 %v2818_v40  ;;  %v10028_v57 = vpop.permute.xlu2 %10027  ;;  %v10041_v40 = vpack.i.bf16 %v12516_v43, %v12514_v63 }
 0x781   : > { %v10615_v38 = vpop.eup %10614  ;;  %v10029_v46 = vunpack.i.l.bf16 %v10028_v57 }
 0x782   : > { %v3329_v9 = vmul.f32 %v10615_v38, %v12328_v23  ;;  %v6759_v30 = vpop.f32.mrf.mxu2  ;;  %v2207_v6 = vpop.xlane.xlu1 %2206 }
 0x783   : > { %v6760_v41 = vadd.f32 %v12423_v48, %v6759_v30  ;;  %v2819_v49 = vmax.f32 %v2207_v6, 1e-08  ;;  %v2220_v27 = vsel %vm1973_vm0, %v10029_v46, 0.0 }
 0x784   : > { %v3547_v39 = vpack.c.bf16 %v3329_v9, %v3328_v53  ;;  %v12526_v53 = vunpack.c.h.bf16 %v9615_v42 }
 0x785   : > { %v7320_v18 = vmax.f32 %v6760_v41, 0.0  ;;  %10618 = vrcp.f32 %v2819_v49 }
 0x786   : > { %3846 = vrot.lane.b32.xlu2 %v3547_v39, %s11344_s13  ;;  %v10617_v20 = vpop.eup %10616  ;;  %v10046_v41 = vpack.i.bf16 %v12526_v53, %v12524_v37 }
 0x787   : > { %v7549_v15 = vpack.c.bf16 %v7320_v18, %v7319_v44  ;;  %v3330_v62 = vmul.f32 %v10617_v20, %v12357_v47 }
 0x789   : > { %7857 = vmatmul.bf16.gmra.mxu3 %v7549_v15  ;;  %v10030_v15 = vunpack.i.h.bf16 %v10028_v57 }
 0x78b   : > { %v10619_v5 = vpop.eup %10618 }
 0x78c   : > { %v5671_v12 = vpop.f32.mrf.mxu1  ;;  %v3331_v36 = vmul.f32 %v10619_v5, %v12359_v0 }
 0x78d   : > { %v5672_v25 = vadd.f32 %v12342_v11, %v5671_v12 }
 0x78e   : > { %v3548_v31 = vpack.c.bf16 %v3331_v36, %v3330_v62  ;;  %2221 = vadd.xlane.f32.xlu0 %v2220_v27  ;;  %v2223_v36 = vsel %vm1973_vm0, %v10030_v15, 0.0 }
 0x78f   : > { %v6224_v60 = vmax.f32 %v5672_v25, 0.0 }
 0x790   : > { %v3843_v24 = vpop.permute.xlu0 %3842  ;;  %3848 = vrot.lane.b32.xlu1 %v3548_v31, %s11344_s13 }
 0x791   : > { %8839 = vmatmul.msk.bf16.gmra.mxu0 %vm1973_vm0, %v3843_v24 }
 0x793   : > { %v7843_v3 = vpop.f32.mrf.mxu3 }
 0x794   : > { %v7844_v21 = vadd.f32 %v12508_v33, %v7843_v3  ;;  %v5673_v32 = vpop.f32.mrf.mxu1 }
 0x795   : > { %v5674_v28 = vadd.f32 %v12342_v11, %v5673_v32 }
 0x796   : > { %8414 = vst [vmem:[%s11979_s22 + $0x170] sm:$0xff] %v7844_v21 }
 0x797   : > { %v6225_v50 = vmax.f32 %v5674_v28, 0.0 }
 0x799   : > { %v6451_v8 = vpack.c.bf16 %v6225_v50, %v6224_v60 }
 0x79b   : > { %6771 = vmatmul.bf16.gmra.mxu2 %v6451_v8  ;;  %v7845_v45 = vpop.f32.mrf.mxu3 }
 0x79c   : > { %v7846_v10 = vadd.f32 %v12508_v33, %v7845_v45  ;;  %v5676_v26 = vpop.f32.mrf.mxu1 }
 0x79d   : > { %v5677_v9 = vadd.f32 %v12342_v11, %v5676_v26 }
 0x79e   : > { %8415 = vst [vmem:[%s11979_s22 + $0x178] sm:$0xff] %v7846_v10 }
 0x79f   : > { %v6226_v49 = vmax.f32 %v5677_v9, 0.0 }
 0x7a2   : > { %v6762_v38 = vpop.f32.mrf.mxu2  ;;  %10042 = vrot.lane.b32.xlu0 %v10041_v40, %s11344_s13 }
 0x7a3   : > { %v6763_v44 = vadd.f32 %v12423_v48, %v6762_v38 }
 0x7a4   : > { %v5678_v30 = vpop.f32.mrf.mxu1 }
 0x7a5   : > { %v5679_v6 = vadd.f32 %v12342_v11, %v5678_v30  ;;  %v7321_v27 = vmax.f32 %v6763_v44, 0.0 }
 0x7a7   : > { %v6227_v39 = vmax.f32 %v5679_v6, 0.0 }
 0x7a9   : > { %v7848_v18 = vpop.f32.mrf.mxu3  ;;  %v6452_v20 = vpack.c.bf16 %v6227_v39, %v6226_v49 }
 0x7aa   : > { %v7849_v46 = vadd.f32 %v12508_v33, %v7848_v18  ;;  %v6764_v62 = vpop.f32.mrf.mxu2  ;;  %10047 = vrot.lane.b32.xlu0 %v10046_v41, %s11344_s13 }
 0x7ab   : > { %v6765_v5 = vadd.f32 %v12423_v48, %v6764_v62  ;;  %6776 = vmatmul.bf16.gmra.mxu2 %v6452_v20 }
 0x7ac   : > { %8416 = vst [vmem:[%s11979_s22 + $0x180] sm:$0xff] %v7849_v46 }
 0x7ad   : > { %v7322_v12 = vmax.f32 %v6765_v5, 0.0 }
 0x7af   : > { %2224 = vadd.xlane.f32.xlu2 %v2223_v36  ;;  %v7550_v31 = vpack.c.bf16 %v7322_v12, %v7321_v27 }
 0x7b1   : > { %v7850_v24 = vpop.f32.mrf.mxu3  ;;  %7862 = vmatmul.bf16.gmra.mxu3 %v7550_v31 }
 0x7b2   : > { %v7851_v25 = vadd.f32 %v12508_v33, %v7850_v24 }
 0x7b4   : > { %8417 = vst [vmem:[%s11979_s22 + $0x188] sm:$0xff] %v7851_v25 }
 0x7b8   : > { %v3845_v57 = vpop.permute.xlu1 %3844 }
 0x7b9   : > { %8840 = vmatmul.msk.bf16.gmra.mxu0 %vm1973_vm0, %v3845_v57  ;;  %v2213_v41 = vpop.xlane.xlu2 %2212 }
 0x7ba   : > { %v2821_v12 = vmax.f32 %v2213_v41, 1e-08 }
 0x7bb   : > { %v2210_v50 = vpop.xlane.xlu0 %2209 }
 0x7bc   : > { %v2820_v25 = vmax.f32 %v2210_v50, 1e-08  ;;  %10620 = vrcp.f32 %v2821_v12 }
 0x7bd   : > { %v4590_v3 = vpop.f32.mrf.mxu0 }
 0x7be   : > { %v4591_v32 = vadd.f32 %v11754_v51, %v4590_v3  ;;  %10622 = vrcp.f32 %v2820_v25 }
 0x7bf   : > { %v5681_v21 = vpop.f32.mrf.mxu1 }
 0x7c0   : > { %v5682_v60 = vadd.f32 %v12342_v11, %v5681_v21  ;;  %v5131_v45 = vmul.f32 %v12219_v19, %v4591_v32 }
 0x7c2   : > { %v6228_v40 = vmax.f32 %v5682_v60, 0.0 }
 0x7c5   : > { %v4592_v28 = vpop.f32.mrf.mxu0 }
 0x7c6   : > { %v4593_v56 = vadd.f32 %v11754_v51, %v4592_v28 }
 0x7c7   : > { %v5683_v8 = vpop.f32.mrf.mxu1 }
 0x7c8   : > { %v5132_v10 = vmul.f32 %v12221_v58, %v4593_v56  ;;  %v5684_v26 = vadd.f32 %v12342_v11, %v5683_v8  ;;  %v10621_v8 = vpop.eup %10620 }
 0x7c9   : > { %v3333_v50 = vmul.f32 %v10621_v8, %v12374_v52 }
 0x7ca   : > { %v6229_v42 = vmax.f32 %v5684_v26, 0.0  ;;  %v6767_v38 = vpop.f32.mrf.mxu2  ;;  %v5354_v9 = vpack.c.bf16 %v5132_v10, %v5131_v45  ;;  %v10623_v10 = vpop.eup %10622 }
 0x7cb   : > { %v6768_v18 = vadd.f32 %v12423_v48, %v6767_v38 }
 0x7cc   : > { %5690 = vmatmul.bf16.gmra.mxu1 %v5354_v9  ;;  %v6453_v30 = vpack.c.bf16 %v6229_v42, %v6228_v40 }
 0x7cd   : > { %v4595_v6 = vpop.f32.mrf.mxu0  ;;  %v7323_v62 = vmax.f32 %v6768_v18, 0.0 }
 0x7ce   : > { %6781 = vmatmul.bf16.gmra.mxu2 %v6453_v30  ;;  %v10033_v49 = vpop.permute.xlu0 %10032  ;;  %v4596_v46 = vadd.f32 %v11754_v51, %v4595_v6  ;;  %v2219_v31 = vpop.xlane.xlu2 %2218 }
 0x7cf   : > { %v10035_v39 = vunpack.i.h.bf16 %v10033_v49  ;;  %v10034_v44 = vunpack.i.l.bf16 %v10033_v49  ;;  %v2823_v56 = vmax.f32 %v2219_v31, 1e-08  ;;  %v9616_v49 = vld [vmem:[%s11536_s17 + $0x170] sm:$0xff]  }
 0x7d0   : > { %v5133_v21 = vmul.f32 %v12244_v61, %v4596_v46 }
 0x7d1   : > { %v2229_v19 = vsel %vm1973_vm0, %v10035_v39, 0.0  ;;  %v2226_v58 = vsel %vm1973_vm0, %v10034_v44, 0.0  ;;  %10624 = vrcp.f32 %v2823_v56 }
 0x7d2   : > { %v6769_v20 = vpop.f32.mrf.mxu2  ;;  %2230 = vadd.xlane.f32.xlu2 %v2229_v19  ;;  %2227 = vadd.xlane.f32.xlu1 %v2226_v58  ;;  %v12567_v19 = vunpack.c.l.bf16 %v9616_v49  ;;  %v12569_v58 = vunpack.c.h.bf16 %v9616_v49 }
 0x7d3   : > { %v6770_v15 = vadd.f32 %v12423_v48, %v6769_v20 }
 0x7d4   : > { %v10051_v20 = vpack.i.bf16 %v12569_v58, %v12567_v19 }
 0x7d5   : > { %v7324_v5 = vmax.f32 %v6770_v15, 0.0  ;;  %v4597_v27 = vpop.f32.mrf.mxu0 }
 0x7d6   : > { %v4598_v36 = vadd.f32 %v11754_v51, %v4597_v27  ;;  %v10038_v24 = vpop.permute.xlu0 %10037 }
 0x7d7   : > { %v7551_v57 = vpack.c.bf16 %v7324_v5, %v7323_v62  ;;  %v10039_v3 = vunpack.i.l.bf16 %v10038_v24  ;;  %v10625_v40 = vpop.eup %10624 }
 0x7d8   : > { %v5134_v32 = vmul.f32 %v12246_v2, %v4598_v36  ;;  %v3332_v2 = vmul.f32 %v10623_v10, %v12372_v29  ;;  %v3335_v30 = vmul.f32 %v10625_v40, %v12408_v16 }
 0x7d9   : > { %7867 = vmatmul.bf16.gmra.mxu3 %v7551_v57  ;;  %v2232_v28 = vsel %vm1973_vm0, %v10039_v3, 0.0 }
 0x7da   : > { %v5355_v60 = vpack.c.bf16 %v5134_v32, %v5133_v21  ;;  %2233 = vadd.xlane.f32.xlu0 %v2232_v28  ;;  %v3549_v38 = vpack.c.bf16 %v3333_v50, %v3332_v2  ;;  %v10040_v21 = vunpack.i.h.bf16 %v10038_v24 }
 0x7dc   : > { %5695 = vmatmul.bf16.gmra.mxu1 %v5355_v60  ;;  %v2235_v28 = vsel %vm1973_vm0, %v10040_v21, 0.0 }
 0x7e0   : > { %v3847_v45 = vpop.permute.xlu2 %3846 }
 0x7e1   : > { %8841 = vmatmul.msk.bf16.gmra.mxu0 %vm1973_vm0, %v3847_v45 }
 0x7e3   : > { %v2216_v61 = vpop.xlane.xlu1 %2215 }
 0x7e4   : > { %v2822_v26 = vmax.f32 %v2216_v61, 1e-08 }
 0x7e6   : > { %10626 = vrcp.f32 %v2822_v26 }
 0x7e8   : > { %v7853_v42 = vpop.f32.mrf.mxu3 }
 0x7e9   : > { %v7854_v9 = vadd.f32 %v12508_v33, %v7853_v42 }
 0x7ea   : > { %3850 = vrot.lane.b32.xlu2 %v3549_v38, %s11344_s13 }
 0x7eb   : > { %8418 = vst [vmem:[%s11979_s22 + $0x190] sm:$0xff] %v7854_v9  ;;  %v9617_v9 = vld [vmem:[%s11536_s17 + $0x178] sm:$0xff]  }
 0x7ec   : > { %v10627_v6 = vpop.eup %10626  ;;  %v12590_v49 = vunpack.c.l.bf16 %v9617_v9 }
 0x7ed   : > { %v3334_v41 = vmul.f32 %v10627_v6, %v12406_v59 }
 0x7ef   : > { %v3550_v39 = vpack.c.bf16 %v3335_v30, %v3334_v41 }
 0x7f0   : > { %v7855_v44 = vpop.f32.mrf.mxu3 }
 0x7f1   : > { %v7856_v18 = vadd.f32 %v12508_v33, %v7855_v44  ;;  %3852 = vrot.lane.b32.xlu1 %v3550_v39, %s11344_s13  ;;  %v12592_v39 = vunpack.c.h.bf16 %v9617_v9 }
 0x7f3   : > { %8419 = vst [vmem:[%s11979_s22 + $0x198] sm:$0xff] %v7856_v18  ;;  %v10056_v18 = vpack.i.bf16 %v12592_v39, %v12590_v49 }
 0x7f9   : > { %10052 = vrot.lane.b32.xlu1 %v10051_v20, %s11344_s13 }
 0x7fa   : > { %v5686_v15 = vpop.f32.mrf.mxu1 }
 0x7fb   : > { %v5687_v46 = vadd.f32 %v12342_v11, %v5686_v15 }
 0x7fd   : > { %v6230_v12 = vmax.f32 %v5687_v46, 0.0 }
 0x801   : > { %v2222_v25 = vpop.xlane.xlu0 %2221 }
 0x802   : > { %v5688_v62 = vpop.f32.mrf.mxu1  ;;  %v3849_v5 = vpop.permute.xlu1 %3848  ;;  %v2824_v38 = vmax.f32 %v2222_v25, 1e-08 }
 0x803   : > { %v5689_v27 = vadd.f32 %v12342_v11, %v5688_v62  ;;  %8842 = vmatmul.msk.bf16.gmra.mxu0 %vm1973_vm0, %v3849_v5 }
 0x804   : > { %10628 = vrcp.f32 %v2824_v38 }
 0x805   : > { %v6231_v36 = vmax.f32 %v5689_v27, 0.0 }
 0x807   : > { %v6454_v31 = vpack.c.bf16 %v6231_v36, %v6230_v12 }
 0x809   : > { %6786 = vmatmul.bf16.gmra.mxu2 %v6454_v31 }
 0x80a   : > { %v10629_v20 = vpop.eup %10628 }
 0x80b   : > { %v3336_v27 = vmul.f32 %v10629_v20, %v12435_v17 }
 0x80c   : > { %v7858_v57 = vpop.f32.mrf.mxu3 }
 0x80d   : > { %v7859_v3 = vadd.f32 %v12508_v33, %v7858_v57 }
 0x80e   : > { %v4600_v32 = vpop.f32.mrf.mxu0 }
 0x80f   : > { %8420 = vst [vmem:[%s11979_s22 + $0x1a0] sm:$0xff] %v7859_v3  ;;  %v4601_v11 = vadd.f32 %v11754_v51, %v4600_v32 }
 0x811   : > { %v5135_v24 = vmul.f32 %v12266_v4, %v4601_v11 }
 0x813   : > { %2236 = vadd.xlane.f32.xlu2 %v2235_v28 }
 0x814   : > { %v7860_v60 = vpop.f32.mrf.mxu3  ;;  %v10043_v56 = vpop.permute.xlu0 %10042 }
 0x815   : > { %v7861_v8 = vadd.f32 %v12508_v33, %v7860_v60  ;;  %v10044_v45 = vunpack.i.l.bf16 %v10043_v56  ;;  %v10045_v40 = vunpack.i.h.bf16 %v10043_v56 }
 0x816   : > { %v4602_v10 = vpop.f32.mrf.mxu0 }
 0x817   : > { %8421 = vst [vmem:[%s11979_s22 + $0x1a8] sm:$0xff] %v7861_v8  ;;  %v4603_v61 = vadd.f32 %v11754_v51, %v4602_v10  ;;  %v2238_v2 = vsel %vm1973_vm0, %v10044_v45, 0.0  ;;  %v2241_v6 = vsel %vm1973_vm0, %v10045_v40, 0.0 }
 0x818   : > { %2239 = vadd.xlane.f32.xlu0 %v2238_v2 }
 0x819   : > { %v5136_v50 = vmul.f32 %v12268_v7, %v4603_v61 }
 0x81b   : > { %v5356_v26 = vpack.c.bf16 %v5136_v50, %v5135_v24 }
 0x81d   : > { %5700 = vmatmul.bf16.gmra.mxu1 %v5356_v26 }
 0x81e   : > { %v6772_v42 = vpop.f32.mrf.mxu2 }
 0x81f   : > { %v6773_v4 = vadd.f32 %v12423_v48, %v6772_v42 }
 0x821   : > { %v7325_v15 = vmax.f32 %v6773_v4, 0.0 }
 0x822   : > { %v2225_v30 = vpop.xlane.xlu2 %2224 }
 0x823   : > { %v2825_v41 = vmax.f32 %v2225_v30, 1e-08  ;;  %2242 = vadd.xlane.f32.xlu1 %v2241_v6  ;;  %v10048_v6 = vpop.permute.xlu0 %10047 }
 0x825   : > { %10630 = vrcp.f32 %v2825_v41  ;;  %v10050_v41 = vunpack.i.h.bf16 %v10048_v6 }
 0x826   : > { %v6774_v7 = vpop.f32.mrf.mxu2 }
 0x827   : > { %v6775_v44 = vadd.f32 %v12423_v48, %v6774_v7 }
 0x829   : > { %v7326_v46 = vmax.f32 %v6775_v44, 0.0 }
 0x82b   : > { %v10631_v62 = vpop.eup %10630  ;;  %v7552_v5 = vpack.c.bf16 %v7326_v46, %v7325_v15  ;;  %10057 = vrot.lane.b32.xlu2 %v10056_v18, %s11344_s13  ;;  %v12615_v18 = vld [vmem:[#allocation8] ss:$0 sm:$0xff] }
 0x82c   : > { %v3337_v12 = vmul.f32 %v10631_v62, %v12437_v13  ;;  %v2247_v62 = vsel %vm1973_vm0, %v10050_v41, 0.0 }
 0x82d   : > { %7872 = vmatmul.bf16.gmra.mxu3 %v7552_v5 }
 0x82e   : > { %v6777_v36 = vpop.f32.mrf.mxu2  ;;  %v3551_v31 = vpack.c.bf16 %v3337_v12, %v3336_v27  ;;  %v10049_v12 = vunpack.i.l.bf16 %v10048_v6 }
 0x82f   : > { %v6778_v57 = vadd.f32 %v12423_v48, %v6777_v36 }
 0x830   : > { %3854 = vrot.lane.b32.xlu0 %v3551_v31, %s11344_s13 }
 0x831   : > { %v7327_v60 = vmax.f32 %v6778_v57, 0.0  ;;  %v2244_v57 = vsel %vm1973_vm0, %v10049_v12, 0.0 }
 0x834   : > { %v7863_v25 = vpop.f32.mrf.mxu3 }
 0x835   : > { %v7864_v3 = vadd.f32 %v12508_v33, %v7863_v25 }
 0x836   : > { %v4605_v21 = vpop.f32.mrf.mxu0  ;;  %v6779_v32 = vpop.f32.mrf.mxu2 }
 0x837   : > { %8422 = vst [vmem:[%s11979_s22 + $0x1b0] sm:$0xff] %v7864_v3  ;;  %v6780_v28 = vadd.f32 %v12423_v48, %v6779_v32  ;;  %v4606_v45 = vadd.f32 %v11754_v51, %v4605_v21 }
 0x839   : > { %v7328_v56 = vmax.f32 %v6780_v28, 0.0  ;;  %v5137_v24 = vmul.f32 %v12316_v34, %v4606_v45 }
 0x83b   : > { %v7553_v11 = vpack.c.bf16 %v7328_v56, %v7327_v60 }
 0x83c   : > { %v7865_v8 = vpop.f32.mrf.mxu3 }
 0x83d   : > { %v7866_v10 = vadd.f32 %v12508_v33, %v7865_v8  ;;  %7877 = vmatmul.bf16.gmra.mxu3 %v7553_v11 }
 0x83e   : > { %v4607_v61 = vpop.f32.mrf.mxu0 }
 0x83f   : > { %8423 = vst [vmem:[%s11979_s22 + $0x1b8] sm:$0xff] %v7866_v10  ;;  %v4608_v2 = vadd.f32 %v11754_v51, %v4607_v61 }
 0x841   : > { %v5138_v50 = vmul.f32 %v12318_v14, %v4608_v2 }
 0x843   : > { %v5357_v26 = vpack.c.bf16 %v5138_v50, %v5137_v24 }
 0x845   : > { %5705 = vmatmul.bf16.gmra.mxu1 %v5357_v26  ;;  %v2231_v40 = vpop.xlane.xlu2 %2230  ;;  %v2228_v42 = vpop.xlane.xlu1 %2227  ;;  %v9618_v26 = vld [vmem:[%s11536_s17 + $0x180] sm:$0xff]  }
 0x846   : > { %v2827_v38 = vmax.f32 %v2231_v40, 1e-08  ;;  %v2826_v9 = vmax.f32 %v2228_v42, 1e-08 }
 0x848   : > { %10632 = vrcp.f32 %v2827_v38 }
 0x849   : > { %10634 = vrcp.f32 %v2826_v9  ;;  %v5691_v30 = vpop.f32.mrf.mxu1 }
 0x84a   : > { %v5692_v20 = vadd.f32 %v12615_v18, %v5691_v30 }
 0x84c   : > { %v6232_v36 = vmax.f32 %v5692_v20, 0.0 }
 0x84d   : > { %v3851_v4 = vpop.permute.xlu2 %3850 }
 0x84e   : > { %v10633_v7 = vpop.eup %10632  ;;  %8843 = vmatmul.msk.bf16.gmra.mxu0 %vm1973_vm0, %v3851_v4  ;;  %v12632_v4 = vunpack.c.l.bf16 %v9618_v26 }
 0x84f   : > { %v10635_v44 = vpop.eup %10634  ;;  %v3339_v34 = vmul.f32 %v10633_v7, %v12476_v55  ;;  %v12634_v7 = vunpack.c.h.bf16 %v9618_v26 }
 0x850   : > { %v3338_v14 = vmul.f32 %v10635_v44, %v12474_v54 }
 0x851   : > { %v6782_v15 = vpop.f32.mrf.mxu2  ;;  %v5693_v46 = vpop.f32.mrf.mxu1  ;;  %v10061_v20 = vpack.i.bf16 %v12634_v7, %v12632_v4 }
 0x852   : > { %v5694_v5 = vadd.f32 %v12615_v18, %v5693_v46  ;;  %v3552_v27 = vpack.c.bf16 %v3339_v34, %v3338_v14  ;;  %v6783_v3 = vadd.f32 %v12423_v48, %v6782_v15 }
 0x854   : > { %v6233_v31 = vmax.f32 %v5694_v5, 0.0  ;;  %3856 = vrot.lane.b32.xlu1 %v3552_v27, %s11344_s13  ;;  %2248 = vadd.xlane.f32.xlu2 %v2247_v62  ;;  %v7329_v60 = vmax.f32 %v6783_v3, 0.0  ;;  %v9619_v62 = vld [vmem:[%s11536_s17 + $0x188] sm:$0xff]  }
 0x855   : > { %v12645_v12 = vunpack.c.l.bf16 %v9619_v62 }
 0x856   : > { %v6455_v25 = vpack.c.bf16 %v6233_v31, %v6232_v36  ;;  %v12647_v36 = vunpack.c.h.bf16 %v9619_v62 }
 0x858   : > { %6791 = vmatmul.bf16.gmra.mxu2 %v6455_v25  ;;  %v2234_v25 = vpop.xlane.xlu0 %2233 }
 0x859   : > { %v6784_v21 = vpop.f32.mrf.mxu2  ;;  %v5696_v32 = vpop.f32.mrf.mxu1  ;;  %v2828_v3 = vmax.f32 %v2234_v25, 1e-08 }
 0x85a   : > { %v6785_v28 = vadd.f32 %v12423_v48, %v6784_v21  ;;  %2245 = vadd.xlane.f32.xlu0 %v2244_v57  ;;  %v5697_v61 = vadd.f32 %v12615_v18, %v5696_v32 }
 0x85b   : > { %10636 = vrcp.f32 %v2828_v3 }
 0x85c   : > { %v7330_v56 = vmax.f32 %v6785_v28, 0.0  ;;  %v7868_v11 = vpop.f32.mrf.mxu3  ;;  %v6234_v40 = vmax.f32 %v5697_v61, 0.0 }
 0x85d   : > { %v7869_v8 = vadd.f32 %v12508_v33, %v7868_v11 }
 0x85e   : > { %v4610_v45 = vpop.f32.mrf.mxu0  ;;  %v7554_v10 = vpack.c.bf16 %v7330_v56, %v7329_v60 }
 0x85f   : > { %8424 = vst [vmem:[%s11979_s22 + $0x1c0] sm:$0xff] %v7869_v8  ;;  %v4611_v9 = vadd.f32 %v11754_v51, %v4610_v45 }
 0x860   : > { %7882 = vmatmul.bf16.gmra.mxu3 %v7554_v10 }
 0x861   : > { %v5698_v2 = vpop.f32.mrf.mxu1  ;;  %v5139_v34 = vmul.f32 %v12326_v22, %v4611_v9  ;;  %v10066_v22 = vpack.i.bf16 %v12647_v36, %v12645_v12  ;;  %v10637_v10 = vpop.eup %10636 }
 0x862   : > { %v5699_v24 = vadd.f32 %v12615_v18, %v5698_v2 }
 0x863   : > { %v3853_v50 = vpop.permute.xlu1 %3852 }
 0x864   : > { %v6235_v42 = vmax.f32 %v5699_v24, 0.0  ;;  %8844 = vmatmul.msk.bf16.gmra.mxu0 %vm1973_vm0, %v3853_v50  ;;  %v7870_v38 = vpop.f32.mrf.mxu3  ;;  %v3340_v24 = vmul.f32 %v10637_v10, %v12483_v1 }
 0x865   : > { %v7871_v30 = vadd.f32 %v12508_v33, %v7870_v38 }
 0x866   : > { %v4612_v6 = vpop.f32.mrf.mxu0  ;;  %v6456_v41 = vpack.c.bf16 %v6235_v42, %v6234_v40 }
 0x867   : > { %8425 = vst [vmem:[%s11979_s22 + $0x1c8] sm:$0xff] %v7871_v30  ;;  %v4613_v44 = vadd.f32 %v11754_v51, %v4612_v6 }
 0x868   : > { %6796 = vmatmul.bf16.gmra.mxu2 %v6456_v41 }
 0x869   : > { %v5140_v14 = vmul.f32 %v12328_v23, %v4613_v44 }
 0x86b   : > { %v5358_v15 = vpack.c.bf16 %v5140_v14, %v5139_v34  ;;  %v10053_v46 = vpop.permute.xlu1 %10052 }
 0x86c   : > { %v10055_v5 = vunpack.i.h.bf16 %v10053_v46  ;;  %v10054_v23 = vunpack.i.l.bf16 %v10053_v46 }
 0x86d   : > { %5710 = vmatmul.bf16.gmra.mxu1 %v5358_v15 }
 0x86e   : > { %10062 = vrot.lane.b32.xlu0 %v10061_v20, %s11344_s13  ;;  %v2253_v27 = vsel %vm1973_vm0, %v10055_v5, 0.0  ;;  %v2250_v31 = vsel %vm1973_vm0, %v10054_v23, 0.0 }
 0x86f   : > { %2254 = vadd.xlane.f32.xlu2 %v2253_v27 }
 0x876   : > { %10067 = vrot.lane.b32.xlu0 %v10066_v22, %s11344_s13  ;;  %v9620_v22 = vld [vmem:[%s11536_s17 + $0x190] sm:$0xff]  }
 0x877   : > { %v12670_v3 = vunpack.c.l.bf16 %v9620_v22 }
 0x87e   : > { %2251 = vadd.xlane.f32.xlu1 %v2250_v31 }
 0x880   : > { %v4615_v57 = vpop.f32.mrf.mxu0 }
 0x881   : > { %v4616_v32 = vadd.f32 %v11754_v51, %v4615_v57 }
 0x883   : > { %v5141_v11 = vmul.f32 %v12357_v47, %v4616_v32 }
 0x886   : > { %v2237_v21 = vpop.xlane.xlu2 %2236 }
 0x887   : > { %v2829_v28 = vmax.f32 %v2237_v21, 1e-08  ;;  %v12672_v21 = vunpack.c.h.bf16 %v9620_v22 }
 0x888   : > { %v4617_v60 = vpop.f32.mrf.mxu0 }
 0x889   : > { %10638 = vrcp.f32 %v2829_v28  ;;  %v4618_v56 = vadd.f32 %v11754_v51, %v4617_v60 }
 0x88b   : > { %v5142_v8 = vmul.f32 %v12359_v0, %v4618_v56  ;;  %v2240_v26 = vpop.xlane.xlu0 %2239  ;;  %v10071_v56 = vpack.i.bf16 %v12672_v21, %v12670_v3 }
 0x88c   : > { %v6787_v45 = vpop.f32.mrf.mxu2  ;;  %v2830_v38 = vmax.f32 %v2240_v26, 1e-08 }
 0x88d   : > { %v5359_v61 = vpack.c.bf16 %v5142_v8, %v5141_v11  ;;  %v6788_v42 = vadd.f32 %v12423_v48, %v6787_v45 }
 0x88e   : > { %v10058_v30 = vpop.permute.xlu2 %10057  ;;  %10640 = vrcp.f32 %v2830_v38 }
 0x88f   : > { %v10639_v2 = vpop.eup %10638  ;;  %5715 = vmatmul.bf16.gmra.mxu1 %v5359_v61  ;;  %v7331_v6 = vmax.f32 %v6788_v42, 0.0  ;;  %v10059_v14 = vunpack.i.l.bf16 %v10058_v30  ;;  %v10060_v45 = vunpack.i.h.bf16 %v10058_v30 }
 0x890   : > { %v3341_v50 = vmul.f32 %v10639_v2, %v12485_v35 }
 0x891   : > { %v2256_v46 = vsel %vm1973_vm0, %v10059_v14, 0.0  ;;  %v2259_v2 = vsel %vm1973_vm0, %v10060_v45, 0.0 }
 0x892   : > { %v3553_v40 = vpack.c.bf16 %v3341_v50, %v3340_v24 }
 0x894   : > { %v6789_v9 = vpop.f32.mrf.mxu2  ;;  %3858 = vrot.lane.b32.xlu2 %v3553_v40, %s11344_s13  ;;  %v10641_v15 = vpop.eup %10640 }
 0x895   : > { %v6790_v47 = vadd.f32 %v12423_v48, %v6789_v9  ;;  %v3342_v5 = vmul.f32 %v10641_v15, %v12514_v63 }
 0x896   : > { %v2243_v0 = vpop.xlane.xlu1 %2242 }
 0x897   : > { %v7332_v41 = vmax.f32 %v6790_v47, 0.0  ;;  %v2831_v44 = vmax.f32 %v2243_v0, 1e-08 }
 0x899   : > { %10642 = vrcp.f32 %v2831_v44  ;;  %v7555_v34 = vpack.c.bf16 %v7332_v41, %v7331_v6  ;;  %v9621_v6 = vld [vmem:[%s11536_s17 + $0x198] sm:$0xff]  }
 0x89a   : > { %v5701_v20 = vpop.f32.mrf.mxu1  ;;  %v12692_v14 = vunpack.c.h.bf16 %v9621_v6 }
 0x89b   : > { %7887 = vmatmul.bf16.gmra.mxu3 %v7555_v34  ;;  %v5702_v27 = vadd.f32 %v12615_v18, %v5701_v20  ;;  %v12690_v34 = vunpack.c.l.bf16 %v9621_v6 }
 0x89d   : > { %v6236_v32 = vmax.f32 %v5702_v27, 0.0  ;;  %v10076_v15 = vpack.i.bf16 %v12692_v14, %v12690_v34 }
 0x89f   : > { %v10643_v62 = vpop.eup %10642 }
 0x8a0   : > { %v3343_v48 = vmul.f32 %v10643_v62, %v12516_v43  ;;  %2257 = vadd.xlane.f32.xlu0 %v2256_v46 }
 0x8a2   : > { %v5703_v23 = vpop.f32.mrf.mxu1  ;;  %v3855_v31 = vpop.permute.xlu0 %3854  ;;  %v3554_v25 = vpack.c.bf16 %v3343_v48, %v3342_v5 }
 0x8a3   : > { %v5704_v57 = vadd.f32 %v12615_v18, %v5703_v23  ;;  %8845 = vmatmul.msk.bf16.gmra.mxu0 %vm1973_vm0, %v3855_v31 }
 0x8a4   : > { %3860 = vrot.lane.b32.xlu1 %v3554_v25, %s11344_s13 }
 0x8a5   : > { %v6237_v28 = vmax.f32 %v5704_v57, 0.0 }
 0x8a7   : > { %v6457_v60 = vpack.c.bf16 %v6237_v28, %v6236_v32 }
 0x8a9   : > { %6801 = vmatmul.bf16.gmra.mxu2 %v6457_v60 }
 0x8ac   : > { %10072 = vrot.lane.b32.xlu1 %v10071_v56, %s11344_s13  ;;  %v12701_v56 = vld [vmem:[#allocation11] ss:$0 sm:$0xff] }
 0x8b0   : > { %v7873_v11 = vpop.f32.mrf.mxu3 }
 0x8b1   : > { %v7874_v8 = vadd.f32 %v12508_v33, %v7873_v11 }
 0x8b3   : > { %8426 = vst [vmem:[%s11979_s22 + $0x1d0] sm:$0xff] %v7874_v8 }
 0x8b8   : > { %v7875_v10 = vpop.f32.mrf.mxu3 }
 0x8b9   : > { %v7876_v61 = vadd.f32 %v12508_v33, %v7875_v10 }
 0x8bb   : > { %8427 = vst [vmem:[%s11979_s22 + $0x1d8] sm:$0xff] %v7876_v61 }
 0x8bd   : > { %2260 = vadd.xlane.f32.xlu2 %v2259_v2 }
 0x8c0   : > { %v7878_v24 = vpop.f32.mrf.mxu3 }
 0x8c1   : > { %v7879_v50 = vadd.f32 %v12508_v33, %v7878_v24 }
 0x8c2   : > { %v5706_v26 = vpop.f32.mrf.mxu1 }
 0x8c3   : > { %8428 = vst [vmem:[%s11979_s22 + $0x1e0] sm:$0xff] %v7879_v50  ;;  %v5707_v38 = vadd.f32 %v12615_v18, %v5706_v26 }
 0x8c5   : > { %v6238_v41 = vmax.f32 %v5707_v38, 0.0 }
 0x8c6   : > { %v3857_v40 = vpop.permute.xlu1 %3856 }
 0x8c7   : > { %8846 = vmatmul.msk.bf16.gmra.mxu0 %vm1973_vm0, %v3857_v40  ;;  %v2249_v25 = vpop.xlane.xlu2 %2248 }
 0x8c8   : > { %v7880_v42 = vpop.f32.mrf.mxu3  ;;  %v2833_v10 = vmax.f32 %v2249_v25, 1e-08 }
 0x8c9   : > { %v7881_v9 = vadd.f32 %v12508_v33, %v7880_v42 }
 0x8ca   : > { %v5708_v47 = vpop.f32.mrf.mxu1  ;;  %10644 = vrcp.f32 %v2833_v10 }
 0x8cb   : > { %8429 = vst [vmem:[%s11979_s22 + $0x1e8] sm:$0xff] %v7881_v9  ;;  %v5709_v0 = vadd.f32 %v12615_v18, %v5708_v47  ;;  %v4620_v30 = vpop.f32.mrf.mxu0 }
 0x8cc   : > { %v4621_v46 = vadd.f32 %v11754_v51, %v4620_v30 }
 0x8cd   : > { %v6239_v44 = vmax.f32 %v5709_v0, 0.0  ;;  %v2246_v22 = vpop.xlane.xlu0 %2245 }
 0x8ce   : > { %v5143_v48 = vmul.f32 %v12372_v29, %v4621_v46  ;;  %v2832_v50 = vmax.f32 %v2246_v22, 1e-08 }
 0x8cf   : > { %v6458_v20 = vpack.c.bf16 %v6239_v44, %v6238_v41 }
 0x8d0   : > { %10646 = vrcp.f32 %v2832_v50  ;;  %v10645_v46 = vpop.eup %10644 }
 0x8d1   : > { %6806 = vmatmul.bf16.gmra.mxu2 %v6458_v20 }
 0x8d3   : > { %v4622_v62 = vpop.f32.mrf.mxu0 }
 0x8d4   : > { %v4623_v5 = vadd.f32 %v11754_v51, %v4622_v62 }
 0x8d5   : > { %10077 = vrot.lane.b32.xlu2 %v10076_v15, %s11344_s13 }
 0x8d6   : > { %v5144_v27 = vmul.f32 %v12374_v52, %v4623_v5 }
 0x8d8   : > { %v5360_v23 = vpack.c.bf16 %v5144_v27, %v5143_v48  ;;  %v10647_v48 = vpop.eup %10646 }
 0x8da   : > { %5720 = vmatmul.bf16.gmra.mxu1 %v5360_v23  ;;  %v3344_v23 = vmul.f32 %v10647_v48, %v12524_v37 }
 0x8db   : > { %v6792_v31 = vpop.f32.mrf.mxu2 }
 0x8dc   : > { %v6793_v11 = vadd.f32 %v12701_v56, %v6792_v31 }
 0x8de   : > { %v7333_v26 = vmax.f32 %v6793_v11, 0.0 }
 0x8e0   : > { %v10063_v57 = vpop.permute.xlu0 %10062 }
 0x8e1   : > { %v10065_v32 = vunpack.i.h.bf16 %v10063_v57  ;;  %v10064_v28 = vunpack.i.l.bf16 %v10063_v57  ;;  %v4625_v60 = vpop.f32.mrf.mxu0 }
 0x8e2   : > { %v2255_v24 = vpop.xlane.xlu2 %2254  ;;  %v4626_v42 = vadd.f32 %v11754_v51, %v4625_v60 }
 0x8e3   : > { %v7883_v8 = vpop.f32.mrf.mxu3  ;;  %v6794_v45 = vpop.f32.mrf.mxu2  ;;  %v2262_v29 = vsel %vm1973_vm0, %v10064_v28, 0.0  ;;  %v2265_v52 = vsel %vm1973_vm0, %v10065_v32, 0.0  ;;  %v2835_v44 = vmax.f32 %v2255_v24, 1e-08 }
 0x8e4   : > { %v7884_v61 = vadd.f32 %v12508_v33, %v7883_v8  ;;  %v6795_v2 = vadd.f32 %v12701_v56, %v6794_v45  ;;  %2263 = vadd.xlane.f32.xlu0 %v2262_v29  ;;  %2266 = vadd.xlane.f32.xlu1 %v2265_v52  ;;  %v5145_v41 = vmul.f32 %v12406_v59, %v4626_v42 }
 0x8e5   : > { %10648 = vrcp.f32 %v2835_v44  ;;  %v3345_v59 = vmul.f32 %v10645_v46, %v12526_v53 }
 0x8e6   : > { %8430 = vst [vmem:[%s11979_s22 + $0x1f0] sm:$0xff] %v7884_v61  ;;  %v7334_v40 = vmax.f32 %v6795_v2, 0.0 }
 0x8e7   : > { %v3555_v52 = vpack.c.bf16 %v3345_v59, %v3344_v23 }
 0x8e8   : > { %v7556_v38 = vpack.c.bf16 %v7334_v40, %v7333_v26  ;;  %v10068_v10 = vpop.permute.xlu0 %10067 }
 0x8e9   : > { %v4627_v9 = vpop.f32.mrf.mxu0  ;;  %v10070_v2 = vunpack.i.h.bf16 %v10068_v10 }
 0x8ea   : > { %v4628_v47 = vadd.f32 %v11754_v51, %v4627_v9  ;;  %v5711_v0 = vpop.f32.mrf.mxu1  ;;  %7892 = vmatmul.bf16.gmra.mxu3 %v7556_v38 }
 0x8eb   : > { %v7885_v30 = vpop.f32.mrf.mxu3  ;;  %v6797_v6 = vpop.f32.mrf.mxu2  ;;  %v5712_v27 = vadd.f32 %v12615_v18, %v5711_v0  ;;  %v2271_v42 = vsel %vm1973_vm0, %v10070_v2, 0.0 }
 0x8ec   : > { %v5146_v20 = vmul.f32 %v12408_v16, %v4628_v47  ;;  %v7886_v15 = vadd.f32 %v12508_v33, %v7885_v30  ;;  %v6798_v16 = vadd.f32 %v12701_v56, %v6797_v6  ;;  %v10649_v8 = vpop.eup %10648 }
 0x8ed   : > { %v6240_v60 = vmax.f32 %v5712_v27, 0.0  ;;  %v3347_v50 = vmul.f32 %v10649_v8, %v12569_v58 }
 0x8ee   : > { %8431 = vst [vmem:[%s11979_s22 + $0x1f8] sm:$0xff] %v7886_v15  ;;  %v3859_v62 = vpop.permute.xlu2 %3858  ;;  %v5361_v5 = vpack.c.bf16 %v5146_v20, %v5145_v41  ;;  %v7335_v45 = vmax.f32 %v6798_v16, 0.0  ;;  %v10069_v15 = vunpack.i.l.bf16 %v10068_v10 }
 0x8ef   : > { %8847 = vmatmul.msk.bf16.gmra.mxu0 %vm1973_vm0, %v3859_v62 }
 0x8f0   : > { %5725 = vmatmul.bf16.gmra.mxu1 %v5361_v5  ;;  %v2268_v27 = vsel %vm1973_vm0, %v10069_v15, 0.0 }
 0x8f1   : > { %v2252_v22 = vpop.xlane.xlu1 %2251 }
 0x8f2   : > { %v5713_v31 = vpop.f32.mrf.mxu1  ;;  %v2834_v25 = vmax.f32 %v2252_v22, 1e-08 }
 0x8f3   : > { %v5714_v57 = vadd.f32 %v12615_v18, %v5713_v31  ;;  %v6799_v32 = vpop.f32.mrf.mxu2 }
 0x8f4   : > { %v6800_v28 = vadd.f32 %v12701_v56, %v6799_v32  ;;  %10650 = vrcp.f32 %v2834_v25 }
 0x8f5   : > { %v6241_v11 = vmax.f32 %v5714_v57, 0.0 }
 0x8f6   : > { %v7336_v29 = vmax.f32 %v6800_v28, 0.0 }
 0x8f7   : > { %v6459_v61 = vpack.c.bf16 %v6241_v11, %v6240_v60 }
 0x8f8   : > { %3862 = vrot.lane.b32.xlu0 %v3555_v52, %s11344_s13  ;;  %v7557_v24 = vpack.c.bf16 %v7336_v29, %v7335_v45  ;;  %v9622_v45 = vld [vmem:[%s11536_s17 + $0x1a0] sm:$0xff]  }
 0x8f9   : > { %6811 = vmatmul.bf16.gmra.mxu2 %v6459_v61  ;;  %v12742_v61 = vunpack.c.l.bf16 %v9622_v45  ;;  %v12744_v2 = vunpack.c.h.bf16 %v9622_v45 }
 0x8fa   : > { %v10651_v26 = vpop.eup %10650  ;;  %7897 = vmatmul.bf16.gmra.mxu3 %v7557_v24 }
 0x8fb   : > { %v3346_v40 = vmul.f32 %v10651_v26, %v12567_v19 }
 0x8fd   : > { %v3556_v38 = vpack.c.bf16 %v3347_v50, %v3346_v40  ;;  %v10081_v50 = vpack.i.bf16 %v12744_v2, %v12742_v61 }
 0x8fe   : > { %2272 = vadd.xlane.f32.xlu2 %v2271_v42 }
 0x8ff   : > { %3864 = vrot.lane.b32.xlu1 %v3556_v38, %s11344_s13 }
 0x90c   : > { %v5716_v9 = vpop.f32.mrf.mxu1 }
 0x90d   : > { %v5717_v47 = vadd.f32 %v12615_v18, %v5716_v9 }
 0x90f   : > { %v6242_v41 = vmax.f32 %v5717_v47, 0.0 }
 0x913   : > { %v2258_v60 = vpop.xlane.xlu0 %2257 }
 0x914   : > { %v5718_v0 = vpop.f32.mrf.mxu1  ;;  %v2836_v52 = vmax.f32 %v2258_v60, 1e-08 }
 0x915   : > { %v5719_v30 = vadd.f32 %v12615_v18, %v5718_v0 }
 0x916   : > { %v3861_v6 = vpop.permute.xlu1 %3860  ;;  %10652 = vrcp.f32 %v2836_v52 }
 0x917   : > { %v6243_v44 = vmax.f32 %v5719_v30, 0.0  ;;  %8848 = vmatmul.msk.bf16.gmra.mxu0 %vm1973_vm0, %v3861_v6 }
 0x919   : > { %v6460_v20 = vpack.c.bf16 %v6243_v44, %v6242_v41 }
 0x91b   : > { %6816 = vmatmul.bf16.gmra.mxu2 %v6460_v20 }
 0x91c   : > { %v10653_v9 = vpop.eup %10652 }
 0x91d   : > { %v3348_v41 = vmul.f32 %v10653_v9, %v12590_v49 }
 0x91e   : > { %v7888_v46 = vpop.f32.mrf.mxu3  ;;  %v10073_v62 = vpop.permute.xlu1 %10072 }
 0x91f   : > { %v7889_v5 = vadd.f32 %v12508_v33, %v7888_v46  ;;  %v10075_v48 = vunpack.i.h.bf16 %v10073_v62  ;;  %v10074_v59 = vunpack.i.l.bf16 %v10073_v62 }
 0x920   : > { %v4630_v22 = vpop.f32.mrf.mxu0 }
 0x921   : > { %8432 = vst [vmem:[%s11979_s22 + $0x200] sm:$0xff] %v7889_v5  ;;  %v2277_v23 = vsel %vm1973_vm0, %v10075_v48, 0.0  ;;  %v2274_v31 = vsel %vm1973_vm0, %v10074_v59, 0.0  ;;  %v4631_v25 = vadd.f32 %v11754_v51, %v4630_v22 }
 0x922   : > { %2278 = vadd.xlane.f32.xlu2 %v2277_v23  ;;  %2269 = vadd.xlane.f32.xlu0 %v2268_v27 }
 0x923   : > { %v5147_v11 = vmul.f32 %v12435_v17, %v4631_v25  ;;  %v9623_v17 = vld [vmem:[%s11536_s17 + $0x1a8] sm:$0xff]  }
 0x924   : > { %v12752_v42 = vunpack.c.l.bf16 %v9623_v17  ;;  %v12754_v38 = vunpack.c.h.bf16 %v9623_v17 }
 0x926   : > { %v7890_v16 = vpop.f32.mrf.mxu3  ;;  %v10086_v20 = vpack.i.bf16 %v12754_v38, %v12752_v42 }
 0x927   : > { %v7891_v57 = vadd.f32 %v12508_v33, %v7890_v16 }
 0x928   : > { %v4632_v32 = vpop.f32.mrf.mxu0 }
 0x929   : > { %8433 = vst [vmem:[%s11979_s22 + $0x208] sm:$0xff] %v7891_v57  ;;  %v4633_v28 = vadd.f32 %v11754_v51, %v4632_v32  ;;  %2275 = vadd.xlane.f32.xlu1 %v2274_v31 }
 0x92b   : > { %v5148_v8 = vmul.f32 %v12437_v13, %v4633_v28 }
 0x92c   : > { %v6802_v29 = vpop.f32.mrf.mxu2 }
 0x92d   : > { %v5362_v10 = vpack.c.bf16 %v5148_v8, %v5147_v11  ;;  %v6803_v26 = vadd.f32 %v12701_v56, %v6802_v29 }
 0x92f   : > { %5730 = vmatmul.bf16.gmra.mxu1 %v5362_v10  ;;  %v7337_v47 = vmax.f32 %v6803_v26, 0.0 }
 0x930   : > { %v2261_v33 = vpop.xlane.xlu2 %2260 }
 0x931   : > { %v2837_v24 = vmax.f32 %v2261_v33, 1e-08 }
 0x933   : > { %10654 = vrcp.f32 %v2837_v24 }
 0x934   : > { %v6804_v13 = vpop.f32.mrf.mxu2 }
 0x935   : > { %v6805_v40 = vadd.f32 %v12701_v56, %v6804_v13 }
 0x936   : > { %10082 = vrot.lane.b32.xlu0 %v10081_v50, %s11344_s13 }
 0x937   : > { %v7338_v0 = vmax.f32 %v6805_v40, 0.0 }
 0x939   : > { %v10655_v30 = vpop.eup %10654  ;;  %v7558_v6 = vpack.c.bf16 %v7338_v0, %v7337_v47 }
 0x93a   : > { %v3349_v44 = vmul.f32 %v10655_v30, %v12592_v39 }
 0x93b   : > { %7902 = vmatmul.bf16.gmra.mxu3 %v7558_v6 }
 0x93c   : > { %v3557_v15 = vpack.c.bf16 %v3349_v44, %v3348_v41 }
 0x93e   : > { %10087 = vrot.lane.b32.xlu0 %v10086_v20, %s11344_s13  ;;  %3866 = vrot.lane.b32.xlu2 %v3557_v15, %s11344_s13 }
 0x944   : > { %v4635_v46 = vpop.f32.mrf.mxu0 }
 0x945   : > { %v4636_v62 = vadd.f32 %v11754_v51, %v4635_v46  ;;  %v12776_v46 = vld [vmem:[#allocation14] ss:$0 sm:$0xff] }
 0x947   : > { %v5149_v27 = vmul.f32 %v12474_v54, %v4636_v62  ;;  %v10078_v54 = vpop.permute.xlu2 %10077 }
 0x948   : > { %v10080_v33 = vunpack.i.h.bf16 %v10078_v54  ;;  %v10079_v17 = vunpack.i.l.bf16 %v10078_v54 }
 0x94a   : > { %v2283_v30 = vsel %vm1973_vm0, %v10080_v33, 0.0  ;;  %v2280_v6 = vsel %vm1973_vm0, %v10079_v17, 0.0 }
 0x94c   : > { %v4637_v5 = vpop.f32.mrf.mxu0 }
 0x94d   : > { %v4638_v48 = vadd.f32 %v11754_v51, %v4637_v5  ;;  %v9624_v5 = vld [vmem:[%s11536_s17 + $0x1b0] sm:$0xff]  }
 0x94f   : > { %v5150_v22 = vmul.f32 %v12476_v55, %v4638_v48 }
 0x951   : > { %v5363_v23 = vpack.c.bf16 %v5150_v22, %v5149_v27 }
 0x953   : > { %5735 = vmatmul.bf16.gmra.mxu1 %v5363_v23  ;;  %v12783_v23 = vunpack.c.l.bf16 %v9624_v5 }
 0x954   : > { %v6807_v59 = vpop.f32.mrf.mxu2 }
 0x955   : > { %v6808_v28 = vadd.f32 %v12701_v56, %v6807_v59  ;;  %v12785_v59 = vunpack.c.h.bf16 %v9624_v5 }
 0x957   : > { %v2264_v16 = vpop.xlane.xlu0 %2263  ;;  %v5721_v31 = vpop.f32.mrf.mxu1  ;;  %v7339_v45 = vmax.f32 %v6808_v28, 0.0 }
 0x958   : > { %v2838_v25 = vmax.f32 %v2264_v16, 1e-08  ;;  %v2267_v57 = vpop.xlane.xlu1 %2266  ;;  %v5722_v8 = vadd.f32 %v12615_v18, %v5721_v31 }
 0x959   : > { %v2839_v32 = vmax.f32 %v2267_v57, 1e-08 }
 0x95a   : > { %10656 = vrcp.f32 %v2838_v25  ;;  %v6244_v13 = vmax.f32 %v5722_v8, 0.0 }
 0x95b   : > { %10658 = vrcp.f32 %v2839_v32 }
 0x95c   : > { %v6809_v60 = vpop.f32.mrf.mxu2 }
 0x95d   : > { %v6810_v11 = vadd.f32 %v12701_v56, %v6809_v60 }
 0x95f   : > { %v7340_v55 = vmax.f32 %v6810_v11, 0.0  ;;  %v5723_v29 = vpop.f32.mrf.mxu1 }
 0x960   : > { %v10657_v52 = vpop.eup %10656  ;;  %v5724_v10 = vadd.f32 %v12615_v18, %v5723_v29  ;;  %v9625_v29 = vld [vmem:[%s11536_s17 + $0x1b8] sm:$0xff]  }
 0x961   : > { %v10659_v24 = vpop.eup %10658  ;;  %v3350_v50 = vmul.f32 %v10657_v52, %v12632_v4  ;;  %v7559_v26 = vpack.c.bf16 %v7340_v55, %v7339_v45  ;;  %v10091_v45 = vpack.i.bf16 %v12785_v59, %v12783_v23 }
 0x962   : > { %v3351_v40 = vmul.f32 %v10659_v24, %v12634_v7  ;;  %v6245_v9 = vmax.f32 %v5724_v10, 0.0 }
 0x963   : > { %7907 = vmatmul.bf16.gmra.mxu3 %v7559_v26 }
 0x964   : > { %v3558_v47 = vpack.c.bf16 %v3351_v40, %v3350_v50  ;;  %v6461_v0 = vpack.c.bf16 %v6245_v9, %v6244_v13 }
 0x966   : > { %3868 = vrot.lane.b32.xlu1 %v3558_v47, %s11344_s13  ;;  %6821 = vmatmul.bf16.gmra.mxu2 %v6461_v0 }
 0x967   : > { %2284 = vadd.xlane.f32.xlu2 %v2283_v30 }
 0x968   : > { %2281 = vadd.xlane.f32.xlu0 %v2280_v6 }
 0x96a   : > { %v3863_v41 = vpop.permute.xlu0 %3862 }
 0x96b   : > { %8849 = vmatmul.msk.bf16.gmra.mxu0 %vm1973_vm0, %v3863_v41 }
 0x96c   : > { %v4640_v44 = vpop.f32.mrf.mxu0 }
 0x96d   : > { %v5726_v20 = vpop.f32.mrf.mxu1  ;;  %v7893_v15 = vpop.f32.mrf.mxu3  ;;  %v4641_v48 = vadd.f32 %v11754_v51, %v4640_v44 }
 0x96e   : > { %v7894_v62 = vadd.f32 %v12776_v46, %v7893_v15  ;;  %v5727_v27 = vadd.f32 %v12615_v18, %v5726_v20 }
 0x96f   : > { %v5151_v28 = vmul.f32 %v12483_v1, %v4641_v48  ;;  %v12798_v1 = vunpack.c.l.bf16 %v9625_v29 }
 0x970   : > { %8434 = vst [vmem:[%s11979_s22 + $0x210] sm:$0xff] %v7894_v62  ;;  %v6246_v11 = vmax.f32 %v5727_v27, 0.0 }
 0x971   : > { %v3865_v54 = vpop.permute.xlu1 %3864  ;;  %v2273_v6 = vpop.xlane.xlu2 %2272 }
 0x974   : > { %v4642_v22 = vpop.f32.mrf.mxu0 }
 0x975   : > { %v4643_v16 = vadd.f32 %v11754_v51, %v4642_v22  ;;  %v5728_v31 = vpop.f32.mrf.mxu1  ;;  %v7895_v25 = vpop.f32.mrf.mxu3 }
 0x976   : > { %v5729_v57 = vadd.f32 %v12615_v18, %v5728_v31  ;;  %v7896_v32 = vadd.f32 %v12776_v46, %v7895_v25 }
 0x977   : > { %v5152_v60 = vmul.f32 %v12485_v35, %v4643_v16  ;;  %v12800_v35 = vunpack.c.h.bf16 %v9625_v29 }
 0x978   : > { %v6247_v8 = vmax.f32 %v5729_v57, 0.0  ;;  %8435 = vst [vmem:[%s11979_s22 + $0x218] sm:$0xff] %v7896_v32 }
 0x979   : > { %v5364_v55 = vpack.c.bf16 %v5152_v60, %v5151_v28  ;;  %v10096_v50 = vpack.i.bf16 %v12800_v35, %v12798_v1 }
 0x97a   : > { %v6462_v52 = vpack.c.bf16 %v6247_v8, %v6246_v11 }
 0x97b   : > { %8850 = vmatmul.msk.bf16.gmra.mxu0 %vm1973_vm0, %v3865_v54  ;;  %5740 = vmatmul.bf16.gmra.mxu1 %v5364_v55 }
 0x97c   : > { %6826 = vmatmul.bf16.gmra.mxu2 %v6462_v52  ;;  %v6812_v10 = vpop.f32.mrf.mxu2  ;;  %10092 = vrot.lane.b32.xlu0 %v10091_v45, %s11344_s13  ;;  %v2841_v52 = vmax.f32 %v2273_v6, 1e-08 }
 0x97d   : > { %v7898_v33 = vpop.f32.mrf.mxu3  ;;  %v6813_v26 = vadd.f32 %v12701_v56, %v6812_v10 }
 0x97e   : > { %v7899_v24 = vadd.f32 %v12776_v46, %v7898_v33  ;;  %10660 = vrcp.f32 %v2841_v52 }
 0x97f   : > { %v7341_v47 = vmax.f32 %v6813_v26, 0.0 }
 0x980   : > { %8436 = vst [vmem:[%s11979_s22 + $0x220] sm:$0xff] %v7899_v24 }
 0x984   : > { %v6814_v17 = vpop.f32.mrf.mxu2  ;;  %10097 = vrot.lane.b32.xlu0 %v10096_v50, %s11344_s13 }
 0x985   : > { %v6815_v13 = vadd.f32 %v12701_v56, %v6814_v17  ;;  %v7900_v40 = vpop.f32.mrf.mxu3 }
 0x986   : > { %v7901_v9 = vadd.f32 %v12776_v46, %v7900_v40 }
 0x987   : > { %v7342_v0 = vmax.f32 %v6815_v13, 0.0 }
 0x988   : > { %8437 = vst [vmem:[%s11979_s22 + $0x228] sm:$0xff] %v7901_v9 }
 0x989   : > { %v7560_v30 = vpack.c.bf16 %v7342_v0, %v7341_v47 }
 0x98b   : > { %7912 = vmatmul.bf16.gmra.mxu3 %v7560_v30  ;;  %v10661_v30 = vpop.eup %10660 }
 0x994   : > { %v4645_v41 = vpop.f32.mrf.mxu0 }
 0x995   : > { %v2279_v44 = vpop.xlane.xlu2 %2278  ;;  %v4646_v20 = vadd.f32 %v11754_v51, %v4645_v41  ;;  %v2270_v16 = vpop.xlane.xlu0 %2269 }
 0x996   : > { %v2843_v10 = vmax.f32 %v2279_v44, 1e-08  ;;  %v2840_v50 = vmax.f32 %v2270_v16, 1e-08 }
 0x997   : > { %v5153_v27 = vmul.f32 %v12514_v63, %v4646_v20 }
 0x998   : > { %10662 = vrcp.f32 %v2843_v10 }
 0x99c   : > { %v4647_v15 = vpop.f32.mrf.mxu0 }
 0x99d   : > { %v4648_v62 = vadd.f32 %v11754_v51, %v4647_v15  ;;  %v3867_v5 = vpop.permute.xlu2 %3866 }
 0x99e   : > { %8851 = vmatmul.msk.bf16.gmra.mxu0 %vm1973_vm0, %v3867_v5  ;;  %v6817_v48 = vpop.f32.mrf.mxu2  ;;  %v10663_v6 = vpop.eup %10662  ;;  %v3353_v5 = vmul.f32 %v10661_v30, %v12647_v36 }
 0x99f   : > { %v5154_v22 = vmul.f32 %v12516_v43, %v4648_v62  ;;  %v6818_v25 = vadd.f32 %v12701_v56, %v6817_v48  ;;  %v2276_v43 = vpop.xlane.xlu1 %2275  ;;  %v3355_v15 = vmul.f32 %v10663_v6, %v12672_v21 }
 0x9a0   : > { %v2842_v24 = vmax.f32 %v2276_v43, 1e-08 }
 0x9a1   : > { %v5365_v31 = vpack.c.bf16 %v5154_v22, %v5153_v27  ;;  %v7343_v60 = vmax.f32 %v6818_v25, 0.0  ;;  %v9626_v25 = vld [vmem:[%s11536_s17 + $0x1c0] sm:$0xff]  }
 0x9a2   : > { %10664 = vrcp.f32 %v2842_v24 }
 0x9a3   : > { %5745 = vmatmul.bf16.gmra.mxu1 %v5365_v31  ;;  %10666 = vrcp.f32 %v2840_v50 }
 0x9a6   : > { %v6819_v57 = vpop.f32.mrf.mxu2 }
 0x9a7   : > { %v6820_v32 = vadd.f32 %v12701_v56, %v6819_v57  ;;  %v12832_v57 = vunpack.c.l.bf16 %v9626_v25 }
 0x9a8   : > { %v10083_v28 = vpop.permute.xlu0 %10082  ;;  %v10665_v44 = vpop.eup %10664 }
 0x9a9   : > { %v7344_v11 = vmax.f32 %v6820_v32, 0.0  ;;  %v10085_v8 = vunpack.i.h.bf16 %v10083_v28  ;;  %v10084_v54 = vunpack.i.l.bf16 %v10083_v28  ;;  %v10667_v20 = vpop.eup %10666  ;;  %v3354_v62 = vmul.f32 %v10665_v44, %v12670_v3 }
 0x9aa   : > { %v3352_v48 = vmul.f32 %v10667_v20, %v12645_v12  ;;  %v12834_v32 = vunpack.c.h.bf16 %v9626_v25 }
 0x9ab   : > { %v2289_v45 = vsel %vm1973_vm0, %v10085_v8, 0.0  ;;  %v2286_v55 = vsel %vm1973_vm0, %v10084_v54, 0.0  ;;  %v7561_v63 = vpack.c.bf16 %v7344_v11, %v7343_v60  ;;  %v3560_v16 = vpack.c.bf16 %v3355_v15, %v3354_v62 }
 0x9ac   : > { %v5731_v29 = vpop.f32.mrf.mxu1  ;;  %2290 = vadd.xlane.f32.xlu2 %v2289_v45  ;;  %2287 = vadd.xlane.f32.xlu1 %v2286_v55  ;;  %v3559_v31 = vpack.c.bf16 %v3353_v5, %v3352_v48  ;;  %v10101_v11 = vpack.i.bf16 %v12834_v32, %v12832_v57 }
 0x9ad   : > { %7917 = vmatmul.bf16.gmra.mxu3 %v7561_v63  ;;  %v5732_v17 = vadd.f32 %v12615_v18, %v5731_v29 }
 0x9af   : > { %v6248_v47 = vmax.f32 %v5732_v17, 0.0 }
 0x9b0   : > { %v10088_v33 = vpop.permute.xlu0 %10087 }
 0x9b1   : > { %v10089_v26 = vunpack.i.l.bf16 %v10088_v33 }
 0x9b3   : > { %v2292_v13 = vsel %vm1973_vm0, %v10089_v26, 0.0  ;;  %v10090_v26 = vunpack.i.h.bf16 %v10088_v33 }
 0x9b4   : > { %v5733_v40 = vpop.f32.mrf.mxu1  ;;  %2293 = vadd.xlane.f32.xlu0 %v2292_v13 }
 0x9b5   : > { %v5734_v9 = vadd.f32 %v12615_v18, %v5733_v40  ;;  %v2295_v40 = vsel %vm1973_vm0, %v10090_v26, 0.0 }
 0x9b7   : > { %v6249_v0 = vmax.f32 %v5734_v9, 0.0 }
 0x9b9   : > { %v6463_v41 = vpack.c.bf16 %v6249_v0, %v6248_v47 }
 0x9bb   : > { %6831 = vmatmul.bf16.gmra.mxu2 %v6463_v41 }
 0x9be   : > { %v7903_v27 = vpop.f32.mrf.mxu3 }
 0x9bf   : > { %v7904_v22 = vadd.f32 %v12776_v46, %v7903_v27 }
 0x9c1   : > { %8438 = vst [vmem:[%s11979_s22 + $0x230] sm:$0xff] %v7904_v22 }
 0x9c4   : > { %3870 = vrot.lane.b32.xlu2 %v3559_v31, %s11344_s13 }
 0x9c5   : > { %3872 = vrot.lane.b32.xlu1 %v3560_v16, %s11344_s13 }
 0x9c6   : > { %v7905_v28 = vpop.f32.mrf.mxu3 }
 0x9c7   : > { %v7906_v60 = vadd.f32 %v12776_v46, %v7905_v28 }
 0x9c9   : > { %8439 = vst [vmem:[%s11979_s22 + $0x238] sm:$0xff] %v7906_v60 }
 0x9cd   : > { %10102 = vrot.lane.b32.xlu1 %v10101_v11, %s11344_s13 }
 0x9d0   : > { %v5736_v8 = vpop.f32.mrf.mxu1 }
 0x9d1   : > { %v5737_v54 = vadd.f32 %v12615_v18, %v5736_v8 }
 0x9d3   : > { %v6250_v29 = vmax.f32 %v5737_v54, 0.0 }
 0x9d8   : > { %v5738_v45 = vpop.f32.mrf.mxu1  ;;  %v3869_v55 = vpop.permute.xlu1 %3868 }
 0x9d9   : > { %v5739_v63 = vadd.f32 %v12615_v18, %v5738_v45  ;;  %8852 = vmatmul.msk.bf16.gmra.mxu0 %vm1973_vm0, %v3869_v55  ;;  %v9627_v45 = vld [vmem:[%s11536_s17 + $0x1c8] sm:$0xff]  }
 0x9da   : > { %v2285_v47 = vpop.xlane.xlu2 %2284 }
 0x9db   : > { %v6251_v43 = vmax.f32 %v5739_v63, 0.0  ;;  %v2282_v10 = vpop.xlane.xlu0 %2281  ;;  %v2845_v5 = vmax.f32 %v2285_v47, 1e-08 }
 0x9dc   : > { %v2844_v27 = vmax.f32 %v2282_v10, 1e-08 }
 0x9dd   : > { %v6464_v52 = vpack.c.bf16 %v6251_v43, %v6250_v29  ;;  %10668 = vrcp.f32 %v2845_v5  ;;  %v12859_v29 = vunpack.c.l.bf16 %v9627_v45  ;;  %v12863_v43 = vld [vmem:[#allocation8] ss:$0 sm:$0xff] }
 0x9de   : > { %10670 = vrcp.f32 %v2844_v27 }
 0x9df   : > { %6836 = vmatmul.bf16.gmra.mxu2 %v6464_v52 }
 0x9e3   : > { %v10669_v55 = vpop.eup %10668 }
 0x9e4   : > { %v10671_v63 = vpop.eup %10670 }
 0x9e6   : > { %v7908_v24 = vpop.f32.mrf.mxu3 }
 0x9e7   : > { %v7909_v50 = vadd.f32 %v12776_v46, %v7908_v24  ;;  %v3356_v24 = vmul.f32 %v10671_v63, %v12690_v34 }
 0x9e8   : > { %v4650_v17 = vpop.f32.mrf.mxu0 }
 0x9e9   : > { %8440 = vst [vmem:[%s11979_s22 + $0x240] sm:$0xff] %v7909_v50  ;;  %v6822_v13 = vpop.f32.mrf.mxu2  ;;  %v4651_v0 = vadd.f32 %v11754_v51, %v4650_v17  ;;  %v3357_v50 = vmul.f32 %v10669_v55, %v12692_v14 }
 0x9ea   : > { %v6823_v41 = vadd.f32 %v12701_v56, %v6822_v13 }
 0x9eb   : > { %v5155_v22 = vmul.f32 %v12524_v37, %v4651_v0 }
 0x9ec   : > { %v7345_v31 = vmax.f32 %v6823_v41, 0.0 }
 0x9ed   : > { %2296 = vadd.xlane.f32.xlu2 %v2295_v40 }
 0x9ee   : > { %v7910_v9 = vpop.f32.mrf.mxu3  ;;  %v10093_v18 = vpop.permute.xlu0 %10092 }
 0x9ef   : > { %v7911_v30 = vadd.f32 %v12776_v46, %v7910_v9  ;;  %v10094_v6 = vunpack.i.l.bf16 %v10093_v18  ;;  %v10095_v44 = vunpack.i.h.bf16 %v10093_v18 }
 0x9f0   : > { %v4652_v20 = vpop.f32.mrf.mxu0 }
 0x9f1   : > { %8441 = vst [vmem:[%s11979_s22 + $0x248] sm:$0xff] %v7911_v30  ;;  %v4653_v33 = vadd.f32 %v11754_v51, %v4652_v20  ;;  %v6824_v15 = vpop.f32.mrf.mxu2  ;;  %v2298_v62 = vsel %vm1973_vm0, %v10094_v6, 0.0  ;;  %v2301_v28 = vsel %vm1973_vm0, %v10095_v44, 0.0  ;;  %v3561_v6 = vpack.c.bf16 %v3357_v50, %v3356_v24 }
 0x9f2   : > { %v6825_v48 = vadd.f32 %v12701_v56, %v6824_v15  ;;  %2299 = vadd.xlane.f32.xlu0 %v2298_v62 }
 0x9f3   : > { %v5156_v16 = vmul.f32 %v12526_v53, %v4653_v33  ;;  %v12861_v53 = vunpack.c.h.bf16 %v9627_v45 }
 0x9f4   : > { %v7346_v25 = vmax.f32 %v6825_v48, 0.0 }
 0x9f5   : > { %v5366_v60 = vpack.c.bf16 %v5156_v16, %v5155_v22  ;;  %v10106_v18 = vpack.i.bf16 %v12861_v53, %v12859_v29 }
 0x9f6   : > { %v7562_v11 = vpack.c.bf16 %v7346_v25, %v7345_v31 }
 0x9f7   : > { %5750 = vmatmul.bf16.gmra.mxu1 %v5366_v60  ;;  %2302 = vadd.xlane.f32.xlu1 %v2301_v28 }
 0x9f8   : > { %v4655_v8 = vpop.f32.mrf.mxu0  ;;  %v5741_v54 = vpop.f32.mrf.mxu1  ;;  %7922 = vmatmul.bf16.gmra.mxu3 %v7562_v11 }
 0x9f9   : > { %v4656_v37 = vadd.f32 %v11754_v51, %v4655_v8  ;;  %v5742_v52 = vadd.f32 %v12863_v43, %v5741_v54 }
 0x9fb   : > { %v5157_v13 = vmul.f32 %v12567_v19, %v4656_v37  ;;  %v6252_v47 = vmax.f32 %v5742_v52, 0.0  ;;  %v10098_v37 = vpop.permute.xlu0 %10097 }
 0x9ff   : > { %v6827_v10 = vpop.f32.mrf.mxu2 }
 0xa00   : > { %v4657_v26 = vpop.f32.mrf.mxu0  ;;  %v5743_v17 = vpop.f32.mrf.mxu1  ;;  %v6828_v19 = vadd.f32 %v12701_v56, %v6827_v10  ;;  %v10100_v10 = vunpack.i.h.bf16 %v10098_v37 }
 0xa01   : > { %v4658_v40 = vadd.f32 %v11754_v51, %v4657_v26  ;;  %v5744_v9 = vadd.f32 %v12863_v43, %v5743_v17 }
 0xa02   : > { %v7347_v15 = vmax.f32 %v6828_v19, 0.0 }
 0xa03   : > { %v5158_v0 = vmul.f32 %v12569_v58, %v4658_v40  ;;  %v6253_v30 = vmax.f32 %v5744_v9, 0.0  ;;  %v10099_v9 = vunpack.i.l.bf16 %v10098_v37 }
 0xa05   : > { %v5367_v41 = vpack.c.bf16 %v5158_v0, %v5157_v13  ;;  %v6465_v44 = vpack.c.bf16 %v6253_v30, %v6252_v47  ;;  %10107 = vrot.lane.b32.xlu2 %v10106_v18, %s11344_s13  ;;  %v2307_v0 = vsel %vm1973_vm0, %v10100_v10, 0.0 }
 0xa06   : > { %3874 = vrot.lane.b32.xlu0 %v3561_v6, %s11344_s13 }
 0xa07   : > { %v6829_v20 = vpop.f32.mrf.mxu2  ;;  %5755 = vmatmul.bf16.gmra.mxu1 %v5367_v41  ;;  %6841 = vmatmul.bf16.gmra.mxu2 %v6465_v44  ;;  %v2304_v41 = vsel %vm1973_vm0, %v10099_v9, 0.0 }
 0xa08   : > { %v6830_v33 = vadd.f32 %v12701_v56, %v6829_v20 }
 0xa0a   : > { %v7348_v62 = vmax.f32 %v6830_v33, 0.0 }
 0xa0c   : > { %v7563_v58 = vpack.c.bf16 %v7348_v62, %v7347_v15  ;;  %v9628_v62 = vld [vmem:[%s11536_s17 + $0x1d0] sm:$0xff]  }
 0xa0e   : > { %7927 = vmatmul.bf16.gmra.mxu3 %v7563_v58  ;;  %v7913_v5 = vpop.f32.mrf.mxu3  ;;  %v12900_v58 = vunpack.c.l.bf16 %v9628_v62 }
 0xa0f   : > { %v7914_v48 = vadd.f32 %v12776_v46, %v7913_v5  ;;  %v12902_v5 = vunpack.c.h.bf16 %v9628_v62 }
 0xa11   : > { %8442 = vst [vmem:[%s11979_s22 + $0x250] sm:$0xff] %v7914_v48 }
 0xa16   : > { %v7915_v27 = vpop.f32.mrf.mxu3 }
 0xa17   : > { %v7916_v22 = vadd.f32 %v12776_v46, %v7915_v27 }
 0xa19   : > { %8443 = vst [vmem:[%s11979_s22 + $0x258] sm:$0xff] %v7916_v22  ;;  %v10111_v22 = vpack.i.bf16 %v12902_v5, %v12900_v58 }
 0xa1b   : > { %v4660_v16 = vpop.f32.mrf.mxu0 }
 0xa1c   : > { %v4661_v8 = vadd.f32 %v11754_v51, %v4660_v16 }
 0xa1e   : > { %v5159_v55 = vmul.f32 %v12590_v49, %v4661_v8 }
 0xa1f   : > { %v2291_v31 = vpop.xlane.xlu2 %2290  ;;  %v2288_v25 = vpop.xlane.xlu1 %2287 }
 0xa20   : > { %v5746_v28 = vpop.f32.mrf.mxu1  ;;  %v2847_v60 = vmax.f32 %v2291_v31, 1e-08  ;;  %v2846_v11 = vmax.f32 %v2288_v25, 1e-08  ;;  %v9629_v31 = vld [vmem:[%s11536_s17 + $0x1d8] sm:$0xff]  }
 0xa21   : > { %v5747_v52 = vadd.f32 %v12863_v43, %v5746_v28  ;;  %v12909_v28 = vunpack.c.l.bf16 %v9629_v31 }
 0xa22   : > { %10672 = vrcp.f32 %v2847_v60  ;;  %v12911_v60 = vunpack.c.h.bf16 %v9629_v31 }
 0xa23   : > { %10674 = vrcp.f32 %v2846_v11  ;;  %v4662_v54 = vpop.f32.mrf.mxu0 }
 0xa24   : > { %v4663_v45 = vadd.f32 %v11754_v51, %v4662_v54 }
 0xa26   : > { %v5160_v63 = vmul.f32 %v12592_v39, %v4663_v45  ;;  %v6254_v39 = vmax.f32 %v5747_v52, 0.0  ;;  %v10116_v45 = vpack.i.bf16 %v12911_v60, %v12909_v28 }
 0xa27   : > { %v3871_v24 = vpop.permute.xlu2 %3870 }
 0xa28   : > { %v10673_v50 = vpop.eup %10672  ;;  %v5748_v26 = vpop.f32.mrf.mxu1  ;;  %8853 = vmatmul.msk.bf16.gmra.mxu0 %vm1973_vm0, %v3871_v24  ;;  %v5368_v17 = vpack.c.bf16 %v5160_v63, %v5159_v55 }
 0xa29   : > { %v10675_v13 = vpop.eup %10674  ;;  %v3359_v40 = vmul.f32 %v10673_v50, %v12744_v2  ;;  %v5749_v18 = vadd.f32 %v12863_v43, %v5748_v26  ;;  %v2294_v50 = vpop.xlane.xlu0 %2293 }
 0xa2a   : > { %v3358_v49 = vmul.f32 %v10675_v13, %v12742_v61  ;;  %5760 = vmatmul.bf16.gmra.mxu1 %v5368_v17  ;;  %v2848_v26 = vmax.f32 %v2294_v50, 1e-08 }
 0xa2b   : > { %v6255_v47 = vmax.f32 %v5749_v18, 0.0 }
 0xa2c   : > { %v3562_v30 = vpack.c.bf16 %v3359_v40, %v3358_v49  ;;  %10676 = vrcp.f32 %v2848_v26 }
 0xa2d   : > { %v6466_v6 = vpack.c.bf16 %v6255_v47, %v6254_v39 }
 0xa2e   : > { %3876 = vrot.lane.b32.xlu1 %v3562_v30, %s11344_s13  ;;  %2308 = vadd.xlane.f32.xlu2 %v2307_v0 }
 0xa2f   : > { %6846 = vmatmul.bf16.gmra.mxu2 %v6466_v6 }
 0xa30   : > { %v7918_v44 = vpop.f32.mrf.mxu3  ;;  %2305 = vadd.xlane.f32.xlu0 %v2304_v41 }
 0xa31   : > { %v7919_v19 = vadd.f32 %v12776_v46, %v7918_v44 }
 0xa32   : > { %v10677_v41 = vpop.eup %10676 }
 0xa33   : > { %8444 = vst [vmem:[%s11979_s22 + $0x260] sm:$0xff] %v7919_v19 }
 0xa37   : > { %v3873_v20 = vpop.permute.xlu1 %3872 }
 0xa38   : > { %8854 = vmatmul.msk.bf16.gmra.mxu0 %vm1973_vm0, %v3873_v20  ;;  %v7920_v33 = vpop.f32.mrf.mxu3  ;;  %v3360_v20 = vmul.f32 %v10677_v41, %v12752_v42 }
 0xa39   : > { %v7921_v15 = vadd.f32 %v12776_v46, %v7920_v33 }
 0xa3b   : > { %8445 = vst [vmem:[%s11979_s22 + $0x268] sm:$0xff] %v7921_v15 }
 0xa3e   : > { %v6832_v48 = vpop.f32.mrf.mxu2 }
 0xa3f   : > { %v10103_v27 = vpop.permute.xlu1 %10102  ;;  %v6833_v11 = vadd.f32 %v12701_v56, %v6832_v48 }
 0xa40   : > { %v10105_v16 = vunpack.i.h.bf16 %v10103_v27  ;;  %v10104_v52 = vunpack.i.l.bf16 %v10103_v27 }
 0xa41   : > { %v7349_v55 = vmax.f32 %v6833_v11, 0.0 }
 0xa42   : > { %v2313_v25 = vsel %vm1973_vm0, %v10105_v16, 0.0  ;;  %v2310_v10 = vsel %vm1973_vm0, %v10104_v52, 0.0 }
 0xa43   : > { %2314 = vadd.xlane.f32.xlu2 %v2313_v25 }
 0xa44   : > { %10112 = vrot.lane.b32.xlu0 %v10111_v22, %s11344_s13 }
 0xa46   : > { %v6834_v8 = vpop.f32.mrf.mxu2 }
 0xa47   : > { %v6835_v54 = vadd.f32 %v12701_v56, %v6834_v8 }
 0xa49   : > { %v7350_v63 = vmax.f32 %v6835_v54, 0.0 }
 0xa4b   : > { %v7564_v37 = vpack.c.bf16 %v7350_v63, %v7349_v55 }
 0xa4c   : > { %10117 = vrot.lane.b32.xlu0 %v10116_v45, %s11344_s13 }
 0xa4d   : > { %7932 = vmatmul.bf16.gmra.mxu3 %v7564_v37 }
 0xa56   : > { %v4665_v24 = vpop.f32.mrf.mxu0 }
 0xa57   : > { %v4666_v17 = vadd.f32 %v11754_v51, %v4665_v24 }
 0xa58   : > { %2311 = vadd.xlane.f32.xlu1 %v2310_v10 }
 0xa59   : > { %v5161_v18 = vmul.f32 %v12632_v4, %v4666_v17 }
 0xa5e   : > { %v4667_v13 = vpop.f32.mrf.mxu0 }
 0xa5f   : > { %v4668_v40 = vadd.f32 %v11754_v51, %v4667_v13 }
 0xa60   : > { %v2297_v9 = vpop.xlane.xlu2 %2296 }
 0xa61   : > { %v5162_v49 = vmul.f32 %v12634_v7, %v4668_v40  ;;  %v2849_v39 = vmax.f32 %v2297_v9, 1e-08  ;;  %v9630_v40 = vld [vmem:[%s11536_s17 + $0x1e0] sm:$0xff]  }
 0xa62   : > { %v6837_v47 = vpop.f32.mrf.mxu2 }
 0xa63   : > { %10678 = vrcp.f32 %v2849_v39  ;;  %v5369_v0 = vpack.c.bf16 %v5162_v49, %v5161_v18  ;;  %v6838_v19 = vadd.f32 %v12701_v56, %v6837_v47  ;;  %v12938_v18 = vunpack.c.l.bf16 %v9630_v40 }
 0xa64   : > { %v12940_v49 = vunpack.c.h.bf16 %v9630_v40 }
 0xa65   : > { %5765 = vmatmul.bf16.gmra.mxu1 %v5369_v0  ;;  %v2300_v30 = vpop.xlane.xlu0 %2299  ;;  %v7351_v22 = vmax.f32 %v6838_v19, 0.0 }
 0xa66   : > { %v2850_v6 = vmax.f32 %v2300_v30, 1e-08  ;;  %v10121_v30 = vpack.i.bf16 %v12940_v49, %v12938_v18 }
 0xa68   : > { %10680 = vrcp.f32 %v2850_v6  ;;  %v10108_v27 = vpop.permute.xlu2 %10107  ;;  %v9631_v6 = vld [vmem:[%s11536_s17 + $0x1e8] sm:$0xff]  }
 0xa69   : > { %v10679_v44 = vpop.eup %10678  ;;  %v10109_v11 = vunpack.i.l.bf16 %v10108_v27  ;;  %v12950_v19 = vunpack.c.h.bf16 %v9631_v6 }
 0xa6a   : > { %v3361_v33 = vmul.f32 %v10679_v44, %v12754_v38  ;;  %v6839_v15 = vpop.f32.mrf.mxu2  ;;  %v2303_v4 = vpop.xlane.xlu1 %2302  ;;  %v12948_v44 = vunpack.c.l.bf16 %v9631_v6 }
 0xa6b   : > { %v6840_v7 = vadd.f32 %v12701_v56, %v6839_v15  ;;  %v2851_v62 = vmax.f32 %v2303_v4, 1e-08  ;;  %v2316_v45 = vsel %vm1973_vm0, %v10109_v11, 0.0 }
 0xa6c   : > { %v3563_v48 = vpack.c.bf16 %v3361_v33, %v3360_v20  ;;  %v10126_v4 = vpack.i.bf16 %v12950_v19, %v12948_v44 }
 0xa6d   : > { %v7352_v16 = vmax.f32 %v6840_v7, 0.0  ;;  %10682 = vrcp.f32 %v2851_v62 }
 0xa6e   : > { %3878 = vrot.lane.b32.xlu2 %v3563_v48, %s11344_s13  ;;  %v10681_v31 = vpop.eup %10680  ;;  %v12956_v48 = vld [vmem:[#allocation11] ss:$0 sm:$0xff] }
 0xa6f   : > { %v7565_v25 = vpack.c.bf16 %v7352_v16, %v7351_v22  ;;  %v3362_v8 = vmul.f32 %v10681_v31, %v12783_v23 }
 0xa71   : > { %7937 = vmatmul.bf16.gmra.mxu3 %v7565_v25  ;;  %v10110_v25 = vunpack.i.h.bf16 %v10108_v27 }
 0xa73   : > { %v10683_v54 = vpop.eup %10682 }
 0xa74   : > { %v3363_v56 = vmul.f32 %v10683_v54, %v12785_v59  ;;  %v5751_v55 = vpop.f32.mrf.mxu1 }
 0xa75   : > { %v5752_v52 = vadd.f32 %v12863_v43, %v5751_v55  ;;  %v2319_v55 = vsel %vm1973_vm0, %v10110_v25, 0.0 }
 0xa76   : > { %v3564_v63 = vpack.c.bf16 %v3363_v56, %v3362_v8  ;;  %2317 = vadd.xlane.f32.xlu0 %v2316_v45 }
 0xa77   : > { %v6256_v17 = vmax.f32 %v5752_v52, 0.0 }
 0xa78   : > { %v3875_v37 = vpop.permute.xlu0 %3874  ;;  %3880 = vrot.lane.b32.xlu1 %v3564_v63, %s11344_s13 }
 0xa79   : > { %8855 = vmatmul.msk.bf16.gmra.mxu0 %vm1973_vm0, %v3875_v37 }
 0xa7b   : > { %v7923_v10 = vpop.f32.mrf.mxu3 }
 0xa7c   : > { %v7924_v24 = vadd.f32 %v12776_v46, %v7923_v10  ;;  %v5753_v50 = vpop.f32.mrf.mxu1 }
 0xa7d   : > { %v5754_v26 = vadd.f32 %v12863_v43, %v5753_v50 }
 0xa7e   : > { %8446 = vst [vmem:[%s11979_s22 + $0x270] sm:$0xff] %v7924_v24 }
 0xa7f   : > { %v6257_v13 = vmax.f32 %v5754_v26, 0.0 }
 0xa81   : > { %v6467_v9 = vpack.c.bf16 %v6257_v13, %v6256_v17 }
 0xa83   : > { %6851 = vmatmul.bf16.gmra.mxu2 %v6467_v9  ;;  %v7925_v39 = vpop.f32.mrf.mxu3 }
 0xa84   : > { %v7926_v47 = vadd.f32 %v12776_v46, %v7925_v39  ;;  %v5756_v0 = vpop.f32.mrf.mxu1 }
 0xa85   : > { %v5757_v20 = vadd.f32 %v12863_v43, %v5756_v0 }
 0xa86   : > { %8447 = vst [vmem:[%s11979_s22 + $0x278] sm:$0xff] %v7926_v47 }
 0xa87   : > { %v6258_v7 = vmax.f32 %v5757_v20, 0.0 }
 0xa8a   : > { %v6842_v41 = vpop.f32.mrf.mxu2  ;;  %10122 = vrot.lane.b32.xlu0 %v10121_v30, %s11344_s13 }
 0xa8b   : > { %v6843_v22 = vadd.f32 %v12956_v48, %v6842_v41 }
 0xa8c   : > { %v5758_v33 = vpop.f32.mrf.mxu1 }
 0xa8d   : > { %v5759_v15 = vadd.f32 %v12863_v43, %v5758_v33  ;;  %v7353_v45 = vmax.f32 %v6843_v22, 0.0 }
 0xa8f   : > { %v6259_v62 = vmax.f32 %v5759_v15, 0.0 }
 0xa91   : > { %v7928_v16 = vpop.f32.mrf.mxu3  ;;  %v6468_v31 = vpack.c.bf16 %v6259_v62, %v6258_v7 }
 0xa92   : > { %v7929_v11 = vadd.f32 %v12776_v46, %v7928_v16  ;;  %v6844_v8 = vpop.f32.mrf.mxu2  ;;  %10127 = vrot.lane.b32.xlu0 %v10126_v4, %s11344_s13 }
 0xa93   : > { %v6845_v54 = vadd.f32 %v12956_v48, %v6844_v8  ;;  %6856 = vmatmul.bf16.gmra.mxu2 %v6468_v31 }
 0xa94   : > { %8448 = vst [vmem:[%s11979_s22 + $0x280] sm:$0xff] %v7929_v11 }
 0xa95   : > { %v7354_v56 = vmax.f32 %v6845_v54, 0.0 }
 0xa97   : > { %2320 = vadd.xlane.f32.xlu2 %v2319_v55  ;;  %v7566_v63 = vpack.c.bf16 %v7354_v56, %v7353_v45 }
 0xa99   : > { %v7930_v37 = vpop.f32.mrf.mxu3  ;;  %7942 = vmatmul.bf16.gmra.mxu3 %v7566_v63 }
 0xa9a   : > { %v7931_v52 = vadd.f32 %v12776_v46, %v7930_v37 }
 0xa9c   : > { %8449 = vst [vmem:[%s11979_s22 + $0x288] sm:$0xff] %v7931_v52 }
 0xaa0   : > { %v3877_v27 = vpop.permute.xlu1 %3876 }
 0xaa1   : > { %8856 = vmatmul.msk.bf16.gmra.mxu0 %vm1973_vm0, %v3877_v27  ;;  %v2309_v4 = vpop.xlane.xlu2 %2308 }
 0xaa2   : > { %v2853_v56 = vmax.f32 %v2309_v4, 1e-08 }
 0xaa3   : > { %v2306_v13 = vpop.xlane.xlu0 %2305 }
 0xaa4   : > { %v2852_v52 = vmax.f32 %v2306_v13, 1e-08  ;;  %10684 = vrcp.f32 %v2853_v56 }
 0xaa5   : > { %v4670_v10 = vpop.f32.mrf.mxu0 }
 0xaa6   : > { %v4671_v50 = vadd.f32 %v11754_v51, %v4670_v10  ;;  %10686 = vrcp.f32 %v2852_v52 }
 0xaa7   : > { %v5761_v24 = vpop.f32.mrf.mxu1 }
 0xaa8   : > { %v5762_v17 = vadd.f32 %v12863_v43, %v5761_v24  ;;  %v5163_v39 = vmul.f32 %v12645_v12, %v4671_v50 }
 0xaaa   : > { %v6260_v30 = vmax.f32 %v5762_v17, 0.0 }
 0xaad   : > { %v4672_v26 = vpop.f32.mrf.mxu0 }
 0xaae   : > { %v4673_v40 = vadd.f32 %v11754_v51, %v4672_v26 }
 0xaaf   : > { %v5763_v9 = vpop.f32.mrf.mxu1 }
 0xab0   : > { %v5164_v47 = vmul.f32 %v12647_v36, %v4673_v40  ;;  %v5764_v0 = vadd.f32 %v12863_v43, %v5763_v9  ;;  %v10685_v9 = vpop.eup %10684 }
 0xab1   : > { %v3365_v13 = vmul.f32 %v10685_v9, %v12800_v35 }
 0xab2   : > { %v6261_v6 = vmax.f32 %v5764_v0, 0.0  ;;  %v6847_v41 = vpop.f32.mrf.mxu2  ;;  %v5370_v20 = vpack.c.bf16 %v5164_v47, %v5163_v39  ;;  %v10687_v47 = vpop.eup %10686 }
 0xab3   : > { %v6848_v16 = vadd.f32 %v12956_v48, %v6847_v41 }
 0xab4   : > { %5770 = vmatmul.bf16.gmra.mxu1 %v5370_v20  ;;  %v6469_v33 = vpack.c.bf16 %v6261_v6, %v6260_v30 }
 0xab5   : > { %v4675_v15 = vpop.f32.mrf.mxu0  ;;  %v7355_v8 = vmax.f32 %v6848_v16, 0.0 }
 0xab6   : > { %6861 = vmatmul.bf16.gmra.mxu2 %v6469_v33  ;;  %v10113_v7 = vpop.permute.xlu0 %10112  ;;  %v4676_v11 = vadd.f32 %v11754_v51, %v4675_v15  ;;  %v2315_v63 = vpop.xlane.xlu2 %2314 }
 0xab7   : > { %v10115_v62 = vunpack.i.h.bf16 %v10113_v7  ;;  %v10114_v22 = vunpack.i.l.bf16 %v10113_v7  ;;  %v2855_v40 = vmax.f32 %v2315_v63, 1e-08  ;;  %v9632_v7 = vld [vmem:[%s11536_s17 + $0x1f0] sm:$0xff]  }
 0xab8   : > { %v5165_v24 = vmul.f32 %v12670_v3, %v4676_v11 }
 0xab9   : > { %v2325_v12 = vsel %vm1973_vm0, %v10115_v62, 0.0  ;;  %v2322_v36 = vsel %vm1973_vm0, %v10114_v22, 0.0  ;;  %10688 = vrcp.f32 %v2855_v40 }
 0xaba   : > { %v6849_v31 = vpop.f32.mrf.mxu2  ;;  %2326 = vadd.xlane.f32.xlu2 %v2325_v12  ;;  %2323 = vadd.xlane.f32.xlu1 %v2322_v36  ;;  %v12993_v12 = vunpack.c.l.bf16 %v9632_v7  ;;  %v12995_v36 = vunpack.c.h.bf16 %v9632_v7 }
 0xabb   : > { %v6850_v25 = vadd.f32 %v12956_v48, %v6849_v31 }
 0xabc   : > { %v10131_v31 = vpack.i.bf16 %v12995_v36, %v12993_v12 }
 0xabd   : > { %v7356_v54 = vmax.f32 %v6850_v25, 0.0  ;;  %v4677_v45 = vpop.f32.mrf.mxu0 }
 0xabe   : > { %v4678_v55 = vadd.f32 %v11754_v51, %v4677_v45  ;;  %v10118_v37 = vpop.permute.xlu0 %10117 }
 0xabf   : > { %v7567_v27 = vpack.c.bf16 %v7356_v54, %v7355_v8  ;;  %v10119_v10 = vunpack.i.l.bf16 %v10118_v37  ;;  %v10689_v30 = vpop.eup %10688 }
 0xac0   : > { %v5166_v50 = vmul.f32 %v12672_v21, %v4678_v55  ;;  %v3364_v21 = vmul.f32 %v10687_v47, %v12798_v1  ;;  %v3367_v33 = vmul.f32 %v10689_v30, %v12834_v32 }
 0xac1   : > { %7947 = vmatmul.bf16.gmra.mxu3 %v7567_v27  ;;  %v2328_v26 = vsel %vm1973_vm0, %v10119_v10, 0.0 }
 0xac2   : > { %v5371_v17 = vpack.c.bf16 %v5166_v50, %v5165_v24  ;;  %2329 = vadd.xlane.f32.xlu0 %v2328_v26  ;;  %v3565_v41 = vpack.c.bf16 %v3365_v13, %v3364_v21  ;;  %v10120_v24 = vunpack.i.h.bf16 %v10118_v37 }
 0xac4   : > { %5775 = vmatmul.bf16.gmra.mxu1 %v5371_v17  ;;  %v2331_v26 = vsel %vm1973_vm0, %v10120_v24, 0.0 }
 0xac8   : > { %v3879_v39 = vpop.permute.xlu2 %3878 }
 0xac9   : > { %8857 = vmatmul.msk.bf16.gmra.mxu0 %vm1973_vm0, %v3879_v39 }
 0xacb   : > { %v2312_v3 = vpop.xlane.xlu1 %2311 }
 0xacc   : > { %v2854_v0 = vmax.f32 %v2312_v3, 1e-08 }
 0xace   : > { %10690 = vrcp.f32 %v2854_v0 }
 0xad0   : > { %v7933_v6 = vpop.f32.mrf.mxu3 }
 0xad1   : > { %v7934_v20 = vadd.f32 %v12776_v46, %v7933_v6 }
 0xad2   : > { %3882 = vrot.lane.b32.xlu2 %v3565_v41, %s11344_s13 }
 0xad3   : > { %8450 = vst [vmem:[%s11979_s22 + $0x290] sm:$0xff] %v7934_v20 }
 0xad4   : > { %v10691_v15 = vpop.eup %10690 }
 0xad5   : > { %v3366_v4 = vmul.f32 %v10691_v15, %v12832_v57 }
 0xad7   : > { %v3566_v62 = vpack.c.bf16 %v3367_v33, %v3366_v4  ;;  %v9633_v33 = vld [vmem:[%s11536_s17 + $0x1f8] sm:$0xff]  }
 0xad8   : > { %v7935_v22 = vpop.f32.mrf.mxu3  ;;  %v13016_v7 = vunpack.c.l.bf16 %v9633_v33 }
 0xad9   : > { %v7936_v16 = vadd.f32 %v12776_v46, %v7935_v22  ;;  %3884 = vrot.lane.b32.xlu1 %v3566_v62, %s11344_s13  ;;  %v13018_v62 = vunpack.c.h.bf16 %v9633_v33 }
 0xadb   : > { %8451 = vst [vmem:[%s11979_s22 + $0x298] sm:$0xff] %v7936_v16  ;;  %v10136_v16 = vpack.i.bf16 %v13018_v62, %v13016_v7 }
 0xae1   : > { %10132 = vrot.lane.b32.xlu1 %v10131_v31, %s11344_s13 }
 0xae2   : > { %v5766_v25 = vpop.f32.mrf.mxu1 }
 0xae3   : > { %v5767_v11 = vadd.f32 %v12863_v43, %v5766_v25 }
 0xae5   : > { %v6262_v56 = vmax.f32 %v5767_v11, 0.0 }
 0xae9   : > { %v2318_v52 = vpop.xlane.xlu0 %2317 }
 0xaea   : > { %v5768_v8 = vpop.f32.mrf.mxu1  ;;  %v3881_v54 = vpop.permute.xlu1 %3880  ;;  %v2856_v20 = vmax.f32 %v2318_v52, 1e-08 }
 0xaeb   : > { %v5769_v45 = vadd.f32 %v12863_v43, %v5768_v8  ;;  %8858 = vmatmul.msk.bf16.gmra.mxu0 %vm1973_vm0, %v3881_v54 }
 0xaec   : > { %10692 = vrcp.f32 %v2856_v20 }
 0xaed   : > { %v6263_v55 = vmax.f32 %v5769_v45, 0.0 }
 0xaef   : > { %v6470_v63 = vpack.c.bf16 %v6263_v55, %v6262_v56 }
 0xaf1   : > { %6866 = vmatmul.bf16.gmra.mxu2 %v6470_v63 }
 0xaf2   : > { %v10693_v31 = vpop.eup %10692 }
 0xaf3   : > { %v3368_v45 = vmul.f32 %v10693_v31, %v12859_v29 }
 0xaf4   : > { %v7938_v27 = vpop.f32.mrf.mxu3 }
 0xaf5   : > { %v7939_v10 = vadd.f32 %v12776_v46, %v7938_v27 }
 0xaf6   : > { %v4680_v50 = vpop.f32.mrf.mxu0 }
 0xaf7   : > { %8452 = vst [vmem:[%s11979_s22 + $0x2a0] sm:$0xff] %v7939_v10  ;;  %v4681_v9 = vadd.f32 %v11754_v51, %v4680_v50  ;;  %v13029_v10 = vld [vmem:[#allocation14] ss:$0 sm:$0xff] }
 0xaf9   : > { %v5167_v37 = vmul.f32 %v12690_v34, %v4681_v9 }
 0xafb   : > { %2332 = vadd.xlane.f32.xlu2 %v2331_v26 }
 0xafc   : > { %v7940_v17 = vpop.f32.mrf.mxu3  ;;  %v10123_v40 = vpop.permute.xlu0 %10122 }
 0xafd   : > { %v7941_v39 = vadd.f32 %v12776_v46, %v7940_v17  ;;  %v10124_v47 = vunpack.i.l.bf16 %v10123_v40  ;;  %v10125_v6 = vunpack.i.h.bf16 %v10123_v40 }
 0xafe   : > { %v4682_v3 = vpop.f32.mrf.mxu0 }
 0xaff   : > { %8453 = vst [vmem:[%s11979_s22 + $0x2a8] sm:$0xff] %v7941_v39  ;;  %v4683_v21 = vadd.f32 %v11754_v51, %v4682_v3  ;;  %v2334_v13 = vsel %vm1973_vm0, %v10124_v47, 0.0  ;;  %v2337_v46 = vsel %vm1973_vm0, %v10125_v6, 0.0 }
 0xb00   : > { %2335 = vadd.xlane.f32.xlu0 %v2334_v13 }
 0xb01   : > { %v5168_v0 = vmul.f32 %v12692_v14, %v4683_v21 }
 0xb03   : > { %v5372_v30 = vpack.c.bf16 %v5168_v0, %v5167_v37 }
 0xb05   : > { %5780 = vmatmul.bf16.gmra.mxu1 %v5372_v30 }
 0xb06   : > { %v6852_v41 = vpop.f32.mrf.mxu2 }
 0xb07   : > { %v6853_v34 = vadd.f32 %v12956_v48, %v6852_v41 }
 0xb09   : > { %v7357_v25 = vmax.f32 %v6853_v34, 0.0 }
 0xb0a   : > { %v2321_v15 = vpop.xlane.xlu2 %2320 }
 0xb0b   : > { %v2857_v4 = vmax.f32 %v2321_v15, 1e-08  ;;  %2338 = vadd.xlane.f32.xlu1 %v2337_v46 }
 0xb0d   : > { %10694 = vrcp.f32 %v2857_v4  ;;  %v10128_v4 = vpop.permute.xlu0 %10127 }
 0xb0e   : > { %v6854_v14 = vpop.f32.mrf.mxu2  ;;  %v10130_v34 = vunpack.i.h.bf16 %v10128_v4 }
 0xb0f   : > { %v6855_v22 = vadd.f32 %v12956_v48, %v6854_v14 }
 0xb11   : > { %v7358_v11 = vmax.f32 %v6855_v22, 0.0 }
 0xb13   : > { %v10695_v8 = vpop.eup %10694  ;;  %v7568_v54 = vpack.c.bf16 %v7358_v11, %v7357_v25  ;;  %10137 = vrot.lane.b32.xlu2 %v10136_v16, %s11344_s13 }
 0xb14   : > { %v3369_v56 = vmul.f32 %v10695_v8, %v12861_v53  ;;  %v2343_v8 = vsel %vm1973_vm0, %v10130_v34, 0.0 }
 0xb15   : > { %7952 = vmatmul.bf16.gmra.mxu3 %v7568_v54 }
 0xb16   : > { %v6857_v55 = vpop.f32.mrf.mxu2  ;;  %v3567_v63 = vpack.c.bf16 %v3369_v56, %v3368_v45  ;;  %v10129_v56 = vunpack.i.l.bf16 %v10128_v4 }
 0xb17   : > { %v6858_v27 = vadd.f32 %v12956_v48, %v6857_v55 }
 0xb18   : > { %3886 = vrot.lane.b32.xlu0 %v3567_v63, %s11344_s13 }
 0xb19   : > { %v7359_v40 = vmax.f32 %v6858_v27, 0.0  ;;  %v2340_v27 = vsel %vm1973_vm0, %v10129_v56, 0.0 }
 0xb1c   : > { %v7943_v52 = vpop.f32.mrf.mxu3 }
 0xb1d   : > { %v7944_v24 = vadd.f32 %v13029_v10, %v7943_v52 }
 0xb1e   : > { %v4685_v50 = vpop.f32.mrf.mxu0  ;;  %v6859_v26 = vpop.f32.mrf.mxu2 }
 0xb1f   : > { %8454 = vst [vmem:[%s11979_s22 + $0x2b0] sm:$0xff] %v7944_v24  ;;  %v6860_v17 = vadd.f32 %v12956_v48, %v6859_v26  ;;  %v4686_v3 = vadd.f32 %v11754_v51, %v4685_v50 }
 0xb21   : > { %v7360_v9 = vmax.f32 %v6860_v17, 0.0  ;;  %v5169_v0 = vmul.f32 %v12742_v61, %v4686_v3 }
 0xb23   : > { %v7569_v39 = vpack.c.bf16 %v7360_v9, %v7359_v40 }
 0xb24   : > { %v7945_v47 = vpop.f32.mrf.mxu3 }
 0xb25   : > { %v7946_v21 = vadd.f32 %v13029_v10, %v7945_v47  ;;  %7957 = vmatmul.bf16.gmra.mxu3 %v7569_v39 }
 0xb26   : > { %v4687_v13 = vpop.f32.mrf.mxu0 }
 0xb27   : > { %8455 = vst [vmem:[%s11979_s22 + $0x2b8] sm:$0xff] %v7946_v21  ;;  %v4688_v37 = vadd.f32 %v11754_v51, %v4687_v13 }
 0xb29   : > { %v5170_v30 = vmul.f32 %v12744_v2, %v4688_v37 }
 0xb2b   : > { %v5373_v6 = vpack.c.bf16 %v5170_v30, %v5169_v0 }
 0xb2d   : > { %5785 = vmatmul.bf16.gmra.mxu1 %v5373_v6  ;;  %v2327_v41 = vpop.xlane.xlu2 %2326  ;;  %v2324_v20 = vpop.xlane.xlu1 %2323  ;;  %v9634_v6 = vld [vmem:[%s11536_s17 + $0x200] sm:$0xff]  }
 0xb2e   : > { %v2859_v33 = vmax.f32 %v2327_v41, 1e-08  ;;  %v2858_v15 = vmax.f32 %v2324_v20, 1e-08 }
 0xb30   : > { %10696 = vrcp.f32 %v2859_v33 }
 0xb31   : > { %10698 = vrcp.f32 %v2858_v15  ;;  %v5771_v46 = vpop.f32.mrf.mxu1 }
 0xb32   : > { %v5772_v31 = vadd.f32 %v12863_v43, %v5771_v46 }
 0xb34   : > { %v6264_v55 = vmax.f32 %v5772_v31, 0.0 }
 0xb35   : > { %v3883_v14 = vpop.permute.xlu2 %3882 }
 0xb36   : > { %v10697_v22 = vpop.eup %10696  ;;  %8859 = vmatmul.msk.bf16.gmra.mxu0 %vm1973_vm0, %v3883_v14  ;;  %v13058_v14 = vunpack.c.l.bf16 %v9634_v6 }
 0xb37   : > { %v10699_v16 = vpop.eup %10698  ;;  %v3371_v61 = vmul.f32 %v10697_v22, %v12902_v5  ;;  %v13060_v22 = vunpack.c.h.bf16 %v9634_v6 }
 0xb38   : > { %v3370_v2 = vmul.f32 %v10699_v16, %v12900_v58 }
 0xb39   : > { %v6862_v25 = vpop.f32.mrf.mxu2  ;;  %v5773_v11 = vpop.f32.mrf.mxu1  ;;  %v10141_v31 = vpack.i.bf16 %v13060_v22, %v13058_v14 }
 0xb3a   : > { %v5774_v54 = vadd.f32 %v12863_v43, %v5773_v11  ;;  %v3568_v45 = vpack.c.bf16 %v3371_v61, %v3370_v2  ;;  %v6863_v24 = vadd.f32 %v12956_v48, %v6862_v25 }
 0xb3c   : > { %v6265_v63 = vmax.f32 %v5774_v54, 0.0  ;;  %3888 = vrot.lane.b32.xlu1 %v3568_v45, %s11344_s13  ;;  %2344 = vadd.xlane.f32.xlu2 %v2343_v8  ;;  %v7361_v40 = vmax.f32 %v6863_v24, 0.0  ;;  %v9635_v8 = vld [vmem:[%s11536_s17 + $0x208] sm:$0xff]  }
 0xb3d   : > { %v13071_v56 = vunpack.c.l.bf16 %v9635_v8 }
 0xb3e   : > { %v6471_v52 = vpack.c.bf16 %v6265_v63, %v6264_v55  ;;  %v13073_v55 = vunpack.c.h.bf16 %v9635_v8 }
 0xb40   : > { %6871 = vmatmul.bf16.gmra.mxu2 %v6471_v52  ;;  %v2330_v52 = vpop.xlane.xlu0 %2329 }
 0xb41   : > { %v6864_v50 = vpop.f32.mrf.mxu2  ;;  %v5776_v26 = vpop.f32.mrf.mxu1  ;;  %v2860_v24 = vmax.f32 %v2330_v52, 1e-08 }
 0xb42   : > { %v6865_v17 = vadd.f32 %v12956_v48, %v6864_v50  ;;  %2341 = vadd.xlane.f32.xlu0 %v2340_v27  ;;  %v5777_v13 = vadd.f32 %v12863_v43, %v5776_v26 }
 0xb43   : > { %10700 = vrcp.f32 %v2860_v24 }
 0xb44   : > { %v7362_v9 = vmax.f32 %v6865_v17, 0.0  ;;  %v7948_v39 = vpop.f32.mrf.mxu3  ;;  %v6266_v41 = vmax.f32 %v5777_v13, 0.0 }
 0xb45   : > { %v7949_v47 = vadd.f32 %v13029_v10, %v7948_v39 }
 0xb46   : > { %v4690_v3 = vpop.f32.mrf.mxu0  ;;  %v7570_v21 = vpack.c.bf16 %v7362_v9, %v7361_v40 }
 0xb47   : > { %8456 = vst [vmem:[%s11979_s22 + $0x2c0] sm:$0xff] %v7949_v47  ;;  %v4691_v15 = vadd.f32 %v11754_v51, %v4690_v3 }
 0xb48   : > { %7962 = vmatmul.bf16.gmra.mxu3 %v7570_v21 }
 0xb49   : > { %v5778_v37 = vpop.f32.mrf.mxu1  ;;  %v5171_v61 = vmul.f32 %v12752_v42, %v4691_v15  ;;  %v10146_v42 = vpack.i.bf16 %v13073_v55, %v13071_v56  ;;  %v10701_v21 = vpop.eup %10700 }
 0xb4a   : > { %v5779_v0 = vadd.f32 %v12863_v43, %v5778_v37 }
 0xb4b   : > { %v3885_v30 = vpop.permute.xlu1 %3884 }
 0xb4c   : > { %v6267_v20 = vmax.f32 %v5779_v0, 0.0  ;;  %8860 = vmatmul.msk.bf16.gmra.mxu0 %vm1973_vm0, %v3885_v30  ;;  %v7950_v33 = vpop.f32.mrf.mxu3  ;;  %v3372_v0 = vmul.f32 %v10701_v21, %v12909_v28 }
 0xb4d   : > { %v7951_v46 = vadd.f32 %v13029_v10, %v7950_v33 }
 0xb4e   : > { %v4692_v4 = vpop.f32.mrf.mxu0  ;;  %v6472_v34 = vpack.c.bf16 %v6267_v20, %v6266_v41 }
 0xb4f   : > { %8457 = vst [vmem:[%s11979_s22 + $0x2c8] sm:$0xff] %v7951_v46  ;;  %v4693_v16 = vadd.f32 %v11754_v51, %v4692_v4 }
 0xb50   : > { %6876 = vmatmul.bf16.gmra.mxu2 %v6472_v34 }
 0xb51   : > { %v5172_v2 = vmul.f32 %v12754_v38, %v4693_v16 }
 0xb53   : > { %v5374_v25 = vpack.c.bf16 %v5172_v2, %v5171_v61  ;;  %v10133_v11 = vpop.permute.xlu1 %10132 }
 0xb54   : > { %v10135_v54 = vunpack.i.h.bf16 %v10133_v11  ;;  %v10134_v38 = vunpack.i.l.bf16 %v10133_v11 }
 0xb55   : > { %5790 = vmatmul.bf16.gmra.mxu1 %v5374_v25 }
 0xb56   : > { %10142 = vrot.lane.b32.xlu0 %v10141_v31, %s11344_s13  ;;  %v2349_v45 = vsel %vm1973_vm0, %v10135_v54, 0.0  ;;  %v2346_v63 = vsel %vm1973_vm0, %v10134_v38, 0.0  ;;  %v9636_v38 = vld [vmem:[%s11536_s17 + $0x210] sm:$0xff]  }
 0xb57   : > { %2350 = vadd.xlane.f32.xlu2 %v2349_v45 }
 0xb5e   : > { %10147 = vrot.lane.b32.xlu0 %v10146_v42, %s11344_s13 }
 0xb66   : > { %2347 = vadd.xlane.f32.xlu1 %v2346_v63 }
 0xb68   : > { %v4695_v27 = vpop.f32.mrf.mxu0 }
 0xb69   : > { %v4696_v26 = vadd.f32 %v11754_v51, %v4695_v27 }
 0xb6b   : > { %v5173_v39 = vmul.f32 %v12783_v23, %v4696_v26  ;;  %v13098_v26 = vunpack.c.h.bf16 %v9636_v38 }
 0xb6e   : > { %v2333_v50 = vpop.xlane.xlu2 %2332 }
 0xb6f   : > { %v2861_v17 = vmax.f32 %v2333_v50, 1e-08  ;;  %v13096_v50 = vunpack.c.l.bf16 %v9636_v38 }
 0xb70   : > { %v4697_v40 = vpop.f32.mrf.mxu0 }
 0xb71   : > { %10702 = vrcp.f32 %v2861_v17  ;;  %v4698_v9 = vadd.f32 %v11754_v51, %v4697_v40 }
 0xb73   : > { %v5174_v47 = vmul.f32 %v12785_v59, %v4698_v9  ;;  %v2336_v6 = vpop.xlane.xlu0 %2335 }
 0xb74   : > { %v6867_v3 = vpop.f32.mrf.mxu2  ;;  %v2862_v33 = vmax.f32 %v2336_v6, 1e-08 }
 0xb75   : > { %v5375_v13 = vpack.c.bf16 %v5174_v47, %v5173_v39  ;;  %v6868_v20 = vadd.f32 %v12956_v48, %v6867_v3  ;;  %v10151_v39 = vpack.i.bf16 %v13098_v26, %v13096_v50 }
 0xb76   : > { %v10138_v46 = vpop.permute.xlu2 %10137  ;;  %10704 = vrcp.f32 %v2862_v33  ;;  %v13111_v33 = vld [vmem:[#allocation8] ss:$0 sm:$0xff] }
 0xb77   : > { %v10703_v37 = vpop.eup %10702  ;;  %5795 = vmatmul.bf16.gmra.mxu1 %v5375_v13  ;;  %v7363_v4 = vmax.f32 %v6868_v20, 0.0  ;;  %v10139_v2 = vunpack.i.l.bf16 %v10138_v46  ;;  %v10140_v3 = vunpack.i.h.bf16 %v10138_v46 }
 0xb78   : > { %v3373_v30 = vmul.f32 %v10703_v37, %v12911_v60 }
 0xb79   : > { %v2352_v11 = vsel %vm1973_vm0, %v10139_v2, 0.0  ;;  %v2355_v37 = vsel %vm1973_vm0, %v10140_v3, 0.0 }
 0xb7a   : > { %v3569_v41 = vpack.c.bf16 %v3373_v30, %v3372_v0 }
 0xb7c   : > { %v6869_v15 = vpop.f32.mrf.mxu2  ;;  %3890 = vrot.lane.b32.xlu2 %v3569_v41, %s11344_s13  ;;  %v10705_v25 = vpop.eup %10704 }
 0xb7d   : > { %v6870_v23 = vadd.f32 %v12956_v48, %v6869_v15  ;;  %v3374_v54 = vmul.f32 %v10705_v25, %v12938_v18 }
 0xb7e   : > { %v2339_v59 = vpop.xlane.xlu1 %2338 }
 0xb7f   : > { %v7364_v34 = vmax.f32 %v6870_v23, 0.0  ;;  %v2863_v16 = vmax.f32 %v2339_v59, 1e-08 }
 0xb81   : > { %10706 = vrcp.f32 %v2863_v16  ;;  %v7571_v61 = vpack.c.bf16 %v7364_v34, %v7363_v4  ;;  %v9637_v34 = vld [vmem:[%s11536_s17 + $0x218] sm:$0xff]  }
 0xb82   : > { %v5781_v31 = vpop.f32.mrf.mxu1  ;;  %v13118_v2 = vunpack.c.l.bf16 %v9637_v34 }
 0xb83   : > { %7967 = vmatmul.bf16.gmra.mxu3 %v7571_v61  ;;  %v5782_v42 = vadd.f32 %v12863_v43, %v5781_v31  ;;  %v13120_v31 = vunpack.c.h.bf16 %v9637_v34 }
 0xb85   : > { %v6268_v17 = vmax.f32 %v5782_v42, 0.0 }
 0xb87   : > { %v10707_v8 = vpop.eup %10706 }
 0xb88   : > { %v3375_v45 = vmul.f32 %v10707_v8, %v12940_v49  ;;  %2353 = vadd.xlane.f32.xlu0 %v2352_v11  ;;  %v10156_v11 = vpack.i.bf16 %v13120_v31, %v13118_v2 }
 0xb8a   : > { %v5783_v63 = vpop.f32.mrf.mxu1  ;;  %v3887_v52 = vpop.permute.xlu0 %3886  ;;  %v3570_v27 = vpack.c.bf16 %v3375_v45, %v3374_v54 }
 0xb8b   : > { %v5784_v24 = vadd.f32 %v12863_v43, %v5783_v63  ;;  %8861 = vmatmul.msk.bf16.gmra.mxu0 %vm1973_vm0, %v3887_v52 }
 0xb8c   : > { %3892 = vrot.lane.b32.xlu1 %v3570_v27, %s11344_s13 }
 0xb8d   : > { %v6269_v40 = vmax.f32 %v5784_v24, 0.0 }
 0xb8f   : > { %v6473_v9 = vpack.c.bf16 %v6269_v40, %v6268_v17 }
 0xb91   : > { %6881 = vmatmul.bf16.gmra.mxu2 %v6473_v9 }
 0xb94   : > { %10152 = vrot.lane.b32.xlu1 %v10151_v39, %s11344_s13 }
 0xb98   : > { %v7953_v43 = vpop.f32.mrf.mxu3 }
 0xb99   : > { %v7954_v47 = vadd.f32 %v13029_v10, %v7953_v43 }
 0xb9b   : > { %8458 = vst [vmem:[%s11979_s22 + $0x2d0] sm:$0xff] %v7954_v47 }
 0xba0   : > { %v7955_v21 = vpop.f32.mrf.mxu3 }
 0xba1   : > { %v7956_v13 = vadd.f32 %v13029_v10, %v7955_v21 }
 0xba3   : > { %8459 = vst [vmem:[%s11979_s22 + $0x2d8] sm:$0xff] %v7956_v13 }
 0xba5   : > { %2356 = vadd.xlane.f32.xlu2 %v2355_v37 }
 0xba8   : > { %v7958_v0 = vpop.f32.mrf.mxu3 }
 0xba9   : > { %v7959_v30 = vadd.f32 %v13029_v10, %v7958_v0 }
 0xbaa   : > { %v5786_v6 = vpop.f32.mrf.mxu1 }
 0xbab   : > { %8460 = vst [vmem:[%s11979_s22 + $0x2e0] sm:$0xff] %v7959_v30  ;;  %v5787_v15 = vadd.f32 %v13111_v33, %v5786_v6 }
 0xbad   : > { %v6270_v16 = vmax.f32 %v5787_v15, 0.0 }
 0xbae   : > { %v3889_v41 = vpop.permute.xlu1 %3888 }
 0xbaf   : > { %8862 = vmatmul.msk.bf16.gmra.mxu0 %vm1973_vm0, %v3889_v41  ;;  %v2345_v24 = vpop.xlane.xlu2 %2344 }
 0xbb0   : > { %v7960_v20 = vpop.f32.mrf.mxu3  ;;  %v2865_v13 = vmax.f32 %v2345_v24, 1e-08 }
 0xbb1   : > { %v7961_v23 = vadd.f32 %v13029_v10, %v7960_v20 }
 0xbb2   : > { %v5788_v59 = vpop.f32.mrf.mxu1  ;;  %10708 = vrcp.f32 %v2865_v13 }
 0xbb3   : > { %8461 = vst [vmem:[%s11979_s22 + $0x2e8] sm:$0xff] %v7961_v23  ;;  %v5789_v46 = vadd.f32 %v13111_v33, %v5788_v59  ;;  %v4700_v4 = vpop.f32.mrf.mxu0 }
 0xbb4   : > { %v4701_v8 = vadd.f32 %v11754_v51, %v4700_v4 }
 0xbb5   : > { %v6271_v61 = vmax.f32 %v5789_v46, 0.0  ;;  %v2342_v63 = vpop.xlane.xlu0 %2341 }
 0xbb6   : > { %v5175_v42 = vmul.f32 %v12798_v1, %v4701_v8  ;;  %v2864_v30 = vmax.f32 %v2342_v63, 1e-08 }
 0xbb7   : > { %v6474_v25 = vpack.c.bf16 %v6271_v61, %v6270_v16 }
 0xbb8   : > { %10710 = vrcp.f32 %v2864_v30  ;;  %v10709_v8 = vpop.eup %10708 }
 0xbb9   : > { %6886 = vmatmul.bf16.gmra.mxu2 %v6474_v25 }
 0xbbb   : > { %v4702_v54 = vpop.f32.mrf.mxu0 }
 0xbbc   : > { %v4703_v45 = vadd.f32 %v11754_v51, %v4702_v54 }
 0xbbd   : > { %10157 = vrot.lane.b32.xlu2 %v10156_v11, %s11344_s13 }
 0xbbe   : > { %v5176_v38 = vmul.f32 %v12800_v35, %v4703_v45 }
 0xbc0   : > { %v5376_v52 = vpack.c.bf16 %v5176_v38, %v5175_v42  ;;  %v10711_v42 = vpop.eup %10710 }
 0xbc2   : > { %5800 = vmatmul.bf16.gmra.mxu1 %v5376_v52  ;;  %v3376_v52 = vmul.f32 %v10711_v42, %v12948_v44 }
 0xbc3   : > { %v6872_v27 = vpop.f32.mrf.mxu2 }
 0xbc4   : > { %v6873_v43 = vadd.f32 %v12956_v48, %v6872_v27 }
 0xbc6   : > { %v7365_v6 = vmax.f32 %v6873_v43, 0.0 }
 0xbc8   : > { %v10143_v17 = vpop.permute.xlu0 %10142 }
 0xbc9   : > { %v10145_v40 = vunpack.i.h.bf16 %v10143_v17  ;;  %v10144_v9 = vunpack.i.l.bf16 %v10143_v17  ;;  %v4705_v39 = vpop.f32.mrf.mxu0 }
 0xbca   : > { %v2351_v0 = vpop.xlane.xlu2 %2350  ;;  %v4706_v20 = vadd.f32 %v11754_v51, %v4705_v39 }
 0xbcb   : > { %v7963_v47 = vpop.f32.mrf.mxu3  ;;  %v6874_v3 = vpop.f32.mrf.mxu2  ;;  %v2358_v21 = vsel %vm1973_vm0, %v10144_v9, 0.0  ;;  %v2361_v1 = vsel %vm1973_vm0, %v10145_v40, 0.0  ;;  %v2867_v61 = vmax.f32 %v2351_v0, 1e-08 }
 0xbcc   : > { %v7964_v35 = vadd.f32 %v13029_v10, %v7963_v47  ;;  %v6875_v37 = vadd.f32 %v12956_v48, %v6874_v3  ;;  %2359 = vadd.xlane.f32.xlu0 %v2358_v21  ;;  %2362 = vadd.xlane.f32.xlu1 %v2361_v1  ;;  %v5177_v16 = vmul.f32 %v12832_v57, %v4706_v20 }
 0xbcd   : > { %10712 = vrcp.f32 %v2867_v61  ;;  %v3377_v57 = vmul.f32 %v10709_v8, %v12950_v19 }
 0xbce   : > { %8462 = vst [vmem:[%s11979_s22 + $0x2f0] sm:$0xff] %v7964_v35  ;;  %v7366_v41 = vmax.f32 %v6875_v37, 0.0 }
 0xbcf   : > { %v3571_v1 = vpack.c.bf16 %v3377_v57, %v3376_v52 }
 0xbd0   : > { %v7572_v15 = vpack.c.bf16 %v7366_v41, %v7365_v6  ;;  %v10148_v13 = vpop.permute.xlu0 %10147 }
 0xbd1   : > { %v4707_v23 = vpop.f32.mrf.mxu0  ;;  %v10150_v37 = vunpack.i.h.bf16 %v10148_v13 }
 0xbd2   : > { %v4708_v59 = vadd.f32 %v11754_v51, %v4707_v23  ;;  %v5791_v46 = vpop.f32.mrf.mxu1  ;;  %7972 = vmatmul.bf16.gmra.mxu3 %v7572_v15 }
 0xbd3   : > { %v7965_v4 = vpop.f32.mrf.mxu3  ;;  %v6877_v34 = vpop.f32.mrf.mxu2  ;;  %v5792_v38 = vadd.f32 %v13111_v33, %v5791_v46  ;;  %v2367_v20 = vsel %vm1973_vm0, %v10150_v37, 0.0 }
 0xbd4   : > { %v5178_v25 = vmul.f32 %v12834_v32, %v4708_v59  ;;  %v7966_v11 = vadd.f32 %v13029_v10, %v7965_v4  ;;  %v6878_v32 = vadd.f32 %v12956_v48, %v6877_v34  ;;  %v10713_v47 = vpop.eup %10712 }
 0xbd5   : > { %v6272_v39 = vmax.f32 %v5792_v38, 0.0  ;;  %v3379_v30 = vmul.f32 %v10713_v47, %v12995_v36 }
 0xbd6   : > { %8463 = vst [vmem:[%s11979_s22 + $0x2f8] sm:$0xff] %v7966_v11  ;;  %v3891_v54 = vpop.permute.xlu2 %3890  ;;  %v5377_v45 = vpack.c.bf16 %v5178_v25, %v5177_v16  ;;  %v7367_v3 = vmax.f32 %v6878_v32, 0.0  ;;  %v10149_v11 = vunpack.i.l.bf16 %v10148_v13 }
 0xbd7   : > { %8863 = vmatmul.msk.bf16.gmra.mxu0 %vm1973_vm0, %v3891_v54 }
 0xbd8   : > { %5805 = vmatmul.bf16.gmra.mxu1 %v5377_v45  ;;  %v2364_v38 = vsel %vm1973_vm0, %v10149_v11, 0.0 }
 0xbd9   : > { %v2348_v63 = vpop.xlane.xlu1 %2347 }
 0xbda   : > { %v5793_v27 = vpop.f32.mrf.mxu1  ;;  %v2866_v24 = vmax.f32 %v2348_v63, 1e-08 }
 0xbdb   : > { %v5794_v17 = vadd.f32 %v13111_v33, %v5793_v27  ;;  %v6879_v40 = vpop.f32.mrf.mxu2 }
 0xbdc   : > { %v6880_v9 = vadd.f32 %v12956_v48, %v6879_v40  ;;  %10714 = vrcp.f32 %v2866_v24 }
 0xbdd   : > { %v6273_v43 = vmax.f32 %v5794_v17, 0.0 }
 0xbde   : > { %v7368_v21 = vmax.f32 %v6880_v9, 0.0 }
 0xbdf   : > { %v6475_v35 = vpack.c.bf16 %v6273_v43, %v6272_v39 }
 0xbe0   : > { %3894 = vrot.lane.b32.xlu0 %v3571_v1, %s11344_s13  ;;  %v7573_v0 = vpack.c.bf16 %v7368_v21, %v7367_v3  ;;  %v9638_v3 = vld [vmem:[%s11536_s17 + $0x220] sm:$0xff]  }
 0xbe1   : > { %6891 = vmatmul.bf16.gmra.mxu2 %v6475_v35  ;;  %v13168_v35 = vunpack.c.l.bf16 %v9638_v3  ;;  %v13170_v37 = vunpack.c.h.bf16 %v9638_v3 }
 0xbe2   : > { %v10715_v6 = vpop.eup %10714  ;;  %7977 = vmatmul.bf16.gmra.mxu3 %v7573_v0 }
 0xbe3   : > { %v3378_v41 = vmul.f32 %v10715_v6, %v12993_v12  ;;  %v10161_v6 = vpack.i.bf16 %v13170_v37, %v13168_v35 }
 0xbe5   : > { %v3572_v15 = vpack.c.bf16 %v3379_v30, %v3378_v41 }
 0xbe6   : > { %2368 = vadd.xlane.f32.xlu2 %v2367_v20 }
 0xbe7   : > { %3896 = vrot.lane.b32.xlu1 %v3572_v15, %s11344_s13 }
 0xbf4   : > { %v5796_v23 = vpop.f32.mrf.mxu1 }
 0xbf5   : > { %v5797_v59 = vadd.f32 %v13111_v33, %v5796_v23 }
 0xbf7   : > { %v6274_v16 = vmax.f32 %v5797_v59, 0.0 }
 0xbfb   : > { %v2354_v39 = vpop.xlane.xlu0 %2353 }
 0xbfc   : > { %v5798_v46 = vpop.f32.mrf.mxu1  ;;  %v2868_v1 = vmax.f32 %v2354_v39, 1e-08 }
 0xbfd   : > { %v5799_v4 = vadd.f32 %v13111_v33, %v5798_v46 }
 0xbfe   : > { %v3893_v34 = vpop.permute.xlu1 %3892  ;;  %10716 = vrcp.f32 %v2868_v1 }
 0xbff   : > { %v6275_v61 = vmax.f32 %v5799_v4, 0.0  ;;  %8864 = vmatmul.msk.bf16.gmra.mxu0 %vm1973_vm0, %v3893_v34 }
 0xc01   : > { %v6476_v25 = vpack.c.bf16 %v6275_v61, %v6274_v16 }
 0xc03   : > { %6896 = vmatmul.bf16.gmra.mxu2 %v6476_v25 }
 0xc04   : > { %v10717_v59 = vpop.eup %10716 }
 0xc05   : > { %v3380_v61 = vmul.f32 %v10717_v59, %v13016_v7 }
 0xc06   : > { %v7968_v8 = vpop.f32.mrf.mxu3  ;;  %v10153_v54 = vpop.permute.xlu1 %10152 }
 0xc07   : > { %v7969_v45 = vadd.f32 %v13029_v10, %v7968_v8  ;;  %v10155_v42 = vunpack.i.h.bf16 %v10153_v54  ;;  %v10154_v57 = vunpack.i.l.bf16 %v10153_v54 }
 0xc08   : > { %v4710_v63 = vpop.f32.mrf.mxu0 }
 0xc09   : > { %8464 = vst [vmem:[%s11979_s22 + $0x300] sm:$0xff] %v7969_v45  ;;  %v2373_v52 = vsel %vm1973_vm0, %v10155_v42, 0.0  ;;  %v2370_v27 = vsel %vm1973_vm0, %v10154_v57, 0.0  ;;  %v4711_v24 = vadd.f32 %v11754_v51, %v4710_v63 }
 0xc0a   : > { %2374 = vadd.xlane.f32.xlu2 %v2373_v52  ;;  %2365 = vadd.xlane.f32.xlu0 %v2364_v38 }
 0xc0b   : > { %v5179_v43 = vmul.f32 %v12859_v29, %v4711_v24  ;;  %v9639_v29 = vld [vmem:[%s11536_s17 + $0x228] sm:$0xff]  }
 0xc0c   : > { %v13178_v15 = vunpack.c.l.bf16 %v9639_v29  ;;  %v13180_v23 = vunpack.c.h.bf16 %v9639_v29 }
 0xc0e   : > { %v7970_v32 = vpop.f32.mrf.mxu3  ;;  %v10166_v11 = vpack.i.bf16 %v13180_v23, %v13178_v15 }
 0xc0f   : > { %v7971_v17 = vadd.f32 %v13029_v10, %v7970_v32 }
 0xc10   : > { %v4712_v40 = vpop.f32.mrf.mxu0 }
 0xc11   : > { %8465 = vst [vmem:[%s11979_s22 + $0x308] sm:$0xff] %v7971_v17  ;;  %v4713_v9 = vadd.f32 %v11754_v51, %v4712_v40  ;;  %2371 = vadd.xlane.f32.xlu1 %v2370_v27 }
 0xc13   : > { %v5180_v47 = vmul.f32 %v12861_v53, %v4713_v9 }
 0xc14   : > { %v6882_v21 = vpop.f32.mrf.mxu2 }
 0xc15   : > { %v5378_v13 = vpack.c.bf16 %v5180_v47, %v5179_v43  ;;  %v6883_v41 = vadd.f32 %v12956_v48, %v6882_v21  ;;  %v13193_v47 = vld [vmem:[#allocation11] ss:$0 sm:$0xff] }
 0xc17   : > { %5810 = vmatmul.bf16.gmra.mxu1 %v5378_v13  ;;  %v7369_v46 = vmax.f32 %v6883_v41, 0.0 }
 0xc18   : > { %v2357_v0 = vpop.xlane.xlu2 %2356 }
 0xc19   : > { %v2869_v30 = vmax.f32 %v2357_v0, 1e-08 }
 0xc1b   : > { %10718 = vrcp.f32 %v2869_v30 }
 0xc1c   : > { %v6884_v53 = vpop.f32.mrf.mxu2 }
 0xc1d   : > { %v6885_v20 = vadd.f32 %v12956_v48, %v6884_v53 }
 0xc1e   : > { %10162 = vrot.lane.b32.xlu0 %v10161_v6, %s11344_s13 }
 0xc1f   : > { %v7370_v4 = vmax.f32 %v6885_v20, 0.0 }
 0xc21   : > { %v10719_v34 = vpop.eup %10718  ;;  %v7574_v16 = vpack.c.bf16 %v7370_v4, %v7369_v46 }
 0xc22   : > { %v3381_v25 = vmul.f32 %v10719_v34, %v13018_v62 }
 0xc23   : > { %7982 = vmatmul.bf16.gmra.mxu3 %v7574_v16 }
 0xc24   : > { %v3573_v8 = vpack.c.bf16 %v3381_v25, %v3380_v61 }
 0xc26   : > { %10167 = vrot.lane.b32.xlu0 %v10166_v11, %s11344_s13  ;;  %3898 = vrot.lane.b32.xlu2 %v3573_v8, %s11344_s13 }
 0xc2c   : > { %v4715_v54 = vpop.f32.mrf.mxu0 }
 0xc2d   : > { %v4716_v45 = vadd.f32 %v11754_v51, %v4715_v54 }
 0xc2f   : > { %v5181_v63 = vmul.f32 %v12900_v58, %v4716_v45 }
 0xc34   : > { %v4717_v42 = vpop.f32.mrf.mxu0 }
 0xc35   : > { %v4718_v38 = vadd.f32 %v11754_v51, %v4717_v42  ;;  %v9640_v42 = vld [vmem:[%s11536_s17 + $0x230] sm:$0xff]  }
 0xc37   : > { %v5182_v52 = vmul.f32 %v12902_v5, %v4718_v38  ;;  %v10158_v5 = vpop.permute.xlu2 %10157 }
 0xc38   : > { %v10160_v6 = vunpack.i.h.bf16 %v10158_v5  ;;  %v10159_v53 = vunpack.i.l.bf16 %v10158_v5 }
 0xc39   : > { %v5379_v57 = vpack.c.bf16 %v5182_v52, %v5181_v63 }
 0xc3a   : > { %v2379_v16 = vsel %vm1973_vm0, %v10160_v6, 0.0  ;;  %v2376_v61 = vsel %vm1973_vm0, %v10159_v53, 0.0 }
 0xc3b   : > { %5815 = vmatmul.bf16.gmra.mxu1 %v5379_v57  ;;  %v13209_v57 = vunpack.c.l.bf16 %v9640_v42 }
 0xc3c   : > { %v6887_v32 = vpop.f32.mrf.mxu2 }
 0xc3d   : > { %v6888_v39 = vadd.f32 %v12956_v48, %v6887_v32  ;;  %v13211_v32 = vunpack.c.h.bf16 %v9640_v42 }
 0xc3f   : > { %v2360_v27 = vpop.xlane.xlu0 %2359  ;;  %v5801_v24 = vpop.f32.mrf.mxu1  ;;  %v7371_v21 = vmax.f32 %v6888_v39, 0.0 }
 0xc40   : > { %v2870_v17 = vmax.f32 %v2360_v27, 1e-08  ;;  %v2363_v40 = vpop.xlane.xlu1 %2362  ;;  %v5802_v58 = vadd.f32 %v13111_v33, %v5801_v24 }
 0xc41   : > { %v2871_v9 = vmax.f32 %v2363_v40, 1e-08 }
 0xc42   : > { %10720 = vrcp.f32 %v2870_v17  ;;  %v6276_v20 = vmax.f32 %v5802_v58, 0.0 }
 0xc43   : > { %10722 = vrcp.f32 %v2871_v9 }
 0xc44   : > { %v6889_v43 = vpop.f32.mrf.mxu2 }
 0xc45   : > { %v6890_v3 = vadd.f32 %v13193_v47, %v6889_v43 }
 0xc47   : > { %v7372_v1 = vmax.f32 %v6890_v3, 0.0  ;;  %v5803_v13 = vpop.f32.mrf.mxu1 }
 0xc48   : > { %v10721_v0 = vpop.eup %10720  ;;  %v5804_v30 = vadd.f32 %v13111_v33, %v5803_v13  ;;  %v9641_v13 = vld [vmem:[%s11536_s17 + $0x238] sm:$0xff]  }
 0xc49   : > { %v10723_v41 = vpop.eup %10722  ;;  %v3382_v29 = vmul.f32 %v10721_v0, %v13058_v14  ;;  %v7575_v48 = vpack.c.bf16 %v7372_v1, %v7371_v21  ;;  %v10171_v21 = vpack.i.bf16 %v13211_v32, %v13209_v57 }
 0xc4a   : > { %v3383_v59 = vmul.f32 %v10723_v41, %v13060_v22  ;;  %v6277_v46 = vmax.f32 %v5804_v30, 0.0 }
 0xc4b   : > { %7987 = vmatmul.bf16.gmra.mxu3 %v7575_v48 }
 0xc4c   : > { %v3574_v4 = vpack.c.bf16 %v3383_v59, %v3382_v29  ;;  %v6477_v34 = vpack.c.bf16 %v6277_v46, %v6276_v20 }
 0xc4e   : > { %3900 = vrot.lane.b32.xlu1 %v3574_v4, %s11344_s13  ;;  %6901 = vmatmul.bf16.gmra.mxu2 %v6477_v34 }
 0xc4f   : > { %2380 = vadd.xlane.f32.xlu2 %v2379_v16 }
 0xc50   : > { %2377 = vadd.xlane.f32.xlu0 %v2376_v61 }
 0xc52   : > { %v3895_v25 = vpop.permute.xlu0 %3894 }
 0xc53   : > { %8865 = vmatmul.msk.bf16.gmra.mxu0 %vm1973_vm0, %v3895_v25 }
 0xc54   : > { %v4720_v11 = vpop.f32.mrf.mxu0 }
 0xc55   : > { %v5806_v8 = vpop.f32.mrf.mxu1  ;;  %v7973_v54 = vpop.f32.mrf.mxu3  ;;  %v4721_v38 = vadd.f32 %v11754_v51, %v4720_v11 }
 0xc56   : > { %v7974_v45 = vadd.f32 %v13029_v10, %v7973_v54  ;;  %v5807_v63 = vadd.f32 %v13111_v33, %v5806_v8 }
 0xc57   : > { %v5183_v39 = vmul.f32 %v12909_v28, %v4721_v38  ;;  %v13224_v28 = vunpack.c.l.bf16 %v9641_v13 }
 0xc58   : > { %8466 = vst [vmem:[%s11979_s22 + $0x310] sm:$0xff] %v7974_v45  ;;  %v6278_v3 = vmax.f32 %v5807_v63, 0.0 }
 0xc59   : > { %v3897_v5 = vpop.permute.xlu1 %3896  ;;  %v2369_v61 = vpop.xlane.xlu2 %2368 }
 0xc5c   : > { %v4722_v52 = vpop.f32.mrf.mxu0 }
 0xc5d   : > { %v4723_v27 = vadd.f32 %v11754_v51, %v4722_v52  ;;  %v5808_v24 = vpop.f32.mrf.mxu1  ;;  %v7975_v17 = vpop.f32.mrf.mxu3 }
 0xc5e   : > { %v5809_v40 = vadd.f32 %v13111_v33, %v5808_v24  ;;  %v7976_v9 = vadd.f32 %v13029_v10, %v7975_v17 }
 0xc5f   : > { %v5184_v43 = vmul.f32 %v12911_v60, %v4723_v27  ;;  %v13226_v60 = vunpack.c.h.bf16 %v9641_v13 }
 0xc60   : > { %v6279_v58 = vmax.f32 %v5809_v40, 0.0  ;;  %8467 = vst [vmem:[%s11979_s22 + $0x318] sm:$0xff] %v7976_v9 }
 0xc61   : > { %v5380_v1 = vpack.c.bf16 %v5184_v43, %v5183_v39  ;;  %v10176_v29 = vpack.i.bf16 %v13226_v60, %v13224_v28 }
 0xc62   : > { %v6478_v0 = vpack.c.bf16 %v6279_v58, %v6278_v3 }
 0xc63   : > { %8866 = vmatmul.msk.bf16.gmra.mxu0 %vm1973_vm0, %v3897_v5  ;;  %5820 = vmatmul.bf16.gmra.mxu1 %v5380_v1 }
 0xc64   : > { %6906 = vmatmul.bf16.gmra.mxu2 %v6478_v0  ;;  %v6892_v30 = vpop.f32.mrf.mxu2  ;;  %10172 = vrot.lane.b32.xlu0 %v10171_v21, %s11344_s13  ;;  %v2873_v0 = vmax.f32 %v2369_v61, 1e-08 }
 0xc65   : > { %v7978_v6 = vpop.f32.mrf.mxu3  ;;  %v6893_v48 = vadd.f32 %v13193_v47, %v6892_v30 }
 0xc66   : > { %v7979_v41 = vadd.f32 %v13029_v10, %v7978_v6  ;;  %10724 = vrcp.f32 %v2873_v0 }
 0xc67   : > { %v7373_v4 = vmax.f32 %v6893_v48, 0.0 }
 0xc68   : > { %8468 = vst [vmem:[%s11979_s22 + $0x320] sm:$0xff] %v7979_v41 }
 0xc6c   : > { %v6894_v53 = vpop.f32.mrf.mxu2  ;;  %10177 = vrot.lane.b32.xlu0 %v10176_v29, %s11344_s13 }
 0xc6d   : > { %v6895_v20 = vadd.f32 %v13193_v47, %v6894_v53  ;;  %v7980_v59 = vpop.f32.mrf.mxu3 }
 0xc6e   : > { %v7981_v46 = vadd.f32 %v13029_v10, %v7980_v59 }
 0xc6f   : > { %v7374_v34 = vmax.f32 %v6895_v20, 0.0 }
 0xc70   : > { %8469 = vst [vmem:[%s11979_s22 + $0x328] sm:$0xff] %v7981_v46 }
 0xc71   : > { %v7576_v16 = vpack.c.bf16 %v7374_v34, %v7373_v4 }
 0xc73   : > { %7992 = vmatmul.bf16.gmra.mxu3 %v7576_v16  ;;  %v10725_v16 = vpop.eup %10724 }
 0xc7c   : > { %v4725_v25 = vpop.f32.mrf.mxu0 }
 0xc7d   : > { %v2375_v11 = vpop.xlane.xlu2 %2374  ;;  %v4726_v8 = vadd.f32 %v11754_v51, %v4725_v25  ;;  %v2366_v27 = vpop.xlane.xlu0 %2365 }
 0xc7e   : > { %v2875_v30 = vmax.f32 %v2375_v11, 1e-08  ;;  %v2872_v29 = vmax.f32 %v2366_v27, 1e-08 }
 0xc7f   : > { %v5185_v63 = vmul.f32 %v12938_v18, %v4726_v8 }
 0xc80   : > { %10726 = vrcp.f32 %v2875_v30 }
 0xc84   : > { %v4727_v54 = vpop.f32.mrf.mxu0 }
 0xc85   : > { %v4728_v45 = vadd.f32 %v11754_v51, %v4727_v54  ;;  %v3899_v42 = vpop.permute.xlu2 %3898 }
 0xc86   : > { %8867 = vmatmul.msk.bf16.gmra.mxu0 %vm1973_vm0, %v3899_v42  ;;  %v6897_v38 = vpop.f32.mrf.mxu2  ;;  %v10727_v61 = vpop.eup %10726  ;;  %v3385_v42 = vmul.f32 %v10725_v16, %v13073_v55 }
 0xc87   : > { %v5186_v52 = vmul.f32 %v12940_v49, %v4728_v45  ;;  %v6898_v17 = vadd.f32 %v13193_v47, %v6897_v38  ;;  %v2372_v49 = vpop.xlane.xlu1 %2371  ;;  %v3387_v54 = vmul.f32 %v10727_v61, %v13098_v26  ;;  %v13274_v61 = vld [vmem:[#allocation14] ss:$0 sm:$0xff] }
 0xc88   : > { %v2874_v41 = vmax.f32 %v2372_v49, 1e-08 }
 0xc89   : > { %v5381_v24 = vpack.c.bf16 %v5186_v52, %v5185_v63  ;;  %v7375_v43 = vmax.f32 %v6898_v17, 0.0  ;;  %v9642_v17 = vld [vmem:[%s11536_s17 + $0x240] sm:$0xff]  }
 0xc8a   : > { %10728 = vrcp.f32 %v2874_v41 }
 0xc8b   : > { %5825 = vmatmul.bf16.gmra.mxu1 %v5381_v24  ;;  %10730 = vrcp.f32 %v2872_v29 }
 0xc8e   : > { %v6899_v40 = vpop.f32.mrf.mxu2 }
 0xc8f   : > { %v6900_v9 = vadd.f32 %v13193_v47, %v6899_v40  ;;  %v13258_v40 = vunpack.c.l.bf16 %v9642_v17 }
 0xc90   : > { %v10163_v39 = vpop.permute.xlu0 %10162  ;;  %v10729_v11 = vpop.eup %10728 }
 0xc91   : > { %v7376_v3 = vmax.f32 %v6900_v9, 0.0  ;;  %v10165_v58 = vunpack.i.h.bf16 %v10163_v39  ;;  %v10164_v5 = vunpack.i.l.bf16 %v10163_v39  ;;  %v10731_v8 = vpop.eup %10730  ;;  %v3386_v45 = vmul.f32 %v10729_v11, %v13096_v50 }
 0xc92   : > { %v3384_v38 = vmul.f32 %v10731_v8, %v13071_v56  ;;  %v13260_v9 = vunpack.c.h.bf16 %v9642_v17 }
 0xc93   : > { %v2385_v21 = vsel %vm1973_vm0, %v10165_v58, 0.0  ;;  %v2382_v1 = vsel %vm1973_vm0, %v10164_v5, 0.0  ;;  %v7577_v18 = vpack.c.bf16 %v7376_v3, %v7375_v43  ;;  %v3576_v27 = vpack.c.bf16 %v3387_v54, %v3386_v45 }
 0xc94   : > { %v5811_v13 = vpop.f32.mrf.mxu1  ;;  %2386 = vadd.xlane.f32.xlu2 %v2385_v21  ;;  %2383 = vadd.xlane.f32.xlu1 %v2382_v1  ;;  %v3575_v24 = vpack.c.bf16 %v3385_v42, %v3384_v38  ;;  %v10181_v3 = vpack.i.bf16 %v13260_v9, %v13258_v40 }
 0xc95   : > { %7997 = vmatmul.bf16.gmra.mxu3 %v7577_v18  ;;  %v5812_v53 = vadd.f32 %v13111_v33, %v5811_v13 }
 0xc97   : > { %v6280_v4 = vmax.f32 %v5812_v53, 0.0 }
 0xc98   : > { %v10168_v6 = vpop.permute.xlu0 %10167 }
 0xc99   : > { %v10169_v48 = vunpack.i.l.bf16 %v10168_v6 }
 0xc9b   : > { %v2388_v20 = vsel %vm1973_vm0, %v10169_v48, 0.0  ;;  %v10170_v48 = vunpack.i.h.bf16 %v10168_v6 }
 0xc9c   : > { %v5813_v59 = vpop.f32.mrf.mxu1  ;;  %2389 = vadd.xlane.f32.xlu0 %v2388_v20 }
 0xc9d   : > { %v5814_v46 = vadd.f32 %v13111_v33, %v5813_v59  ;;  %v2391_v59 = vsel %vm1973_vm0, %v10170_v48, 0.0 }
 0xc9f   : > { %v6281_v34 = vmax.f32 %v5814_v46, 0.0 }
 0xca1   : > { %v6479_v25 = vpack.c.bf16 %v6281_v34, %v6280_v4 }
 0xca3   : > { %6911 = vmatmul.bf16.gmra.mxu2 %v6479_v25 }
 0xca6   : > { %v7983_v63 = vpop.f32.mrf.mxu3 }
 0xca7   : > { %v7984_v52 = vadd.f32 %v13029_v10, %v7983_v63 }
 0xca9   : > { %8470 = vst [vmem:[%s11979_s22 + $0x330] sm:$0xff] %v7984_v52 }
 0xcac   : > { %3902 = vrot.lane.b32.xlu2 %v3575_v24, %s11344_s13 }
 0xcad   : > { %3904 = vrot.lane.b32.xlu1 %v3576_v27, %s11344_s13 }
 0xcae   : > { %v7985_v39 = vpop.f32.mrf.mxu3 }
 0xcaf   : > { %v7986_v43 = vadd.f32 %v13029_v10, %v7985_v39 }
 0xcb1   : > { %8471 = vst [vmem:[%s11979_s22 + $0x338] sm:$0xff] %v7986_v43 }
 0xcb5   : > { %10182 = vrot.lane.b32.xlu1 %v10181_v3, %s11344_s13 }
 0xcb8   : > { %v5816_v58 = vpop.f32.mrf.mxu1 }
 0xcb9   : > { %v5817_v5 = vadd.f32 %v13111_v33, %v5816_v58 }
 0xcbb   : > { %v6282_v13 = vmax.f32 %v5817_v5, 0.0 }
 0xcc0   : > { %v5818_v21 = vpop.f32.mrf.mxu1  ;;  %v3901_v1 = vpop.permute.xlu1 %3900 }
 0xcc1   : > { %v5819_v18 = vadd.f32 %v13111_v33, %v5818_v21  ;;  %8868 = vmatmul.msk.bf16.gmra.mxu0 %vm1973_vm0, %v3901_v1  ;;  %v9643_v1 = vld [vmem:[%s11536_s17 + $0x248] sm:$0xff]  }
 0xcc2   : > { %v2381_v34 = vpop.xlane.xlu2 %2380 }
 0xcc3   : > { %v6283_v49 = vmax.f32 %v5819_v18, 0.0  ;;  %v2378_v30 = vpop.xlane.xlu0 %2377  ;;  %v2877_v38 = vmax.f32 %v2381_v34, 1e-08 }
 0xcc4   : > { %v2876_v52 = vmax.f32 %v2378_v30, 1e-08 }
 0xcc5   : > { %v6480_v0 = vpack.c.bf16 %v6283_v49, %v6282_v13  ;;  %10732 = vrcp.f32 %v2877_v38  ;;  %v13287_v49 = vunpack.c.l.bf16 %v9643_v1 }
 0xcc6   : > { %10734 = vrcp.f32 %v2876_v52 }
 0xcc7   : > { %6916 = vmatmul.bf16.gmra.mxu2 %v6480_v0 }
 0xccb   : > { %v10733_v18 = vpop.eup %10732 }
 0xccc   : > { %v10735_v13 = vpop.eup %10734 }
 0xcce   : > { %v7988_v41 = vpop.f32.mrf.mxu3 }
 0xccf   : > { %v7989_v29 = vadd.f32 %v13029_v10, %v7988_v41  ;;  %v3388_v41 = vmul.f32 %v10735_v13, %v13118_v2 }
 0xcd0   : > { %v4730_v53 = vpop.f32.mrf.mxu0 }
 0xcd1   : > { %8472 = vst [vmem:[%s11979_s22 + $0x340] sm:$0xff] %v7989_v29  ;;  %v6902_v20 = vpop.f32.mrf.mxu2  ;;  %v4731_v16 = vadd.f32 %v11754_v51, %v4730_v53  ;;  %v3389_v29 = vmul.f32 %v10733_v18, %v13120_v31 }
 0xcd2   : > { %v6903_v10 = vadd.f32 %v13193_v47, %v6902_v20 }
 0xcd3   : > { %v5187_v27 = vmul.f32 %v12948_v44, %v4731_v16 }
 0xcd4   : > { %v7377_v17 = vmax.f32 %v6903_v10, 0.0 }
 0xcd5   : > { %2392 = vadd.xlane.f32.xlu2 %v2391_v59 }
 0xcd6   : > { %v7990_v46 = vpop.f32.mrf.mxu3  ;;  %v10173_v4 = vpop.permute.xlu0 %10172 }
 0xcd7   : > { %v7991_v25 = vadd.f32 %v13274_v61, %v7990_v46  ;;  %v10174_v11 = vunpack.i.l.bf16 %v10173_v4  ;;  %v10175_v6 = vunpack.i.h.bf16 %v10173_v4 }
 0xcd8   : > { %v4732_v8 = vpop.f32.mrf.mxu0 }
 0xcd9   : > { %8473 = vst [vmem:[%s11979_s22 + $0x348] sm:$0xff] %v7991_v25  ;;  %v4733_v54 = vadd.f32 %v11754_v51, %v4732_v8  ;;  %v6904_v45 = vpop.f32.mrf.mxu2  ;;  %v2394_v42 = vsel %vm1973_vm0, %v10174_v11, 0.0  ;;  %v2397_v43 = vsel %vm1973_vm0, %v10175_v6, 0.0  ;;  %v3577_v11 = vpack.c.bf16 %v3389_v29, %v3388_v41 }
 0xcda   : > { %v6905_v63 = vadd.f32 %v13193_v47, %v6904_v45  ;;  %2395 = vadd.xlane.f32.xlu0 %v2394_v42 }
 0xcdb   : > { %v5188_v24 = vmul.f32 %v12950_v19, %v4733_v54  ;;  %v13289_v19 = vunpack.c.h.bf16 %v9643_v1 }
 0xcdc   : > { %v7378_v39 = vmax.f32 %v6905_v63, 0.0 }
 0xcdd   : > { %v5382_v3 = vpack.c.bf16 %v5188_v24, %v5187_v27  ;;  %v10186_v4 = vpack.i.bf16 %v13289_v19, %v13287_v49 }
 0xcde   : > { %v7578_v58 = vpack.c.bf16 %v7378_v39, %v7377_v17 }
 0xcdf   : > { %5830 = vmatmul.bf16.gmra.mxu1 %v5382_v3  ;;  %2398 = vadd.xlane.f32.xlu1 %v2397_v43 }
 0xce0   : > { %v4735_v5 = vpop.f32.mrf.mxu0  ;;  %v5821_v21 = vpop.f32.mrf.mxu1  ;;  %8002 = vmatmul.bf16.gmra.mxu3 %v7578_v58 }
 0xce1   : > { %v4736_v44 = vadd.f32 %v11754_v51, %v4735_v5  ;;  %v5822_v0 = vadd.f32 %v13111_v33, %v5821_v21 }
 0xce3   : > { %v5189_v20 = vmul.f32 %v12993_v12, %v4736_v44  ;;  %v6284_v34 = vmax.f32 %v5822_v0, 0.0  ;;  %v10178_v44 = vpop.permute.xlu0 %10177 }
 0xce7   : > { %v6907_v30 = vpop.f32.mrf.mxu2 }
 0xce8   : > { %v4737_v48 = vpop.f32.mrf.mxu0  ;;  %v5823_v53 = vpop.f32.mrf.mxu1  ;;  %v6908_v12 = vadd.f32 %v13193_v47, %v6907_v30  ;;  %v10180_v30 = vunpack.i.h.bf16 %v10178_v44 }
 0xce9   : > { %v4738_v59 = vadd.f32 %v11754_v51, %v4737_v48  ;;  %v5824_v46 = vadd.f32 %v13111_v33, %v5823_v53 }
 0xcea   : > { %v7379_v45 = vmax.f32 %v6908_v12, 0.0 }
 0xceb   : > { %v5190_v16 = vmul.f32 %v12995_v36, %v4738_v59  ;;  %v6285_v25 = vmax.f32 %v5824_v46, 0.0  ;;  %v10179_v46 = vunpack.i.l.bf16 %v10178_v44 }
 0xced   : > { %v5383_v10 = vpack.c.bf16 %v5190_v16, %v5189_v20  ;;  %v6481_v6 = vpack.c.bf16 %v6285_v25, %v6284_v34  ;;  %10187 = vrot.lane.b32.xlu2 %v10186_v4, %s11344_s13  ;;  %v2403_v16 = vsel %vm1973_vm0, %v10180_v30, 0.0 }
 0xcee   : > { %3906 = vrot.lane.b32.xlu0 %v3577_v11, %s11344_s13 }
 0xcef   : > { %v6909_v8 = vpop.f32.mrf.mxu2  ;;  %5835 = vmatmul.bf16.gmra.mxu1 %v5383_v10  ;;  %6921 = vmatmul.bf16.gmra.mxu2 %v6481_v6  ;;  %v2400_v10 = vsel %vm1973_vm0, %v10179_v46, 0.0 }
 0xcf0   : > { %v6910_v54 = vadd.f32 %v13193_v47, %v6909_v8 }
 0xcf2   : > { %v7380_v42 = vmax.f32 %v6910_v54, 0.0 }
 0xcf4   : > { %v7579_v36 = vpack.c.bf16 %v7380_v42, %v7379_v45  ;;  %v9644_v45 = vld [vmem:[%s11536_s17 + $0x250] sm:$0xff]  }
 0xcf5   : > { %v13326_v42 = vunpack.c.l.bf16 %v9644_v45 }
 0xcf6   : > { %8007 = vmatmul.bf16.gmra.mxu3 %v7579_v36  ;;  %v7993_v38 = vpop.f32.mrf.mxu3  ;;  %v13328_v36 = vunpack.c.h.bf16 %v9644_v45 }
 0xcf7   : > { %v7994_v63 = vadd.f32 %v13274_v61, %v7993_v38 }
 0xcf9   : > { %8474 = vst [vmem:[%s11979_s22 + $0x350] sm:$0xff] %v7994_v63 }
 0xcfe   : > { %v7995_v52 = vpop.f32.mrf.mxu3 }
 0xcff   : > { %v7996_v27 = vadd.f32 %v13274_v61, %v7995_v52  ;;  %v10191_v52 = vpack.i.bf16 %v13328_v36, %v13326_v42 }
 0xd01   : > { %8475 = vst [vmem:[%s11979_s22 + $0x358] sm:$0xff] %v7996_v27 }
 0xd03   : > { %v4740_v24 = vpop.f32.mrf.mxu0 }
 0xd04   : > { %v4741_v5 = vadd.f32 %v11754_v51, %v4740_v24  ;;  %v9645_v24 = vld [vmem:[%s11536_s17 + $0x258] sm:$0xff]  }
 0xd06   : > { %v5191_v18 = vmul.f32 %v13016_v7, %v4741_v5 }
 0xd07   : > { %v2387_v17 = vpop.xlane.xlu2 %2386  ;;  %v2384_v39 = vpop.xlane.xlu1 %2383 }
 0xd08   : > { %v5826_v43 = vpop.f32.mrf.mxu1  ;;  %v2879_v3 = vmax.f32 %v2387_v17, 1e-08  ;;  %v2878_v58 = vmax.f32 %v2384_v39, 1e-08  ;;  %v13335_v39 = vunpack.c.l.bf16 %v9645_v24 }
 0xd09   : > { %v5827_v0 = vadd.f32 %v13111_v33, %v5826_v43  ;;  %v13337_v43 = vunpack.c.h.bf16 %v9645_v24 }
 0xd0a   : > { %10736 = vrcp.f32 %v2879_v3 }
 0xd0b   : > { %10738 = vrcp.f32 %v2878_v58  ;;  %v4742_v21 = vpop.f32.mrf.mxu0 }
 0xd0c   : > { %v4743_v1 = vadd.f32 %v11754_v51, %v4742_v21  ;;  %v10196_v21 = vpack.i.bf16 %v13337_v43, %v13335_v39 }
 0xd0e   : > { %v5192_v13 = vmul.f32 %v13018_v62, %v4743_v1  ;;  %v6286_v62 = vmax.f32 %v5827_v0, 0.0 }
 0xd0f   : > { %v3903_v41 = vpop.permute.xlu2 %3902 }
 0xd10   : > { %v10737_v29 = vpop.eup %10736  ;;  %v5828_v48 = vpop.f32.mrf.mxu1  ;;  %8869 = vmatmul.msk.bf16.gmra.mxu0 %vm1973_vm0, %v3903_v41  ;;  %v5384_v53 = vpack.c.bf16 %v5192_v13, %v5191_v18 }
 0xd11   : > { %v10739_v20 = vpop.eup %10738  ;;  %v3391_v59 = vmul.f32 %v10737_v29, %v13170_v37  ;;  %v5829_v4 = vadd.f32 %v13111_v33, %v5828_v48  ;;  %v2390_v41 = vpop.xlane.xlu0 %2389 }
 0xd12   : > { %v3390_v7 = vmul.f32 %v10739_v20, %v13168_v35  ;;  %5840 = vmatmul.bf16.gmra.mxu1 %v5384_v53  ;;  %v2880_v29 = vmax.f32 %v2390_v41, 1e-08 }
 0xd13   : > { %v6287_v34 = vmax.f32 %v5829_v4, 0.0 }
 0xd14   : > { %v3578_v25 = vpack.c.bf16 %v3391_v59, %v3390_v7  ;;  %10740 = vrcp.f32 %v2880_v29 }
 0xd15   : > { %v6482_v11 = vpack.c.bf16 %v6287_v34, %v6286_v62 }
 0xd16   : > { %3908 = vrot.lane.b32.xlu1 %v3578_v25, %s11344_s13  ;;  %2404 = vadd.xlane.f32.xlu2 %v2403_v16 }
 0xd17   : > { %6926 = vmatmul.bf16.gmra.mxu2 %v6482_v11 }
 0xd18   : > { %v7998_v6 = vpop.f32.mrf.mxu3  ;;  %2401 = vadd.xlane.f32.xlu0 %v2400_v10 }
 0xd19   : > { %v7999_v33 = vadd.f32 %v13274_v61, %v7998_v6 }
 0xd1a   : > { %v10741_v11 = vpop.eup %10740 }
 0xd1b   : > { %8476 = vst [vmem:[%s11979_s22 + $0x360] sm:$0xff] %v7999_v33  ;;  %v3392_v33 = vmul.f32 %v10741_v11, %v13178_v15  ;;  %v9647_v11 = vld [vmem:[%s11536_s17 + $0x268] sm:$0xff]  }
 0xd1f   : > { %v3905_v12 = vpop.permute.xlu1 %3904 }
 0xd20   : > { %8870 = vmatmul.msk.bf16.gmra.mxu0 %vm1973_vm0, %v3905_v12  ;;  %v8000_v8 = vpop.f32.mrf.mxu3 }
 0xd21   : > { %v8001_v54 = vadd.f32 %v13274_v61, %v8000_v8 }
 0xd23   : > { %8477 = vst [vmem:[%s11979_s22 + $0x368] sm:$0xff] %v8001_v54 }
 0xd26   : > { %v6912_v38 = vpop.f32.mrf.mxu2 }
 0xd27   : > { %v10183_v63 = vpop.permute.xlu1 %10182  ;;  %v6913_v3 = vadd.f32 %v13193_v47, %v6912_v38 }
 0xd28   : > { %v10185_v27 = vunpack.i.h.bf16 %v10183_v63  ;;  %v10184_v44 = vunpack.i.l.bf16 %v10183_v63 }
 0xd29   : > { %v7381_v1 = vmax.f32 %v6913_v3, 0.0 }
 0xd2a   : > { %v2409_v17 = vsel %vm1973_vm0, %v10185_v27, 0.0  ;;  %v2406_v0 = vsel %vm1973_vm0, %v10184_v44, 0.0  ;;  %v13359_v44 = vld [vmem:[#allocation8] ss:$0 sm:$0xff] }
 0xd2b   : > { %2410 = vadd.xlane.f32.xlu2 %v2409_v17 }
 0xd2c   : > { %10192 = vrot.lane.b32.xlu0 %v10191_v52, %s11344_s13 }
 0xd2e   : > { %v6914_v58 = vpop.f32.mrf.mxu2 }
 0xd2f   : > { %v6915_v5 = vadd.f32 %v13193_v47, %v6914_v58 }
 0xd31   : > { %v7382_v18 = vmax.f32 %v6915_v5, 0.0 }
 0xd33   : > { %v7580_v13 = vpack.c.bf16 %v7382_v18, %v7381_v1 }
 0xd34   : > { %10197 = vrot.lane.b32.xlu0 %v10196_v21, %s11344_s13 }
 0xd35   : > { %8012 = vmatmul.bf16.gmra.mxu3 %v7580_v13 }
 0xd3e   : > { %v4745_v30 = vpop.f32.mrf.mxu0 }
 0xd3f   : > { %v4746_v48 = vadd.f32 %v11754_v51, %v4745_v30 }
 0xd40   : > { %2407 = vadd.xlane.f32.xlu1 %v2406_v0 }
 0xd41   : > { %v5193_v46 = vmul.f32 %v13058_v14, %v4746_v48 }
 0xd46   : > { %v4747_v53 = vpop.f32.mrf.mxu0 }
 0xd47   : > { %v4748_v20 = vadd.f32 %v11754_v51, %v4747_v53 }
 0xd48   : > { %v2393_v59 = vpop.xlane.xlu2 %2392 }
 0xd49   : > { %v5194_v4 = vmul.f32 %v13060_v22, %v4748_v20  ;;  %v2881_v7 = vmax.f32 %v2393_v59, 1e-08  ;;  %v9646_v59 = vld [vmem:[%s11536_s17 + $0x260] sm:$0xff]  }
 0xd4a   : > { %v6917_v62 = vpop.f32.mrf.mxu2 }
 0xd4b   : > { %10742 = vrcp.f32 %v2881_v7  ;;  %v5385_v34 = vpack.c.bf16 %v5194_v4, %v5193_v46  ;;  %v6918_v6 = vadd.f32 %v13193_v47, %v6917_v62  ;;  %v13366_v4 = vunpack.c.l.bf16 %v9646_v59 }
 0xd4c   : > { %v13368_v7 = vunpack.c.h.bf16 %v9646_v59 }
 0xd4d   : > { %5845 = vmatmul.bf16.gmra.mxu1 %v5385_v34  ;;  %v2396_v16 = vpop.xlane.xlu0 %2395  ;;  %v7383_v63 = vmax.f32 %v6918_v6, 0.0  ;;  %v13376_v6 = vunpack.c.l.bf16 %v9647_v11 }
 0xd4e   : > { %v2882_v25 = vmax.f32 %v2396_v16, 1e-08 }
 0xd50   : > { %10744 = vrcp.f32 %v2882_v25  ;;  %v10188_v38 = vpop.permute.xlu2 %10187  ;;  %v10201_v25 = vpack.i.bf16 %v13368_v7, %v13366_v4 }
 0xd51   : > { %v10743_v10 = vpop.eup %10742  ;;  %v10189_v17 = vunpack.i.l.bf16 %v10188_v38 }
 0xd52   : > { %v3393_v12 = vmul.f32 %v10743_v10, %v13180_v23  ;;  %v6919_v8 = vpop.f32.mrf.mxu2  ;;  %v2399_v14 = vpop.xlane.xlu1 %2398 }
 0xd53   : > { %v6920_v22 = vadd.f32 %v13193_v47, %v6919_v8  ;;  %v2883_v54 = vmax.f32 %v2399_v14, 1e-08  ;;  %v2412_v5 = vsel %vm1973_vm0, %v10189_v17, 0.0 }
 0xd54   : > { %v3579_v45 = vpack.c.bf16 %v3393_v12, %v3392_v33  ;;  %v13378_v33 = vunpack.c.h.bf16 %v9647_v11 }
 0xd55   : > { %v7384_v52 = vmax.f32 %v6920_v22, 0.0  ;;  %10746 = vrcp.f32 %v2883_v54 }
 0xd56   : > { %3910 = vrot.lane.b32.xlu2 %v3579_v45, %s11344_s13  ;;  %v10745_v27 = vpop.eup %10744  ;;  %v10206_v22 = vpack.i.bf16 %v13378_v33, %v13376_v6 }
 0xd57   : > { %v7581_v24 = vpack.c.bf16 %v7384_v52, %v7383_v63  ;;  %v3394_v3 = vmul.f32 %v10745_v27, %v13209_v57 }
 0xd59   : > { %8017 = vmatmul.bf16.gmra.mxu3 %v7581_v24  ;;  %v10190_v24 = vunpack.i.h.bf16 %v10188_v38 }
 0xd5b   : > { %v10747_v58 = vpop.eup %10746 }
 0xd5c   : > { %v3395_v21 = vmul.f32 %v10747_v58, %v13211_v32  ;;  %v5831_v1 = vpop.f32.mrf.mxu1 }
 0xd5d   : > { %v5832_v0 = vadd.f32 %v13359_v44, %v5831_v1  ;;  %v2415_v1 = vsel %vm1973_vm0, %v10190_v24, 0.0 }
 0xd5e   : > { %v3580_v18 = vpack.c.bf16 %v3395_v21, %v3394_v3  ;;  %2413 = vadd.xlane.f32.xlu0 %v2412_v5 }
 0xd5f   : > { %v6288_v53 = vmax.f32 %v5832_v0, 0.0 }
 0xd60   : > { %v3907_v13 = vpop.permute.xlu0 %3906  ;;  %3912 = vrot.lane.b32.xlu1 %v3580_v18, %s11344_s13 }
 0xd61   : > { %8871 = vmatmul.msk.bf16.gmra.mxu0 %vm1973_vm0, %v3907_v13 }
 0xd63   : > { %v8003_v30 = vpop.f32.mrf.mxu3 }
 0xd64   : > { %v8004_v41 = vadd.f32 %v13274_v61, %v8003_v30  ;;  %v5833_v29 = vpop.f32.mrf.mxu1 }
 0xd65   : > { %v5834_v48 = vadd.f32 %v13359_v44, %v5833_v29 }
 0xd66   : > { %8478 = vst [vmem:[%s11979_s22 + $0x370] sm:$0xff] %v8004_v41 }
 0xd67   : > { %v6289_v20 = vmax.f32 %v5834_v48, 0.0 }
 0xd69   : > { %v6483_v46 = vpack.c.bf16 %v6289_v20, %v6288_v53 }
 0xd6b   : > { %6931 = vmatmul.bf16.gmra.mxu2 %v6483_v46  ;;  %v8005_v62 = vpop.f32.mrf.mxu3 }
 0xd6c   : > { %v8006_v34 = vadd.f32 %v13274_v61, %v8005_v62  ;;  %v5836_v16 = vpop.f32.mrf.mxu1 }
 0xd6d   : > { %v5837_v12 = vadd.f32 %v13359_v44, %v5836_v16 }
 0xd6e   : > { %8479 = vst [vmem:[%s11979_s22 + $0x378] sm:$0xff] %v8006_v34 }
 0xd6f   : > { %v6290_v54 = vmax.f32 %v5837_v12, 0.0 }
 0xd72   : > { %v6922_v10 = vpop.f32.mrf.mxu2  ;;  %10202 = vrot.lane.b32.xlu0 %v10201_v25, %s11344_s13 }
 0xd73   : > { %v6923_v63 = vadd.f32 %v13193_v47, %v6922_v10 }
 0xd74   : > { %v5838_v8 = vpop.f32.mrf.mxu1 }
 0xd75   : > { %v5839_v14 = vadd.f32 %v13359_v44, %v5838_v8  ;;  %v7385_v5 = vmax.f32 %v6923_v63, 0.0 }
 0xd77   : > { %v6291_v45 = vmax.f32 %v5839_v14, 0.0 }
 0xd79   : > { %v8008_v52 = vpop.f32.mrf.mxu3  ;;  %v6484_v27 = vpack.c.bf16 %v6291_v45, %v6290_v54 }
 0xd7a   : > { %v8009_v17 = vadd.f32 %v13274_v61, %v8008_v52  ;;  %v6924_v3 = vpop.f32.mrf.mxu2  ;;  %10207 = vrot.lane.b32.xlu0 %v10206_v22, %s11344_s13 }
 0xd7b   : > { %v6925_v58 = vadd.f32 %v13193_v47, %v6924_v3  ;;  %6936 = vmatmul.bf16.gmra.mxu2 %v6484_v27 }
 0xd7c   : > { %8480 = vst [vmem:[%s11979_s22 + $0x380] sm:$0xff] %v8009_v17 }
 0xd7d   : > { %v7386_v21 = vmax.f32 %v6925_v58, 0.0 }
 0xd7f   : > { %2416 = vadd.xlane.f32.xlu2 %v2415_v1  ;;  %v7582_v18 = vpack.c.bf16 %v7386_v21, %v7385_v5 }
 0xd81   : > { %v8010_v13 = vpop.f32.mrf.mxu3  ;;  %8022 = vmatmul.bf16.gmra.mxu3 %v7582_v18 }
 0xd82   : > { %v8011_v0 = vadd.f32 %v13274_v61, %v8010_v13 }
 0xd84   : > { %8481 = vst [vmem:[%s11979_s22 + $0x388] sm:$0xff] %v8011_v0 }
 0xd88   : > { %v3909_v38 = vpop.permute.xlu1 %3908 }
 0xd89   : > { %8872 = vmatmul.msk.bf16.gmra.mxu0 %vm1973_vm0, %v3909_v38  ;;  %v2405_v22 = vpop.xlane.xlu2 %2404 }
 0xd8a   : > { %v2885_v21 = vmax.f32 %v2405_v22, 1e-08  ;;  %v9648_v22 = vld [vmem:[%s11536_s17 + $0x270] sm:$0xff]  }
 0xd8b   : > { %v2402_v20 = vpop.xlane.xlu0 %2401 }
 0xd8c   : > { %v2884_v0 = vmax.f32 %v2402_v20, 1e-08  ;;  %10748 = vrcp.f32 %v2885_v21 }
 0xd8d   : > { %v4750_v30 = vpop.f32.mrf.mxu0 }
 0xd8e   : > { %v4751_v29 = vadd.f32 %v11754_v51, %v4750_v30  ;;  %10750 = vrcp.f32 %v2884_v0 }
 0xd8f   : > { %v5841_v41 = vpop.f32.mrf.mxu1 }
 0xd90   : > { %v5842_v53 = vadd.f32 %v13359_v44, %v5841_v41  ;;  %v5195_v62 = vmul.f32 %v13071_v56, %v4751_v29 }
 0xd92   : > { %v6292_v25 = vmax.f32 %v5842_v53, 0.0 }
 0xd95   : > { %v4752_v48 = vpop.f32.mrf.mxu0 }
 0xd96   : > { %v4753_v59 = vadd.f32 %v11754_v51, %v4752_v48 }
 0xd97   : > { %v5843_v46 = vpop.f32.mrf.mxu1 }
 0xd98   : > { %v5196_v34 = vmul.f32 %v13073_v55, %v4753_v59  ;;  %v5844_v16 = vadd.f32 %v13359_v44, %v5843_v46  ;;  %v10749_v59 = vpop.eup %10748 }
 0xd99   : > { %v3397_v20 = vmul.f32 %v10749_v59, %v13226_v60 }
 0xd9a   : > { %v6293_v11 = vmax.f32 %v5844_v16, 0.0  ;;  %v6927_v10 = vpop.f32.mrf.mxu2  ;;  %v5386_v12 = vpack.c.bf16 %v5196_v34, %v5195_v62  ;;  %v10751_v62 = vpop.eup %10750 }
 0xd9b   : > { %v6928_v52 = vadd.f32 %v13193_v47, %v6927_v10 }
 0xd9c   : > { %5850 = vmatmul.bf16.gmra.mxu1 %v5386_v12  ;;  %v6485_v8 = vpack.c.bf16 %v6293_v11, %v6292_v25 }
 0xd9d   : > { %v4755_v14 = vpop.f32.mrf.mxu0  ;;  %v7387_v3 = vmax.f32 %v6928_v52, 0.0  ;;  %v13419_v52 = vunpack.c.l.bf16 %v9648_v22 }
 0xd9e   : > { %6941 = vmatmul.bf16.gmra.mxu2 %v6485_v8  ;;  %v10193_v54 = vpop.permute.xlu0 %10192  ;;  %v4756_v17 = vadd.f32 %v11754_v51, %v4755_v14  ;;  %v2411_v18 = vpop.xlane.xlu2 %2410 }
 0xd9f   : > { %v10195_v45 = vunpack.i.h.bf16 %v10193_v54  ;;  %v10194_v63 = vunpack.i.l.bf16 %v10193_v54  ;;  %v2887_v53 = vmax.f32 %v2411_v18, 1e-08 }
 0xda0   : > { %v5197_v41 = vmul.f32 %v13096_v50, %v4756_v17 }
 0xda1   : > { %v2421_v56 = vsel %vm1973_vm0, %v10195_v45, 0.0  ;;  %v2418_v55 = vsel %vm1973_vm0, %v10194_v63, 0.0  ;;  %10752 = vrcp.f32 %v2887_v53 }
 0xda2   : > { %v6929_v27 = vpop.f32.mrf.mxu2  ;;  %2422 = vadd.xlane.f32.xlu2 %v2421_v56  ;;  %2419 = vadd.xlane.f32.xlu1 %v2418_v55  ;;  %v13421_v56 = vunpack.c.h.bf16 %v9648_v22 }
 0xda3   : > { %v6930_v24 = vadd.f32 %v13193_v47, %v6929_v27 }
 0xda4   : > { %v10211_v55 = vpack.i.bf16 %v13421_v56, %v13419_v52 }
 0xda5   : > { %v7388_v58 = vmax.f32 %v6930_v24, 0.0  ;;  %v4757_v5 = vpop.f32.mrf.mxu0 }
 0xda6   : > { %v4758_v1 = vadd.f32 %v11754_v51, %v4757_v5  ;;  %v10198_v13 = vpop.permute.xlu0 %10197 }
 0xda7   : > { %v7583_v38 = vpack.c.bf16 %v7388_v58, %v7387_v3  ;;  %v10199_v30 = vunpack.i.l.bf16 %v10198_v13  ;;  %v10753_v16 = vpop.eup %10752 }
 0xda8   : > { %v5198_v29 = vmul.f32 %v13098_v26, %v4758_v1  ;;  %v3396_v26 = vmul.f32 %v10751_v62, %v13224_v28  ;;  %v3399_v12 = vmul.f32 %v10753_v16, %v13260_v9 }
 0xda9   : > { %8027 = vmatmul.bf16.gmra.mxu3 %v7583_v38  ;;  %v2424_v47 = vsel %vm1973_vm0, %v10199_v30, 0.0  ;;  %v10200_v30 = vunpack.i.h.bf16 %v10198_v13 }
 0xdaa   : > { %v5387_v48 = vpack.c.bf16 %v5198_v29, %v5197_v41  ;;  %2425 = vadd.xlane.f32.xlu0 %v2424_v47  ;;  %v3581_v11 = vpack.c.bf16 %v3397_v20, %v3396_v26 }
 0xdab   : > { %v2427_v29 = vsel %vm1973_vm0, %v10200_v30, 0.0 }
 0xdac   : > { %5855 = vmatmul.bf16.gmra.mxu1 %v5387_v48 }
 0xdb0   : > { %v3911_v46 = vpop.permute.xlu2 %3910 }
 0xdb1   : > { %8873 = vmatmul.msk.bf16.gmra.mxu0 %vm1973_vm0, %v3911_v46 }
 0xdb3   : > { %v2408_v50 = vpop.xlane.xlu1 %2407 }
 0xdb4   : > { %v2886_v34 = vmax.f32 %v2408_v50, 1e-08 }
 0xdb6   : > { %10754 = vrcp.f32 %v2886_v34 }
 0xdb8   : > { %v8013_v25 = vpop.f32.mrf.mxu3 }
 0xdb9   : > { %v8014_v10 = vadd.f32 %v13274_v61, %v8013_v25 }
 0xdba   : > { %3914 = vrot.lane.b32.xlu2 %v3581_v11, %s11344_s13 }
 0xdbb   : > { %8482 = vst [vmem:[%s11979_s22 + $0x390] sm:$0xff] %v8014_v10  ;;  %v9649_v10 = vld [vmem:[%s11536_s17 + $0x278] sm:$0xff]  }
 0xdbc   : > { %v10755_v8 = vpop.eup %10754  ;;  %v13442_v22 = vunpack.c.l.bf16 %v9649_v10 }
 0xdbd   : > { %v3398_v14 = vmul.f32 %v10755_v8, %v13258_v40 }
 0xdbf   : > { %v3582_v54 = vpack.c.bf16 %v3399_v12, %v3398_v14 }
 0xdc0   : > { %v8015_v45 = vpop.f32.mrf.mxu3 }
 0xdc1   : > { %v8016_v63 = vadd.f32 %v13274_v61, %v8015_v45  ;;  %3916 = vrot.lane.b32.xlu1 %v3582_v54, %s11344_s13  ;;  %v13444_v54 = vunpack.c.h.bf16 %v9649_v10  ;;  %v13446_v45 = vld [vmem:[#allocation11] ss:$0 sm:$0xff] }
 0xdc3   : > { %8483 = vst [vmem:[%s11979_s22 + $0x398] sm:$0xff] %v8016_v63 }
 0xdc9   : > { %10212 = vrot.lane.b32.xlu1 %v10211_v55, %s11344_s13  ;;  %v10216_v55 = vpack.i.bf16 %v13444_v54, %v13442_v22 }
 0xdca   : > { %v5846_v27 = vpop.f32.mrf.mxu1 }
 0xdcb   : > { %v5847_v24 = vadd.f32 %v13359_v44, %v5846_v27 }
 0xdcd   : > { %v6294_v5 = vmax.f32 %v5847_v24, 0.0 }
 0xdd1   : > { %v2414_v18 = vpop.xlane.xlu0 %2413 }
 0xdd2   : > { %v5848_v17 = vpop.f32.mrf.mxu1  ;;  %v3913_v3 = vpop.permute.xlu1 %3912  ;;  %v2888_v11 = vmax.f32 %v2414_v18, 1e-08 }
 0xdd3   : > { %v5849_v58 = vadd.f32 %v13359_v44, %v5848_v17  ;;  %8874 = vmatmul.msk.bf16.gmra.mxu0 %vm1973_vm0, %v3913_v3 }
 0xdd4   : > { %10756 = vrcp.f32 %v2888_v11 }
 0xdd5   : > { %v6295_v21 = vmax.f32 %v5849_v58, 0.0 }
 0xdd7   : > { %v6486_v1 = vpack.c.bf16 %v6295_v21, %v6294_v5 }
 0xdd9   : > { %6946 = vmatmul.bf16.gmra.mxu2 %v6486_v1 }
 0xdda   : > { %v10757_v27 = vpop.eup %10756 }
 0xddb   : > { %v3400_v5 = vmul.f32 %v10757_v27, %v13287_v49 }
 0xddc   : > { %v8018_v0 = vpop.f32.mrf.mxu3 }
 0xddd   : > { %v8019_v38 = vadd.f32 %v13274_v61, %v8018_v0 }
 0xdde   : > { %v4760_v41 = vpop.f32.mrf.mxu0 }
 0xddf   : > { %8484 = vst [vmem:[%s11979_s22 + $0x3a0] sm:$0xff] %v8019_v38  ;;  %v4761_v53 = vadd.f32 %v11754_v51, %v4760_v41 }
 0xde1   : > { %v5199_v13 = vmul.f32 %v13118_v2, %v4761_v53 }
 0xde3   : > { %2428 = vadd.xlane.f32.xlu2 %v2427_v29 }
 0xde4   : > { %v8020_v47 = vpop.f32.mrf.mxu3  ;;  %v10203_v48 = vpop.permute.xlu0 %10202 }
 0xde5   : > { %v8021_v59 = vadd.f32 %v13274_v61, %v8020_v47  ;;  %v10204_v46 = vunpack.i.l.bf16 %v10203_v48  ;;  %v10205_v16 = vunpack.i.h.bf16 %v10203_v48 }
 0xde6   : > { %v4762_v62 = vpop.f32.mrf.mxu0 }
 0xde7   : > { %8485 = vst [vmem:[%s11979_s22 + $0x3a8] sm:$0xff] %v8021_v59  ;;  %v4763_v50 = vadd.f32 %v11754_v51, %v4762_v62  ;;  %v2430_v26 = vsel %vm1973_vm0, %v10204_v46, 0.0  ;;  %v2433_v8 = vsel %vm1973_vm0, %v10205_v16, 0.0 }
 0xde8   : > { %2431 = vadd.xlane.f32.xlu0 %v2430_v26 }
 0xde9   : > { %v5200_v20 = vmul.f32 %v13120_v31, %v4763_v50 }
 0xdeb   : > { %v5388_v34 = vpack.c.bf16 %v5200_v20, %v5199_v13 }
 0xded   : > { %5860 = vmatmul.bf16.gmra.mxu1 %v5388_v34 }
 0xdee   : > { %v6932_v25 = vpop.f32.mrf.mxu2 }
 0xdef   : > { %v6933_v2 = vadd.f32 %v13446_v45, %v6932_v25 }
 0xdf1   : > { %v7389_v24 = vmax.f32 %v6933_v2, 0.0 }
 0xdf2   : > { %v2417_v12 = vpop.xlane.xlu2 %2416 }
 0xdf3   : > { %v2889_v14 = vmax.f32 %v2417_v12, 1e-08  ;;  %2434 = vadd.xlane.f32.xlu1 %v2433_v8 }
 0xdf5   : > { %10758 = vrcp.f32 %v2889_v14  ;;  %v10208_v14 = vpop.permute.xlu0 %10207 }
 0xdf6   : > { %v6934_v31 = vpop.f32.mrf.mxu2  ;;  %v10210_v2 = vunpack.i.h.bf16 %v10208_v14 }
 0xdf7   : > { %v6935_v63 = vadd.f32 %v13446_v45, %v6934_v31 }
 0xdf9   : > { %v7390_v17 = vmax.f32 %v6935_v63, 0.0 }
 0xdfb   : > { %v10759_v3 = vpop.eup %10758  ;;  %v7584_v58 = vpack.c.bf16 %v7390_v17, %v7389_v24  ;;  %10217 = vrot.lane.b32.xlu2 %v10216_v55, %s11344_s13 }
 0xdfc   : > { %v3401_v21 = vmul.f32 %v10759_v3, %v13289_v19  ;;  %v2439_v3 = vsel %vm1973_vm0, %v10210_v2, 0.0 }
 0xdfd   : > { %8032 = vmatmul.bf16.gmra.mxu3 %v7584_v58 }
 0xdfe   : > { %v6937_v1 = vpop.f32.mrf.mxu2  ;;  %v3583_v18 = vpack.c.bf16 %v3401_v21, %v3400_v5  ;;  %v10209_v21 = vunpack.i.l.bf16 %v10208_v14 }
 0xdff   : > { %v6938_v38 = vadd.f32 %v13446_v45, %v6937_v1 }
 0xe00   : > { %3918 = vrot.lane.b32.xlu0 %v3583_v18, %s11344_s13 }
 0xe01   : > { %v7391_v48 = vmax.f32 %v6938_v38, 0.0  ;;  %v2436_v38 = vsel %vm1973_vm0, %v10209_v21, 0.0 }
 0xe04   : > { %v8023_v0 = vpop.f32.mrf.mxu3 }
 0xe05   : > { %v8024_v30 = vadd.f32 %v13274_v61, %v8023_v0 }
 0xe06   : > { %v4765_v41 = vpop.f32.mrf.mxu0  ;;  %v6939_v29 = vpop.f32.mrf.mxu2 }
 0xe07   : > { %8486 = vst [vmem:[%s11979_s22 + $0x3b0] sm:$0xff] %v8024_v30  ;;  %v6940_v47 = vadd.f32 %v13446_v45, %v6939_v29  ;;  %v4766_v62 = vadd.f32 %v11754_v51, %v4765_v41 }
 0xe09   : > { %v7392_v53 = vmax.f32 %v6940_v47, 0.0  ;;  %v5201_v20 = vmul.f32 %v13168_v35, %v4766_v62 }
 0xe0b   : > { %v7585_v59 = vpack.c.bf16 %v7392_v53, %v7391_v48 }
 0xe0c   : > { %v8025_v46 = vpop.f32.mrf.mxu3 }
 0xe0d   : > { %v8026_v50 = vadd.f32 %v13274_v61, %v8025_v46  ;;  %8037 = vmatmul.bf16.gmra.mxu3 %v7585_v59 }
 0xe0e   : > { %v4767_v26 = vpop.f32.mrf.mxu0 }
 0xe0f   : > { %8487 = vst [vmem:[%s11979_s22 + $0x3b8] sm:$0xff] %v8026_v50  ;;  %v4768_v13 = vadd.f32 %v11754_v51, %v4767_v26 }
 0xe11   : > { %v5202_v34 = vmul.f32 %v13170_v37, %v4768_v13 }
 0xe13   : > { %v5389_v16 = vpack.c.bf16 %v5202_v34, %v5201_v20 }
 0xe15   : > { %5865 = vmatmul.bf16.gmra.mxu1 %v5389_v16  ;;  %v2423_v25 = vpop.xlane.xlu2 %2422  ;;  %v2420_v11 = vpop.xlane.xlu1 %2419  ;;  %v9650_v16 = vld [vmem:[%s11536_s17 + $0x280] sm:$0xff]  }
 0xe16   : > { %v2891_v10 = vmax.f32 %v2423_v25, 1e-08  ;;  %v2890_v12 = vmax.f32 %v2420_v11, 1e-08 }
 0xe18   : > { %10760 = vrcp.f32 %v2891_v10 }
 0xe19   : > { %10762 = vrcp.f32 %v2890_v12  ;;  %v5851_v8 = vpop.f32.mrf.mxu1 }
 0xe1a   : > { %v5852_v27 = vadd.f32 %v13359_v44, %v5851_v8 }
 0xe1c   : > { %v6296_v1 = vmax.f32 %v5852_v27, 0.0 }
 0xe1d   : > { %v3915_v31 = vpop.permute.xlu2 %3914 }
 0xe1e   : > { %v10761_v63 = vpop.eup %10760  ;;  %8875 = vmatmul.msk.bf16.gmra.mxu0 %vm1973_vm0, %v3915_v31  ;;  %v13484_v31 = vunpack.c.l.bf16 %v9650_v16 }
 0xe1f   : > { %v10763_v55 = vpop.eup %10762  ;;  %v3403_v35 = vmul.f32 %v10761_v63, %v13328_v36  ;;  %v13486_v63 = vunpack.c.h.bf16 %v9650_v16 }
 0xe20   : > { %v3402_v37 = vmul.f32 %v10763_v55, %v13326_v42 }
 0xe21   : > { %v6942_v24 = vpop.f32.mrf.mxu2  ;;  %v5853_v17 = vpop.f32.mrf.mxu1  ;;  %v10221_v27 = vpack.i.bf16 %v13486_v63, %v13484_v31 }
 0xe22   : > { %v5854_v58 = vadd.f32 %v13359_v44, %v5853_v17  ;;  %v3584_v5 = vpack.c.bf16 %v3403_v35, %v3402_v37  ;;  %v6943_v30 = vadd.f32 %v13446_v45, %v6942_v24 }
 0xe24   : > { %v6297_v18 = vmax.f32 %v5854_v58, 0.0  ;;  %3920 = vrot.lane.b32.xlu1 %v3584_v5, %s11344_s13  ;;  %2440 = vadd.xlane.f32.xlu2 %v2439_v3  ;;  %v7393_v48 = vmax.f32 %v6943_v30, 0.0 }
 0xe26   : > { %v6487_v0 = vpack.c.bf16 %v6297_v18, %v6296_v1  ;;  %v2426_v18 = vpop.xlane.xlu0 %2425 }
 0xe28   : > { %6951 = vmatmul.bf16.gmra.mxu2 %v6487_v0 }
 0xe29   : > { %v6944_v41 = vpop.f32.mrf.mxu2  ;;  %v5856_v29 = vpop.f32.mrf.mxu1 }
 0xe2a   : > { %v6945_v47 = vadd.f32 %v13446_v45, %v6944_v41  ;;  %2437 = vadd.xlane.f32.xlu0 %v2436_v38  ;;  %v5857_v26 = vadd.f32 %v13359_v44, %v5856_v29  ;;  %v2892_v38 = vmax.f32 %v2426_v18, 1e-08 }
 0xe2c   : > { %v7394_v53 = vmax.f32 %v6945_v47, 0.0  ;;  %v8028_v59 = vpop.f32.mrf.mxu3  ;;  %v6298_v25 = vmax.f32 %v5857_v26, 0.0  ;;  %10764 = vrcp.f32 %v2892_v38 }
 0xe2d   : > { %v8029_v46 = vadd.f32 %v13274_v61, %v8028_v59 }
 0xe2e   : > { %v4770_v62 = vpop.f32.mrf.mxu0  ;;  %v7586_v50 = vpack.c.bf16 %v7394_v53, %v7393_v48 }
 0xe2f   : > { %8488 = vst [vmem:[%s11979_s22 + $0x3c0] sm:$0xff] %v8029_v46  ;;  %v4771_v12 = vadd.f32 %v11754_v51, %v4770_v62 }
 0xe30   : > { %8042 = vmatmul.bf16.gmra.mxu3 %v7586_v50 }
 0xe31   : > { %v5858_v13 = vpop.f32.mrf.mxu1  ;;  %v5203_v35 = vmul.f32 %v13178_v15, %v4771_v12 }
 0xe32   : > { %v5859_v20 = vadd.f32 %v13359_v44, %v5858_v13  ;;  %v10765_v62 = vpop.eup %10764 }
 0xe33   : > { %v3917_v34 = vpop.permute.xlu1 %3916  ;;  %v3404_v13 = vmul.f32 %v10765_v62, %v13335_v39 }
 0xe34   : > { %v6299_v11 = vmax.f32 %v5859_v20, 0.0  ;;  %8876 = vmatmul.msk.bf16.gmra.mxu0 %vm1973_vm0, %v3917_v34  ;;  %v8030_v10 = vpop.f32.mrf.mxu3 }
 0xe35   : > { %v8031_v8 = vadd.f32 %v13274_v61, %v8030_v10  ;;  %v9651_v61 = vld [vmem:[%s11536_s17 + $0x288] sm:$0xff]  }
 0xe36   : > { %v4772_v14 = vpop.f32.mrf.mxu0  ;;  %v6488_v2 = vpack.c.bf16 %v6299_v11, %v6298_v25  ;;  %v13497_v5 = vunpack.c.l.bf16 %v9651_v61  ;;  %v13499_v21 = vunpack.c.h.bf16 %v9651_v61 }
 0xe37   : > { %8489 = vst [vmem:[%s11979_s22 + $0x3c8] sm:$0xff] %v8031_v8  ;;  %v4773_v55 = vadd.f32 %v11754_v51, %v4772_v14 }
 0xe38   : > { %6956 = vmatmul.bf16.gmra.mxu2 %v6488_v2  ;;  %v10226_v15 = vpack.i.bf16 %v13499_v21, %v13497_v5 }
 0xe39   : > { %v5204_v37 = vmul.f32 %v13180_v23, %v4773_v55 }
 0xe3b   : > { %v5390_v24 = vpack.c.bf16 %v5204_v37, %v5203_v35  ;;  %v10213_v17 = vpop.permute.xlu1 %10212 }
 0xe3c   : > { %v10215_v3 = vunpack.i.h.bf16 %v10213_v17  ;;  %v10214_v23 = vunpack.i.l.bf16 %v10213_v17 }
 0xe3d   : > { %5870 = vmatmul.bf16.gmra.mxu1 %v5390_v24 }
 0xe3e   : > { %10222 = vrot.lane.b32.xlu0 %v10221_v27, %s11344_s13  ;;  %v2445_v58 = vsel %vm1973_vm0, %v10215_v3, 0.0  ;;  %v2442_v1 = vsel %vm1973_vm0, %v10214_v23, 0.0 }
 0xe3f   : > { %2446 = vadd.xlane.f32.xlu2 %v2445_v58 }
 0xe46   : > { %10227 = vrot.lane.b32.xlu0 %v10226_v15, %s11344_s13  ;;  %v9652_v15 = vld [vmem:[%s11536_s17 + $0x290] sm:$0xff]  }
 0xe47   : > { %v13522_v38 = vunpack.c.l.bf16 %v9652_v15 }
 0xe4e   : > { %2443 = vadd.xlane.f32.xlu1 %v2442_v1 }
 0xe50   : > { %v4775_v0 = vpop.f32.mrf.mxu0 }
 0xe51   : > { %v4776_v41 = vadd.f32 %v11754_v51, %v4775_v0 }
 0xe53   : > { %v5205_v53 = vmul.f32 %v13209_v57, %v4776_v41 }
 0xe56   : > { %v2429_v30 = vpop.xlane.xlu2 %2428 }
 0xe57   : > { %v2893_v29 = vmax.f32 %v2429_v30, 1e-08  ;;  %v13524_v30 = vunpack.c.h.bf16 %v9652_v15 }
 0xe58   : > { %v4777_v47 = vpop.f32.mrf.mxu0 }
 0xe59   : > { %10766 = vrcp.f32 %v2893_v29  ;;  %v4778_v48 = vadd.f32 %v11754_v51, %v4777_v47 }
 0xe5b   : > { %v5206_v59 = vmul.f32 %v13211_v32, %v4778_v48  ;;  %v2432_v34 = vpop.xlane.xlu0 %2431  ;;  %v10231_v48 = vpack.i.bf16 %v13524_v30, %v13522_v38 }
 0xe5c   : > { %v6947_v46 = vpop.f32.mrf.mxu2  ;;  %v2894_v11 = vmax.f32 %v2432_v34, 1e-08 }
 0xe5d   : > { %v5391_v50 = vpack.c.bf16 %v5206_v59, %v5205_v53  ;;  %v6948_v25 = vadd.f32 %v13446_v45, %v6947_v46  ;;  %v13529_v59 = vld [vmem:[#allocation14] ss:$0 sm:$0xff] }
 0xe5e   : > { %v10218_v12 = vpop.permute.xlu2 %10217  ;;  %10768 = vrcp.f32 %v2894_v11 }
 0xe5f   : > { %v10767_v26 = vpop.eup %10766  ;;  %5875 = vmatmul.bf16.gmra.mxu1 %v5391_v50  ;;  %v7395_v8 = vmax.f32 %v6948_v25, 0.0  ;;  %v10219_v35 = vunpack.i.l.bf16 %v10218_v12  ;;  %v10220_v62 = vunpack.i.h.bf16 %v10218_v12 }
 0xe60   : > { %v3405_v20 = vmul.f32 %v10767_v26, %v13337_v43 }
 0xe61   : > { %v2448_v24 = vsel %vm1973_vm0, %v10219_v35, 0.0 }
 0xe62   : > { %v3585_v16 = vpack.c.bf16 %v3405_v20, %v3404_v13  ;;  %v2451_v13 = vsel %vm1973_vm0, %v10220_v62, 0.0 }
 0xe64   : > { %v6949_v10 = vpop.f32.mrf.mxu2  ;;  %3922 = vrot.lane.b32.xlu2 %v3585_v16, %s11344_s13  ;;  %v10769_v27 = vpop.eup %10768 }
 0xe65   : > { %v6950_v57 = vadd.f32 %v13446_v45, %v6949_v10  ;;  %v3406_v61 = vmul.f32 %v10769_v27, %v13366_v4 }
 0xe66   : > { %v2435_v32 = vpop.xlane.xlu1 %2434 }
 0xe67   : > { %v7396_v14 = vmax.f32 %v6950_v57, 0.0  ;;  %v2895_v2 = vmax.f32 %v2435_v32, 1e-08 }
 0xe69   : > { %10770 = vrcp.f32 %v2895_v2  ;;  %v7587_v55 = vpack.c.bf16 %v7396_v14, %v7395_v8  ;;  %v9653_v14 = vld [vmem:[%s11536_s17 + $0x298] sm:$0xff]  }
 0xe6a   : > { %v5861_v37 = vpop.f32.mrf.mxu1  ;;  %v13544_v35 = vunpack.c.l.bf16 %v9653_v14 }
 0xe6b   : > { %8047 = vmatmul.bf16.gmra.mxu3 %v7587_v55  ;;  %v5862_v58 = vadd.f32 %v13359_v44, %v5861_v37  ;;  %v13546_v37 = vunpack.c.h.bf16 %v9653_v14 }
 0xe6d   : > { %v6300_v41 = vmax.f32 %v5862_v58, 0.0 }
 0xe6f   : > { %v10771_v17 = vpop.eup %10770 }
 0xe70   : > { %v3407_v3 = vmul.f32 %v10771_v17, %v13368_v7  ;;  %2449 = vadd.xlane.f32.xlu0 %v2448_v24  ;;  %v10236_v24 = vpack.i.bf16 %v13546_v37, %v13544_v35 }
 0xe72   : > { %v5863_v23 = vpop.f32.mrf.mxu1  ;;  %v3919_v1 = vpop.permute.xlu0 %3918  ;;  %v3586_v18 = vpack.c.bf16 %v3407_v3, %v3406_v61 }
 0xe73   : > { %v5864_v0 = vadd.f32 %v13359_v44, %v5863_v23  ;;  %8877 = vmatmul.msk.bf16.gmra.mxu0 %vm1973_vm0, %v3919_v1 }
 0xe74   : > { %3924 = vrot.lane.b32.xlu1 %v3586_v18, %s11344_s13 }
 0xe75   : > { %v6301_v29 = vmax.f32 %v5864_v0, 0.0 }
 0xe77   : > { %v6489_v47 = vpack.c.bf16 %v6301_v29, %v6300_v41 }
 0xe79   : > { %6961 = vmatmul.bf16.gmra.mxu2 %v6489_v47 }
 0xe7c   : > { %10232 = vrot.lane.b32.xlu1 %v10231_v48, %s11344_s13 }
 0xe80   : > { %v8033_v53 = vpop.f32.mrf.mxu3 }
 0xe81   : > { %v8034_v46 = vadd.f32 %v13529_v59, %v8033_v53 }
 0xe83   : > { %8490 = vst [vmem:[%s11979_s22 + $0x3d0] sm:$0xff] %v8034_v46 }
 0xe88   : > { %v8035_v50 = vpop.f32.mrf.mxu3 }
 0xe89   : > { %v8036_v26 = vadd.f32 %v13529_v59, %v8035_v50 }
 0xe8b   : > { %8491 = vst [vmem:[%s11979_s22 + $0x3d8] sm:$0xff] %v8036_v26 }
 0xe8d   : > { %2452 = vadd.xlane.f32.xlu2 %v2451_v13 }
 0xe90   : > { %v8038_v20 = vpop.f32.mrf.mxu3 }
 0xe91   : > { %v8039_v34 = vadd.f32 %v13529_v59, %v8038_v20 }
 0xe92   : > { %v5866_v16 = vpop.f32.mrf.mxu1 }
 0xe93   : > { %8492 = vst [vmem:[%s11979_s22 + $0x3e0] sm:$0xff] %v8039_v34  ;;  %v5867_v10 = vadd.f32 %v13359_v44, %v5866_v16 }
 0xe95   : > { %v6302_v2 = vmax.f32 %v5867_v10, 0.0 }
 0xe96   : > { %v3921_v25 = vpop.permute.xlu1 %3920 }
 0xe97   : > { %8878 = vmatmul.msk.bf16.gmra.mxu0 %vm1973_vm0, %v3921_v25  ;;  %v2441_v0 = vpop.xlane.xlu2 %2440 }
 0xe98   : > { %v8040_v11 = vpop.f32.mrf.mxu3  ;;  %v2897_v26 = vmax.f32 %v2441_v0, 1e-08 }
 0xe99   : > { %v8041_v57 = vadd.f32 %v13529_v59, %v8040_v11 }
 0xe9a   : > { %v5868_v32 = vpop.f32.mrf.mxu1  ;;  %10772 = vrcp.f32 %v2897_v26 }
 0xe9b   : > { %8493 = vst [vmem:[%s11979_s22 + $0x3e8] sm:$0xff] %v8041_v57  ;;  %v5869_v12 = vadd.f32 %v13359_v44, %v5868_v32  ;;  %v4780_v8 = vpop.f32.mrf.mxu0 }
 0xe9c   : > { %v4781_v17 = vadd.f32 %v11754_v51, %v4780_v8 }
 0xe9d   : > { %v6303_v55 = vmax.f32 %v5869_v12, 0.0  ;;  %v2438_v23 = vpop.xlane.xlu0 %2437 }
 0xe9e   : > { %v5207_v58 = vmul.f32 %v13224_v28, %v4781_v17  ;;  %v2896_v34 = vmax.f32 %v2438_v23, 1e-08 }
 0xe9f   : > { %v6490_v27 = vpack.c.bf16 %v6303_v55, %v6302_v2 }
 0xea0   : > { %10774 = vrcp.f32 %v2896_v34  ;;  %v10773_v17 = vpop.eup %10772 }
 0xea1   : > { %6966 = vmatmul.bf16.gmra.mxu2 %v6490_v27 }
 0xea3   : > { %v4782_v61 = vpop.f32.mrf.mxu0 }
 0xea4   : > { %v4783_v3 = vadd.f32 %v11754_v51, %v4782_v61 }
 0xea5   : > { %10237 = vrot.lane.b32.xlu2 %v10236_v24, %s11344_s13 }
 0xea6   : > { %v5208_v15 = vmul.f32 %v13226_v60, %v4783_v3 }
 0xea8   : > { %v5392_v1 = vpack.c.bf16 %v5208_v15, %v5207_v58  ;;  %v10775_v58 = vpop.eup %10774 }
 0xeaa   : > { %5880 = vmatmul.bf16.gmra.mxu1 %v5392_v1  ;;  %v3408_v1 = vmul.f32 %v10775_v58, %v13376_v6 }
 0xeab   : > { %v6952_v18 = vpop.f32.mrf.mxu2 }
 0xeac   : > { %v6953_v53 = vadd.f32 %v13446_v45, %v6952_v18 }
 0xeae   : > { %v7397_v16 = vmax.f32 %v6953_v53, 0.0 }
 0xeb0   : > { %v10223_v41 = vpop.permute.xlu0 %10222 }
 0xeb1   : > { %v10225_v29 = vunpack.i.h.bf16 %v10223_v41  ;;  %v10224_v47 = vunpack.i.l.bf16 %v10223_v41  ;;  %v4785_v48 = vpop.f32.mrf.mxu0 }
 0xeb2   : > { %v2447_v20 = vpop.xlane.xlu2 %2446  ;;  %v4786_v11 = vadd.f32 %v11754_v51, %v4785_v48 }
 0xeb3   : > { %v8043_v46 = vpop.f32.mrf.mxu3  ;;  %v6954_v62 = vpop.f32.mrf.mxu2  ;;  %v2454_v50 = vsel %vm1973_vm0, %v10224_v47, 0.0  ;;  %v2457_v28 = vsel %vm1973_vm0, %v10225_v29, 0.0  ;;  %v2899_v55 = vmax.f32 %v2447_v20, 1e-08 }
 0xeb4   : > { %v8044_v60 = vadd.f32 %v13529_v59, %v8043_v46  ;;  %v6955_v13 = vadd.f32 %v13446_v45, %v6954_v62  ;;  %2455 = vadd.xlane.f32.xlu0 %v2454_v50  ;;  %2458 = vadd.xlane.f32.xlu1 %v2457_v28  ;;  %v5209_v2 = vmul.f32 %v13258_v40, %v4786_v11 }
 0xeb5   : > { %10776 = vrcp.f32 %v2899_v55  ;;  %v3409_v40 = vmul.f32 %v10773_v17, %v13378_v33 }
 0xeb6   : > { %8494 = vst [vmem:[%s11979_s22 + $0x3f0] sm:$0xff] %v8044_v60  ;;  %v7398_v25 = vmax.f32 %v6955_v13, 0.0 }
 0xeb7   : > { %v3587_v28 = vpack.c.bf16 %v3409_v40, %v3408_v1 }
 0xeb8   : > { %v7588_v10 = vpack.c.bf16 %v7398_v25, %v7397_v16  ;;  %v10228_v26 = vpop.permute.xlu0 %10227 }
 0xeb9   : > { %v4787_v57 = vpop.f32.mrf.mxu0  ;;  %v10230_v13 = vunpack.i.h.bf16 %v10228_v26 }
 0xeba   : > { %v4788_v32 = vadd.f32 %v11754_v51, %v4787_v57  ;;  %v5871_v12 = vpop.f32.mrf.mxu1  ;;  %8052 = vmatmul.bf16.gmra.mxu3 %v7588_v10 }
 0xebb   : > { %v8045_v8 = vpop.f32.mrf.mxu3  ;;  %v6957_v14 = vpop.f32.mrf.mxu2  ;;  %v5872_v15 = vadd.f32 %v13359_v44, %v5871_v12  ;;  %v2463_v11 = vsel %vm1973_vm0, %v10230_v13, 0.0 }
 0xebc   : > { %v5210_v27 = vmul.f32 %v13260_v9, %v4788_v32  ;;  %v8046_v24 = vadd.f32 %v13529_v59, %v8045_v8  ;;  %v6958_v9 = vadd.f32 %v13446_v45, %v6957_v14  ;;  %v10777_v46 = vpop.eup %10776 }
 0xebd   : > { %v6304_v48 = vmax.f32 %v5872_v15, 0.0  ;;  %v3411_v34 = vmul.f32 %v10777_v46, %v13421_v56  ;;  %v9654_v46 = vld [vmem:[%s11536_s17 + $0x2a0] sm:$0xff]  }
 0xebe   : > { %8495 = vst [vmem:[%s11979_s22 + $0x3f8] sm:$0xff] %v8046_v24  ;;  %v3923_v61 = vpop.permute.xlu2 %3922  ;;  %v5393_v3 = vpack.c.bf16 %v5210_v27, %v5209_v2  ;;  %v7399_v62 = vmax.f32 %v6958_v9, 0.0  ;;  %v10229_v24 = vunpack.i.l.bf16 %v10228_v26  ;;  %v13594_v26 = vunpack.c.l.bf16 %v9654_v46 }
 0xebf   : > { %8879 = vmatmul.msk.bf16.gmra.mxu0 %vm1973_vm0, %v3923_v61 }
 0xec0   : > { %5885 = vmatmul.bf16.gmra.mxu1 %v5393_v3  ;;  %v2460_v15 = vsel %vm1973_vm0, %v10229_v24, 0.0 }
 0xec1   : > { %v2444_v23 = vpop.xlane.xlu1 %2443 }
 0xec2   : > { %v5873_v18 = vpop.f32.mrf.mxu1  ;;  %v2898_v0 = vmax.f32 %v2444_v23, 1e-08 }
 0xec3   : > { %v5874_v41 = vadd.f32 %v13359_v44, %v5873_v18  ;;  %v6959_v29 = vpop.f32.mrf.mxu2 }
 0xec4   : > { %v6960_v47 = vadd.f32 %v13446_v45, %v6959_v29  ;;  %10778 = vrcp.f32 %v2898_v0 }
 0xec5   : > { %v6305_v53 = vmax.f32 %v5874_v41, 0.0 }
 0xec6   : > { %v7400_v50 = vmax.f32 %v6960_v47, 0.0 }
 0xec7   : > { %v6491_v60 = vpack.c.bf16 %v6305_v53, %v6304_v48 }
 0xec8   : > { %3926 = vrot.lane.b32.xlu0 %v3587_v28, %s11344_s13  ;;  %v7589_v20 = vpack.c.bf16 %v7400_v50, %v7399_v62 }
 0xec9   : > { %6971 = vmatmul.bf16.gmra.mxu2 %v6491_v60  ;;  %v13596_v60 = vunpack.c.h.bf16 %v9654_v46 }
 0xeca   : > { %v10779_v16 = vpop.eup %10778  ;;  %8057 = vmatmul.bf16.gmra.mxu3 %v7589_v20 }
 0xecb   : > { %v3410_v25 = vmul.f32 %v10779_v16, %v13419_v52 }
 0xecd   : > { %v3588_v10 = vpack.c.bf16 %v3411_v34, %v3410_v25  ;;  %v10241_v34 = vpack.i.bf16 %v13596_v60, %v13594_v26 }
 0xece   : > { %2464 = vadd.xlane.f32.xlu2 %v2463_v11 }
 0xecf   : > { %3928 = vrot.lane.b32.xlu1 %v3588_v10, %s11344_s13 }
 0xedc   : > { %v5876_v57 = vpop.f32.mrf.mxu1 }
 0xedd   : > { %v5877_v32 = vadd.f32 %v13359_v44, %v5876_v57 }
 0xedf   : > { %v6306_v2 = vmax.f32 %v5877_v32, 0.0 }
 0xee3   : > { %v2450_v47 = vpop.xlane.xlu0 %2449 }
 0xee4   : > { %v5878_v12 = vpop.f32.mrf.mxu1  ;;  %v2900_v50 = vmax.f32 %v2450_v47, 1e-08 }
 0xee5   : > { %v5879_v8 = vadd.f32 %v13359_v44, %v5878_v12 }
 0xee6   : > { %v3925_v14 = vpop.permute.xlu1 %3924  ;;  %10780 = vrcp.f32 %v2900_v50 }
 0xee7   : > { %v6307_v55 = vmax.f32 %v5879_v8, 0.0  ;;  %8880 = vmatmul.msk.bf16.gmra.mxu0 %vm1973_vm0, %v3925_v14 }
 0xee9   : > { %v6492_v27 = vpack.c.bf16 %v6307_v55, %v6306_v2 }
 0xeeb   : > { %6976 = vmatmul.bf16.gmra.mxu2 %v6492_v27 }
 0xeec   : > { %v10781_v57 = vpop.eup %10780 }
 0xeed   : > { %v3412_v2 = vmul.f32 %v10781_v57, %v13442_v22 }
 0xeee   : > { %v8048_v17 = vpop.f32.mrf.mxu3  ;;  %v10233_v61 = vpop.permute.xlu1 %10232 }
 0xeef   : > { %v8049_v3 = vadd.f32 %v13529_v59, %v8048_v17  ;;  %v10235_v58 = vunpack.i.h.bf16 %v10233_v61  ;;  %v10234_v1 = vunpack.i.l.bf16 %v10233_v61 }
 0xef0   : > { %v4790_v23 = vpop.f32.mrf.mxu0 }
 0xef1   : > { %8496 = vst [vmem:[%s11979_s22 + $0x400] sm:$0xff] %v8049_v3  ;;  %v2469_v44 = vsel %vm1973_vm0, %v10235_v58, 0.0  ;;  %v2466_v9 = vsel %vm1973_vm0, %v10234_v1, 0.0  ;;  %v4791_v18 = vadd.f32 %v11754_v51, %v4790_v23 }
 0xef2   : > { %2470 = vadd.xlane.f32.xlu2 %v2469_v44  ;;  %2461 = vadd.xlane.f32.xlu0 %v2460_v15 }
 0xef3   : > { %v5211_v48 = vmul.f32 %v13287_v49, %v4791_v18  ;;  %v9655_v49 = vld [vmem:[%s11536_s17 + $0x2a8] sm:$0xff]  }
 0xef4   : > { %v13604_v11 = vunpack.c.l.bf16 %v9655_v49  ;;  %v13606_v10 = vunpack.c.h.bf16 %v9655_v49 }
 0xef6   : > { %v8050_v40 = vpop.f32.mrf.mxu3  ;;  %v10246_v27 = vpack.i.bf16 %v13606_v10, %v13604_v11 }
 0xef7   : > { %v8051_v0 = vadd.f32 %v13529_v59, %v8050_v40 }
 0xef8   : > { %v4792_v41 = vpop.f32.mrf.mxu0 }
 0xef9   : > { %8497 = vst [vmem:[%s11979_s22 + $0x408] sm:$0xff] %v8051_v0  ;;  %v4793_v29 = vadd.f32 %v11754_v51, %v4792_v41  ;;  %2467 = vadd.xlane.f32.xlu1 %v2466_v9 }
 0xefb   : > { %v5212_v53 = vmul.f32 %v13289_v19, %v4793_v29 }
 0xefc   : > { %v6962_v62 = vpop.f32.mrf.mxu2 }
 0xefd   : > { %v5394_v28 = vpack.c.bf16 %v5212_v53, %v5211_v48  ;;  %v6963_v16 = vadd.f32 %v13446_v45, %v6962_v62  ;;  %v13620_v53 = vld [vmem:[#allocation8] ss:$0 sm:$0xff] }
 0xeff   : > { %5890 = vmatmul.bf16.gmra.mxu1 %v5394_v28  ;;  %v7401_v32 = vmax.f32 %v6963_v16, 0.0 }
 0xf00   : > { %v2453_v13 = vpop.xlane.xlu2 %2452 }
 0xf01   : > { %v2901_v20 = vmax.f32 %v2453_v13, 1e-08 }
 0xf03   : > { %10782 = vrcp.f32 %v2901_v20 }
 0xf04   : > { %v6964_v19 = vpop.f32.mrf.mxu2 }
 0xf05   : > { %v6965_v25 = vadd.f32 %v13446_v45, %v6964_v19 }
 0xf06   : > { %10242 = vrot.lane.b32.xlu0 %v10241_v34, %s11344_s13 }
 0xf07   : > { %v7402_v12 = vmax.f32 %v6965_v25, 0.0 }
 0xf09   : > { %v10783_v8 = vpop.eup %10782  ;;  %v7590_v14 = vpack.c.bf16 %v7402_v12, %v7401_v32 }
 0xf0a   : > { %v3413_v55 = vmul.f32 %v10783_v8, %v13444_v54 }
 0xf0b   : > { %8062 = vmatmul.bf16.gmra.mxu3 %v7590_v14 }
 0xf0c   : > { %v3589_v24 = vpack.c.bf16 %v3413_v55, %v3412_v2 }
 0xf0e   : > { %10247 = vrot.lane.b32.xlu0 %v10246_v27, %s11344_s13  ;;  %3930 = vrot.lane.b32.xlu2 %v3589_v24, %s11344_s13 }
 0xf14   : > { %v4795_v17 = vpop.f32.mrf.mxu0 }
 0xf15   : > { %v4796_v61 = vadd.f32 %v11754_v51, %v4795_v17 }
 0xf17   : > { %v5213_v15 = vmul.f32 %v13326_v42, %v4796_v61 }
 0xf1c   : > { %v4797_v3 = vpop.f32.mrf.mxu0 }
 0xf1d   : > { %v4798_v58 = vadd.f32 %v11754_v51, %v4797_v3  ;;  %v9656_v3 = vld [vmem:[%s11536_s17 + $0x2b0] sm:$0xff]  }
 0xf1f   : > { %v5214_v23 = vmul.f32 %v13328_v36, %v4798_v58  ;;  %v10238_v36 = vpop.permute.xlu2 %10237 }
 0xf20   : > { %v10240_v20 = vunpack.i.h.bf16 %v10238_v36  ;;  %v10239_v19 = vunpack.i.l.bf16 %v10238_v36 }
 0xf21   : > { %v5395_v44 = vpack.c.bf16 %v5214_v23, %v5213_v15 }
 0xf22   : > { %v2475_v14 = vsel %vm1973_vm0, %v10240_v20, 0.0  ;;  %v2472_v2 = vsel %vm1973_vm0, %v10239_v19, 0.0 }
 0xf23   : > { %5895 = vmatmul.bf16.gmra.mxu1 %v5395_v44  ;;  %v13635_v44 = vunpack.c.l.bf16 %v9656_v3 }
 0xf24   : > { %v6967_v1 = vpop.f32.mrf.mxu2 }
 0xf25   : > { %v6968_v29 = vadd.f32 %v13446_v45, %v6967_v1  ;;  %v13637_v1 = vunpack.c.h.bf16 %v9656_v3 }
 0xf27   : > { %v2456_v40 = vpop.xlane.xlu0 %2455  ;;  %v5881_v9 = vpop.f32.mrf.mxu1  ;;  %v7403_v46 = vmax.f32 %v6968_v29, 0.0 }
 0xf28   : > { %v2902_v18 = vmax.f32 %v2456_v40, 1e-08  ;;  %v2459_v0 = vpop.xlane.xlu1 %2458  ;;  %v5882_v42 = vadd.f32 %v13620_v53, %v5881_v9 }
 0xf29   : > { %v2903_v41 = vmax.f32 %v2459_v0, 1e-08 }
 0xf2a   : > { %10784 = vrcp.f32 %v2902_v18  ;;  %v6308_v25 = vmax.f32 %v5882_v42, 0.0 }
 0xf2b   : > { %10786 = vrcp.f32 %v2903_v41 }
 0xf2c   : > { %v6969_v47 = vpop.f32.mrf.mxu2 }
 0xf2d   : > { %v6970_v48 = vadd.f32 %v13446_v45, %v6969_v47 }
 0xf2f   : > { %v7404_v62 = vmax.f32 %v6970_v48, 0.0  ;;  %v5883_v50 = vpop.f32.mrf.mxu1 }
 0xf30   : > { %v10785_v28 = vpop.eup %10784  ;;  %v5884_v13 = vadd.f32 %v13620_v53, %v5883_v50  ;;  %v9657_v50 = vld [vmem:[%s11536_s17 + $0x2b8] sm:$0xff]  }
 0xf31   : > { %v10787_v34 = vpop.eup %10786  ;;  %v3414_v16 = vmul.f32 %v10785_v28, %v13484_v31  ;;  %v7591_v49 = vpack.c.bf16 %v7404_v62, %v7403_v46  ;;  %v10251_v46 = vpack.i.bf16 %v13637_v1, %v13635_v44 }
 0xf32   : > { %v3415_v57 = vmul.f32 %v10787_v34, %v13486_v63  ;;  %v6309_v32 = vmax.f32 %v5884_v13, 0.0 }
 0xf33   : > { %8067 = vmatmul.bf16.gmra.mxu3 %v7591_v49 }
 0xf34   : > { %v3590_v12 = vpack.c.bf16 %v3415_v57, %v3414_v16  ;;  %v6493_v8 = vpack.c.bf16 %v6309_v32, %v6308_v25 }
 0xf36   : > { %3932 = vrot.lane.b32.xlu1 %v3590_v12, %s11344_s13  ;;  %6981 = vmatmul.bf16.gmra.mxu2 %v6493_v8 }
 0xf37   : > { %2476 = vadd.xlane.f32.xlu2 %v2475_v14 }
 0xf38   : > { %2473 = vadd.xlane.f32.xlu0 %v2472_v2 }
 0xf3a   : > { %v3927_v55 = vpop.permute.xlu0 %3926 }
 0xf3b   : > { %8881 = vmatmul.msk.bf16.gmra.mxu0 %vm1973_vm0, %v3927_v55 }
 0xf3c   : > { %v4800_v27 = vpop.f32.mrf.mxu0 }
 0xf3d   : > { %v5886_v24 = vpop.f32.mrf.mxu1  ;;  %v8053_v17 = vpop.f32.mrf.mxu3  ;;  %v4801_v58 = vadd.f32 %v11754_v51, %v4800_v27 }
 0xf3e   : > { %v8054_v61 = vadd.f32 %v13529_v59, %v8053_v17  ;;  %v5887_v15 = vadd.f32 %v13620_v53, %v5886_v24 }
 0xf3f   : > { %v5215_v29 = vmul.f32 %v13335_v39, %v4801_v58  ;;  %v13650_v39 = vunpack.c.l.bf16 %v9657_v50 }
 0xf40   : > { %8498 = vst [vmem:[%s11979_s22 + $0x410] sm:$0xff] %v8054_v61  ;;  %v6310_v48 = vmax.f32 %v5887_v15, 0.0 }
 0xf41   : > { %v3929_v36 = vpop.permute.xlu1 %3928  ;;  %v2465_v2 = vpop.xlane.xlu2 %2464 }
 0xf44   : > { %v4802_v23 = vpop.f32.mrf.mxu0 }
 0xf45   : > { %v4803_v40 = vadd.f32 %v11754_v51, %v4802_v23  ;;  %v5888_v9 = vpop.f32.mrf.mxu1  ;;  %v8055_v18 = vpop.f32.mrf.mxu3 }
 0xf46   : > { %v5889_v0 = vadd.f32 %v13620_v53, %v5888_v9  ;;  %v8056_v41 = vadd.f32 %v13529_v59, %v8055_v18 }
 0xf47   : > { %v5216_v47 = vmul.f32 %v13337_v43, %v4803_v40  ;;  %v13652_v43 = vunpack.c.h.bf16 %v9657_v50 }
 0xf48   : > { %v6311_v42 = vmax.f32 %v5889_v0, 0.0  ;;  %8499 = vst [vmem:[%s11979_s22 + $0x418] sm:$0xff] %v8056_v41 }
 0xf49   : > { %v5396_v62 = vpack.c.bf16 %v5216_v47, %v5215_v29  ;;  %v10256_v16 = vpack.i.bf16 %v13652_v43, %v13650_v39 }
 0xf4a   : > { %v6494_v28 = vpack.c.bf16 %v6311_v42, %v6310_v48 }
 0xf4b   : > { %8882 = vmatmul.msk.bf16.gmra.mxu0 %vm1973_vm0, %v3929_v36  ;;  %5900 = vmatmul.bf16.gmra.mxu1 %v5396_v62 }
 0xf4c   : > { %6986 = vmatmul.bf16.gmra.mxu2 %v6494_v28  ;;  %v6972_v13 = vpop.f32.mrf.mxu2  ;;  %10252 = vrot.lane.b32.xlu0 %v10251_v46, %s11344_s13  ;;  %v2905_v28 = vmax.f32 %v2465_v2, 1e-08 }
 0xf4d   : > { %v8058_v20 = vpop.f32.mrf.mxu3  ;;  %v6973_v49 = vadd.f32 %v13446_v45, %v6972_v13 }
 0xf4e   : > { %v8059_v34 = vadd.f32 %v13529_v59, %v8058_v20  ;;  %10788 = vrcp.f32 %v2905_v28 }
 0xf4f   : > { %v7405_v12 = vmax.f32 %v6973_v49, 0.0 }
 0xf50   : > { %8500 = vst [vmem:[%s11979_s22 + $0x420] sm:$0xff] %v8059_v34 }
 0xf54   : > { %v6974_v19 = vpop.f32.mrf.mxu2  ;;  %10257 = vrot.lane.b32.xlu0 %v10256_v16, %s11344_s13 }
 0xf55   : > { %v6975_v25 = vadd.f32 %v13446_v45, %v6974_v19  ;;  %v8060_v57 = vpop.f32.mrf.mxu3 }
 0xf56   : > { %v8061_v32 = vadd.f32 %v13529_v59, %v8060_v57 }
 0xf57   : > { %v7406_v8 = vmax.f32 %v6975_v25, 0.0 }
 0xf58   : > { %8501 = vst [vmem:[%s11979_s22 + $0x428] sm:$0xff] %v8061_v32 }
 0xf59   : > { %v7592_v14 = vpack.c.bf16 %v7406_v8, %v7405_v12  ;;  %v10789_v8 = vpop.eup %10788 }
 0xf5b   : > { %8072 = vmatmul.bf16.gmra.mxu3 %v7592_v14 }
 0xf64   : > { %v4805_v55 = vpop.f32.mrf.mxu0 }
 0xf65   : > { %v2471_v27 = vpop.xlane.xlu2 %2470  ;;  %v4806_v24 = vadd.f32 %v11754_v51, %v4805_v55  ;;  %v2462_v40 = vpop.xlane.xlu0 %2461 }
 0xf66   : > { %v2907_v13 = vmax.f32 %v2471_v27, 1e-08 }
 0xf67   : > { %v5217_v15 = vmul.f32 %v13366_v4, %v4806_v24 }
 0xf68   : > { %10790 = vrcp.f32 %v2907_v13 }
 0xf6c   : > { %v4807_v17 = vpop.f32.mrf.mxu0 }
 0xf6d   : > { %v4808_v61 = vadd.f32 %v11754_v51, %v4807_v17  ;;  %v3931_v3 = vpop.permute.xlu2 %3930 }
 0xf6e   : > { %8883 = vmatmul.msk.bf16.gmra.mxu0 %vm1973_vm0, %v3931_v3  ;;  %v6977_v58 = vpop.f32.mrf.mxu2  ;;  %v10791_v14 = vpop.eup %10790 }
 0xf6f   : > { %v5218_v23 = vmul.f32 %v13368_v7, %v4808_v61  ;;  %v6978_v18 = vadd.f32 %v13446_v45, %v6977_v58  ;;  %v2468_v7 = vpop.xlane.xlu1 %2467  ;;  %v3419_v24 = vmul.f32 %v10791_v14, %v13524_v30  ;;  %v3417_v61 = vmul.f32 %v10789_v8, %v13499_v21 }
 0xf70   : > { %v2906_v34 = vmax.f32 %v2468_v7, 1e-08 }
 0xf71   : > { %v5397_v9 = vpack.c.bf16 %v5218_v23, %v5217_v15  ;;  %v7407_v47 = vmax.f32 %v6978_v18, 0.0 }
 0xf72   : > { %10792 = vrcp.f32 %v2906_v34 }
 0xf73   : > { %5905 = vmatmul.bf16.gmra.mxu1 %v5397_v9  ;;  %v9658_v9 = vld [vmem:[%s11536_s17 + $0x2c0] sm:$0xff]  }
 0xf74   : > { %v13684_v18 = vunpack.c.l.bf16 %v9658_v9 }
 0xf76   : > { %v6979_v0 = vpop.f32.mrf.mxu2 }
 0xf77   : > { %v6980_v41 = vadd.f32 %v13446_v45, %v6979_v0  ;;  %v2904_v45 = vmax.f32 %v2462_v40, 1e-08  ;;  %v13686_v0 = vunpack.c.h.bf16 %v9658_v9 }
 0xf78   : > { %v10243_v29 = vpop.permute.xlu0 %10242  ;;  %v10793_v55 = vpop.eup %10792 }
 0xf79   : > { %v7408_v48 = vmax.f32 %v6980_v41, 0.0  ;;  %v10245_v42 = vunpack.i.h.bf16 %v10243_v29  ;;  %v10244_v36 = vunpack.i.l.bf16 %v10243_v29  ;;  %10794 = vrcp.f32 %v2904_v45 }
 0xf7a   : > { %v3418_v17 = vmul.f32 %v10793_v55, %v13522_v38 }
 0xf7b   : > { %v2481_v46 = vsel %vm1973_vm0, %v10245_v42, 0.0  ;;  %v2478_v62 = vsel %vm1973_vm0, %v10244_v36, 0.0  ;;  %v7593_v4 = vpack.c.bf16 %v7408_v48, %v7407_v47  ;;  %v10261_v47 = vpack.i.bf16 %v13686_v0, %v13684_v18 }
 0xf7c   : > { %v5891_v50 = vpop.f32.mrf.mxu1  ;;  %2482 = vadd.xlane.f32.xlu2 %v2481_v46  ;;  %2479 = vadd.xlane.f32.xlu1 %v2478_v62  ;;  %v3592_v23 = vpack.c.bf16 %v3419_v24, %v3418_v17 }
 0xf7d   : > { %8077 = vmatmul.bf16.gmra.mxu3 %v7593_v4  ;;  %v5892_v49 = vadd.f32 %v13620_v53, %v5891_v50 }
 0xf7f   : > { %v6312_v32 = vmax.f32 %v5892_v49, 0.0  ;;  %v10795_v27 = vpop.eup %10794 }
 0xf80   : > { %v10248_v20 = vpop.permute.xlu0 %10247  ;;  %v3416_v3 = vmul.f32 %v10795_v27, %v13497_v5 }
 0xf81   : > { %v10249_v16 = vunpack.i.l.bf16 %v10248_v20  ;;  %v10250_v45 = vunpack.i.h.bf16 %v10248_v20 }
 0xf82   : > { %v3591_v40 = vpack.c.bf16 %v3417_v61, %v3416_v3 }
 0xf83   : > { %v2484_v19 = vsel %vm1973_vm0, %v10249_v16, 0.0 }
 0xf84   : > { %v5893_v25 = vpop.f32.mrf.mxu1  ;;  %2485 = vadd.xlane.f32.xlu0 %v2484_v19  ;;  %v2487_v19 = vsel %vm1973_vm0, %v10250_v45, 0.0 }
 0xf85   : > { %v5894_v57 = vadd.f32 %v13620_v53, %v5893_v25 }
 0xf87   : > { %v6313_v12 = vmax.f32 %v5894_v57, 0.0 }
 0xf89   : > { %v6495_v2 = vpack.c.bf16 %v6313_v12, %v6312_v32 }
 0xf8b   : > { %6991 = vmatmul.bf16.gmra.mxu2 %v6495_v2  ;;  %v13701_v2 = vld [vmem:[#allocation11] ss:$0 sm:$0xff] }
 0xf8e   : > { %v8063_v58 = vpop.f32.mrf.mxu3 }
 0xf8f   : > { %v8064_v15 = vadd.f32 %v13529_v59, %v8063_v58 }
 0xf91   : > { %8502 = vst [vmem:[%s11979_s22 + $0x430] sm:$0xff] %v8064_v15 }
 0xf94   : > { %3934 = vrot.lane.b32.xlu2 %v3591_v40, %s11344_s13 }
 0xf95   : > { %3936 = vrot.lane.b32.xlu1 %v3592_v23, %s11344_s13 }
 0xf96   : > { %v8065_v41 = vpop.f32.mrf.mxu3 }
 0xf97   : > { %v8066_v29 = vadd.f32 %v13529_v59, %v8065_v41 }
 0xf99   : > { %8503 = vst [vmem:[%s11979_s22 + $0x438] sm:$0xff] %v8066_v29 }
 0xf9d   : > { %10262 = vrot.lane.b32.xlu1 %v10261_v47, %s11344_s13 }
 0xfa0   : > { %v5896_v48 = vpop.f32.mrf.mxu1 }
 0xfa1   : > { %v5897_v42 = vadd.f32 %v13620_v53, %v5896_v48 }
 0xfa3   : > { %v6314_v4 = vmax.f32 %v5897_v42, 0.0 }
 0xfa8   : > { %v5898_v36 = vpop.f32.mrf.mxu1  ;;  %v3933_v46 = vpop.permute.xlu1 %3932 }
 0xfa9   : > { %v5899_v62 = vadd.f32 %v13620_v53, %v5898_v36  ;;  %8884 = vmatmul.msk.bf16.gmra.mxu0 %vm1973_vm0, %v3933_v46  ;;  %v9659_v46 = vld [vmem:[%s11536_s17 + $0x2c8] sm:$0xff]  }
 0xfaa   : > { %v2477_v32 = vpop.xlane.xlu2 %2476 }
 0xfab   : > { %v6315_v50 = vmax.f32 %v5899_v62, 0.0  ;;  %v2474_v28 = vpop.xlane.xlu0 %2473  ;;  %v2909_v3 = vmax.f32 %v2477_v32, 1e-08 }
 0xfac   : > { %v2908_v15 = vmax.f32 %v2474_v28, 1e-08 }
 0xfad   : > { %v6496_v7 = vpack.c.bf16 %v6315_v50, %v6314_v4  ;;  %10796 = vrcp.f32 %v2909_v3  ;;  %v13713_v50 = vunpack.c.l.bf16 %v9659_v46 }
 0xfae   : > { %10798 = vrcp.f32 %v2908_v15 }
 0xfaf   : > { %6996 = vmatmul.bf16.gmra.mxu2 %v6496_v7 }
 0xfb3   : > { %v10797_v62 = vpop.eup %10796 }
 0xfb4   : > { %v10799_v4 = vpop.eup %10798 }
 0xfb6   : > { %v8068_v13 = vpop.f32.mrf.mxu3 }
 0xfb7   : > { %v8069_v34 = vadd.f32 %v13529_v59, %v8068_v13  ;;  %v3420_v13 = vmul.f32 %v10799_v4, %v13544_v35 }
 0xfb8   : > { %v4810_v16 = vpop.f32.mrf.mxu0 }
 0xfb9   : > { %8504 = vst [vmem:[%s11979_s22 + $0x440] sm:$0xff] %v8069_v34  ;;  %v6982_v49 = vpop.f32.mrf.mxu2  ;;  %v4811_v12 = vadd.f32 %v11754_v51, %v4810_v16  ;;  %v3421_v34 = vmul.f32 %v10797_v62, %v13546_v37 }
 0xfba   : > { %v6983_v55 = vadd.f32 %v13701_v2, %v6982_v49 }
 0xfbb   : > { %v5219_v23 = vmul.f32 %v13376_v6, %v4811_v12 }
 0xfbc   : > { %v7409_v9 = vmax.f32 %v6983_v55, 0.0 }
 0xfbd   : > { %2488 = vadd.xlane.f32.xlu2 %v2487_v19 }
 0xfbe   : > { %v8070_v25 = vpop.f32.mrf.mxu3  ;;  %v10253_v57 = vpop.permute.xlu0 %10252 }
 0xfbf   : > { %v8071_v8 = vadd.f32 %v13529_v59, %v8070_v25  ;;  %v10254_v14 = vunpack.i.l.bf16 %v10253_v57  ;;  %v10255_v20 = vunpack.i.h.bf16 %v10253_v57 }
 0xfc0   : > { %v4812_v27 = vpop.f32.mrf.mxu0 }
 0xfc1   : > { %8505 = vst [vmem:[%s11979_s22 + $0x448] sm:$0xff] %v8071_v8  ;;  %v4813_v24 = vadd.f32 %v11754_v51, %v4812_v27  ;;  %v6984_v17 = vpop.f32.mrf.mxu2  ;;  %v2490_v61 = vsel %vm1973_vm0, %v10254_v14, 0.0  ;;  %v2493_v29 = vsel %vm1973_vm0, %v10255_v20, 0.0  ;;  %v3593_v14 = vpack.c.bf16 %v3421_v34, %v3420_v13 }
 0xfc2   : > { %v6985_v58 = vadd.f32 %v13701_v2, %v6984_v17  ;;  %2491 = vadd.xlane.f32.xlu0 %v2490_v61 }
 0xfc3   : > { %v5220_v40 = vmul.f32 %v13378_v33, %v4813_v24  ;;  %v13715_v33 = vunpack.c.h.bf16 %v9659_v46 }
 0xfc4   : > { %v7410_v41 = vmax.f32 %v6985_v58, 0.0 }
 0xfc5   : > { %v5398_v47 = vpack.c.bf16 %v5220_v40, %v5219_v23  ;;  %v10266_v57 = vpack.i.bf16 %v13715_v33, %v13713_v50 }
 0xfc6   : > { %v7594_v48 = vpack.c.bf16 %v7410_v41, %v7409_v9 }
 0xfc7   : > { %5910 = vmatmul.bf16.gmra.mxu1 %v5398_v47  ;;  %2494 = vadd.xlane.f32.xlu1 %v2493_v29 }
 0xfc8   : > { %v4815_v42 = vpop.f32.mrf.mxu0  ;;  %v5901_v36 = vpop.f32.mrf.mxu1  ;;  %8082 = vmatmul.bf16.gmra.mxu3 %v7594_v48 }
 0xfc9   : > { %v4816_v6 = vadd.f32 %v11754_v51, %v4815_v42  ;;  %v5902_v7 = vadd.f32 %v13620_v53, %v5901_v36 }
 0xfcb   : > { %v5221_v49 = vmul.f32 %v13419_v52, %v4816_v6  ;;  %v6316_v32 = vmax.f32 %v5902_v7, 0.0  ;;  %v10258_v6 = vpop.permute.xlu0 %10257 }
 0xfcf   : > { %v6987_v28 = vpop.f32.mrf.mxu2 }
 0xfd0   : > { %v4817_v45 = vpop.f32.mrf.mxu0  ;;  %v5903_v16 = vpop.f32.mrf.mxu1  ;;  %v6988_v52 = vadd.f32 %v13701_v2, %v6987_v28  ;;  %v10260_v28 = vunpack.i.h.bf16 %v10258_v6 }
 0xfd1   : > { %v4818_v19 = vadd.f32 %v11754_v51, %v4817_v45  ;;  %v5904_v25 = vadd.f32 %v13620_v53, %v5903_v16 }
 0xfd2   : > { %v7411_v17 = vmax.f32 %v6988_v52, 0.0 }
 0xfd3   : > { %v5222_v12 = vmul.f32 %v13421_v56, %v4818_v19  ;;  %v6317_v8 = vmax.f32 %v5904_v25, 0.0  ;;  %v10259_v25 = vunpack.i.l.bf16 %v10258_v6 }
 0xfd5   : > { %v5399_v55 = vpack.c.bf16 %v5222_v12, %v5221_v49  ;;  %v6497_v20 = vpack.c.bf16 %v6317_v8, %v6316_v32  ;;  %10267 = vrot.lane.b32.xlu2 %v10266_v57, %s11344_s13  ;;  %v2499_v12 = vsel %vm1973_vm0, %v10260_v28, 0.0 }
 0xfd6   : > { %3938 = vrot.lane.b32.xlu0 %v3593_v14, %s11344_s13 }
 0xfd7   : > { %v6989_v27 = vpop.f32.mrf.mxu2  ;;  %5915 = vmatmul.bf16.gmra.mxu1 %v5399_v55  ;;  %7001 = vmatmul.bf16.gmra.mxu2 %v6497_v20  ;;  %v2496_v55 = vsel %vm1973_vm0, %v10259_v25, 0.0 }
 0xfd8   : > { %v6990_v24 = vadd.f32 %v13701_v2, %v6989_v27 }
 0xfda   : > { %v7412_v61 = vmax.f32 %v6990_v24, 0.0 }
 0xfdc   : > { %v7595_v56 = vpack.c.bf16 %v7412_v61, %v7411_v17  ;;  %v9660_v61 = vld [vmem:[%s11536_s17 + $0x2d0] sm:$0xff]  }
 0xfde   : > { %8087 = vmatmul.bf16.gmra.mxu3 %v7595_v56  ;;  %v8073_v3 = vpop.f32.mrf.mxu3  ;;  %v13752_v56 = vunpack.c.l.bf16 %v9660_v61 }
 0xfdf   : > { %v8074_v58 = vadd.f32 %v13529_v59, %v8073_v3  ;;  %v13754_v3 = vunpack.c.h.bf16 %v9660_v61 }
 0xfe1   : > { %8506 = vst [vmem:[%s11979_s22 + $0x450] sm:$0xff] %v8074_v58 }
 0xfe6   : > { %v8075_v15 = vpop.f32.mrf.mxu3 }
 0xfe7   : > { %v8076_v23 = vadd.f32 %v13529_v59, %v8075_v15 }
 0xfe9   : > { %8507 = vst [vmem:[%s11979_s22 + $0x458] sm:$0xff] %v8076_v23  ;;  %v10271_v23 = vpack.i.bf16 %v13754_v3, %v13752_v56 }
 0xfeb   : > { %v4820_v40 = vpop.f32.mrf.mxu0 }
 0xfec   : > { %v4821_v42 = vadd.f32 %v11754_v51, %v4820_v40 }
 0xfee   : > { %v5223_v62 = vmul.f32 %v13442_v22, %v4821_v42 }
 0xfef   : > { %v2483_v9 = vpop.xlane.xlu2 %2482  ;;  %v2480_v41 = vpop.xlane.xlu1 %2479 }
 0xff0   : > { %v5906_v29 = vpop.f32.mrf.mxu1  ;;  %v2911_v47 = vmax.f32 %v2483_v9, 1e-08  ;;  %v2910_v48 = vmax.f32 %v2480_v41, 1e-08  ;;  %v9661_v9 = vld [vmem:[%s11536_s17 + $0x2d8] sm:$0xff]  }
 0xff1   : > { %v5907_v7 = vadd.f32 %v13620_v53, %v5906_v29  ;;  %v13761_v29 = vunpack.c.l.bf16 %v9661_v9 }
 0xff2   : > { %10800 = vrcp.f32 %v2911_v47 }
 0xff3   : > { %10802 = vrcp.f32 %v2910_v48  ;;  %v4822_v36 = vpop.f32.mrf.mxu0 }
 0xff4   : > { %v4823_v46 = vadd.f32 %v11754_v51, %v4822_v36 }
 0xff6   : > { %v5224_v4 = vmul.f32 %v13444_v54, %v4823_v46  ;;  %v6318_v54 = vmax.f32 %v5907_v7, 0.0 }
 0xff7   : > { %v3935_v13 = vpop.permute.xlu2 %3934 }
 0xff8   : > { %v10801_v34 = vpop.eup %10800  ;;  %v5908_v45 = vpop.f32.mrf.mxu1  ;;  %8885 = vmatmul.msk.bf16.gmra.mxu0 %vm1973_vm0, %v3935_v13  ;;  %v5400_v16 = vpack.c.bf16 %v5224_v4, %v5223_v62 }
 0xff9   : > { %v10803_v49 = vpop.eup %10802  ;;  %v3423_v19 = vmul.f32 %v10801_v34, %v13596_v60  ;;  %v5909_v57 = vadd.f32 %v13620_v53, %v5908_v45  ;;  %v2486_v13 = vpop.xlane.xlu0 %2485 }
 0xffa   : > { %v3422_v22 = vmul.f32 %v10803_v49, %v13594_v26  ;;  %5920 = vmatmul.bf16.gmra.mxu1 %v5400_v16  ;;  %v2912_v34 = vmax.f32 %v2486_v13, 1e-08 }
 0xffb   : > { %v6319_v32 = vmax.f32 %v5909_v57, 0.0 }
 0xffc   : > { %v3594_v8 = vpack.c.bf16 %v3423_v19, %v3422_v22  ;;  %10804 = vrcp.f32 %v2912_v34 }
 0xffd   : > { %v6498_v14 = vpack.c.bf16 %v6319_v32, %v6318_v54 }
 0xffe   : > { %3940 = vrot.lane.b32.xlu1 %v3594_v8, %s11344_s13  ;;  %2500 = vadd.xlane.f32.xlu2 %v2499_v12 }
 0xfff   : > { %7006 = vmatmul.bf16.gmra.mxu2 %v6498_v14 }
0x1000   : > { %v8078_v20 = vpop.f32.mrf.mxu3  ;;  %2497 = vadd.xlane.f32.xlu0 %v2496_v55 }
0x1001   : > { %v8079_v52 = vadd.f32 %v13529_v59, %v8078_v20 }
0x1002   : > { %v10805_v14 = vpop.eup %10804 }
0x1003   : > { %8508 = vst [vmem:[%s11979_s22 + $0x460] sm:$0xff] %v8079_v52  ;;  %v3424_v52 = vmul.f32 %v10805_v14, %v13604_v11  ;;  %v9663_v14 = vld [vmem:[%s11536_s17 + $0x2e8] sm:$0xff]  }
0x1007   : > { %v3937_v27 = vpop.permute.xlu1 %3936 }
0x1008   : > { %8886 = vmatmul.msk.bf16.gmra.mxu0 %vm1973_vm0, %v3937_v27  ;;  %v8080_v24 = vpop.f32.mrf.mxu3 }
0x1009   : > { %v8081_v17 = vadd.f32 %v13529_v59, %v8080_v24  ;;  %v13763_v59 = vunpack.c.h.bf16 %v9661_v9 }
0x100b   : > { %8509 = vst [vmem:[%s11979_s22 + $0x468] sm:$0xff] %v8081_v17  ;;  %v10276_v36 = vpack.i.bf16 %v13763_v59, %v13761_v29 }
0x100e   : > { %v6992_v58 = vpop.f32.mrf.mxu2 }
0x100f   : > { %v10263_v15 = vpop.permute.xlu1 %10262  ;;  %v6993_v47 = vadd.f32 %v13701_v2, %v6992_v58 }
0x1010   : > { %v10265_v40 = vunpack.i.h.bf16 %v10263_v15  ;;  %v10264_v6 = vunpack.i.l.bf16 %v10263_v15 }
0x1011   : > { %v7413_v46 = vmax.f32 %v6993_v47, 0.0 }
0x1012   : > { %v2505_v41 = vsel %vm1973_vm0, %v10265_v40, 0.0  ;;  %v2502_v7 = vsel %vm1973_vm0, %v10264_v6, 0.0 }
0x1013   : > { %2506 = vadd.xlane.f32.xlu2 %v2505_v41 }
0x1014   : > { %10272 = vrot.lane.b32.xlu0 %v10271_v23, %s11344_s13 }
0x1016   : > { %v6994_v48 = vpop.f32.mrf.mxu2 }
0x1017   : > { %v6995_v42 = vadd.f32 %v13701_v2, %v6994_v48 }
0x1019   : > { %v7414_v62 = vmax.f32 %v6995_v42, 0.0 }
0x101b   : > { %v7596_v4 = vpack.c.bf16 %v7414_v62, %v7413_v46 }
0x101c   : > { %10277 = vrot.lane.b32.xlu0 %v10276_v36, %s11344_s13 }
0x101d   : > { %8092 = vmatmul.bf16.gmra.mxu3 %v7596_v4 }
0x1026   : > { %v4825_v28 = vpop.f32.mrf.mxu0 }
0x1027   : > { %v4826_v45 = vadd.f32 %v11754_v51, %v4825_v28  ;;  %v13786_v28 = vld [vmem:[#allocation14] ss:$0 sm:$0xff] }
0x1028   : > { %2503 = vadd.xlane.f32.xlu1 %v2502_v7 }
0x1029   : > { %v5225_v25 = vmul.f32 %v13484_v31, %v4826_v45 }
0x102e   : > { %v4827_v16 = vpop.f32.mrf.mxu0 }
0x102f   : > { %v4828_v49 = vadd.f32 %v11754_v51, %v4827_v16 }
0x1030   : > { %v2489_v19 = vpop.xlane.xlu2 %2488 }
0x1031   : > { %v5226_v57 = vmul.f32 %v13486_v63, %v4828_v49  ;;  %v2913_v22 = vmax.f32 %v2489_v19, 1e-08  ;;  %v9662_v19 = vld [vmem:[%s11536_s17 + $0x2e0] sm:$0xff]  }
0x1032   : > { %v6997_v54 = vpop.f32.mrf.mxu2 }
0x1033   : > { %10806 = vrcp.f32 %v2913_v22  ;;  %v5401_v32 = vpack.c.bf16 %v5226_v57, %v5225_v25  ;;  %v6998_v20 = vadd.f32 %v13701_v2, %v6997_v54  ;;  %v13792_v57 = vunpack.c.l.bf16 %v9662_v19 }
0x1034   : > { %v13794_v22 = vunpack.c.h.bf16 %v9662_v19 }
0x1035   : > { %5925 = vmatmul.bf16.gmra.mxu1 %v5401_v32  ;;  %v2492_v12 = vpop.xlane.xlu0 %2491  ;;  %v7415_v15 = vmax.f32 %v6998_v20, 0.0  ;;  %v13802_v20 = vunpack.c.l.bf16 %v9663_v14 }
0x1036   : > { %v2914_v8 = vmax.f32 %v2492_v12, 1e-08 }
0x1038   : > { %10808 = vrcp.f32 %v2914_v8  ;;  %v10268_v58 = vpop.permute.xlu2 %10267  ;;  %v10281_v8 = vpack.i.bf16 %v13794_v22, %v13792_v57 }
0x1039   : > { %v10807_v55 = vpop.eup %10806  ;;  %v10269_v41 = vunpack.i.l.bf16 %v10268_v58 }
0x103a   : > { %v3425_v27 = vmul.f32 %v10807_v55, %v13606_v10  ;;  %v6999_v24 = vpop.f32.mrf.mxu2  ;;  %v2495_v31 = vpop.xlane.xlu1 %2494 }
0x103b   : > { %v7000_v63 = vadd.f32 %v13701_v2, %v6999_v24  ;;  %v2915_v17 = vmax.f32 %v2495_v31, 1e-08  ;;  %v2508_v42 = vsel %vm1973_vm0, %v10269_v41, 0.0 }
0x103c   : > { %v3595_v61 = vpack.c.bf16 %v3425_v27, %v3424_v52  ;;  %v13804_v52 = vunpack.c.h.bf16 %v9663_v14 }
0x103d   : > { %v7416_v23 = vmax.f32 %v7000_v63, 0.0  ;;  %10810 = vrcp.f32 %v2915_v17 }
0x103e   : > { %3942 = vrot.lane.b32.xlu2 %v3595_v61, %s11344_s13  ;;  %v10809_v40 = vpop.eup %10808  ;;  %v10286_v63 = vpack.i.bf16 %v13804_v52, %v13802_v20 }
0x103f   : > { %v7597_v9 = vpack.c.bf16 %v7416_v23, %v7415_v15  ;;  %v3426_v47 = vmul.f32 %v10809_v40, %v13635_v44 }
0x1041   : > { %8097 = vmatmul.bf16.gmra.mxu3 %v7597_v9  ;;  %v10270_v9 = vunpack.i.h.bf16 %v10268_v58 }
0x1043   : > { %v10811_v48 = vpop.eup %10810 }
0x1044   : > { %v3427_v36 = vmul.f32 %v10811_v48, %v13637_v1  ;;  %v5911_v46 = vpop.f32.mrf.mxu1 }
0x1045   : > { %v5912_v6 = vadd.f32 %v13620_v53, %v5911_v46  ;;  %v2511_v46 = vsel %vm1973_vm0, %v10270_v9, 0.0 }
0x1046   : > { %v3596_v62 = vpack.c.bf16 %v3427_v36, %v3426_v47  ;;  %2509 = vadd.xlane.f32.xlu0 %v2508_v42 }
0x1047   : > { %v6320_v16 = vmax.f32 %v5912_v6, 0.0 }
0x1048   : > { %v3939_v4 = vpop.permute.xlu0 %3938  ;;  %3944 = vrot.lane.b32.xlu1 %v3596_v62, %s11344_s13 }
0x1049   : > { %8887 = vmatmul.msk.bf16.gmra.mxu0 %vm1973_vm0, %v3939_v4 }
0x104b   : > { %v8083_v7 = vpop.f32.mrf.mxu3 }
0x104c   : > { %v8084_v13 = vadd.f32 %v13786_v28, %v8083_v7  ;;  %v5913_v34 = vpop.f32.mrf.mxu1 }
0x104d   : > { %v5914_v45 = vadd.f32 %v13620_v53, %v5913_v34 }
0x104e   : > { %8510 = vst [vmem:[%s11979_s22 + $0x470] sm:$0xff] %v8084_v13 }
0x104f   : > { %v6321_v49 = vmax.f32 %v5914_v45, 0.0 }
0x1051   : > { %v6499_v25 = vpack.c.bf16 %v6321_v49, %v6320_v16 }
0x1053   : > { %7011 = vmatmul.bf16.gmra.mxu2 %v6499_v25  ;;  %v8085_v54 = vpop.f32.mrf.mxu3 }
0x1054   : > { %v8086_v32 = vadd.f32 %v13786_v28, %v8085_v54  ;;  %v5916_v12 = vpop.f32.mrf.mxu1 }
0x1055   : > { %v5917_v27 = vadd.f32 %v13620_v53, %v5916_v12 }
0x1056   : > { %8511 = vst [vmem:[%s11979_s22 + $0x478] sm:$0xff] %v8086_v32 }
0x1057   : > { %v6322_v17 = vmax.f32 %v5917_v27, 0.0 }
0x105a   : > { %v7002_v55 = vpop.f32.mrf.mxu2  ;;  %10282 = vrot.lane.b32.xlu0 %v10281_v8, %s11344_s13 }
0x105b   : > { %v7003_v15 = vadd.f32 %v13701_v2, %v7002_v55 }
0x105c   : > { %v5918_v24 = vpop.f32.mrf.mxu1 }
0x105d   : > { %v5919_v31 = vadd.f32 %v13620_v53, %v5918_v24  ;;  %v7417_v42 = vmax.f32 %v7003_v15, 0.0 }
0x105f   : > { %v6323_v61 = vmax.f32 %v5919_v31, 0.0 }
0x1061   : > { %v8088_v23 = vpop.f32.mrf.mxu3  ;;  %v6500_v40 = vpack.c.bf16 %v6323_v61, %v6322_v17 }
0x1062   : > { %v8089_v41 = vadd.f32 %v13786_v28, %v8088_v23  ;;  %v7004_v47 = vpop.f32.mrf.mxu2  ;;  %10287 = vrot.lane.b32.xlu0 %v10286_v63, %s11344_s13 }
0x1063   : > { %v7005_v48 = vadd.f32 %v13701_v2, %v7004_v47  ;;  %7016 = vmatmul.bf16.gmra.mxu2 %v6500_v40 }
0x1064   : > { %8512 = vst [vmem:[%s11979_s22 + $0x480] sm:$0xff] %v8089_v41 }
0x1065   : > { %v7418_v36 = vmax.f32 %v7005_v48, 0.0 }
0x1067   : > { %2512 = vadd.xlane.f32.xlu2 %v2511_v46  ;;  %v7598_v62 = vpack.c.bf16 %v7418_v36, %v7417_v42 }
0x1069   : > { %v8090_v4 = vpop.f32.mrf.mxu3  ;;  %8102 = vmatmul.bf16.gmra.mxu3 %v7598_v62 }
0x106a   : > { %v8091_v6 = vadd.f32 %v13786_v28, %v8090_v4 }
0x106c   : > { %8513 = vst [vmem:[%s11979_s22 + $0x488] sm:$0xff] %v8091_v6 }
0x1070   : > { %v3941_v58 = vpop.permute.xlu1 %3940 }
0x1071   : > { %8888 = vmatmul.msk.bf16.gmra.mxu0 %vm1973_vm0, %v3941_v58  ;;  %v2501_v63 = vpop.xlane.xlu2 %2500 }
0x1072   : > { %v2917_v36 = vmax.f32 %v2501_v63, 1e-08 }
0x1073   : > { %v2498_v49 = vpop.xlane.xlu0 %2497 }
0x1074   : > { %v2916_v6 = vmax.f32 %v2498_v49, 1e-08  ;;  %10812 = vrcp.f32 %v2917_v36 }
0x1075   : > { %v4830_v7 = vpop.f32.mrf.mxu0 }
0x1076   : > { %v4831_v34 = vadd.f32 %v11754_v51, %v4830_v7  ;;  %10814 = vrcp.f32 %v2916_v6 }
0x1077   : > { %v5921_v13 = vpop.f32.mrf.mxu1 }
0x1078   : > { %v5922_v16 = vadd.f32 %v13620_v53, %v5921_v13  ;;  %v5227_v54 = vmul.f32 %v13497_v5, %v4831_v34 }
0x107a   : > { %v6324_v8 = vmax.f32 %v5922_v16, 0.0 }
0x107d   : > { %v4832_v45 = vpop.f32.mrf.mxu0 }
0x107e   : > { %v4833_v19 = vadd.f32 %v11754_v51, %v4832_v45 }
0x107f   : > { %v5923_v25 = vpop.f32.mrf.mxu1 }
0x1080   : > { %v5228_v32 = vmul.f32 %v13499_v21, %v4833_v19  ;;  %v5924_v12 = vadd.f32 %v13620_v53, %v5923_v25  ;;  %v10813_v25 = vpop.eup %10812 }
0x1081   : > { %v3429_v49 = vmul.f32 %v10813_v25, %v13652_v43 }
0x1082   : > { %v6325_v14 = vmax.f32 %v5924_v12, 0.0  ;;  %v7007_v55 = vpop.f32.mrf.mxu2  ;;  %v5402_v27 = vpack.c.bf16 %v5228_v32, %v5227_v54  ;;  %v10815_v32 = vpop.eup %10814 }
0x1083   : > { %v7008_v23 = vadd.f32 %v13701_v2, %v7007_v55 }
0x1084   : > { %5930 = vmatmul.bf16.gmra.mxu1 %v5402_v27  ;;  %v6501_v24 = vpack.c.bf16 %v6325_v14, %v6324_v8 }
0x1085   : > { %v4835_v31 = vpop.f32.mrf.mxu0  ;;  %v7419_v47 = vmax.f32 %v7008_v23, 0.0 }
0x1086   : > { %7021 = vmatmul.bf16.gmra.mxu2 %v6501_v24  ;;  %v10273_v17 = vpop.permute.xlu0 %10272  ;;  %v4836_v41 = vadd.f32 %v11754_v51, %v4835_v31  ;;  %v2507_v62 = vpop.xlane.xlu2 %2506 }
0x1087   : > { %v10275_v61 = vunpack.i.h.bf16 %v10273_v17  ;;  %v10274_v15 = vunpack.i.l.bf16 %v10273_v17  ;;  %v2919_v19 = vmax.f32 %v2507_v62, 1e-08  ;;  %v9664_v17 = vld [vmem:[%s11536_s17 + $0x2f0] sm:$0xff]  }
0x1088   : > { %v5229_v13 = vmul.f32 %v13522_v38, %v4836_v41 }
0x1089   : > { %v2517_v5 = vsel %vm1973_vm0, %v10275_v61, 0.0  ;;  %v2514_v21 = vsel %vm1973_vm0, %v10274_v15, 0.0  ;;  %10816 = vrcp.f32 %v2919_v19 }
0x108a   : > { %v7009_v40 = vpop.f32.mrf.mxu2  ;;  %2518 = vadd.xlane.f32.xlu2 %v2517_v5  ;;  %2515 = vadd.xlane.f32.xlu1 %v2514_v21  ;;  %v13845_v5 = vunpack.c.l.bf16 %v9664_v17  ;;  %v13847_v21 = vunpack.c.h.bf16 %v9664_v17 }
0x108b   : > { %v7010_v9 = vadd.f32 %v13701_v2, %v7009_v40 }
0x108c   : > { %v10291_v40 = vpack.i.bf16 %v13847_v21, %v13845_v5 }
0x108d   : > { %v7420_v48 = vmax.f32 %v7010_v9, 0.0  ;;  %v4837_v42 = vpop.f32.mrf.mxu0 }
0x108e   : > { %v4838_v46 = vadd.f32 %v11754_v51, %v4837_v42  ;;  %v10278_v4 = vpop.permute.xlu0 %10277 }
0x108f   : > { %v7599_v58 = vpack.c.bf16 %v7420_v48, %v7419_v47  ;;  %v10279_v7 = vunpack.i.l.bf16 %v10278_v4  ;;  %v10817_v8 = vpop.eup %10816 }
0x1090   : > { %v5230_v34 = vmul.f32 %v13524_v30, %v4838_v46  ;;  %v3428_v30 = vmul.f32 %v10815_v32, %v13650_v39  ;;  %v3431_v24 = vmul.f32 %v10817_v8, %v13686_v0 }
0x1091   : > { %8107 = vmatmul.bf16.gmra.mxu3 %v7599_v58  ;;  %v2520_v45 = vsel %vm1973_vm0, %v10279_v7, 0.0 }
0x1092   : > { %v5403_v16 = vpack.c.bf16 %v5230_v34, %v5229_v13  ;;  %2521 = vadd.xlane.f32.xlu0 %v2520_v45  ;;  %v3597_v55 = vpack.c.bf16 %v3429_v49, %v3428_v30  ;;  %v10280_v13 = vunpack.i.h.bf16 %v10278_v4 }
0x1094   : > { %5935 = vmatmul.bf16.gmra.mxu1 %v5403_v16  ;;  %v2523_v45 = vsel %vm1973_vm0, %v10280_v13, 0.0 }
0x1098   : > { %v3943_v54 = vpop.permute.xlu2 %3942 }
0x1099   : > { %8889 = vmatmul.msk.bf16.gmra.mxu0 %vm1973_vm0, %v3943_v54 }
0x109b   : > { %v2504_v38 = vpop.xlane.xlu1 %2503 }
0x109c   : > { %v2918_v12 = vmax.f32 %v2504_v38, 1e-08 }
0x109e   : > { %10818 = vrcp.f32 %v2918_v12 }
0x10a0   : > { %v8093_v14 = vpop.f32.mrf.mxu3 }
0x10a1   : > { %v8094_v27 = vadd.f32 %v13786_v28, %v8093_v14 }
0x10a2   : > { %3946 = vrot.lane.b32.xlu2 %v3597_v55, %s11344_s13 }
0x10a3   : > { %8514 = vst [vmem:[%s11979_s22 + $0x490] sm:$0xff] %v8094_v27  ;;  %v9665_v27 = vld [vmem:[%s11536_s17 + $0x2f8] sm:$0xff]  }
0x10a4   : > { %v10819_v31 = vpop.eup %10818  ;;  %v13868_v17 = vunpack.c.l.bf16 %v9665_v27 }
0x10a5   : > { %v3430_v63 = vmul.f32 %v10819_v31, %v13684_v18 }
0x10a7   : > { %v3598_v61 = vpack.c.bf16 %v3431_v24, %v3430_v63 }
0x10a8   : > { %v8095_v15 = vpop.f32.mrf.mxu3 }
0x10a9   : > { %v8096_v23 = vadd.f32 %v13786_v28, %v8095_v15  ;;  %3948 = vrot.lane.b32.xlu1 %v3598_v61, %s11344_s13  ;;  %v13870_v61 = vunpack.c.h.bf16 %v9665_v27 }
0x10ab   : > { %8515 = vst [vmem:[%s11979_s22 + $0x498] sm:$0xff] %v8096_v23  ;;  %v10296_v23 = vpack.i.bf16 %v13870_v61, %v13868_v17 }
0x10b1   : > { %10292 = vrot.lane.b32.xlu1 %v10291_v40, %s11344_s13 }
0x10b2   : > { %v5926_v9 = vpop.f32.mrf.mxu1 }
0x10b3   : > { %v5927_v41 = vadd.f32 %v13620_v53, %v5926_v9 }
0x10b5   : > { %v6326_v36 = vmax.f32 %v5927_v41, 0.0 }
0x10b9   : > { %v2510_v6 = vpop.xlane.xlu0 %2509 }
0x10ba   : > { %v5928_v47 = vpop.f32.mrf.mxu1  ;;  %v3945_v48 = vpop.permute.xlu1 %3944  ;;  %v2920_v55 = vmax.f32 %v2510_v6, 1e-08 }
0x10bb   : > { %v5929_v42 = vadd.f32 %v13620_v53, %v5928_v47  ;;  %8890 = vmatmul.msk.bf16.gmra.mxu0 %vm1973_vm0, %v3945_v48 }
0x10bc   : > { %10820 = vrcp.f32 %v2920_v55 }
0x10bd   : > { %v6327_v46 = vmax.f32 %v5929_v42, 0.0 }
0x10bf   : > { %v6502_v62 = vpack.c.bf16 %v6327_v46, %v6326_v36 }
0x10c1   : > { %7026 = vmatmul.bf16.gmra.mxu2 %v6502_v62 }
0x10c2   : > { %v10821_v40 = vpop.eup %10820 }
0x10c3   : > { %v3432_v42 = vmul.f32 %v10821_v40, %v13713_v50 }
0x10c4   : > { %v8098_v58 = vpop.f32.mrf.mxu3 }
0x10c5   : > { %v8099_v7 = vadd.f32 %v13786_v28, %v8098_v58 }
0x10c6   : > { %v4840_v34 = vpop.f32.mrf.mxu0 }
0x10c7   : > { %8516 = vst [vmem:[%s11979_s22 + $0x4a0] sm:$0xff] %v8099_v7  ;;  %v4841_v53 = vadd.f32 %v11754_v51, %v4840_v34 }
0x10c9   : > { %v5231_v4 = vmul.f32 %v13544_v35, %v4841_v53 }
0x10cb   : > { %2524 = vadd.xlane.f32.xlu2 %v2523_v45 }
0x10cc   : > { %v8100_v16 = vpop.f32.mrf.mxu3  ;;  %v10283_v19 = vpop.permute.xlu0 %10282 }
0x10cd   : > { %v8101_v25 = vadd.f32 %v13786_v28, %v8100_v16  ;;  %v10284_v54 = vunpack.i.l.bf16 %v10283_v19  ;;  %v10285_v8 = vunpack.i.h.bf16 %v10283_v19 }
0x10ce   : > { %v4842_v32 = vpop.f32.mrf.mxu0 }
0x10cf   : > { %8517 = vst [vmem:[%s11979_s22 + $0x4a8] sm:$0xff] %v8101_v25  ;;  %v4843_v38 = vadd.f32 %v11754_v51, %v4842_v32  ;;  %v2526_v30 = vsel %vm1973_vm0, %v10284_v54, 0.0  ;;  %v2529_v31 = vsel %vm1973_vm0, %v10285_v8, 0.0 }
0x10d0   : > { %2527 = vadd.xlane.f32.xlu0 %v2526_v30 }
0x10d1   : > { %v5232_v49 = vmul.f32 %v13546_v37, %v4843_v38 }
0x10d3   : > { %v5404_v12 = vpack.c.bf16 %v5232_v49, %v5231_v4 }
0x10d5   : > { %5940 = vmatmul.bf16.gmra.mxu1 %v5404_v12 }
0x10d6   : > { %v7012_v14 = vpop.f32.mrf.mxu2 }
0x10d7   : > { %v7013_v35 = vadd.f32 %v13701_v2, %v7012_v14 }
0x10d9   : > { %v7421_v9 = vmax.f32 %v7013_v35, 0.0 }
0x10da   : > { %v2513_v24 = vpop.xlane.xlu2 %2512 }
0x10db   : > { %v2921_v63 = vmax.f32 %v2513_v24, 1e-08  ;;  %2530 = vadd.xlane.f32.xlu1 %v2529_v31  ;;  %v10288_v31 = vpop.permute.xlu0 %10287 }
0x10dd   : > { %10822 = vrcp.f32 %v2921_v63  ;;  %v10290_v63 = vunpack.i.h.bf16 %v10288_v31 }
0x10de   : > { %v7014_v37 = vpop.f32.mrf.mxu2 }
0x10df   : > { %v7015_v15 = vadd.f32 %v13701_v2, %v7014_v37 }
0x10e1   : > { %v7422_v41 = vmax.f32 %v7015_v15, 0.0 }
0x10e3   : > { %v10823_v47 = vpop.eup %10822  ;;  %v7600_v48 = vpack.c.bf16 %v7422_v41, %v7421_v9  ;;  %10297 = vrot.lane.b32.xlu2 %v10296_v23, %s11344_s13  ;;  %v13893_v23 = vld [vmem:[#allocation8] ss:$0 sm:$0xff] }
0x10e4   : > { %v3433_v36 = vmul.f32 %v10823_v47, %v13715_v33  ;;  %v2535_v47 = vsel %vm1973_vm0, %v10290_v63, 0.0 }
0x10e5   : > { %8112 = vmatmul.bf16.gmra.mxu3 %v7600_v48 }
0x10e6   : > { %v7017_v46 = vpop.f32.mrf.mxu2  ;;  %v3599_v62 = vpack.c.bf16 %v3433_v36, %v3432_v42  ;;  %v10289_v36 = vunpack.i.l.bf16 %v10288_v31 }
0x10e7   : > { %v7018_v58 = vadd.f32 %v13701_v2, %v7017_v46 }
0x10e8   : > { %3950 = vrot.lane.b32.xlu0 %v3599_v62, %s11344_s13 }
0x10e9   : > { %v7423_v16 = vmax.f32 %v7018_v58, 0.0  ;;  %v2532_v58 = vsel %vm1973_vm0, %v10289_v36, 0.0 }
0x10ec   : > { %v8103_v6 = vpop.f32.mrf.mxu3 }
0x10ed   : > { %v8104_v7 = vadd.f32 %v13786_v28, %v8103_v6 }
0x10ee   : > { %v4845_v13 = vpop.f32.mrf.mxu0  ;;  %v7019_v34 = vpop.f32.mrf.mxu2 }
0x10ef   : > { %8518 = vst [vmem:[%s11979_s22 + $0x4b0] sm:$0xff] %v8104_v7  ;;  %v7020_v45 = vadd.f32 %v13701_v2, %v7019_v34  ;;  %v4846_v54 = vadd.f32 %v11754_v51, %v4845_v13 }
0x10f1   : > { %v7424_v19 = vmax.f32 %v7020_v45, 0.0  ;;  %v5233_v4 = vmul.f32 %v13594_v26, %v4846_v54 }
0x10f3   : > { %v7601_v53 = vpack.c.bf16 %v7424_v19, %v7423_v16 }
0x10f4   : > { %v8105_v25 = vpop.f32.mrf.mxu3 }
0x10f5   : > { %v8106_v32 = vadd.f32 %v13786_v28, %v8105_v25  ;;  %8117 = vmatmul.bf16.gmra.mxu3 %v7601_v53 }
0x10f6   : > { %v4847_v38 = vpop.f32.mrf.mxu0 }
0x10f7   : > { %8519 = vst [vmem:[%s11979_s22 + $0x4b8] sm:$0xff] %v8106_v32  ;;  %v4848_v30 = vadd.f32 %v11754_v51, %v4847_v38 }
0x10f9   : > { %v5234_v49 = vmul.f32 %v13596_v60, %v4848_v30 }
0x10fb   : > { %v5405_v12 = vpack.c.bf16 %v5234_v49, %v5233_v4 }
0x10fd   : > { %5945 = vmatmul.bf16.gmra.mxu1 %v5405_v12  ;;  %v2519_v8 = vpop.xlane.xlu2 %2518  ;;  %v2516_v14 = vpop.xlane.xlu1 %2515  ;;  %v9666_v12 = vld [vmem:[%s11536_s17 + $0x300] sm:$0xff]  }
0x10fe   : > { %v2923_v55 = vmax.f32 %v2519_v8, 1e-08  ;;  %v2922_v27 = vmax.f32 %v2516_v14, 1e-08 }
0x1100   : > { %10824 = vrcp.f32 %v2923_v55 }
0x1101   : > { %10826 = vrcp.f32 %v2922_v27  ;;  %v5931_v24 = vpop.f32.mrf.mxu1 }
0x1102   : > { %v5932_v40 = vadd.f32 %v13893_v23, %v5931_v24 }
0x1104   : > { %v6328_v46 = vmax.f32 %v5932_v40, 0.0 }
0x1105   : > { %v3947_v35 = vpop.permute.xlu2 %3946 }
0x1106   : > { %v10825_v37 = vpop.eup %10824  ;;  %8891 = vmatmul.msk.bf16.gmra.mxu0 %vm1973_vm0, %v3947_v35  ;;  %v13910_v35 = vunpack.c.l.bf16 %v9666_v12 }
0x1107   : > { %v10827_v15 = vpop.eup %10826  ;;  %v3435_v26 = vmul.f32 %v10825_v37, %v13754_v3  ;;  %v13912_v37 = vunpack.c.h.bf16 %v9666_v12 }
0x1108   : > { %v3434_v60 = vmul.f32 %v10827_v15, %v13752_v56 }
0x1109   : > { %v7022_v9 = vpop.f32.mrf.mxu2  ;;  %v5933_v41 = vpop.f32.mrf.mxu1  ;;  %v10301_v40 = vpack.i.bf16 %v13912_v37, %v13910_v35 }
0x110a   : > { %v5934_v48 = vadd.f32 %v13893_v23, %v5933_v41  ;;  %v3600_v42 = vpack.c.bf16 %v3435_v26, %v3434_v60  ;;  %v7023_v7 = vadd.f32 %v13701_v2, %v7022_v9 }
0x110c   : > { %v6329_v62 = vmax.f32 %v5934_v48, 0.0  ;;  %3952 = vrot.lane.b32.xlu1 %v3600_v42, %s11344_s13  ;;  %2536 = vadd.xlane.f32.xlu2 %v2535_v47  ;;  %v7425_v16 = vmax.f32 %v7023_v7, 0.0  ;;  %v9667_v47 = vld [vmem:[%s11536_s17 + $0x308] sm:$0xff]  }
0x110d   : > { %v13923_v36 = vunpack.c.l.bf16 %v9667_v47 }
0x110e   : > { %v6503_v6 = vpack.c.bf16 %v6329_v62, %v6328_v46  ;;  %v13925_v46 = vunpack.c.h.bf16 %v9667_v47 }
0x1110   : > { %7031 = vmatmul.bf16.gmra.mxu2 %v6503_v6  ;;  %v2522_v6 = vpop.xlane.xlu0 %2521 }
0x1111   : > { %v7024_v13 = vpop.f32.mrf.mxu2  ;;  %v5936_v34 = vpop.f32.mrf.mxu1  ;;  %v2924_v7 = vmax.f32 %v2522_v6, 1e-08 }
0x1112   : > { %v7025_v45 = vadd.f32 %v13701_v2, %v7024_v13  ;;  %2533 = vadd.xlane.f32.xlu0 %v2532_v58  ;;  %v5937_v38 = vadd.f32 %v13893_v23, %v5936_v34 }
0x1113   : > { %10828 = vrcp.f32 %v2924_v7 }
0x1114   : > { %v7426_v19 = vmax.f32 %v7025_v45, 0.0  ;;  %v8108_v53 = vpop.f32.mrf.mxu3  ;;  %v6330_v8 = vmax.f32 %v5937_v38, 0.0 }
0x1115   : > { %v8109_v25 = vadd.f32 %v13786_v28, %v8108_v53 }
0x1116   : > { %v4850_v54 = vpop.f32.mrf.mxu0  ;;  %v7602_v32 = vpack.c.bf16 %v7426_v19, %v7425_v16 }
0x1117   : > { %8520 = vst [vmem:[%s11979_s22 + $0x4c0] sm:$0xff] %v8109_v25  ;;  %v4851_v27 = vadd.f32 %v11754_v51, %v4850_v54 }
0x1118   : > { %8122 = vmatmul.bf16.gmra.mxu3 %v7602_v32 }
0x1119   : > { %v5938_v30 = vpop.f32.mrf.mxu1  ;;  %v5235_v26 = vmul.f32 %v13604_v11, %v4851_v27  ;;  %v10306_v11 = vpack.i.bf16 %v13925_v46, %v13923_v36  ;;  %v10829_v32 = vpop.eup %10828 }
0x111a   : > { %v5939_v4 = vadd.f32 %v13893_v23, %v5938_v30 }
0x111b   : > { %v3949_v49 = vpop.permute.xlu1 %3948 }
0x111c   : > { %v6331_v14 = vmax.f32 %v5939_v4, 0.0  ;;  %8892 = vmatmul.msk.bf16.gmra.mxu0 %vm1973_vm0, %v3949_v49  ;;  %v8110_v55 = vpop.f32.mrf.mxu3  ;;  %v3436_v4 = vmul.f32 %v10829_v32, %v13761_v29 }
0x111d   : > { %v8111_v24 = vadd.f32 %v13786_v28, %v8110_v55 }
0x111e   : > { %v4852_v31 = vpop.f32.mrf.mxu0  ;;  %v6504_v63 = vpack.c.bf16 %v6331_v14, %v6330_v8 }
0x111f   : > { %8521 = vst [vmem:[%s11979_s22 + $0x4c8] sm:$0xff] %v8111_v24  ;;  %v4853_v15 = vadd.f32 %v11754_v51, %v4852_v31 }
0x1120   : > { %7036 = vmatmul.bf16.gmra.mxu2 %v6504_v63 }
0x1121   : > { %v5236_v60 = vmul.f32 %v13606_v10, %v4853_v15 }
0x1123   : > { %v5406_v9 = vpack.c.bf16 %v5236_v60, %v5235_v26  ;;  %v10293_v41 = vpop.permute.xlu1 %10292 }
0x1124   : > { %v10295_v48 = vunpack.i.h.bf16 %v10293_v41  ;;  %v10294_v10 = vunpack.i.l.bf16 %v10293_v41 }
0x1125   : > { %5950 = vmatmul.bf16.gmra.mxu1 %v5406_v9 }
0x1126   : > { %10302 = vrot.lane.b32.xlu0 %v10301_v40, %s11344_s13  ;;  %v2541_v42 = vsel %vm1973_vm0, %v10295_v48, 0.0  ;;  %v2538_v62 = vsel %vm1973_vm0, %v10294_v10, 0.0 }
0x1127   : > { %2542 = vadd.xlane.f32.xlu2 %v2541_v42 }
0x112e   : > { %10307 = vrot.lane.b32.xlu0 %v10306_v11, %s11344_s13  ;;  %v9668_v11 = vld [vmem:[%s11536_s17 + $0x310] sm:$0xff]  }
0x112f   : > { %v13948_v7 = vunpack.c.l.bf16 %v9668_v11 }
0x1136   : > { %2539 = vadd.xlane.f32.xlu1 %v2538_v62 }
0x1138   : > { %v4855_v58 = vpop.f32.mrf.mxu0 }
0x1139   : > { %v4856_v34 = vadd.f32 %v11754_v51, %v4855_v58 }
0x113b   : > { %v5237_v53 = vmul.f32 %v13635_v44, %v4856_v34 }
0x113e   : > { %v2525_v13 = vpop.xlane.xlu2 %2524 }
0x113f   : > { %v2925_v45 = vmax.f32 %v2525_v13, 1e-08  ;;  %v13950_v13 = vunpack.c.h.bf16 %v9668_v11 }
0x1140   : > { %v4857_v16 = vpop.f32.mrf.mxu0 }
0x1141   : > { %10830 = vrcp.f32 %v2925_v45  ;;  %v4858_v19 = vadd.f32 %v11754_v51, %v4857_v16 }
0x1143   : > { %v5238_v25 = vmul.f32 %v13637_v1, %v4858_v19  ;;  %v2528_v12 = vpop.xlane.xlu0 %2527  ;;  %v10311_v19 = vpack.i.bf16 %v13950_v13, %v13948_v7 }
0x1144   : > { %v7027_v54 = vpop.f32.mrf.mxu2  ;;  %v2926_v55 = vmax.f32 %v2528_v12, 1e-08 }
0x1145   : > { %v5407_v38 = vpack.c.bf16 %v5238_v25, %v5237_v53  ;;  %v7028_v14 = vadd.f32 %v13701_v2, %v7027_v54 }
0x1146   : > { %v10298_v24 = vpop.permute.xlu2 %10297  ;;  %10832 = vrcp.f32 %v2926_v55 }
0x1147   : > { %v10831_v30 = vpop.eup %10830  ;;  %5955 = vmatmul.bf16.gmra.mxu1 %v5407_v38  ;;  %v7427_v31 = vmax.f32 %v7028_v14, 0.0  ;;  %v10299_v60 = vunpack.i.l.bf16 %v10298_v24  ;;  %v10300_v54 = vunpack.i.h.bf16 %v10298_v24 }
0x1148   : > { %v3437_v49 = vmul.f32 %v10831_v30, %v13763_v59 }
0x1149   : > { %v2544_v41 = vsel %vm1973_vm0, %v10299_v60, 0.0  ;;  %v2547_v30 = vsel %vm1973_vm0, %v10300_v54, 0.0 }
0x114a   : > { %v3601_v8 = vpack.c.bf16 %v3437_v49, %v3436_v4 }
0x114c   : > { %v7029_v27 = vpop.f32.mrf.mxu2  ;;  %3954 = vrot.lane.b32.xlu2 %v3601_v8, %s11344_s13  ;;  %v10833_v9 = vpop.eup %10832 }
0x114d   : > { %v7030_v44 = vadd.f32 %v13701_v2, %v7029_v27  ;;  %v3438_v48 = vmul.f32 %v10833_v9, %v13792_v57 }
0x114e   : > { %v2531_v1 = vpop.xlane.xlu1 %2530 }
0x114f   : > { %v7428_v63 = vmax.f32 %v7030_v44, 0.0  ;;  %v2927_v15 = vmax.f32 %v2531_v1, 1e-08 }
0x1151   : > { %10834 = vrcp.f32 %v2927_v15  ;;  %v7603_v26 = vpack.c.bf16 %v7428_v63, %v7427_v31  ;;  %v9669_v31 = vld [vmem:[%s11536_s17 + $0x318] sm:$0xff]  }
0x1152   : > { %v5941_v40 = vpop.f32.mrf.mxu1  ;;  %v13970_v60 = vunpack.c.h.bf16 %v9669_v31 }
0x1153   : > { %8127 = vmatmul.bf16.gmra.mxu3 %v7603_v26  ;;  %v5942_v42 = vadd.f32 %v13893_v23, %v5941_v40  ;;  %v13968_v26 = vunpack.c.l.bf16 %v9669_v31 }
0x1155   : > { %v6332_v34 = vmax.f32 %v5942_v42, 0.0  ;;  %v10316_v9 = vpack.i.bf16 %v13970_v60, %v13968_v26 }
0x1157   : > { %v10835_v47 = vpop.eup %10834 }
0x1158   : > { %v3439_v2 = vmul.f32 %v10835_v47, %v13794_v22  ;;  %2545 = vadd.xlane.f32.xlu0 %v2544_v41 }
0x115a   : > { %v5943_v10 = vpop.f32.mrf.mxu1  ;;  %v3951_v62 = vpop.permute.xlu0 %3950  ;;  %v3602_v6 = vpack.c.bf16 %v3439_v2, %v3438_v48 }
0x115b   : > { %v5944_v58 = vadd.f32 %v13893_v23, %v5943_v10  ;;  %8893 = vmatmul.msk.bf16.gmra.mxu0 %vm1973_vm0, %v3951_v62 }
0x115c   : > { %3956 = vrot.lane.b32.xlu1 %v3602_v6, %s11344_s13 }
0x115d   : > { %v6333_v45 = vmax.f32 %v5944_v58, 0.0 }
0x115f   : > { %v6505_v16 = vpack.c.bf16 %v6333_v45, %v6332_v34 }
0x1161   : > { %7041 = vmatmul.bf16.gmra.mxu2 %v6505_v16 }
0x1164   : > { %10312 = vrot.lane.b32.xlu1 %v10311_v19, %s11344_s13  ;;  %v13979_v19 = vld [vmem:[#allocation11] ss:$0 sm:$0xff] }
0x1168   : > { %v8113_v53 = vpop.f32.mrf.mxu3 }
0x1169   : > { %v8114_v25 = vadd.f32 %v13786_v28, %v8113_v53 }
0x116b   : > { %8522 = vst [vmem:[%s11979_s22 + $0x4d0] sm:$0xff] %v8114_v25 }
0x1170   : > { %v8115_v32 = vpop.f32.mrf.mxu3 }
0x1171   : > { %v8116_v38 = vadd.f32 %v13786_v28, %v8115_v32 }
0x1173   : > { %8523 = vst [vmem:[%s11979_s22 + $0x4d8] sm:$0xff] %v8116_v38 }
0x1175   : > { %2548 = vadd.xlane.f32.xlu2 %v2547_v30 }
0x1178   : > { %v8118_v4 = vpop.f32.mrf.mxu3 }
0x1179   : > { %v8119_v49 = vadd.f32 %v13786_v28, %v8118_v4 }
0x117a   : > { %v5946_v12 = vpop.f32.mrf.mxu1 }
0x117b   : > { %8524 = vst [vmem:[%s11979_s22 + $0x4e0] sm:$0xff] %v8119_v49  ;;  %v5947_v55 = vadd.f32 %v13893_v23, %v5946_v12 }
0x117d   : > { %v6334_v63 = vmax.f32 %v5947_v55, 0.0 }
0x117e   : > { %v3953_v8 = vpop.permute.xlu1 %3952 }
0x117f   : > { %8894 = vmatmul.msk.bf16.gmra.mxu0 %vm1973_vm0, %v3953_v8  ;;  %v2537_v6 = vpop.xlane.xlu2 %2536 }
0x1180   : > { %v8120_v14 = vpop.f32.mrf.mxu3  ;;  %v2929_v32 = vmax.f32 %v2537_v6, 1e-08 }
0x1181   : > { %v8121_v27 = vadd.f32 %v13786_v28, %v8120_v14 }
0x1182   : > { %v5948_v44 = vpop.f32.mrf.mxu1  ;;  %10836 = vrcp.f32 %v2929_v32 }
0x1183   : > { %8525 = vst [vmem:[%s11979_s22 + $0x4e8] sm:$0xff] %v8121_v27  ;;  %v5949_v1 = vadd.f32 %v13893_v23, %v5948_v44  ;;  %v4860_v24 = vpop.f32.mrf.mxu0 }
0x1184   : > { %v4861_v41 = vadd.f32 %v11754_v51, %v4860_v24 }
0x1185   : > { %v6335_v15 = vmax.f32 %v5949_v1, 0.0  ;;  %v2534_v11 = vpop.xlane.xlu0 %2533 }
0x1186   : > { %v5239_v2 = vmul.f32 %v13650_v39, %v4861_v41  ;;  %v2928_v49 = vmax.f32 %v2534_v11, 1e-08 }
0x1187   : > { %v6506_v40 = vpack.c.bf16 %v6335_v15, %v6334_v63 }
0x1188   : > { %10838 = vrcp.f32 %v2928_v49  ;;  %v10837_v41 = vpop.eup %10836 }
0x1189   : > { %7046 = vmatmul.bf16.gmra.mxu2 %v6506_v40 }
0x118b   : > { %v4862_v47 = vpop.f32.mrf.mxu0 }
0x118c   : > { %v4863_v48 = vadd.f32 %v11754_v51, %v4862_v47 }
0x118d   : > { %10317 = vrot.lane.b32.xlu2 %v10316_v9, %s11344_s13 }
0x118e   : > { %v5240_v42 = vmul.f32 %v13652_v43, %v4863_v48 }
0x1190   : > { %v5408_v10 = vpack.c.bf16 %v5240_v42, %v5239_v2  ;;  %v10839_v2 = vpop.eup %10838 }
0x1192   : > { %5960 = vmatmul.bf16.gmra.mxu1 %v5408_v10  ;;  %v3440_v10 = vmul.f32 %v10839_v2, %v13802_v20 }
0x1193   : > { %v7032_v62 = vpop.f32.mrf.mxu2 }
0x1194   : > { %v7033_v53 = vadd.f32 %v13979_v19, %v7032_v62 }
0x1196   : > { %v7429_v12 = vmax.f32 %v7033_v53, 0.0 }
0x1198   : > { %v10303_v58 = vpop.permute.xlu0 %10302 }
0x1199   : > { %v10305_v34 = vunpack.i.h.bf16 %v10303_v58  ;;  %v10304_v45 = vunpack.i.l.bf16 %v10303_v58  ;;  %v4865_v16 = vpop.f32.mrf.mxu0 }
0x119a   : > { %v2543_v4 = vpop.xlane.xlu2 %2542  ;;  %v4866_v14 = vadd.f32 %v11754_v51, %v4865_v16 }
0x119b   : > { %v8123_v25 = vpop.f32.mrf.mxu3  ;;  %v7034_v54 = vpop.f32.mrf.mxu2  ;;  %v2550_v39 = vsel %vm1973_vm0, %v10304_v45, 0.0  ;;  %v2553_v43 = vsel %vm1973_vm0, %v10305_v34, 0.0  ;;  %v2931_v15 = vmax.f32 %v2543_v4, 1e-08 }
0x119c   : > { %v8124_v38 = vadd.f32 %v13786_v28, %v8123_v25  ;;  %v7035_v30 = vadd.f32 %v13979_v19, %v7034_v54  ;;  %2551 = vadd.xlane.f32.xlu0 %v2550_v39  ;;  %2554 = vadd.xlane.f32.xlu1 %v2553_v43  ;;  %v5241_v63 = vmul.f32 %v13684_v18, %v4866_v14 }
0x119d   : > { %10840 = vrcp.f32 %v2931_v15  ;;  %v3441_v18 = vmul.f32 %v10837_v41, %v13804_v52 }
0x119e   : > { %8526 = vst [vmem:[%s11979_s22 + $0x4f0] sm:$0xff] %v8124_v38  ;;  %v7430_v8 = vmax.f32 %v7035_v30, 0.0 }
0x119f   : > { %v3603_v43 = vpack.c.bf16 %v3441_v18, %v3440_v10 }
0x11a0   : > { %v7604_v55 = vpack.c.bf16 %v7430_v8, %v7429_v12  ;;  %v10308_v32 = vpop.permute.xlu0 %10307 }
0x11a1   : > { %v4867_v27 = vpop.f32.mrf.mxu0  ;;  %v10310_v30 = vunpack.i.h.bf16 %v10308_v32 }
0x11a2   : > { %v4868_v44 = vadd.f32 %v11754_v51, %v4867_v27  ;;  %v5951_v1 = vpop.f32.mrf.mxu1  ;;  %8132 = vmatmul.bf16.gmra.mxu3 %v7604_v55 }
0x11a3   : > { %v8125_v24 = vpop.f32.mrf.mxu3  ;;  %v7037_v31 = vpop.f32.mrf.mxu2  ;;  %v5952_v42 = vadd.f32 %v13893_v23, %v5951_v1  ;;  %v2559_v14 = vsel %vm1973_vm0, %v10310_v30, 0.0 }
0x11a4   : > { %v5242_v40 = vmul.f32 %v13686_v0, %v4868_v44  ;;  %v8126_v9 = vadd.f32 %v13786_v28, %v8125_v24  ;;  %v7038_v0 = vadd.f32 %v13979_v19, %v7037_v31  ;;  %v10841_v25 = vpop.eup %10840 }
0x11a5   : > { %v6336_v16 = vmax.f32 %v5952_v42, 0.0  ;;  %v3443_v49 = vmul.f32 %v10841_v25, %v13847_v21 }
0x11a6   : > { %8527 = vst [vmem:[%s11979_s22 + $0x4f8] sm:$0xff] %v8126_v9  ;;  %v3955_v47 = vpop.permute.xlu2 %3954  ;;  %v5409_v48 = vpack.c.bf16 %v5242_v40, %v5241_v63  ;;  %v7431_v54 = vmax.f32 %v7038_v0, 0.0  ;;  %v10309_v9 = vunpack.i.l.bf16 %v10308_v32 }
0x11a7   : > { %8895 = vmatmul.msk.bf16.gmra.mxu0 %vm1973_vm0, %v3955_v47 }
0x11a8   : > { %5965 = vmatmul.bf16.gmra.mxu1 %v5409_v48  ;;  %v2556_v42 = vsel %vm1973_vm0, %v10309_v9, 0.0 }
0x11a9   : > { %v2540_v11 = vpop.xlane.xlu1 %2539 }
0x11aa   : > { %v5953_v62 = vpop.f32.mrf.mxu1  ;;  %v2930_v6 = vmax.f32 %v2540_v11, 1e-08 }
0x11ab   : > { %v5954_v58 = vadd.f32 %v13893_v23, %v5953_v62  ;;  %v7039_v34 = vpop.f32.mrf.mxu2 }
0x11ac   : > { %v7040_v45 = vadd.f32 %v13979_v19, %v7039_v34  ;;  %10842 = vrcp.f32 %v2930_v6 }
0x11ad   : > { %v6337_v53 = vmax.f32 %v5954_v58, 0.0 }
0x11ae   : > { %v7432_v39 = vmax.f32 %v7040_v45, 0.0 }
0x11af   : > { %v6507_v38 = vpack.c.bf16 %v6337_v53, %v6336_v16 }
0x11b0   : > { %3958 = vrot.lane.b32.xlu0 %v3603_v43, %s11344_s13  ;;  %v7605_v4 = vpack.c.bf16 %v7432_v39, %v7431_v54  ;;  %v9670_v54 = vld [vmem:[%s11536_s17 + $0x320] sm:$0xff]  }
0x11b1   : > { %7051 = vmatmul.bf16.gmra.mxu2 %v6507_v38  ;;  %v14020_v38 = vunpack.c.l.bf16 %v9670_v54  ;;  %v14022_v30 = vunpack.c.h.bf16 %v9670_v54 }
0x11b2   : > { %v10843_v12 = vpop.eup %10842  ;;  %8137 = vmatmul.bf16.gmra.mxu3 %v7605_v4 }
0x11b3   : > { %v3442_v8 = vmul.f32 %v10843_v12, %v13845_v5 }
0x11b5   : > { %v3604_v55 = vpack.c.bf16 %v3443_v49, %v3442_v8  ;;  %v10321_v49 = vpack.i.bf16 %v14022_v30, %v14020_v38 }
0x11b6   : > { %2560 = vadd.xlane.f32.xlu2 %v2559_v14 }
0x11b7   : > { %3960 = vrot.lane.b32.xlu1 %v3604_v55, %s11344_s13 }
0x11c4   : > { %v5956_v27 = vpop.f32.mrf.mxu1 }
0x11c5   : > { %v5957_v44 = vadd.f32 %v13893_v23, %v5956_v27 }
0x11c7   : > { %v6338_v63 = vmax.f32 %v5957_v44, 0.0 }
0x11cb   : > { %v2546_v16 = vpop.xlane.xlu0 %2545 }
0x11cc   : > { %v5958_v1 = vpop.f32.mrf.mxu1  ;;  %v2932_v43 = vmax.f32 %v2546_v16, 1e-08 }
0x11cd   : > { %v5959_v24 = vadd.f32 %v13893_v23, %v5958_v1 }
0x11ce   : > { %v3957_v31 = vpop.permute.xlu1 %3956  ;;  %10844 = vrcp.f32 %v2932_v43 }
0x11cf   : > { %v6339_v15 = vmax.f32 %v5959_v24, 0.0  ;;  %8896 = vmatmul.msk.bf16.gmra.mxu0 %vm1973_vm0, %v3957_v31 }
0x11d1   : > { %v6508_v40 = vpack.c.bf16 %v6339_v15, %v6338_v63 }
0x11d3   : > { %7056 = vmatmul.bf16.gmra.mxu2 %v6508_v40 }
0x11d4   : > { %v10845_v27 = vpop.eup %10844 }
0x11d5   : > { %v3444_v63 = vmul.f32 %v10845_v27, %v13868_v17 }
0x11d6   : > { %v8128_v41 = vpop.f32.mrf.mxu3  ;;  %v10313_v47 = vpop.permute.xlu1 %10312 }
0x11d7   : > { %v8129_v48 = vadd.f32 %v13786_v28, %v8128_v41  ;;  %v10315_v2 = vunpack.i.h.bf16 %v10313_v47  ;;  %v10314_v18 = vunpack.i.l.bf16 %v10313_v47 }
0x11d8   : > { %v4870_v11 = vpop.f32.mrf.mxu0 }
0x11d9   : > { %8528 = vst [vmem:[%s11979_s22 + $0x500] sm:$0xff] %v8129_v48  ;;  %v2565_v10 = vsel %vm1973_vm0, %v10315_v2, 0.0  ;;  %v2562_v62 = vsel %vm1973_vm0, %v10314_v18, 0.0  ;;  %v4871_v6 = vadd.f32 %v11754_v51, %v4870_v11 }
0x11da   : > { %2566 = vadd.xlane.f32.xlu2 %v2565_v10  ;;  %2557 = vadd.xlane.f32.xlu0 %v2556_v42 }
0x11db   : > { %v5243_v53 = vmul.f32 %v13713_v50, %v4871_v6  ;;  %v9671_v50 = vld [vmem:[%s11536_s17 + $0x328] sm:$0xff]  }
0x11dc   : > { %v14030_v14 = vunpack.c.l.bf16 %v9671_v50  ;;  %v14032_v55 = vunpack.c.h.bf16 %v9671_v50 }
0x11de   : > { %v8130_v0 = vpop.f32.mrf.mxu3  ;;  %v10326_v40 = vpack.i.bf16 %v14032_v55, %v14030_v14 }
0x11df   : > { %v8131_v58 = vadd.f32 %v13786_v28, %v8130_v0 }
0x11e0   : > { %v4872_v34 = vpop.f32.mrf.mxu0 }
0x11e1   : > { %8529 = vst [vmem:[%s11979_s22 + $0x508] sm:$0xff] %v8131_v58  ;;  %v4873_v45 = vadd.f32 %v11754_v51, %v4872_v34  ;;  %2563 = vadd.xlane.f32.xlu1 %v2562_v62 }
0x11e3   : > { %v5244_v25 = vmul.f32 %v13715_v33, %v4873_v45 }
0x11e4   : > { %v7042_v39 = vpop.f32.mrf.mxu2 }
0x11e5   : > { %v5410_v32 = vpack.c.bf16 %v5244_v25, %v5243_v53  ;;  %v7043_v12 = vadd.f32 %v13979_v19, %v7042_v39 }
0x11e7   : > { %5970 = vmatmul.bf16.gmra.mxu1 %v5410_v32  ;;  %v7433_v44 = vmax.f32 %v7043_v12, 0.0 }
0x11e8   : > { %v2549_v28 = vpop.xlane.xlu2 %2548 }
0x11e9   : > { %v2933_v4 = vmax.f32 %v2549_v28, 1e-08 }
0x11eb   : > { %10846 = vrcp.f32 %v2933_v4 }
0x11ec   : > { %v7044_v33 = vpop.f32.mrf.mxu2 }
0x11ed   : > { %v7045_v8 = vadd.f32 %v13979_v19, %v7044_v33 }
0x11ee   : > { %10322 = vrot.lane.b32.xlu0 %v10321_v49, %s11344_s13 }
0x11ef   : > { %v7434_v1 = vmax.f32 %v7045_v8, 0.0 }
0x11f1   : > { %v10847_v24 = vpop.eup %10846  ;;  %v7606_v31 = vpack.c.bf16 %v7434_v1, %v7433_v44 }
0x11f2   : > { %v3445_v15 = vmul.f32 %v10847_v24, %v13870_v61 }
0x11f3   : > { %8142 = vmatmul.bf16.gmra.mxu3 %v7606_v31 }
0x11f4   : > { %v3605_v9 = vpack.c.bf16 %v3445_v15, %v3444_v63 }
0x11f6   : > { %10327 = vrot.lane.b32.xlu0 %v10326_v40, %s11344_s13  ;;  %3962 = vrot.lane.b32.xlu2 %v3605_v9, %s11344_s13 }
0x11fc   : > { %v4875_v41 = vpop.f32.mrf.mxu0 }
0x11fd   : > { %v4876_v47 = vadd.f32 %v11754_v51, %v4875_v41  ;;  %v14054_v41 = vld [vmem:[#allocation14] ss:$0 sm:$0xff] }
0x11ff   : > { %v5245_v42 = vmul.f32 %v13752_v56, %v4876_v47  ;;  %v10318_v56 = vpop.permute.xlu2 %10317 }
0x1200   : > { %v10320_v28 = vunpack.i.h.bf16 %v10318_v56  ;;  %v10319_v50 = vunpack.i.l.bf16 %v10318_v56 }
0x1202   : > { %v2571_v24 = vsel %vm1973_vm0, %v10320_v28, 0.0  ;;  %v2568_v31 = vsel %vm1973_vm0, %v10319_v50, 0.0 }
0x1204   : > { %v4877_v48 = vpop.f32.mrf.mxu0 }
0x1205   : > { %v4878_v2 = vadd.f32 %v11754_v51, %v4877_v48  ;;  %v9672_v48 = vld [vmem:[%s11536_s17 + $0x330] sm:$0xff]  }
0x1207   : > { %v5246_v11 = vmul.f32 %v13754_v3, %v4878_v2 }
0x1209   : > { %v5411_v10 = vpack.c.bf16 %v5246_v11, %v5245_v42 }
0x120b   : > { %5975 = vmatmul.bf16.gmra.mxu1 %v5411_v10  ;;  %v14061_v10 = vunpack.c.l.bf16 %v9672_v48 }
0x120c   : > { %v7047_v18 = vpop.f32.mrf.mxu2 }
0x120d   : > { %v7048_v45 = vadd.f32 %v13979_v19, %v7047_v18  ;;  %v14063_v18 = vunpack.c.h.bf16 %v9672_v48 }
0x120f   : > { %v2552_v0 = vpop.xlane.xlu0 %2551  ;;  %v5961_v62 = vpop.f32.mrf.mxu1  ;;  %v7435_v54 = vmax.f32 %v7048_v45, 0.0 }
0x1210   : > { %v2934_v6 = vmax.f32 %v2552_v0, 1e-08  ;;  %v2555_v58 = vpop.xlane.xlu1 %2554  ;;  %v5962_v25 = vadd.f32 %v13893_v23, %v5961_v62 }
0x1211   : > { %v2935_v34 = vmax.f32 %v2555_v58, 1e-08 }
0x1212   : > { %10848 = vrcp.f32 %v2934_v6  ;;  %v6340_v33 = vmax.f32 %v5962_v25, 0.0 }
0x1213   : > { %10850 = vrcp.f32 %v2935_v34 }
0x1214   : > { %v7049_v16 = vpop.f32.mrf.mxu2 }
0x1215   : > { %v7050_v53 = vadd.f32 %v13979_v19, %v7049_v16 }
0x1217   : > { %v7436_v3 = vmax.f32 %v7050_v53, 0.0  ;;  %v5963_v39 = vpop.f32.mrf.mxu1 }
0x1218   : > { %v10849_v43 = vpop.eup %10848  ;;  %v5964_v32 = vadd.f32 %v13893_v23, %v5963_v39  ;;  %v9673_v39 = vld [vmem:[%s11536_s17 + $0x338] sm:$0xff]  }
0x1219   : > { %v10851_v4 = vpop.eup %10850  ;;  %v3446_v49 = vmul.f32 %v10849_v43, %v13910_v35  ;;  %v7607_v12 = vpack.c.bf16 %v7436_v3, %v7435_v54  ;;  %v10331_v54 = vpack.i.bf16 %v14063_v18, %v14061_v10 }
0x121a   : > { %v3447_v8 = vmul.f32 %v10851_v4, %v13912_v37  ;;  %v6341_v27 = vmax.f32 %v5964_v32, 0.0 }
0x121b   : > { %8147 = vmatmul.bf16.gmra.mxu3 %v7607_v12 }
0x121c   : > { %v3606_v44 = vpack.c.bf16 %v3447_v8, %v3446_v49  ;;  %v6509_v1 = vpack.c.bf16 %v6341_v27, %v6340_v33 }
0x121e   : > { %3964 = vrot.lane.b32.xlu1 %v3606_v44, %s11344_s13  ;;  %7061 = vmatmul.bf16.gmra.mxu2 %v6509_v1 }
0x121f   : > { %2572 = vadd.xlane.f32.xlu2 %v2571_v24 }
0x1220   : > { %2569 = vadd.xlane.f32.xlu0 %v2568_v31 }
0x1222   : > { %v3959_v63 = vpop.permute.xlu0 %3958 }
0x1223   : > { %8897 = vmatmul.msk.bf16.gmra.mxu0 %vm1973_vm0, %v3959_v63 }
0x1224   : > { %v4880_v15 = vpop.f32.mrf.mxu0 }
0x1225   : > { %v5966_v40 = vpop.f32.mrf.mxu1  ;;  %v8133_v9 = vpop.f32.mrf.mxu3  ;;  %v4881_v2 = vadd.f32 %v11754_v51, %v4880_v15 }
0x1226   : > { %v8134_v47 = vadd.f32 %v14054_v41, %v8133_v9  ;;  %v5967_v42 = vadd.f32 %v13893_v23, %v5966_v40 }
0x1227   : > { %v5247_v45 = vmul.f32 %v13761_v29, %v4881_v2  ;;  %v14076_v29 = vunpack.c.l.bf16 %v9673_v39 }
0x1228   : > { %8530 = vst [vmem:[%s11979_s22 + $0x510] sm:$0xff] %v8134_v47  ;;  %v6342_v53 = vmax.f32 %v5967_v42, 0.0 }
0x1229   : > { %v3961_v56 = vpop.permute.xlu1 %3960  ;;  %v2561_v31 = vpop.xlane.xlu2 %2560 }
0x122c   : > { %v4882_v11 = vpop.f32.mrf.mxu0 }
0x122d   : > { %v4883_v0 = vadd.f32 %v11754_v51, %v4882_v11  ;;  %v5968_v62 = vpop.f32.mrf.mxu1  ;;  %v8135_v6 = vpop.f32.mrf.mxu3 }
0x122e   : > { %v5969_v58 = vadd.f32 %v13893_v23, %v5968_v62  ;;  %v8136_v34 = vadd.f32 %v14054_v41, %v8135_v6 }
0x122f   : > { %v5248_v16 = vmul.f32 %v13763_v59, %v4883_v0  ;;  %v14078_v59 = vunpack.c.h.bf16 %v9673_v39 }
0x1230   : > { %v6343_v25 = vmax.f32 %v5969_v58, 0.0  ;;  %8531 = vst [vmem:[%s11979_s22 + $0x518] sm:$0xff] %v8136_v34 }
0x1231   : > { %v5412_v3 = vpack.c.bf16 %v5248_v16, %v5247_v45  ;;  %v10336_v49 = vpack.i.bf16 %v14078_v59, %v14076_v29 }
0x1232   : > { %v6510_v43 = vpack.c.bf16 %v6343_v25, %v6342_v53 }
0x1233   : > { %8898 = vmatmul.msk.bf16.gmra.mxu0 %vm1973_vm0, %v3961_v56  ;;  %5980 = vmatmul.bf16.gmra.mxu1 %v5412_v3 }
0x1234   : > { %7066 = vmatmul.bf16.gmra.mxu2 %v6510_v43  ;;  %v7052_v32 = vpop.f32.mrf.mxu2  ;;  %10332 = vrot.lane.b32.xlu0 %v10331_v54, %s11344_s13  ;;  %v2937_v43 = vmax.f32 %v2561_v31, 1e-08 }
0x1235   : > { %v8138_v28 = vpop.f32.mrf.mxu3  ;;  %v7053_v12 = vadd.f32 %v13979_v19, %v7052_v32 }
0x1236   : > { %v8139_v4 = vadd.f32 %v14054_v41, %v8138_v28  ;;  %10852 = vrcp.f32 %v2937_v43 }
0x1237   : > { %v7437_v44 = vmax.f32 %v7053_v12, 0.0 }
0x1238   : > { %8532 = vst [vmem:[%s11979_s22 + $0x520] sm:$0xff] %v8139_v4 }
0x123c   : > { %v7054_v50 = vpop.f32.mrf.mxu2  ;;  %10337 = vrot.lane.b32.xlu0 %v10336_v49, %s11344_s13 }
0x123d   : > { %v7055_v33 = vadd.f32 %v13979_v19, %v7054_v50  ;;  %v8140_v8 = vpop.f32.mrf.mxu3 }
0x123e   : > { %v8141_v27 = vadd.f32 %v14054_v41, %v8140_v8 }
0x123f   : > { %v7438_v1 = vmax.f32 %v7055_v33, 0.0 }
0x1240   : > { %8533 = vst [vmem:[%s11979_s22 + $0x528] sm:$0xff] %v8141_v27 }
0x1241   : > { %v7608_v24 = vpack.c.bf16 %v7438_v1, %v7437_v44 }
0x1243   : > { %8152 = vmatmul.bf16.gmra.mxu3 %v7608_v24  ;;  %v10853_v24 = vpop.eup %10852 }
0x124c   : > { %v4885_v63 = vpop.f32.mrf.mxu0 }
0x124d   : > { %v2567_v15 = vpop.xlane.xlu2 %2566  ;;  %v4886_v40 = vadd.f32 %v11754_v51, %v4885_v63  ;;  %v2558_v0 = vpop.xlane.xlu0 %2557 }
0x124e   : > { %v2939_v32 = vmax.f32 %v2567_v15, 1e-08  ;;  %v2936_v49 = vmax.f32 %v2558_v0, 1e-08 }
0x124f   : > { %v5249_v42 = vmul.f32 %v13792_v57, %v4886_v40 }
0x1250   : > { %10854 = vrcp.f32 %v2939_v32 }
0x1254   : > { %v4887_v9 = vpop.f32.mrf.mxu0 }
0x1255   : > { %v4888_v47 = vadd.f32 %v11754_v51, %v4887_v9  ;;  %v3963_v48 = vpop.permute.xlu2 %3962 }
0x1256   : > { %8899 = vmatmul.msk.bf16.gmra.mxu0 %vm1973_vm0, %v3963_v48  ;;  %v7057_v2 = vpop.f32.mrf.mxu2  ;;  %v10855_v31 = vpop.eup %10854  ;;  %v3449_v48 = vmul.f32 %v10853_v24, %v13925_v46 }
0x1257   : > { %v5250_v11 = vmul.f32 %v13794_v22, %v4888_v47  ;;  %v7058_v6 = vadd.f32 %v13979_v19, %v7057_v2  ;;  %v2564_v22 = vpop.xlane.xlu1 %2563  ;;  %v3451_v9 = vmul.f32 %v10855_v31, %v13950_v13 }
0x1258   : > { %v2938_v4 = vmax.f32 %v2564_v22, 1e-08 }
0x1259   : > { %v5413_v62 = vpack.c.bf16 %v5250_v11, %v5249_v42  ;;  %v7439_v16 = vmax.f32 %v7058_v6, 0.0  ;;  %v9674_v6 = vld [vmem:[%s11536_s17 + $0x340] sm:$0xff]  }
0x125a   : > { %10856 = vrcp.f32 %v2938_v4 }
0x125b   : > { %5985 = vmatmul.bf16.gmra.mxu1 %v5413_v62  ;;  %10858 = vrcp.f32 %v2936_v49 }
0x125e   : > { %v7059_v58 = vpop.f32.mrf.mxu2 }
0x125f   : > { %v7060_v34 = vadd.f32 %v13979_v19, %v7059_v58  ;;  %v14110_v58 = vunpack.c.l.bf16 %v9674_v6 }
0x1260   : > { %v10323_v45 = vpop.permute.xlu0 %10322  ;;  %v10857_v15 = vpop.eup %10856 }
0x1261   : > { %v7440_v53 = vmax.f32 %v7060_v34, 0.0  ;;  %v10325_v25 = vunpack.i.h.bf16 %v10323_v45  ;;  %v10324_v56 = vunpack.i.l.bf16 %v10323_v45  ;;  %v10859_v40 = vpop.eup %10858  ;;  %v3450_v47 = vmul.f32 %v10857_v15, %v13948_v7 }
0x1262   : > { %v3448_v2 = vmul.f32 %v10859_v40, %v13923_v36  ;;  %v14112_v34 = vunpack.c.h.bf16 %v9674_v6 }
0x1263   : > { %v2577_v54 = vsel %vm1973_vm0, %v10325_v25, 0.0  ;;  %v2574_v3 = vsel %vm1973_vm0, %v10324_v56, 0.0  ;;  %v7609_v57 = vpack.c.bf16 %v7440_v53, %v7439_v16  ;;  %v3608_v0 = vpack.c.bf16 %v3451_v9, %v3450_v47 }
0x1264   : > { %v5971_v39 = vpop.f32.mrf.mxu1  ;;  %2578 = vadd.xlane.f32.xlu2 %v2577_v54  ;;  %2575 = vadd.xlane.f32.xlu1 %v2574_v3  ;;  %v3607_v62 = vpack.c.bf16 %v3449_v48, %v3448_v2  ;;  %v10341_v53 = vpack.i.bf16 %v14112_v34, %v14110_v58 }
0x1265   : > { %8157 = vmatmul.bf16.gmra.mxu3 %v7609_v57  ;;  %v5972_v50 = vadd.f32 %v13893_v23, %v5971_v39 }
0x1267   : > { %v6344_v44 = vmax.f32 %v5972_v50, 0.0 }
0x1268   : > { %v10328_v28 = vpop.permute.xlu0 %10327 }
0x1269   : > { %v10329_v12 = vunpack.i.l.bf16 %v10328_v28 }
0x126b   : > { %v2580_v33 = vsel %vm1973_vm0, %v10329_v12, 0.0  ;;  %v10330_v12 = vunpack.i.h.bf16 %v10328_v28 }
0x126c   : > { %v5973_v8 = vpop.f32.mrf.mxu1  ;;  %2581 = vadd.xlane.f32.xlu0 %v2580_v33 }
0x126d   : > { %v5974_v27 = vadd.f32 %v13893_v23, %v5973_v8  ;;  %v2583_v8 = vsel %vm1973_vm0, %v10330_v12, 0.0 }
0x126f   : > { %v6345_v1 = vmax.f32 %v5974_v27, 0.0 }
0x1271   : > { %v6511_v63 = vpack.c.bf16 %v6345_v1, %v6344_v44 }
0x1273   : > { %7071 = vmatmul.bf16.gmra.mxu2 %v6511_v63 }
0x1276   : > { %v8143_v42 = vpop.f32.mrf.mxu3 }
0x1277   : > { %v8144_v11 = vadd.f32 %v14054_v41, %v8143_v42 }
0x1279   : > { %8534 = vst [vmem:[%s11979_s22 + $0x530] sm:$0xff] %v8144_v11 }
0x127c   : > { %3966 = vrot.lane.b32.xlu2 %v3607_v62, %s11344_s13 }
0x127d   : > { %3968 = vrot.lane.b32.xlu1 %v3608_v0, %s11344_s13 }
0x127e   : > { %v8145_v45 = vpop.f32.mrf.mxu3 }
0x127f   : > { %v8146_v16 = vadd.f32 %v14054_v41, %v8145_v45 }
0x1281   : > { %8535 = vst [vmem:[%s11979_s22 + $0x538] sm:$0xff] %v8146_v16 }
0x1285   : > { %10342 = vrot.lane.b32.xlu1 %v10341_v53, %s11344_s13 }
0x1288   : > { %v5976_v25 = vpop.f32.mrf.mxu1 }
0x1289   : > { %v5977_v56 = vadd.f32 %v13893_v23, %v5976_v25 }
0x128b   : > { %v6346_v39 = vmax.f32 %v5977_v56, 0.0 }
0x1290   : > { %v5978_v54 = vpop.f32.mrf.mxu1  ;;  %v3965_v3 = vpop.permute.xlu1 %3964 }
0x1291   : > { %v5979_v57 = vadd.f32 %v13893_v23, %v5978_v54  ;;  %8900 = vmatmul.msk.bf16.gmra.mxu0 %vm1973_vm0, %v3965_v3  ;;  %v9675_v54 = vld [vmem:[%s11536_s17 + $0x348] sm:$0xff]  }
0x1292   : > { %v2573_v44 = vpop.xlane.xlu2 %2572 }
0x1293   : > { %v6347_v22 = vmax.f32 %v5979_v57, 0.0  ;;  %v2570_v32 = vpop.xlane.xlu0 %2569  ;;  %v2941_v48 = vmax.f32 %v2573_v44, 1e-08 }
0x1294   : > { %v2940_v42 = vmax.f32 %v2570_v32, 1e-08 }
0x1295   : > { %v6512_v43 = vpack.c.bf16 %v6347_v22, %v6346_v39  ;;  %10860 = vrcp.f32 %v2941_v48  ;;  %v14137_v39 = vunpack.c.l.bf16 %v9675_v54  ;;  %v14141_v22 = vld [vmem:[#allocation8] ss:$0 sm:$0xff] }
0x1296   : > { %10862 = vrcp.f32 %v2940_v42 }
0x1297   : > { %7076 = vmatmul.bf16.gmra.mxu2 %v6512_v43 }
0x129b   : > { %v10861_v3 = vpop.eup %10860 }
0x129c   : > { %v10863_v57 = vpop.eup %10862 }
0x129e   : > { %v8148_v4 = vpop.f32.mrf.mxu3 }
0x129f   : > { %v8149_v49 = vadd.f32 %v14054_v41, %v8148_v4  ;;  %v3452_v4 = vmul.f32 %v10863_v57, %v13968_v26 }
0x12a0   : > { %v4890_v50 = vpop.f32.mrf.mxu0 }
0x12a1   : > { %8536 = vst [vmem:[%s11979_s22 + $0x540] sm:$0xff] %v8149_v49  ;;  %v7062_v33 = vpop.f32.mrf.mxu2  ;;  %v4891_v1 = vadd.f32 %v11754_v51, %v4890_v50  ;;  %v3453_v49 = vmul.f32 %v10861_v3, %v13970_v60 }
0x12a2   : > { %v7063_v63 = vadd.f32 %v13979_v19, %v7062_v33 }
0x12a3   : > { %v5251_v11 = vmul.f32 %v13802_v20, %v4891_v1 }
0x12a4   : > { %v7441_v62 = vmax.f32 %v7063_v63, 0.0 }
0x12a5   : > { %2584 = vadd.xlane.f32.xlu2 %v2583_v8 }
0x12a6   : > { %v8150_v27 = vpop.f32.mrf.mxu3  ;;  %v10333_v23 = vpop.permute.xlu0 %10332 }
0x12a7   : > { %v8151_v24 = vadd.f32 %v14054_v41, %v8150_v27  ;;  %v10334_v31 = vunpack.i.l.bf16 %v10333_v23  ;;  %v10335_v15 = vunpack.i.h.bf16 %v10333_v23 }
0x12a8   : > { %v4892_v40 = vpop.f32.mrf.mxu0 }
0x12a9   : > { %8537 = vst [vmem:[%s11979_s22 + $0x548] sm:$0xff] %v8151_v24  ;;  %v4893_v28 = vadd.f32 %v11754_v51, %v4892_v40  ;;  %v7064_v9 = vpop.f32.mrf.mxu2  ;;  %v2586_v47 = vsel %vm1973_vm0, %v10334_v31, 0.0  ;;  %v2589_v45 = vsel %vm1973_vm0, %v10335_v15, 0.0  ;;  %v3609_v31 = vpack.c.bf16 %v3453_v49, %v3452_v4 }
0x12aa   : > { %v7065_v2 = vadd.f32 %v13979_v19, %v7064_v9  ;;  %2587 = vadd.xlane.f32.xlu0 %v2586_v47 }
0x12ab   : > { %v5252_v0 = vmul.f32 %v13804_v52, %v4893_v28  ;;  %v14139_v52 = vunpack.c.h.bf16 %v9675_v54 }
0x12ac   : > { %v7442_v6 = vmax.f32 %v7065_v2, 0.0 }
0x12ad   : > { %v5414_v16 = vpack.c.bf16 %v5252_v0, %v5251_v11  ;;  %v10346_v23 = vpack.i.bf16 %v14139_v52, %v14137_v39 }
0x12ae   : > { %v7610_v53 = vpack.c.bf16 %v7442_v6, %v7441_v62 }
0x12af   : > { %5990 = vmatmul.bf16.gmra.mxu1 %v5414_v16  ;;  %2590 = vadd.xlane.f32.xlu1 %v2589_v45 }
0x12b0   : > { %v4895_v25 = vpop.f32.mrf.mxu0  ;;  %v5981_v56 = vpop.f32.mrf.mxu1  ;;  %8162 = vmatmul.bf16.gmra.mxu3 %v7610_v53 }
0x12b1   : > { %v4896_v20 = vadd.f32 %v11754_v51, %v4895_v25  ;;  %v5982_v43 = vadd.f32 %v14141_v22, %v5981_v56 }
0x12b3   : > { %v5253_v33 = vmul.f32 %v13845_v5, %v4896_v20  ;;  %v6348_v44 = vmax.f32 %v5982_v43, 0.0  ;;  %v10338_v20 = vpop.permute.xlu0 %10337 }
0x12b7   : > { %v7067_v32 = vpop.f32.mrf.mxu2 }
0x12b8   : > { %v4897_v12 = vpop.f32.mrf.mxu0  ;;  %v5983_v50 = vpop.f32.mrf.mxu1  ;;  %v7068_v5 = vadd.f32 %v13979_v19, %v7067_v32  ;;  %v10340_v32 = vunpack.i.h.bf16 %v10338_v20 }
0x12b9   : > { %v4898_v8 = vadd.f32 %v11754_v51, %v4897_v12  ;;  %v5984_v27 = vadd.f32 %v14141_v22, %v5983_v50 }
0x12ba   : > { %v7443_v9 = vmax.f32 %v7068_v5, 0.0 }
0x12bb   : > { %v5254_v1 = vmul.f32 %v13847_v21, %v4898_v8  ;;  %v6349_v24 = vmax.f32 %v5984_v27, 0.0  ;;  %v10339_v27 = vunpack.i.l.bf16 %v10338_v20 }
0x12bd   : > { %v5415_v63 = vpack.c.bf16 %v5254_v1, %v5253_v33  ;;  %v6513_v15 = vpack.c.bf16 %v6349_v24, %v6348_v44  ;;  %10347 = vrot.lane.b32.xlu2 %v10346_v23, %s11344_s13  ;;  %v2595_v1 = vsel %vm1973_vm0, %v10340_v32, 0.0 }
0x12be   : > { %3970 = vrot.lane.b32.xlu0 %v3609_v31, %s11344_s13 }
0x12bf   : > { %v7069_v40 = vpop.f32.mrf.mxu2  ;;  %5995 = vmatmul.bf16.gmra.mxu1 %v5415_v63  ;;  %7081 = vmatmul.bf16.gmra.mxu2 %v6513_v15  ;;  %v2592_v63 = vsel %vm1973_vm0, %v10339_v27, 0.0 }
0x12c0   : > { %v7070_v28 = vadd.f32 %v13979_v19, %v7069_v40 }
0x12c2   : > { %v7444_v47 = vmax.f32 %v7070_v28, 0.0 }
0x12c4   : > { %v7611_v21 = vpack.c.bf16 %v7444_v47, %v7443_v9  ;;  %v9676_v47 = vld [vmem:[%s11536_s17 + $0x350] sm:$0xff]  }
0x12c6   : > { %8167 = vmatmul.bf16.gmra.mxu3 %v7611_v21  ;;  %v8153_v48 = vpop.f32.mrf.mxu3  ;;  %v14178_v21 = vunpack.c.l.bf16 %v9676_v47 }
0x12c7   : > { %v8154_v2 = vadd.f32 %v14054_v41, %v8153_v48  ;;  %v14180_v48 = vunpack.c.h.bf16 %v9676_v47 }
0x12c9   : > { %8538 = vst [vmem:[%s11979_s22 + $0x550] sm:$0xff] %v8154_v2 }
0x12ce   : > { %v8155_v42 = vpop.f32.mrf.mxu3 }
0x12cf   : > { %v8156_v11 = vadd.f32 %v14054_v41, %v8155_v42 }
0x12d1   : > { %8539 = vst [vmem:[%s11979_s22 + $0x558] sm:$0xff] %v8156_v11  ;;  %v10351_v11 = vpack.i.bf16 %v14180_v48, %v14178_v21 }
0x12d3   : > { %v4900_v0 = vpop.f32.mrf.mxu0 }
0x12d4   : > { %v4901_v25 = vadd.f32 %v11754_v51, %v4900_v0 }
0x12d6   : > { %v5255_v3 = vmul.f32 %v13868_v17, %v4901_v25 }
0x12d7   : > { %v2579_v62 = vpop.xlane.xlu2 %2578  ;;  %v2576_v6 = vpop.xlane.xlu1 %2575 }
0x12d8   : > { %v5986_v45 = vpop.f32.mrf.mxu1  ;;  %v2943_v16 = vmax.f32 %v2579_v62, 1e-08  ;;  %v2942_v53 = vmax.f32 %v2576_v6, 1e-08  ;;  %v9677_v62 = vld [vmem:[%s11536_s17 + $0x358] sm:$0xff]  }
0x12d9   : > { %v5987_v43 = vadd.f32 %v14141_v22, %v5986_v45  ;;  %v14187_v45 = vunpack.c.l.bf16 %v9677_v62 }
0x12da   : > { %10864 = vrcp.f32 %v2943_v16  ;;  %v14189_v16 = vunpack.c.h.bf16 %v9677_v62 }
0x12db   : > { %10866 = vrcp.f32 %v2942_v53  ;;  %v4902_v56 = vpop.f32.mrf.mxu0 }
0x12dc   : > { %v4903_v54 = vadd.f32 %v11754_v51, %v4902_v56 }
0x12de   : > { %v5256_v57 = vmul.f32 %v13870_v61, %v4903_v54  ;;  %v6350_v61 = vmax.f32 %v5987_v43, 0.0  ;;  %v10356_v54 = vpack.i.bf16 %v14189_v16, %v14187_v45 }
0x12df   : > { %v3967_v4 = vpop.permute.xlu2 %3966 }
0x12e0   : > { %v10865_v49 = vpop.eup %10864  ;;  %v5988_v12 = vpop.f32.mrf.mxu1  ;;  %8901 = vmatmul.msk.bf16.gmra.mxu0 %vm1973_vm0, %v3967_v4  ;;  %v5416_v50 = vpack.c.bf16 %v5256_v57, %v5255_v3 }
0x12e1   : > { %v10867_v33 = vpop.eup %10866  ;;  %v3455_v8 = vmul.f32 %v10865_v49, %v14022_v30  ;;  %v5989_v23 = vadd.f32 %v14141_v22, %v5988_v12  ;;  %v2582_v49 = vpop.xlane.xlu0 %2581 }
0x12e2   : > { %v3454_v17 = vmul.f32 %v10867_v33, %v14020_v38  ;;  %6000 = vmatmul.bf16.gmra.mxu1 %v5416_v50  ;;  %v2944_v12 = vmax.f32 %v2582_v49, 1e-08 }
0x12e3   : > { %v6351_v44 = vmax.f32 %v5989_v23, 0.0 }
0x12e4   : > { %v3610_v24 = vpack.c.bf16 %v3455_v8, %v3454_v17  ;;  %10868 = vrcp.f32 %v2944_v12 }
0x12e5   : > { %v6514_v31 = vpack.c.bf16 %v6351_v44, %v6350_v61 }
0x12e6   : > { %3972 = vrot.lane.b32.xlu1 %v3610_v24, %s11344_s13  ;;  %2596 = vadd.xlane.f32.xlu2 %v2595_v1 }
0x12e7   : > { %7086 = vmatmul.bf16.gmra.mxu2 %v6514_v31 }
0x12e8   : > { %v8158_v15 = vpop.f32.mrf.mxu3  ;;  %2593 = vadd.xlane.f32.xlu0 %v2592_v63 }
0x12e9   : > { %v8159_v5 = vadd.f32 %v14054_v41, %v8158_v15 }
0x12ea   : > { %v10869_v63 = vpop.eup %10868 }
0x12eb   : > { %8540 = vst [vmem:[%s11979_s22 + $0x560] sm:$0xff] %v8159_v5 }
0x12ef   : > { %v3969_v40 = vpop.permute.xlu1 %3968 }
0x12f0   : > { %8902 = vmatmul.msk.bf16.gmra.mxu0 %vm1973_vm0, %v3969_v40  ;;  %v8160_v28 = vpop.f32.mrf.mxu3  ;;  %v3456_v40 = vmul.f32 %v10869_v63, %v14030_v14 }
0x12f1   : > { %v8161_v9 = vadd.f32 %v14054_v41, %v8160_v28 }
0x12f3   : > { %8541 = vst [vmem:[%s11979_s22 + $0x568] sm:$0xff] %v8161_v9 }
0x12f6   : > { %v7072_v2 = vpop.f32.mrf.mxu2 }
0x12f7   : > { %v10343_v42 = vpop.permute.xlu1 %10342  ;;  %v7073_v53 = vadd.f32 %v13979_v19, %v7072_v2 }
0x12f8   : > { %v10345_v0 = vunpack.i.h.bf16 %v10343_v42  ;;  %v10344_v43 = vunpack.i.l.bf16 %v10343_v42 }
0x12f9   : > { %v7445_v3 = vmax.f32 %v7073_v53, 0.0 }
0x12fa   : > { %v2601_v6 = vsel %vm1973_vm0, %v10345_v0, 0.0  ;;  %v2598_v32 = vsel %vm1973_vm0, %v10344_v43, 0.0 }
0x12fb   : > { %2602 = vadd.xlane.f32.xlu2 %v2601_v6 }
0x12fc   : > { %10352 = vrot.lane.b32.xlu0 %v10351_v11, %s11344_s13 }
0x12fe   : > { %v7074_v25 = vpop.f32.mrf.mxu2 }
0x12ff   : > { %v7075_v56 = vadd.f32 %v13979_v19, %v7074_v25 }
0x1301   : > { %v7446_v57 = vmax.f32 %v7075_v56, 0.0 }
0x1303   : > { %v7612_v20 = vpack.c.bf16 %v7446_v57, %v7445_v3 }
0x1304   : > { %10357 = vrot.lane.b32.xlu0 %v10356_v54, %s11344_s13 }
0x1305   : > { %8172 = vmatmul.bf16.gmra.mxu3 %v7612_v20 }
0x130e   : > { %v4905_v4 = vpop.f32.mrf.mxu0 }
0x130f   : > { %v4906_v50 = vadd.f32 %v11754_v51, %v4905_v4 }
0x1310   : > { %2599 = vadd.xlane.f32.xlu1 %v2598_v32 }
0x1311   : > { %v5257_v23 = vmul.f32 %v13910_v35, %v4906_v50 }
0x1316   : > { %v4907_v33 = vpop.f32.mrf.mxu0 }
0x1317   : > { %v4908_v8 = vadd.f32 %v11754_v51, %v4907_v33 }
0x1318   : > { %v2585_v27 = vpop.xlane.xlu2 %2584 }
0x1319   : > { %v5258_v17 = vmul.f32 %v13912_v37, %v4908_v8  ;;  %v2945_v61 = vmax.f32 %v2585_v27, 1e-08  ;;  %v9678_v8 = vld [vmem:[%s11536_s17 + $0x360] sm:$0xff]  }
0x131a   : > { %v7077_v44 = vpop.f32.mrf.mxu2 }
0x131b   : > { %10870 = vrcp.f32 %v2945_v61  ;;  %v5417_v1 = vpack.c.bf16 %v5258_v17, %v5257_v23  ;;  %v7078_v5 = vadd.f32 %v13979_v19, %v7077_v44  ;;  %v14216_v23 = vunpack.c.l.bf16 %v9678_v8 }
0x131c   : > { %v14218_v17 = vunpack.c.h.bf16 %v9678_v8 }
0x131d   : > { %6005 = vmatmul.bf16.gmra.mxu1 %v5417_v1  ;;  %v2588_v24 = vpop.xlane.xlu0 %2587  ;;  %v7447_v11 = vmax.f32 %v7078_v5, 0.0 }
0x131e   : > { %v2946_v31 = vmax.f32 %v2588_v24, 1e-08  ;;  %v10361_v24 = vpack.i.bf16 %v14218_v17, %v14216_v23 }
0x1320   : > { %10872 = vrcp.f32 %v2946_v31  ;;  %v10348_v42 = vpop.permute.xlu2 %10347  ;;  %v9679_v31 = vld [vmem:[%s11536_s17 + $0x368] sm:$0xff]  }
0x1321   : > { %v10871_v15 = vpop.eup %10870  ;;  %v10349_v53 = vunpack.i.l.bf16 %v10348_v42  ;;  %v14228_v5 = vunpack.c.h.bf16 %v9679_v31 }
0x1322   : > { %v3457_v28 = vmul.f32 %v10871_v15, %v14032_v55  ;;  %v7079_v9 = vpop.f32.mrf.mxu2  ;;  %v2591_v35 = vpop.xlane.xlu1 %2590  ;;  %v14226_v15 = vunpack.c.l.bf16 %v9679_v31 }
0x1323   : > { %v7080_v37 = vadd.f32 %v13979_v19, %v7079_v9  ;;  %v2947_v47 = vmax.f32 %v2591_v35, 1e-08  ;;  %v2604_v54 = vsel %vm1973_vm0, %v10349_v53, 0.0 }
0x1324   : > { %v3611_v2 = vpack.c.bf16 %v3457_v28, %v3456_v40  ;;  %v10366_v35 = vpack.i.bf16 %v14228_v5, %v14226_v15 }
0x1325   : > { %v7448_v0 = vmax.f32 %v7080_v37, 0.0  ;;  %10874 = vrcp.f32 %v2947_v47 }
0x1326   : > { %3974 = vrot.lane.b32.xlu2 %v3611_v2, %s11344_s13  ;;  %v10873_v62 = vpop.eup %10872  ;;  %v14234_v2 = vld [vmem:[#allocation11] ss:$0 sm:$0xff] }
0x1327   : > { %v7613_v6 = vpack.c.bf16 %v7448_v0, %v7447_v11  ;;  %v3458_v25 = vmul.f32 %v10873_v62, %v14061_v10 }
0x1329   : > { %8177 = vmatmul.bf16.gmra.mxu3 %v7613_v6  ;;  %v10350_v6 = vunpack.i.h.bf16 %v10348_v42 }
0x132b   : > { %v10875_v56 = vpop.eup %10874 }
0x132c   : > { %v3459_v19 = vmul.f32 %v10875_v56, %v14063_v18  ;;  %v5991_v3 = vpop.f32.mrf.mxu1 }
0x132d   : > { %v5992_v43 = vadd.f32 %v14141_v22, %v5991_v3  ;;  %v2607_v3 = vsel %vm1973_vm0, %v10350_v6, 0.0 }
0x132e   : > { %v3612_v57 = vpack.c.bf16 %v3459_v19, %v3458_v25  ;;  %2605 = vadd.xlane.f32.xlu0 %v2604_v54 }
0x132f   : > { %v6352_v50 = vmax.f32 %v5992_v43, 0.0 }
0x1330   : > { %v3971_v20 = vpop.permute.xlu0 %3970  ;;  %3976 = vrot.lane.b32.xlu1 %v3612_v57, %s11344_s13 }
0x1331   : > { %8903 = vmatmul.msk.bf16.gmra.mxu0 %vm1973_vm0, %v3971_v20 }
0x1333   : > { %v8163_v32 = vpop.f32.mrf.mxu3 }
0x1334   : > { %v8164_v4 = vadd.f32 %v14054_v41, %v8163_v32  ;;  %v5993_v49 = vpop.f32.mrf.mxu1 }
0x1335   : > { %v5994_v12 = vadd.f32 %v14141_v22, %v5993_v49 }
0x1336   : > { %8542 = vst [vmem:[%s11979_s22 + $0x570] sm:$0xff] %v8164_v4 }
0x1337   : > { %v6353_v33 = vmax.f32 %v5994_v12, 0.0 }
0x1339   : > { %v6515_v27 = vpack.c.bf16 %v6353_v33, %v6352_v50 }
0x133b   : > { %7091 = vmatmul.bf16.gmra.mxu2 %v6515_v27  ;;  %v8165_v61 = vpop.f32.mrf.mxu3 }
0x133c   : > { %v8166_v44 = vadd.f32 %v14054_v41, %v8165_v61  ;;  %v5996_v1 = vpop.f32.mrf.mxu1 }
0x133d   : > { %v5997_v40 = vadd.f32 %v14141_v22, %v5996_v1 }
0x133e   : > { %8543 = vst [vmem:[%s11979_s22 + $0x578] sm:$0xff] %v8166_v44 }
0x133f   : > { %v6354_v37 = vmax.f32 %v5997_v40, 0.0 }
0x1342   : > { %v7082_v63 = vpop.f32.mrf.mxu2  ;;  %10362 = vrot.lane.b32.xlu0 %v10361_v24, %s11344_s13 }
0x1343   : > { %v7083_v11 = vadd.f32 %v14234_v2, %v7082_v63 }
0x1344   : > { %v5998_v28 = vpop.f32.mrf.mxu1 }
0x1345   : > { %v5999_v9 = vadd.f32 %v14141_v22, %v5998_v28  ;;  %v7449_v54 = vmax.f32 %v7083_v11, 0.0 }
0x1347   : > { %v6355_v47 = vmax.f32 %v5999_v9, 0.0 }
0x1349   : > { %v8168_v0 = vpop.f32.mrf.mxu3  ;;  %v6516_v62 = vpack.c.bf16 %v6355_v47, %v6354_v37 }
0x134a   : > { %v8169_v53 = vadd.f32 %v14054_v41, %v8168_v0  ;;  %v7084_v25 = vpop.f32.mrf.mxu2  ;;  %10367 = vrot.lane.b32.xlu0 %v10366_v35, %s11344_s13 }
0x134b   : > { %v7085_v56 = vadd.f32 %v14234_v2, %v7084_v25  ;;  %7096 = vmatmul.bf16.gmra.mxu2 %v6516_v62 }
0x134c   : > { %8544 = vst [vmem:[%s11979_s22 + $0x580] sm:$0xff] %v8169_v53 }
0x134d   : > { %v7450_v19 = vmax.f32 %v7085_v56, 0.0 }
0x134f   : > { %2608 = vadd.xlane.f32.xlu2 %v2607_v3  ;;  %v7614_v57 = vpack.c.bf16 %v7450_v19, %v7449_v54 }
0x1351   : > { %v8170_v20 = vpop.f32.mrf.mxu3  ;;  %8182 = vmatmul.bf16.gmra.mxu3 %v7614_v57 }
0x1352   : > { %v8171_v43 = vadd.f32 %v14054_v41, %v8170_v20 }
0x1354   : > { %8545 = vst [vmem:[%s11979_s22 + $0x588] sm:$0xff] %v8171_v43 }
0x1358   : > { %v3973_v42 = vpop.permute.xlu1 %3972 }
0x1359   : > { %8904 = vmatmul.msk.bf16.gmra.mxu0 %vm1973_vm0, %v3973_v42  ;;  %v2597_v35 = vpop.xlane.xlu2 %2596 }
0x135a   : > { %v2949_v19 = vmax.f32 %v2597_v35, 1e-08 }
0x135b   : > { %v2594_v33 = vpop.xlane.xlu0 %2593 }
0x135c   : > { %v2948_v43 = vmax.f32 %v2594_v33, 1e-08  ;;  %10876 = vrcp.f32 %v2949_v19 }
0x135d   : > { %v4910_v32 = vpop.f32.mrf.mxu0 }
0x135e   : > { %v4911_v49 = vadd.f32 %v11754_v51, %v4910_v32  ;;  %10878 = vrcp.f32 %v2948_v43 }
0x135f   : > { %v6001_v4 = vpop.f32.mrf.mxu1 }
0x1360   : > { %v6002_v50 = vadd.f32 %v14141_v22, %v6001_v4  ;;  %v5259_v61 = vmul.f32 %v13923_v36, %v4911_v49 }
0x1362   : > { %v6356_v24 = vmax.f32 %v6002_v50, 0.0 }
0x1365   : > { %v4912_v12 = vpop.f32.mrf.mxu0 }
0x1366   : > { %v4913_v8 = vadd.f32 %v11754_v51, %v4912_v12 }
0x1367   : > { %v6003_v27 = vpop.f32.mrf.mxu1 }
0x1368   : > { %v5260_v44 = vmul.f32 %v13925_v46, %v4913_v8  ;;  %v6004_v1 = vadd.f32 %v14141_v22, %v6003_v27  ;;  %v10877_v27 = vpop.eup %10876 }
0x1369   : > { %v3461_v33 = vmul.f32 %v10877_v27, %v14078_v59 }
0x136a   : > { %v6357_v31 = vmax.f32 %v6004_v1, 0.0  ;;  %v7087_v63 = vpop.f32.mrf.mxu2  ;;  %v5418_v40 = vpack.c.bf16 %v5260_v44, %v5259_v61  ;;  %v10879_v44 = vpop.eup %10878 }
0x136b   : > { %v7088_v0 = vadd.f32 %v14234_v2, %v7087_v63 }
0x136c   : > { %6010 = vmatmul.bf16.gmra.mxu1 %v5418_v40  ;;  %v6517_v28 = vpack.c.bf16 %v6357_v31, %v6356_v24 }
0x136d   : > { %v4915_v9 = vpop.f32.mrf.mxu0  ;;  %v7451_v25 = vmax.f32 %v7088_v0, 0.0 }
0x136e   : > { %7101 = vmatmul.bf16.gmra.mxu2 %v6517_v28  ;;  %v10353_v37 = vpop.permute.xlu0 %10352  ;;  %v4916_v53 = vadd.f32 %v11754_v51, %v4915_v9  ;;  %v2603_v57 = vpop.xlane.xlu2 %2602 }
0x136f   : > { %v10355_v47 = vunpack.i.h.bf16 %v10353_v37  ;;  %v10354_v11 = vunpack.i.l.bf16 %v10353_v37  ;;  %v2951_v8 = vmax.f32 %v2603_v57, 1e-08  ;;  %v9680_v37 = vld [vmem:[%s11536_s17 + $0x370] sm:$0xff]  }
0x1370   : > { %v5261_v4 = vmul.f32 %v13948_v7, %v4916_v53 }
0x1371   : > { %v2613_v36 = vsel %vm1973_vm0, %v10355_v47, 0.0  ;;  %v2610_v46 = vsel %vm1973_vm0, %v10354_v11, 0.0  ;;  %10880 = vrcp.f32 %v2951_v8 }
0x1372   : > { %v7089_v62 = vpop.f32.mrf.mxu2  ;;  %2614 = vadd.xlane.f32.xlu2 %v2613_v36  ;;  %2611 = vadd.xlane.f32.xlu1 %v2610_v46  ;;  %v14271_v36 = vunpack.c.l.bf16 %v9680_v37  ;;  %v14273_v46 = vunpack.c.h.bf16 %v9680_v37 }
0x1373   : > { %v7090_v6 = vadd.f32 %v14234_v2, %v7089_v62 }
0x1374   : > { %v10371_v62 = vpack.i.bf16 %v14273_v46, %v14271_v36 }
0x1375   : > { %v7452_v56 = vmax.f32 %v7090_v6, 0.0  ;;  %v4917_v54 = vpop.f32.mrf.mxu0 }
0x1376   : > { %v4918_v3 = vadd.f32 %v11754_v51, %v4917_v54  ;;  %v10358_v20 = vpop.permute.xlu0 %10357 }
0x1377   : > { %v7615_v42 = vpack.c.bf16 %v7452_v56, %v7451_v25  ;;  %v10359_v32 = vunpack.i.l.bf16 %v10358_v20  ;;  %v10881_v24 = vpop.eup %10880 }
0x1378   : > { %v5262_v49 = vmul.f32 %v13950_v13, %v4918_v3  ;;  %v3460_v13 = vmul.f32 %v10879_v44, %v14076_v29  ;;  %v3463_v28 = vmul.f32 %v10881_v24, %v14112_v34 }
0x1379   : > { %8187 = vmatmul.bf16.gmra.mxu3 %v7615_v42  ;;  %v2616_v12 = vsel %vm1973_vm0, %v10359_v32, 0.0 }
0x137a   : > { %v5419_v50 = vpack.c.bf16 %v5262_v49, %v5261_v4  ;;  %2617 = vadd.xlane.f32.xlu0 %v2616_v12  ;;  %v3613_v63 = vpack.c.bf16 %v3461_v33, %v3460_v13  ;;  %v10360_v4 = vunpack.i.h.bf16 %v10358_v20 }
0x137c   : > { %6015 = vmatmul.bf16.gmra.mxu1 %v5419_v50  ;;  %v2619_v12 = vsel %vm1973_vm0, %v10360_v4, 0.0 }
0x1380   : > { %v3975_v61 = vpop.permute.xlu2 %3974 }
0x1381   : > { %8905 = vmatmul.msk.bf16.gmra.mxu0 %vm1973_vm0, %v3975_v61 }
0x1383   : > { %v2600_v7 = vpop.xlane.xlu1 %2599 }
0x1384   : > { %v2950_v1 = vmax.f32 %v2600_v7, 1e-08 }
0x1386   : > { %10882 = vrcp.f32 %v2950_v1 }
0x1388   : > { %v8173_v31 = vpop.f32.mrf.mxu3 }
0x1389   : > { %v8174_v40 = vadd.f32 %v14054_v41, %v8173_v31 }
0x138a   : > { %3978 = vrot.lane.b32.xlu2 %v3613_v63, %s11344_s13 }
0x138b   : > { %8546 = vst [vmem:[%s11979_s22 + $0x590] sm:$0xff] %v8174_v40 }
0x138c   : > { %v10883_v9 = vpop.eup %10882 }
0x138d   : > { %v3462_v35 = vmul.f32 %v10883_v9, %v14110_v58 }
0x138f   : > { %v3614_v47 = vpack.c.bf16 %v3463_v28, %v3462_v35  ;;  %v9681_v28 = vld [vmem:[%s11536_s17 + $0x378] sm:$0xff]  }
0x1390   : > { %v8175_v11 = vpop.f32.mrf.mxu3  ;;  %v14294_v37 = vunpack.c.l.bf16 %v9681_v28 }
0x1391   : > { %v8176_v0 = vadd.f32 %v14054_v41, %v8175_v11  ;;  %3980 = vrot.lane.b32.xlu1 %v3614_v47, %s11344_s13  ;;  %v14296_v47 = vunpack.c.h.bf16 %v9681_v28 }
0x1393   : > { %8547 = vst [vmem:[%s11979_s22 + $0x598] sm:$0xff] %v8176_v0  ;;  %v10376_v0 = vpack.i.bf16 %v14296_v47, %v14294_v37 }
0x1399   : > { %10372 = vrot.lane.b32.xlu1 %v10371_v62, %s11344_s13 }
0x139a   : > { %v6006_v6 = vpop.f32.mrf.mxu1 }
0x139b   : > { %v6007_v53 = vadd.f32 %v14141_v22, %v6006_v6 }
0x139d   : > { %v6358_v19 = vmax.f32 %v6007_v53, 0.0 }
0x13a1   : > { %v2606_v43 = vpop.xlane.xlu0 %2605 }
0x13a2   : > { %v6008_v25 = vpop.f32.mrf.mxu1  ;;  %v3977_v56 = vpop.permute.xlu1 %3976  ;;  %v2952_v40 = vmax.f32 %v2606_v43, 1e-08 }
0x13a3   : > { %v6009_v54 = vadd.f32 %v14141_v22, %v6008_v25  ;;  %8906 = vmatmul.msk.bf16.gmra.mxu0 %vm1973_vm0, %v3977_v56 }
0x13a4   : > { %10884 = vrcp.f32 %v2952_v40 }
0x13a5   : > { %v6359_v3 = vmax.f32 %v6009_v54, 0.0 }
0x13a7   : > { %v6518_v57 = vpack.c.bf16 %v6359_v3, %v6358_v19 }
0x13a9   : > { %7106 = vmatmul.bf16.gmra.mxu2 %v6518_v57 }
0x13aa   : > { %v10885_v62 = vpop.eup %10884 }
0x13ab   : > { %v3464_v54 = vmul.f32 %v10885_v62, %v14137_v39 }
0x13ac   : > { %v8178_v42 = vpop.f32.mrf.mxu3 }
0x13ad   : > { %v8179_v32 = vadd.f32 %v14054_v41, %v8178_v42 }
0x13ae   : > { %v4920_v49 = vpop.f32.mrf.mxu0 }
0x13af   : > { %8548 = vst [vmem:[%s11979_s22 + $0x5a0] sm:$0xff] %v8179_v32  ;;  %v4921_v27 = vadd.f32 %v11754_v51, %v4920_v49  ;;  %v14307_v32 = vld [vmem:[#allocation14] ss:$0 sm:$0xff] }
0x13b1   : > { %v5263_v20 = vmul.f32 %v13968_v26, %v4921_v27 }
0x13b3   : > { %2620 = vadd.xlane.f32.xlu2 %v2619_v12 }
0x13b4   : > { %v8180_v50 = vpop.f32.mrf.mxu3  ;;  %v10363_v8 = vpop.permute.xlu0 %10362 }
0x13b5   : > { %v8181_v61 = vadd.f32 %v14054_v41, %v8180_v50  ;;  %v10364_v44 = vunpack.i.l.bf16 %v10363_v8  ;;  %v10365_v31 = vunpack.i.h.bf16 %v10363_v8 }
0x13b6   : > { %v4922_v7 = vpop.f32.mrf.mxu0 }
0x13b7   : > { %8549 = vst [vmem:[%s11979_s22 + $0x5a8] sm:$0xff] %v8181_v61  ;;  %v4923_v13 = vadd.f32 %v11754_v51, %v4922_v7  ;;  %v2622_v33 = vsel %vm1973_vm0, %v10364_v44, 0.0  ;;  %v2625_v41 = vsel %vm1973_vm0, %v10365_v31, 0.0 }
0x13b8   : > { %2623 = vadd.xlane.f32.xlu0 %v2622_v33 }
0x13b9   : > { %v5264_v1 = vmul.f32 %v13970_v60, %v4923_v13 }
0x13bb   : > { %v5420_v24 = vpack.c.bf16 %v5264_v1, %v5263_v20 }
0x13bd   : > { %6020 = vmatmul.bf16.gmra.mxu1 %v5420_v24 }
0x13be   : > { %v7092_v63 = vpop.f32.mrf.mxu2 }
0x13bf   : > { %v7093_v26 = vadd.f32 %v14234_v2, %v7092_v63 }
0x13c1   : > { %v7453_v6 = vmax.f32 %v7093_v26, 0.0 }
0x13c2   : > { %v2609_v9 = vpop.xlane.xlu2 %2608 }
0x13c3   : > { %v2953_v35 = vmax.f32 %v2609_v9, 1e-08  ;;  %2626 = vadd.xlane.f32.xlu1 %v2625_v41 }
0x13c5   : > { %10886 = vrcp.f32 %v2953_v35  ;;  %v10368_v35 = vpop.permute.xlu0 %10367 }
0x13c6   : > { %v7094_v60 = vpop.f32.mrf.mxu2  ;;  %v10370_v26 = vunpack.i.h.bf16 %v10368_v35 }
0x13c7   : > { %v7095_v11 = vadd.f32 %v14234_v2, %v7094_v60 }
0x13c9   : > { %v7454_v53 = vmax.f32 %v7095_v11, 0.0 }
0x13cb   : > { %v10887_v25 = vpop.eup %10886  ;;  %v7616_v56 = vpack.c.bf16 %v7454_v53, %v7453_v6  ;;  %10377 = vrot.lane.b32.xlu2 %v10376_v0, %s11344_s13 }
0x13cc   : > { %v3465_v19 = vmul.f32 %v10887_v25, %v14139_v52  ;;  %v2631_v25 = vsel %vm1973_vm0, %v10370_v26, 0.0 }
0x13cd   : > { %8192 = vmatmul.bf16.gmra.mxu3 %v7616_v56 }
0x13ce   : > { %v7097_v3 = vpop.f32.mrf.mxu2  ;;  %v3615_v57 = vpack.c.bf16 %v3465_v19, %v3464_v54  ;;  %v10369_v19 = vunpack.i.l.bf16 %v10368_v35 }
0x13cf   : > { %v7098_v42 = vadd.f32 %v14234_v2, %v7097_v3 }
0x13d0   : > { %3982 = vrot.lane.b32.xlu0 %v3615_v57, %s11344_s13 }
0x13d1   : > { %v7455_v8 = vmax.f32 %v7098_v42, 0.0  ;;  %v2628_v42 = vsel %vm1973_vm0, %v10369_v19, 0.0 }
0x13d4   : > { %v8183_v43 = vpop.f32.mrf.mxu3 }
0x13d5   : > { %v8184_v4 = vadd.f32 %v14307_v32, %v8183_v43 }
0x13d6   : > { %v4925_v49 = vpop.f32.mrf.mxu0  ;;  %v7099_v12 = vpop.f32.mrf.mxu2 }
0x13d7   : > { %8550 = vst [vmem:[%s11979_s22 + $0x5b0] sm:$0xff] %v8184_v4  ;;  %v7100_v50 = vadd.f32 %v14234_v2, %v7099_v12  ;;  %v4926_v7 = vadd.f32 %v11754_v51, %v4925_v49 }
0x13d9   : > { %v7456_v27 = vmax.f32 %v7100_v50, 0.0  ;;  %v5265_v1 = vmul.f32 %v14020_v38, %v4926_v7 }
0x13db   : > { %v7617_v61 = vpack.c.bf16 %v7456_v27, %v7455_v8 }
0x13dc   : > { %v8185_v44 = vpop.f32.mrf.mxu3 }
0x13dd   : > { %v8186_v13 = vadd.f32 %v14307_v32, %v8185_v44  ;;  %8197 = vmatmul.bf16.gmra.mxu3 %v7617_v61 }
0x13de   : > { %v4927_v33 = vpop.f32.mrf.mxu0 }
0x13df   : > { %8551 = vst [vmem:[%s11979_s22 + $0x5b8] sm:$0xff] %v8186_v13  ;;  %v4928_v20 = vadd.f32 %v11754_v51, %v4927_v33 }
0x13e1   : > { %v5266_v24 = vmul.f32 %v14022_v30, %v4928_v20 }
0x13e3   : > { %v5421_v31 = vpack.c.bf16 %v5266_v24, %v5265_v1 }
0x13e5   : > { %6025 = vmatmul.bf16.gmra.mxu1 %v5421_v31  ;;  %v2615_v63 = vpop.xlane.xlu2 %2614  ;;  %v2612_v40 = vpop.xlane.xlu1 %2611  ;;  %v9682_v31 = vld [vmem:[%s11536_s17 + $0x380] sm:$0xff]  }
0x13e6   : > { %v2955_v28 = vmax.f32 %v2615_v63, 1e-08  ;;  %v2954_v9 = vmax.f32 %v2612_v40, 1e-08 }
0x13e8   : > { %10888 = vrcp.f32 %v2955_v28 }
0x13e9   : > { %10890 = vrcp.f32 %v2954_v9  ;;  %v6011_v41 = vpop.f32.mrf.mxu1 }
0x13ea   : > { %v6012_v62 = vadd.f32 %v14141_v22, %v6011_v41 }
0x13ec   : > { %v6360_v3 = vmax.f32 %v6012_v62, 0.0 }
0x13ed   : > { %v3979_v60 = vpop.permute.xlu2 %3978 }
0x13ee   : > { %v10889_v11 = vpop.eup %10888  ;;  %8907 = vmatmul.msk.bf16.gmra.mxu0 %vm1973_vm0, %v3979_v60  ;;  %v14336_v60 = vunpack.c.l.bf16 %v9682_v31 }
0x13ef   : > { %v10891_v0 = vpop.eup %10890  ;;  %v3467_v38 = vmul.f32 %v10889_v11, %v14180_v48  ;;  %v14338_v11 = vunpack.c.h.bf16 %v9682_v31 }
0x13f0   : > { %v3466_v30 = vmul.f32 %v10891_v0, %v14178_v21 }
0x13f1   : > { %v7102_v6 = vpop.f32.mrf.mxu2  ;;  %v6013_v53 = vpop.f32.mrf.mxu1  ;;  %v10381_v62 = vpack.i.bf16 %v14338_v11, %v14336_v60 }
0x13f2   : > { %v6014_v56 = vadd.f32 %v14141_v22, %v6013_v53  ;;  %v3616_v54 = vpack.c.bf16 %v3467_v38, %v3466_v30  ;;  %v7103_v4 = vadd.f32 %v14234_v2, %v7102_v6 }
0x13f4   : > { %v6361_v57 = vmax.f32 %v6014_v56, 0.0  ;;  %3984 = vrot.lane.b32.xlu1 %v3616_v54, %s11344_s13  ;;  %2632 = vadd.xlane.f32.xlu2 %v2631_v25  ;;  %v7457_v8 = vmax.f32 %v7103_v4, 0.0  ;;  %v9683_v25 = vld [vmem:[%s11536_s17 + $0x388] sm:$0xff]  }
0x13f5   : > { %v14349_v19 = vunpack.c.l.bf16 %v9683_v25 }
0x13f6   : > { %v6519_v43 = vpack.c.bf16 %v6361_v57, %v6360_v3  ;;  %v14351_v3 = vunpack.c.h.bf16 %v9683_v25 }
0x13f8   : > { %7111 = vmatmul.bf16.gmra.mxu2 %v6519_v43  ;;  %v2618_v43 = vpop.xlane.xlu0 %2617 }
0x13f9   : > { %v7104_v49 = vpop.f32.mrf.mxu2  ;;  %v6016_v12 = vpop.f32.mrf.mxu1  ;;  %v2956_v4 = vmax.f32 %v2618_v43, 1e-08 }
0x13fa   : > { %v7105_v50 = vadd.f32 %v14234_v2, %v7104_v49  ;;  %2629 = vadd.xlane.f32.xlu0 %v2628_v42  ;;  %v6017_v33 = vadd.f32 %v14141_v22, %v6016_v12 }
0x13fb   : > { %10892 = vrcp.f32 %v2956_v4 }
0x13fc   : > { %v7458_v27 = vmax.f32 %v7105_v50, 0.0  ;;  %v8188_v61 = vpop.f32.mrf.mxu3  ;;  %v6362_v63 = vmax.f32 %v6017_v33, 0.0 }
0x13fd   : > { %v8189_v44 = vadd.f32 %v14307_v32, %v8188_v61 }
0x13fe   : > { %v4930_v7 = vpop.f32.mrf.mxu0  ;;  %v7618_v13 = vpack.c.bf16 %v7458_v27, %v7457_v8 }
0x13ff   : > { %8552 = vst [vmem:[%s11979_s22 + $0x5c0] sm:$0xff] %v8189_v44  ;;  %v4931_v9 = vadd.f32 %v11754_v51, %v4930_v7 }
0x1400   : > { %8202 = vmatmul.bf16.gmra.mxu3 %v7618_v13 }
0x1401   : > { %v6018_v20 = vpop.f32.mrf.mxu1  ;;  %v5267_v38 = vmul.f32 %v14030_v14, %v4931_v9  ;;  %v10386_v14 = vpack.i.bf16 %v14351_v3, %v14349_v19  ;;  %v10893_v13 = vpop.eup %10892 }
0x1402   : > { %v6019_v1 = vadd.f32 %v14141_v22, %v6018_v20 }
0x1403   : > { %v3981_v24 = vpop.permute.xlu1 %3980 }
0x1404   : > { %v6363_v40 = vmax.f32 %v6019_v1, 0.0  ;;  %8908 = vmatmul.msk.bf16.gmra.mxu0 %vm1973_vm0, %v3981_v24  ;;  %v8190_v28 = vpop.f32.mrf.mxu3  ;;  %v3468_v1 = vmul.f32 %v10893_v13, %v14187_v45 }
0x1405   : > { %v8191_v41 = vadd.f32 %v14307_v32, %v8190_v28 }
0x1406   : > { %v4932_v35 = vpop.f32.mrf.mxu0  ;;  %v6520_v26 = vpack.c.bf16 %v6363_v40, %v6362_v63 }
0x1407   : > { %8553 = vst [vmem:[%s11979_s22 + $0x5c8] sm:$0xff] %v8191_v41  ;;  %v4933_v0 = vadd.f32 %v11754_v51, %v4932_v35 }
0x1408   : > { %7116 = vmatmul.bf16.gmra.mxu2 %v6520_v26 }
0x1409   : > { %v5268_v30 = vmul.f32 %v14032_v55, %v4933_v0 }
0x140b   : > { %v5422_v6 = vpack.c.bf16 %v5268_v30, %v5267_v38  ;;  %v10373_v53 = vpop.permute.xlu1 %10372 }
0x140c   : > { %v10375_v56 = vunpack.i.h.bf16 %v10373_v53  ;;  %v10374_v55 = vunpack.i.l.bf16 %v10373_v53 }
0x140d   : > { %6030 = vmatmul.bf16.gmra.mxu1 %v5422_v6 }
0x140e   : > { %10382 = vrot.lane.b32.xlu0 %v10381_v62, %s11344_s13  ;;  %v2637_v54 = vsel %vm1973_vm0, %v10375_v56, 0.0  ;;  %v2634_v57 = vsel %vm1973_vm0, %v10374_v55, 0.0  ;;  %v9684_v55 = vld [vmem:[%s11536_s17 + $0x390] sm:$0xff]  }
0x140f   : > { %2638 = vadd.xlane.f32.xlu2 %v2637_v54 }
0x1416   : > { %10387 = vrot.lane.b32.xlu0 %v10386_v14, %s11344_s13 }
0x141e   : > { %2635 = vadd.xlane.f32.xlu1 %v2634_v57 }
0x1420   : > { %v4935_v42 = vpop.f32.mrf.mxu0 }
0x1421   : > { %v4936_v12 = vadd.f32 %v11754_v51, %v4935_v42 }
0x1423   : > { %v5269_v61 = vmul.f32 %v14061_v10, %v4936_v12  ;;  %v14376_v12 = vunpack.c.h.bf16 %v9684_v55 }
0x1426   : > { %v2621_v49 = vpop.xlane.xlu2 %2620 }
0x1427   : > { %v2957_v50 = vmax.f32 %v2621_v49, 1e-08  ;;  %v14374_v49 = vunpack.c.l.bf16 %v9684_v55 }
0x1428   : > { %v4937_v8 = vpop.f32.mrf.mxu0 }
0x1429   : > { %10894 = vrcp.f32 %v2957_v50  ;;  %v4938_v27 = vadd.f32 %v11754_v51, %v4937_v8 }
0x142b   : > { %v5270_v44 = vmul.f32 %v14063_v18, %v4938_v27  ;;  %v2624_v31 = vpop.xlane.xlu0 %2623 }
0x142c   : > { %v7107_v7 = vpop.f32.mrf.mxu2  ;;  %v2958_v28 = vmax.f32 %v2624_v31, 1e-08 }
0x142d   : > { %v5423_v33 = vpack.c.bf16 %v5270_v44, %v5269_v61  ;;  %v7108_v40 = vadd.f32 %v14234_v2, %v7107_v7  ;;  %v10391_v61 = vpack.i.bf16 %v14376_v12, %v14374_v49 }
0x142e   : > { %v10378_v41 = vpop.permute.xlu2 %10377  ;;  %10896 = vrcp.f32 %v2958_v28  ;;  %v14389_v28 = vld [vmem:[#allocation8] ss:$0 sm:$0xff] }
0x142f   : > { %v10895_v20 = vpop.eup %10894  ;;  %6035 = vmatmul.bf16.gmra.mxu1 %v5423_v33  ;;  %v7459_v35 = vmax.f32 %v7108_v40, 0.0  ;;  %v10379_v30 = vunpack.i.l.bf16 %v10378_v41  ;;  %v10380_v7 = vunpack.i.h.bf16 %v10378_v41 }
0x1430   : > { %v3469_v24 = vmul.f32 %v10895_v20, %v14189_v16 }
0x1431   : > { %v2640_v53 = vsel %vm1973_vm0, %v10379_v30, 0.0  ;;  %v2643_v20 = vsel %vm1973_vm0, %v10380_v7, 0.0 }
0x1432   : > { %v3617_v63 = vpack.c.bf16 %v3469_v24, %v3468_v1 }
0x1434   : > { %v7109_v9 = vpop.f32.mrf.mxu2  ;;  %3986 = vrot.lane.b32.xlu2 %v3617_v63, %s11344_s13  ;;  %v10897_v6 = vpop.eup %10896 }
0x1435   : > { %v7110_v10 = vadd.f32 %v14234_v2, %v7109_v9  ;;  %v3470_v56 = vmul.f32 %v10897_v6, %v14216_v23 }
0x1436   : > { %v2627_v18 = vpop.xlane.xlu1 %2626 }
0x1437   : > { %v7460_v26 = vmax.f32 %v7110_v10, 0.0  ;;  %v2959_v0 = vmax.f32 %v2627_v18, 1e-08 }
0x1439   : > { %10898 = vrcp.f32 %v2959_v0  ;;  %v7619_v38 = vpack.c.bf16 %v7460_v26, %v7459_v35  ;;  %v9685_v26 = vld [vmem:[%s11536_s17 + $0x398] sm:$0xff]  }
0x143a   : > { %v6021_v62 = vpop.f32.mrf.mxu1  ;;  %v14396_v30 = vunpack.c.l.bf16 %v9685_v26 }
0x143b   : > { %8207 = vmatmul.bf16.gmra.mxu3 %v7619_v38  ;;  %v6022_v14 = vadd.f32 %v14141_v22, %v6021_v62  ;;  %v14398_v62 = vunpack.c.h.bf16 %v9685_v26 }
0x143d   : > { %v6364_v50 = vmax.f32 %v6022_v14, 0.0 }
0x143f   : > { %v10899_v25 = vpop.eup %10898 }
0x1440   : > { %v3471_v54 = vmul.f32 %v10899_v25, %v14218_v17  ;;  %2641 = vadd.xlane.f32.xlu0 %v2640_v53  ;;  %v10396_v53 = vpack.i.bf16 %v14398_v62, %v14396_v30 }
0x1442   : > { %v6023_v57 = vpop.f32.mrf.mxu1  ;;  %v3983_v43 = vpop.permute.xlu0 %3982  ;;  %v3618_v42 = vpack.c.bf16 %v3471_v54, %v3470_v56 }
0x1443   : > { %v6024_v4 = vadd.f32 %v14141_v22, %v6023_v57  ;;  %8909 = vmatmul.msk.bf16.gmra.mxu0 %vm1973_vm0, %v3983_v43 }
0x1444   : > { %3988 = vrot.lane.b32.xlu1 %v3618_v42, %s11344_s13 }
0x1445   : > { %v6365_v8 = vmax.f32 %v6024_v4, 0.0 }
0x1447   : > { %v6521_v27 = vpack.c.bf16 %v6365_v8, %v6364_v50 }
0x1449   : > { %7121 = vmatmul.bf16.gmra.mxu2 %v6521_v27 }
0x144c   : > { %10392 = vrot.lane.b32.xlu1 %v10391_v61, %s11344_s13 }
0x1450   : > { %v8193_v22 = vpop.f32.mrf.mxu3 }
0x1451   : > { %v8194_v44 = vadd.f32 %v14307_v32, %v8193_v22 }
0x1453   : > { %8554 = vst [vmem:[%s11979_s22 + $0x5d0] sm:$0xff] %v8194_v44 }
0x1458   : > { %v8195_v13 = vpop.f32.mrf.mxu3 }
0x1459   : > { %v8196_v33 = vadd.f32 %v14307_v32, %v8195_v13 }
0x145b   : > { %8555 = vst [vmem:[%s11979_s22 + $0x5d8] sm:$0xff] %v8196_v33 }
0x145d   : > { %2644 = vadd.xlane.f32.xlu2 %v2643_v20 }
0x1460   : > { %v8198_v1 = vpop.f32.mrf.mxu3 }
0x1461   : > { %v8199_v24 = vadd.f32 %v14307_v32, %v8198_v1 }
0x1462   : > { %v6026_v31 = vpop.f32.mrf.mxu1 }
0x1463   : > { %8556 = vst [vmem:[%s11979_s22 + $0x5e0] sm:$0xff] %v8199_v24  ;;  %v6027_v9 = vadd.f32 %v14389_v28, %v6026_v31 }
0x1465   : > { %v6366_v0 = vmax.f32 %v6027_v9, 0.0 }
0x1466   : > { %v3985_v63 = vpop.permute.xlu1 %3984 }
0x1467   : > { %8910 = vmatmul.msk.bf16.gmra.mxu0 %vm1973_vm0, %v3985_v63  ;;  %v2633_v4 = vpop.xlane.xlu2 %2632 }
0x1468   : > { %v8200_v40 = vpop.f32.mrf.mxu3  ;;  %v2961_v33 = vmax.f32 %v2633_v4, 1e-08 }
0x1469   : > { %v8201_v10 = vadd.f32 %v14307_v32, %v8200_v40 }
0x146a   : > { %v6028_v18 = vpop.f32.mrf.mxu1  ;;  %10900 = vrcp.f32 %v2961_v33 }
0x146b   : > { %8557 = vst [vmem:[%s11979_s22 + $0x5e8] sm:$0xff] %v8201_v10  ;;  %v6029_v41 = vadd.f32 %v14389_v28, %v6028_v18  ;;  %v4940_v35 = vpop.f32.mrf.mxu0 }
0x146c   : > { %v4941_v25 = vadd.f32 %v11754_v51, %v4940_v35 }
0x146d   : > { %v6367_v38 = vmax.f32 %v6029_v41, 0.0  ;;  %v2630_v57 = vpop.xlane.xlu0 %2629 }
0x146e   : > { %v5271_v14 = vmul.f32 %v14076_v29, %v4941_v25  ;;  %v2960_v24 = vmax.f32 %v2630_v57, 1e-08 }
0x146f   : > { %v6522_v6 = vpack.c.bf16 %v6367_v38, %v6366_v0 }
0x1470   : > { %10902 = vrcp.f32 %v2960_v24  ;;  %v10901_v25 = vpop.eup %10900 }
0x1471   : > { %7126 = vmatmul.bf16.gmra.mxu2 %v6522_v6 }
0x1473   : > { %v4942_v56 = vpop.f32.mrf.mxu0 }
0x1474   : > { %v4943_v54 = vadd.f32 %v11754_v51, %v4942_v56 }
0x1475   : > { %10397 = vrot.lane.b32.xlu2 %v10396_v53, %s11344_s13 }
0x1476   : > { %v5272_v55 = vmul.f32 %v14078_v59, %v4943_v54 }
0x1478   : > { %v5424_v43 = vpack.c.bf16 %v5272_v55, %v5271_v14  ;;  %v10903_v14 = vpop.eup %10902 }
0x147a   : > { %6040 = vmatmul.bf16.gmra.mxu1 %v5424_v43  ;;  %v3472_v43 = vmul.f32 %v10903_v14, %v14226_v15 }
0x147b   : > { %v7112_v42 = vpop.f32.mrf.mxu2 }
0x147c   : > { %v7113_v22 = vadd.f32 %v14234_v2, %v7112_v42 }
0x147e   : > { %v7461_v31 = vmax.f32 %v7113_v22, 0.0 }
0x1480   : > { %v10383_v50 = vpop.permute.xlu0 %10382 }
0x1481   : > { %v10385_v8 = vunpack.i.h.bf16 %v10383_v50  ;;  %v10384_v27 = vunpack.i.l.bf16 %v10383_v50  ;;  %v4945_v61 = vpop.f32.mrf.mxu0 }
0x1482   : > { %v2639_v1 = vpop.xlane.xlu2 %2638  ;;  %v4946_v40 = vadd.f32 %v11754_v51, %v4945_v61 }
0x1483   : > { %v8203_v44 = vpop.f32.mrf.mxu3  ;;  %v7114_v7 = vpop.f32.mrf.mxu2  ;;  %v2646_v13 = vsel %vm1973_vm0, %v10384_v27, 0.0  ;;  %v2649_v29 = vsel %vm1973_vm0, %v10385_v8, 0.0  ;;  %v2963_v38 = vmax.f32 %v2639_v1, 1e-08 }
0x1484   : > { %v8204_v59 = vadd.f32 %v14307_v32, %v8203_v44  ;;  %v7115_v20 = vadd.f32 %v14234_v2, %v7114_v7  ;;  %2647 = vadd.xlane.f32.xlu0 %v2646_v13  ;;  %2650 = vadd.xlane.f32.xlu1 %v2649_v29  ;;  %v5273_v0 = vmul.f32 %v14110_v58, %v4946_v40 }
0x1485   : > { %10904 = vrcp.f32 %v2963_v38  ;;  %v3473_v58 = vmul.f32 %v10901_v25, %v14228_v5 }
0x1486   : > { %8558 = vst [vmem:[%s11979_s22 + $0x5f0] sm:$0xff] %v8204_v59  ;;  %v7462_v63 = vmax.f32 %v7115_v20, 0.0 }
0x1487   : > { %v3619_v29 = vpack.c.bf16 %v3473_v58, %v3472_v43 }
0x1488   : > { %v7620_v9 = vpack.c.bf16 %v7462_v63, %v7461_v31  ;;  %v10388_v33 = vpop.permute.xlu0 %10387 }
0x1489   : > { %v4947_v10 = vpop.f32.mrf.mxu0  ;;  %v10390_v20 = vunpack.i.h.bf16 %v10388_v33 }
0x148a   : > { %v4948_v18 = vadd.f32 %v11754_v51, %v4947_v10  ;;  %v6031_v41 = vpop.f32.mrf.mxu1  ;;  %8212 = vmatmul.bf16.gmra.mxu3 %v7620_v9 }
0x148b   : > { %v8205_v35 = vpop.f32.mrf.mxu3  ;;  %v7117_v26 = vpop.f32.mrf.mxu2  ;;  %v6032_v55 = vadd.f32 %v14389_v28, %v6031_v41  ;;  %v2655_v40 = vsel %vm1973_vm0, %v10390_v20, 0.0 }
0x148c   : > { %v5274_v6 = vmul.f32 %v14112_v34, %v4948_v18  ;;  %v8206_v53 = vadd.f32 %v14307_v32, %v8205_v35  ;;  %v7118_v34 = vadd.f32 %v14234_v2, %v7117_v26  ;;  %v10905_v44 = vpop.eup %10904 }
0x148d   : > { %v6368_v61 = vmax.f32 %v6032_v55, 0.0  ;;  %v3475_v24 = vmul.f32 %v10905_v44, %v14273_v46 }
0x148e   : > { %8559 = vst [vmem:[%s11979_s22 + $0x5f8] sm:$0xff] %v8206_v53  ;;  %v3987_v56 = vpop.permute.xlu2 %3986  ;;  %v5425_v54 = vpack.c.bf16 %v5274_v6, %v5273_v0  ;;  %v7463_v7 = vmax.f32 %v7118_v34, 0.0  ;;  %v10389_v53 = vunpack.i.l.bf16 %v10388_v33 }
0x148f   : > { %8911 = vmatmul.msk.bf16.gmra.mxu0 %vm1973_vm0, %v3987_v56 }
0x1490   : > { %6045 = vmatmul.bf16.gmra.mxu1 %v5425_v54  ;;  %v2652_v55 = vsel %vm1973_vm0, %v10389_v53, 0.0 }
0x1491   : > { %v2636_v57 = vpop.xlane.xlu1 %2635 }
0x1492   : > { %v6033_v42 = vpop.f32.mrf.mxu1  ;;  %v2962_v4 = vmax.f32 %v2636_v57, 1e-08 }
0x1493   : > { %v6034_v50 = vadd.f32 %v14389_v28, %v6033_v42  ;;  %v7119_v8 = vpop.f32.mrf.mxu2 }
0x1494   : > { %v7120_v27 = vadd.f32 %v14234_v2, %v7119_v8  ;;  %10906 = vrcp.f32 %v2962_v4 }
0x1495   : > { %v6369_v22 = vmax.f32 %v6034_v50, 0.0 }
0x1496   : > { %v7464_v13 = vmax.f32 %v7120_v27, 0.0 }
0x1497   : > { %v6523_v59 = vpack.c.bf16 %v6369_v22, %v6368_v61 }
0x1498   : > { %3990 = vrot.lane.b32.xlu0 %v3619_v29, %s11344_s13  ;;  %v7621_v1 = vpack.c.bf16 %v7464_v13, %v7463_v7  ;;  %v9686_v7 = vld [vmem:[%s11536_s17 + $0x3a0] sm:$0xff]  }
0x1499   : > { %7131 = vmatmul.bf16.gmra.mxu2 %v6523_v59  ;;  %v14446_v59 = vunpack.c.l.bf16 %v9686_v7  ;;  %v14448_v20 = vunpack.c.h.bf16 %v9686_v7 }
0x149a   : > { %v10907_v31 = vpop.eup %10906  ;;  %8217 = vmatmul.bf16.gmra.mxu3 %v7621_v1 }
0x149b   : > { %v3474_v63 = vmul.f32 %v10907_v31, %v14271_v36  ;;  %v10401_v31 = vpack.i.bf16 %v14448_v20, %v14446_v59 }
0x149d   : > { %v3620_v9 = vpack.c.bf16 %v3475_v24, %v3474_v63 }
0x149e   : > { %2656 = vadd.xlane.f32.xlu2 %v2655_v40 }
0x149f   : > { %3992 = vrot.lane.b32.xlu1 %v3620_v9, %s11344_s13 }
0x14ac   : > { %v6036_v10 = vpop.f32.mrf.mxu1 }
0x14ad   : > { %v6037_v18 = vadd.f32 %v14389_v28, %v6036_v10 }
0x14af   : > { %v6370_v0 = vmax.f32 %v6037_v18, 0.0 }
0x14b3   : > { %v2642_v61 = vpop.xlane.xlu0 %2641 }
0x14b4   : > { %v6038_v41 = vpop.f32.mrf.mxu1  ;;  %v2964_v29 = vmax.f32 %v2642_v61, 1e-08 }
0x14b5   : > { %v6039_v35 = vadd.f32 %v14389_v28, %v6038_v41 }
0x14b6   : > { %v3989_v26 = vpop.permute.xlu1 %3988  ;;  %10908 = vrcp.f32 %v2964_v29 }
0x14b7   : > { %v6371_v38 = vmax.f32 %v6039_v35, 0.0  ;;  %8912 = vmatmul.msk.bf16.gmra.mxu0 %vm1973_vm0, %v3989_v26 }
0x14b9   : > { %v6524_v6 = vpack.c.bf16 %v6371_v38, %v6370_v0 }
0x14bb   : > { %7136 = vmatmul.bf16.gmra.mxu2 %v6524_v6 }
0x14bc   : > { %v10909_v18 = vpop.eup %10908 }
0x14bd   : > { %v3476_v38 = vmul.f32 %v10909_v18, %v14294_v37 }
0x14be   : > { %v8208_v25 = vpop.f32.mrf.mxu3  ;;  %v10393_v56 = vpop.permute.xlu1 %10392 }
0x14bf   : > { %v8209_v54 = vadd.f32 %v14307_v32, %v8208_v25  ;;  %v10395_v14 = vunpack.i.h.bf16 %v10393_v56  ;;  %v10394_v58 = vunpack.i.l.bf16 %v10393_v56 }
0x14c0   : > { %v4950_v57 = vpop.f32.mrf.mxu0 }
0x14c1   : > { %8560 = vst [vmem:[%s11979_s22 + $0x600] sm:$0xff] %v8209_v54  ;;  %v2661_v43 = vsel %vm1973_vm0, %v10395_v14, 0.0  ;;  %v2658_v42 = vsel %vm1973_vm0, %v10394_v58, 0.0  ;;  %v4951_v4 = vadd.f32 %v11754_v51, %v4950_v57 }
0x14c2   : > { %2662 = vadd.xlane.f32.xlu2 %v2661_v43  ;;  %2653 = vadd.xlane.f32.xlu0 %v2652_v55 }
0x14c3   : > { %v5275_v22 = vmul.f32 %v14137_v39, %v4951_v4  ;;  %v9687_v39 = vld [vmem:[%s11536_s17 + $0x3a8] sm:$0xff]  }
0x14c4   : > { %v14456_v9 = vunpack.c.l.bf16 %v9687_v39  ;;  %v14458_v10 = vunpack.c.h.bf16 %v9687_v39 }
0x14c6   : > { %v8210_v34 = vpop.f32.mrf.mxu3  ;;  %v10406_v53 = vpack.i.bf16 %v14458_v10, %v14456_v9 }
0x14c7   : > { %v8211_v50 = vadd.f32 %v14307_v32, %v8210_v34 }
0x14c8   : > { %v4952_v8 = vpop.f32.mrf.mxu0 }
0x14c9   : > { %8561 = vst [vmem:[%s11979_s22 + $0x608] sm:$0xff] %v8211_v50  ;;  %v4953_v27 = vadd.f32 %v11754_v51, %v4952_v8  ;;  %2659 = vadd.xlane.f32.xlu1 %v2658_v42 }
0x14cb   : > { %v5276_v44 = vmul.f32 %v14139_v52, %v4953_v27 }
0x14cc   : > { %v7122_v13 = vpop.f32.mrf.mxu2 }
0x14cd   : > { %v5426_v33 = vpack.c.bf16 %v5276_v44, %v5275_v22  ;;  %v7123_v63 = vadd.f32 %v14234_v2, %v7122_v13  ;;  %v14471_v44 = vld [vmem:[#allocation11] ss:$0 sm:$0xff] }
0x14cf   : > { %6050 = vmatmul.bf16.gmra.mxu1 %v5426_v33  ;;  %v7465_v41 = vmax.f32 %v7123_v63, 0.0 }
0x14d0   : > { %v2645_v1 = vpop.xlane.xlu2 %2644 }
0x14d1   : > { %v2965_v24 = vmax.f32 %v2645_v1, 1e-08 }
0x14d3   : > { %10910 = vrcp.f32 %v2965_v24 }
0x14d4   : > { %v7124_v52 = vpop.f32.mrf.mxu2 }
0x14d5   : > { %v7125_v40 = vadd.f32 %v14234_v2, %v7124_v52 }
0x14d6   : > { %10402 = vrot.lane.b32.xlu0 %v10401_v31, %s11344_s13 }
0x14d7   : > { %v7466_v35 = vmax.f32 %v7125_v40, 0.0 }
0x14d9   : > { %v10911_v26 = vpop.eup %10910  ;;  %v7622_v0 = vpack.c.bf16 %v7466_v35, %v7465_v41 }
0x14da   : > { %v3477_v6 = vmul.f32 %v10911_v26, %v14296_v47 }
0x14db   : > { %8222 = vmatmul.bf16.gmra.mxu3 %v7622_v0 }
0x14dc   : > { %v3621_v25 = vpack.c.bf16 %v3477_v6, %v3476_v38 }
0x14de   : > { %10407 = vrot.lane.b32.xlu0 %v10406_v53, %s11344_s13  ;;  %3994 = vrot.lane.b32.xlu2 %v3621_v25, %s11344_s13 }
0x14e4   : > { %v4955_v56 = vpop.f32.mrf.mxu0 }
0x14e5   : > { %v4956_v54 = vadd.f32 %v11754_v51, %v4955_v56 }
0x14e7   : > { %v5277_v57 = vmul.f32 %v14178_v21, %v4956_v54  ;;  %v10398_v21 = vpop.permute.xlu2 %10397 }
0x14e8   : > { %v10400_v31 = vunpack.i.h.bf16 %v10398_v21  ;;  %v10399_v52 = vunpack.i.l.bf16 %v10398_v21 }
0x14ea   : > { %v2667_v0 = vsel %vm1973_vm0, %v10400_v31, 0.0  ;;  %v2664_v38 = vsel %vm1973_vm0, %v10399_v52, 0.0 }
0x14ec   : > { %v4957_v14 = vpop.f32.mrf.mxu0 }
0x14ed   : > { %v4958_v55 = vadd.f32 %v11754_v51, %v4957_v14  ;;  %v9688_v14 = vld [vmem:[%s11536_s17 + $0x3b0] sm:$0xff]  }
0x14ef   : > { %v5278_v43 = vmul.f32 %v14180_v48, %v4958_v55 }
0x14f1   : > { %v5427_v58 = vpack.c.bf16 %v5278_v43, %v5277_v57 }
0x14f3   : > { %6055 = vmatmul.bf16.gmra.mxu1 %v5427_v58  ;;  %v14487_v58 = vunpack.c.l.bf16 %v9688_v14 }
0x14f4   : > { %v7127_v34 = vpop.f32.mrf.mxu2 }
0x14f5   : > { %v7128_v61 = vadd.f32 %v14234_v2, %v7127_v34  ;;  %v14489_v34 = vunpack.c.h.bf16 %v9688_v14 }
0x14f7   : > { %v2648_v42 = vpop.xlane.xlu0 %2647  ;;  %v6041_v4 = vpop.f32.mrf.mxu1  ;;  %v7467_v13 = vmax.f32 %v7128_v61, 0.0 }
0x14f8   : > { %v2966_v50 = vmax.f32 %v2648_v42, 1e-08  ;;  %v2651_v8 = vpop.xlane.xlu1 %2650  ;;  %v6042_v48 = vadd.f32 %v14389_v28, %v6041_v4 }
0x14f9   : > { %v2967_v27 = vmax.f32 %v2651_v8, 1e-08 }
0x14fa   : > { %10912 = vrcp.f32 %v2966_v50  ;;  %v6372_v40 = vmax.f32 %v6042_v48, 0.0 }
0x14fb   : > { %10914 = vrcp.f32 %v2967_v27 }
0x14fc   : > { %v7129_v22 = vpop.f32.mrf.mxu2 }
0x14fd   : > { %v7130_v7 = vadd.f32 %v14471_v44, %v7129_v22 }
0x14ff   : > { %v7468_v29 = vmax.f32 %v7130_v7, 0.0  ;;  %v6043_v33 = vpop.f32.mrf.mxu1 }
0x1500   : > { %v10913_v1 = vpop.eup %10912  ;;  %v6044_v24 = vadd.f32 %v14389_v28, %v6043_v33  ;;  %v9689_v33 = vld [vmem:[%s11536_s17 + $0x3b8] sm:$0xff]  }
0x1501   : > { %v10915_v63 = vpop.eup %10914  ;;  %v3478_v39 = vmul.f32 %v10913_v1, %v14336_v60  ;;  %v7623_v2 = vpack.c.bf16 %v7468_v29, %v7467_v13  ;;  %v10411_v13 = vpack.i.bf16 %v14489_v34, %v14487_v58 }
0x1502   : > { %v3479_v18 = vmul.f32 %v10915_v63, %v14338_v11  ;;  %v6373_v41 = vmax.f32 %v6044_v24, 0.0 }
0x1503   : > { %8227 = vmatmul.bf16.gmra.mxu3 %v7623_v2 }
0x1504   : > { %v3622_v35 = vpack.c.bf16 %v3479_v18, %v3478_v39  ;;  %v6525_v26 = vpack.c.bf16 %v6373_v41, %v6372_v40 }
0x1506   : > { %3996 = vrot.lane.b32.xlu1 %v3622_v35, %s11344_s13  ;;  %7141 = vmatmul.bf16.gmra.mxu2 %v6525_v26 }
0x1507   : > { %2668 = vadd.xlane.f32.xlu2 %v2667_v0 }
0x1508   : > { %2665 = vadd.xlane.f32.xlu0 %v2664_v38 }
0x150a   : > { %v3991_v6 = vpop.permute.xlu0 %3990 }
0x150b   : > { %8913 = vmatmul.msk.bf16.gmra.mxu0 %vm1973_vm0, %v3991_v6 }
0x150c   : > { %v4960_v53 = vpop.f32.mrf.mxu0 }
0x150d   : > { %v6046_v25 = vpop.f32.mrf.mxu1  ;;  %v8213_v56 = vpop.f32.mrf.mxu3  ;;  %v4961_v55 = vadd.f32 %v11754_v51, %v4960_v53 }
0x150e   : > { %v8214_v54 = vadd.f32 %v14307_v32, %v8213_v56  ;;  %v6047_v57 = vadd.f32 %v14389_v28, %v6046_v25 }
0x150f   : > { %v5279_v61 = vmul.f32 %v14187_v45, %v4961_v55  ;;  %v14502_v45 = vunpack.c.l.bf16 %v9689_v33 }
0x1510   : > { %8562 = vst [vmem:[%s11979_s22 + $0x610] sm:$0xff] %v8214_v54  ;;  %v6374_v7 = vmax.f32 %v6047_v57, 0.0 }
0x1511   : > { %v3993_v48 = vpop.permute.xlu1 %3992  ;;  %v2657_v38 = vpop.xlane.xlu2 %2656 }
0x1514   : > { %v4962_v43 = vpop.f32.mrf.mxu0 }
0x1515   : > { %v4963_v42 = vadd.f32 %v11754_v51, %v4962_v43  ;;  %v6048_v4 = vpop.f32.mrf.mxu1  ;;  %v8215_v50 = vpop.f32.mrf.mxu3 }
0x1516   : > { %v6049_v8 = vadd.f32 %v14389_v28, %v6048_v4  ;;  %v8216_v27 = vadd.f32 %v14307_v32, %v8215_v50 }
0x1517   : > { %v5280_v22 = vmul.f32 %v14189_v16, %v4963_v42  ;;  %v14504_v16 = vunpack.c.h.bf16 %v9689_v33 }
0x1518   : > { %v6375_v21 = vmax.f32 %v6049_v8, 0.0  ;;  %8563 = vst [vmem:[%s11979_s22 + $0x618] sm:$0xff] %v8216_v27 }
0x1519   : > { %v5428_v29 = vpack.c.bf16 %v5280_v22, %v5279_v61  ;;  %v10416_v39 = vpack.i.bf16 %v14504_v16, %v14502_v45 }
0x151a   : > { %v6526_v1 = vpack.c.bf16 %v6375_v21, %v6374_v7 }
0x151b   : > { %8914 = vmatmul.msk.bf16.gmra.mxu0 %vm1973_vm0, %v3993_v48  ;;  %6060 = vmatmul.bf16.gmra.mxu1 %v5428_v29 }
0x151c   : > { %7146 = vmatmul.bf16.gmra.mxu2 %v6526_v1  ;;  %v7132_v24 = vpop.f32.mrf.mxu2  ;;  %10412 = vrot.lane.b32.xlu0 %v10411_v13, %s11344_s13  ;;  %v2969_v1 = vmax.f32 %v2657_v38, 1e-08 }
0x151d   : > { %v8218_v31 = vpop.f32.mrf.mxu3  ;;  %v7133_v2 = vadd.f32 %v14471_v44, %v7132_v24 }
0x151e   : > { %v8219_v63 = vadd.f32 %v14307_v32, %v8218_v31  ;;  %10916 = vrcp.f32 %v2969_v1 }
0x151f   : > { %v7469_v35 = vmax.f32 %v7133_v2, 0.0 }
0x1520   : > { %8564 = vst [vmem:[%s11979_s22 + $0x620] sm:$0xff] %v8219_v63 }
0x1524   : > { %v7134_v52 = vpop.f32.mrf.mxu2  ;;  %10417 = vrot.lane.b32.xlu0 %v10416_v39, %s11344_s13 }
0x1525   : > { %v7135_v40 = vadd.f32 %v14471_v44, %v7134_v52  ;;  %v8220_v18 = vpop.f32.mrf.mxu3 }
0x1526   : > { %v8221_v41 = vadd.f32 %v14307_v32, %v8220_v18 }
0x1527   : > { %v7470_v26 = vmax.f32 %v7135_v40, 0.0 }
0x1528   : > { %8565 = vst [vmem:[%s11979_s22 + $0x628] sm:$0xff] %v8221_v41 }
0x1529   : > { %v7624_v0 = vpack.c.bf16 %v7470_v26, %v7469_v35 }
0x152b   : > { %8232 = vmatmul.bf16.gmra.mxu3 %v7624_v0  ;;  %v10917_v0 = vpop.eup %10916 }
0x1534   : > { %v4965_v6 = vpop.f32.mrf.mxu0 }
0x1535   : > { %v2663_v53 = vpop.xlane.xlu2 %2662  ;;  %v4966_v25 = vadd.f32 %v11754_v51, %v4965_v6  ;;  %v2654_v42 = vpop.xlane.xlu0 %2653 }
0x1536   : > { %v2971_v24 = vmax.f32 %v2663_v53, 1e-08  ;;  %v2968_v39 = vmax.f32 %v2654_v42, 1e-08 }
0x1537   : > { %v5281_v57 = vmul.f32 %v14216_v23, %v4966_v25 }
0x1538   : > { %10918 = vrcp.f32 %v2971_v24 }
0x153c   : > { %v4967_v56 = vpop.f32.mrf.mxu0 }
0x153d   : > { %v4968_v54 = vadd.f32 %v11754_v51, %v4967_v56  ;;  %v3995_v14 = vpop.permute.xlu2 %3994 }
0x153e   : > { %8915 = vmatmul.msk.bf16.gmra.mxu0 %vm1973_vm0, %v3995_v14  ;;  %v7137_v55 = vpop.f32.mrf.mxu2  ;;  %v10919_v38 = vpop.eup %10918  ;;  %v3481_v14 = vmul.f32 %v10917_v0, %v14351_v3 }
0x153f   : > { %v5282_v43 = vmul.f32 %v14218_v17, %v4968_v54  ;;  %v7138_v50 = vadd.f32 %v14471_v44, %v7137_v55  ;;  %v2660_v17 = vpop.xlane.xlu1 %2659  ;;  %v3483_v56 = vmul.f32 %v10919_v38, %v14376_v12  ;;  %v14552_v38 = vld [vmem:[#allocation14] ss:$0 sm:$0xff] }
0x1540   : > { %v2970_v63 = vmax.f32 %v2660_v17, 1e-08 }
0x1541   : > { %v5429_v4 = vpack.c.bf16 %v5282_v43, %v5281_v57  ;;  %v7471_v22 = vmax.f32 %v7138_v50, 0.0  ;;  %v9690_v50 = vld [vmem:[%s11536_s17 + $0x3c0] sm:$0xff]  }
0x1542   : > { %10920 = vrcp.f32 %v2970_v63 }
0x1543   : > { %6065 = vmatmul.bf16.gmra.mxu1 %v5429_v4  ;;  %10922 = vrcp.f32 %v2968_v39 }
0x1546   : > { %v7139_v8 = vpop.f32.mrf.mxu2 }
0x1547   : > { %v7140_v27 = vadd.f32 %v14471_v44, %v7139_v8  ;;  %v14536_v8 = vunpack.c.l.bf16 %v9690_v50 }
0x1548   : > { %v10403_v61 = vpop.permute.xlu0 %10402  ;;  %v10921_v53 = vpop.eup %10920 }
0x1549   : > { %v7472_v7 = vmax.f32 %v7140_v27, 0.0  ;;  %v10405_v21 = vunpack.i.h.bf16 %v10403_v61  ;;  %v10404_v48 = vunpack.i.l.bf16 %v10403_v61  ;;  %v10923_v25 = vpop.eup %10922  ;;  %v3482_v54 = vmul.f32 %v10921_v53, %v14374_v49 }
0x154a   : > { %v3480_v55 = vmul.f32 %v10923_v25, %v14349_v19  ;;  %v14538_v27 = vunpack.c.h.bf16 %v9690_v50 }
0x154b   : > { %v2673_v13 = vsel %vm1973_vm0, %v10405_v21, 0.0  ;;  %v2670_v29 = vsel %vm1973_vm0, %v10404_v48, 0.0  ;;  %v7625_v23 = vpack.c.bf16 %v7472_v7, %v7471_v22  ;;  %v3624_v42 = vpack.c.bf16 %v3483_v56, %v3482_v54 }
0x154c   : > { %v6051_v33 = vpop.f32.mrf.mxu1  ;;  %2674 = vadd.xlane.f32.xlu2 %v2673_v13  ;;  %2671 = vadd.xlane.f32.xlu1 %v2670_v29  ;;  %v3623_v4 = vpack.c.bf16 %v3481_v14, %v3480_v55  ;;  %v10421_v7 = vpack.i.bf16 %v14538_v27, %v14536_v8 }
0x154d   : > { %8237 = vmatmul.bf16.gmra.mxu3 %v7625_v23  ;;  %v6052_v52 = vadd.f32 %v14389_v28, %v6051_v33 }
0x154f   : > { %v6376_v35 = vmax.f32 %v6052_v52, 0.0 }
0x1550   : > { %v10408_v31 = vpop.permute.xlu0 %10407 }
0x1551   : > { %v10409_v2 = vunpack.i.l.bf16 %v10408_v31 }
0x1553   : > { %v2676_v40 = vsel %vm1973_vm0, %v10409_v2, 0.0  ;;  %v10410_v2 = vunpack.i.h.bf16 %v10408_v31 }
0x1554   : > { %v6053_v18 = vpop.f32.mrf.mxu1  ;;  %2677 = vadd.xlane.f32.xlu0 %v2676_v40 }
0x1555   : > { %v6054_v41 = vadd.f32 %v14389_v28, %v6053_v18  ;;  %v2679_v18 = vsel %vm1973_vm0, %v10410_v2, 0.0 }
0x1557   : > { %v6377_v26 = vmax.f32 %v6054_v41, 0.0 }
0x1559   : > { %v6527_v6 = vpack.c.bf16 %v6377_v26, %v6376_v35 }
0x155b   : > { %7151 = vmatmul.bf16.gmra.mxu2 %v6527_v6 }
0x155e   : > { %v8223_v57 = vpop.f32.mrf.mxu3 }
0x155f   : > { %v8224_v43 = vadd.f32 %v14307_v32, %v8223_v57 }
0x1561   : > { %8566 = vst [vmem:[%s11979_s22 + $0x630] sm:$0xff] %v8224_v43 }
0x1564   : > { %3998 = vrot.lane.b32.xlu2 %v3623_v4, %s11344_s13 }
0x1565   : > { %4000 = vrot.lane.b32.xlu1 %v3624_v42, %s11344_s13 }
0x1566   : > { %v8225_v61 = vpop.f32.mrf.mxu3 }
0x1567   : > { %v8226_v22 = vadd.f32 %v14307_v32, %v8225_v61 }
0x1569   : > { %8567 = vst [vmem:[%s11979_s22 + $0x638] sm:$0xff] %v8226_v22 }
0x156d   : > { %10422 = vrot.lane.b32.xlu1 %v10421_v7, %s11344_s13 }
0x1570   : > { %v6056_v21 = vpop.f32.mrf.mxu1 }
0x1571   : > { %v6057_v48 = vadd.f32 %v14389_v28, %v6056_v21 }
0x1573   : > { %v6378_v33 = vmax.f32 %v6057_v48, 0.0 }
0x1578   : > { %v6058_v13 = vpop.f32.mrf.mxu1  ;;  %v3997_v29 = vpop.permute.xlu1 %3996 }
0x1579   : > { %v6059_v23 = vadd.f32 %v14389_v28, %v6058_v13  ;;  %8916 = vmatmul.msk.bf16.gmra.mxu0 %vm1973_vm0, %v3997_v29  ;;  %v9691_v29 = vld [vmem:[%s11536_s17 + $0x3c8] sm:$0xff]  }
0x157a   : > { %v2669_v26 = vpop.xlane.xlu2 %2668 }
0x157b   : > { %v6379_v17 = vmax.f32 %v6059_v23, 0.0  ;;  %v2666_v24 = vpop.xlane.xlu0 %2665  ;;  %v2973_v14 = vmax.f32 %v2669_v26, 1e-08 }
0x157c   : > { %v2972_v43 = vmax.f32 %v2666_v24, 1e-08 }
0x157d   : > { %v6528_v1 = vpack.c.bf16 %v6379_v17, %v6378_v33  ;;  %10924 = vrcp.f32 %v2973_v14  ;;  %v14565_v17 = vunpack.c.l.bf16 %v9691_v29 }
0x157e   : > { %10926 = vrcp.f32 %v2972_v43 }
0x157f   : > { %7156 = vmatmul.bf16.gmra.mxu2 %v6528_v1 }
0x1583   : > { %v10925_v23 = vpop.eup %10924 }
0x1584   : > { %v10927_v33 = vpop.eup %10926 }
0x1586   : > { %v8228_v63 = vpop.f32.mrf.mxu3 }
0x1587   : > { %v8229_v39 = vadd.f32 %v14307_v32, %v8228_v63  ;;  %v3484_v63 = vmul.f32 %v10927_v33, %v14396_v30 }
0x1588   : > { %v4970_v52 = vpop.f32.mrf.mxu0 }
0x1589   : > { %8568 = vst [vmem:[%s11979_s22 + $0x640] sm:$0xff] %v8229_v39  ;;  %v7142_v40 = vpop.f32.mrf.mxu2  ;;  %v4971_v0 = vadd.f32 %v11754_v51, %v4970_v52  ;;  %v3485_v39 = vmul.f32 %v10925_v23, %v14398_v62 }
0x158a   : > { %v7143_v32 = vadd.f32 %v14471_v44, %v7142_v40 }
0x158b   : > { %v5283_v42 = vmul.f32 %v14226_v15, %v4971_v0 }
0x158c   : > { %v7473_v50 = vmax.f32 %v7143_v32, 0.0 }
0x158d   : > { %2680 = vadd.xlane.f32.xlu2 %v2679_v18 }
0x158e   : > { %v8230_v41 = vpop.f32.mrf.mxu3  ;;  %v10413_v35 = vpop.permute.xlu0 %10412 }
0x158f   : > { %v8231_v6 = vadd.f32 %v14552_v38, %v8230_v41  ;;  %v10414_v53 = vunpack.i.l.bf16 %v10413_v35  ;;  %v10415_v55 = vunpack.i.h.bf16 %v10413_v35 }
0x1590   : > { %v4972_v25 = vpop.f32.mrf.mxu0 }
0x1591   : > { %8569 = vst [vmem:[%s11979_s22 + $0x648] sm:$0xff] %v8231_v6  ;;  %v4973_v31 = vadd.f32 %v11754_v51, %v4972_v25  ;;  %v7144_v56 = vpop.f32.mrf.mxu2  ;;  %v2682_v54 = vsel %vm1973_vm0, %v10414_v53, 0.0  ;;  %v2685_v7 = vsel %vm1973_vm0, %v10415_v55, 0.0  ;;  %v3625_v53 = vpack.c.bf16 %v3485_v39, %v3484_v63 }
0x1592   : > { %v7145_v57 = vadd.f32 %v14471_v44, %v7144_v56  ;;  %2683 = vadd.xlane.f32.xlu0 %v2682_v54 }
0x1593   : > { %v5284_v4 = vmul.f32 %v14228_v5, %v4973_v31  ;;  %v14567_v5 = vunpack.c.h.bf16 %v9691_v29 }
0x1594   : > { %v7474_v61 = vmax.f32 %v7145_v57, 0.0 }
0x1595   : > { %v5430_v22 = vpack.c.bf16 %v5284_v4, %v5283_v42  ;;  %v10426_v35 = vpack.i.bf16 %v14567_v5, %v14565_v17 }
0x1596   : > { %v7626_v21 = vpack.c.bf16 %v7474_v61, %v7473_v50  ;;  %v10418_v33 = vpop.permute.xlu0 %10417 }
0x1597   : > { %6070 = vmatmul.bf16.gmra.mxu1 %v5430_v22  ;;  %2686 = vadd.xlane.f32.xlu1 %v2685_v7 }
0x1598   : > { %v4975_v48 = vpop.f32.mrf.mxu0  ;;  %v6061_v13 = vpop.f32.mrf.mxu1  ;;  %8242 = vmatmul.bf16.gmra.mxu3 %v7626_v21 }
0x1599   : > { %v4976_v15 = vadd.f32 %v11754_v51, %v4975_v48  ;;  %v6062_v1 = vadd.f32 %v14389_v28, %v6061_v13 }
0x159b   : > { %v5285_v40 = vmul.f32 %v14271_v36, %v4976_v15  ;;  %v6380_v26 = vmax.f32 %v6062_v1, 0.0  ;;  %v10420_v1 = vunpack.i.h.bf16 %v10418_v33 }
0x159f   : > { %v7147_v24 = vpop.f32.mrf.mxu2 }
0x15a0   : > { %v4977_v2 = vpop.f32.mrf.mxu0  ;;  %v6063_v52 = vpop.f32.mrf.mxu1  ;;  %v7148_v36 = vadd.f32 %v14471_v44, %v7147_v24 }
0x15a1   : > { %v4978_v18 = vadd.f32 %v11754_v51, %v4977_v2  ;;  %v6064_v41 = vadd.f32 %v14389_v28, %v6063_v52 }
0x15a2   : > { %v7475_v54 = vmax.f32 %v7148_v36, 0.0 }
0x15a3   : > { %v5286_v0 = vmul.f32 %v14273_v46, %v4978_v18  ;;  %v6381_v6 = vmax.f32 %v6064_v41, 0.0  ;;  %v10419_v18 = vunpack.i.l.bf16 %v10418_v33 }
0x15a5   : > { %v5431_v32 = vpack.c.bf16 %v5286_v0, %v5285_v40  ;;  %v6529_v25 = vpack.c.bf16 %v6381_v6, %v6380_v26  ;;  %10427 = vrot.lane.b32.xlu2 %v10426_v35, %s11344_s13  ;;  %v2691_v0 = vsel %vm1973_vm0, %v10420_v1, 0.0 }
0x15a6   : > { %4002 = vrot.lane.b32.xlu0 %v3625_v53, %s11344_s13 }
0x15a7   : > { %v7149_v31 = vpop.f32.mrf.mxu2  ;;  %6075 = vmatmul.bf16.gmra.mxu1 %v5431_v32  ;;  %7161 = vmatmul.bf16.gmra.mxu2 %v6529_v25  ;;  %v2688_v32 = vsel %vm1973_vm0, %v10419_v18, 0.0 }
0x15a8   : > { %v7150_v56 = vadd.f32 %v14471_v44, %v7149_v31 }
0x15aa   : > { %v7476_v14 = vmax.f32 %v7150_v56, 0.0 }
0x15ac   : > { %v7627_v46 = vpack.c.bf16 %v7476_v14, %v7475_v54  ;;  %v9692_v54 = vld [vmem:[%s11536_s17 + $0x3d0] sm:$0xff]  }
0x15ad   : > { %v14604_v14 = vunpack.c.l.bf16 %v9692_v54 }
0x15ae   : > { %8247 = vmatmul.bf16.gmra.mxu3 %v7627_v46  ;;  %v8233_v55 = vpop.f32.mrf.mxu3  ;;  %v14606_v46 = vunpack.c.h.bf16 %v9692_v54 }
0x15af   : > { %v8234_v57 = vadd.f32 %v14552_v38, %v8233_v55 }
0x15b1   : > { %8570 = vst [vmem:[%s11979_s22 + $0x650] sm:$0xff] %v8234_v57 }
0x15b6   : > { %v8235_v43 = vpop.f32.mrf.mxu3 }
0x15b7   : > { %v8236_v42 = vadd.f32 %v14552_v38, %v8235_v43  ;;  %v10431_v43 = vpack.i.bf16 %v14606_v46, %v14604_v14 }
0x15b9   : > { %8571 = vst [vmem:[%s11979_s22 + $0x658] sm:$0xff] %v8236_v42 }
0x15bb   : > { %v4980_v4 = vpop.f32.mrf.mxu0 }
0x15bc   : > { %v4981_v48 = vadd.f32 %v11754_v51, %v4980_v4  ;;  %v9693_v4 = vld [vmem:[%s11536_s17 + $0x3d8] sm:$0xff]  }
0x15be   : > { %v5287_v23 = vmul.f32 %v14294_v37, %v4981_v48 }
0x15bf   : > { %v2675_v50 = vpop.xlane.xlu2 %2674  ;;  %v2672_v61 = vpop.xlane.xlu1 %2671 }
0x15c0   : > { %v6066_v22 = vpop.f32.mrf.mxu1  ;;  %v2975_v7 = vmax.f32 %v2675_v50, 1e-08  ;;  %v2974_v21 = vmax.f32 %v2672_v61, 1e-08  ;;  %v14613_v61 = vunpack.c.l.bf16 %v9693_v4 }
0x15c1   : > { %v6067_v24 = vadd.f32 %v14389_v28, %v6066_v22  ;;  %v14615_v22 = vunpack.c.h.bf16 %v9693_v4 }
0x15c2   : > { %10928 = vrcp.f32 %v2975_v7 }
0x15c3   : > { %10930 = vrcp.f32 %v2974_v21  ;;  %v4982_v13 = vpop.f32.mrf.mxu0 }
0x15c4   : > { %v4983_v29 = vadd.f32 %v11754_v51, %v4982_v13  ;;  %v10436_v13 = vpack.i.bf16 %v14615_v22, %v14613_v61 }
0x15c6   : > { %v5288_v15 = vmul.f32 %v14296_v47, %v4983_v29  ;;  %v6382_v47 = vmax.f32 %v6067_v24, 0.0 }
0x15c7   : > { %v3999_v63 = vpop.permute.xlu2 %3998 }
0x15c8   : > { %v10929_v39 = vpop.eup %10928  ;;  %v6068_v2 = vpop.f32.mrf.mxu1  ;;  %8917 = vmatmul.msk.bf16.gmra.mxu0 %vm1973_vm0, %v3999_v63  ;;  %v5432_v52 = vpack.c.bf16 %v5288_v15, %v5287_v23 }
0x15c9   : > { %v10931_v40 = vpop.eup %10930  ;;  %v3487_v41 = vmul.f32 %v10929_v39, %v14448_v20  ;;  %v6069_v35 = vadd.f32 %v14389_v28, %v6068_v2  ;;  %v2678_v63 = vpop.xlane.xlu0 %2677 }
0x15ca   : > { %v3486_v37 = vmul.f32 %v10931_v40, %v14446_v59  ;;  %6080 = vmatmul.bf16.gmra.mxu1 %v5432_v52  ;;  %v2976_v39 = vmax.f32 %v2678_v63, 1e-08 }
0x15cb   : > { %v6383_v26 = vmax.f32 %v6069_v35, 0.0 }
0x15cc   : > { %v3626_v6 = vpack.c.bf16 %v3487_v41, %v3486_v37  ;;  %10932 = vrcp.f32 %v2976_v39 }
0x15cd   : > { %v6530_v53 = vpack.c.bf16 %v6383_v26, %v6382_v47 }
0x15ce   : > { %4004 = vrot.lane.b32.xlu1 %v3626_v6, %s11344_s13  ;;  %2692 = vadd.xlane.f32.xlu2 %v2691_v0 }
0x15cf   : > { %7166 = vmatmul.bf16.gmra.mxu2 %v6530_v53 }
0x15d0   : > { %v8238_v25 = vpop.f32.mrf.mxu3  ;;  %2689 = vadd.xlane.f32.xlu0 %v2688_v32 }
0x15d1   : > { %v8239_v28 = vadd.f32 %v14552_v38, %v8238_v25 }
0x15d2   : > { %v10933_v6 = vpop.eup %10932 }
0x15d3   : > { %8572 = vst [vmem:[%s11979_s22 + $0x660] sm:$0xff] %v8239_v28  ;;  %v3488_v28 = vmul.f32 %v10933_v6, %v14456_v9 }
0x15d7   : > { %v4001_v36 = vpop.permute.xlu1 %4000 }
0x15d8   : > { %8918 = vmatmul.msk.bf16.gmra.mxu0 %vm1973_vm0, %v4001_v36  ;;  %v8240_v31 = vpop.f32.mrf.mxu3 }
0x15d9   : > { %v8241_v56 = vadd.f32 %v14552_v38, %v8240_v31 }
0x15db   : > { %8573 = vst [vmem:[%s11979_s22 + $0x668] sm:$0xff] %v8241_v56 }
0x15de   : > { %v7152_v55 = vpop.f32.mrf.mxu2 }
0x15df   : > { %v10423_v57 = vpop.permute.xlu1 %10422  ;;  %v7153_v7 = vadd.f32 %v14471_v44, %v7152_v55 }
0x15e0   : > { %v10425_v42 = vunpack.i.h.bf16 %v10423_v57  ;;  %v10424_v15 = vunpack.i.l.bf16 %v10423_v57 }
0x15e1   : > { %v7477_v29 = vmax.f32 %v7153_v7, 0.0 }
0x15e2   : > { %v2697_v50 = vsel %vm1973_vm0, %v10425_v42, 0.0  ;;  %v2694_v1 = vsel %vm1973_vm0, %v10424_v15, 0.0  ;;  %v14637_v15 = vld [vmem:[#allocation8] ss:$0 sm:$0xff] }
0x15e3   : > { %2698 = vadd.xlane.f32.xlu2 %v2697_v50 }
0x15e4   : > { %10432 = vrot.lane.b32.xlu0 %v10431_v43, %s11344_s13 }
0x15e6   : > { %v7154_v21 = vpop.f32.mrf.mxu2 }
0x15e7   : > { %v7155_v48 = vadd.f32 %v14471_v44, %v7154_v21 }
0x15e9   : > { %v7478_v23 = vmax.f32 %v7155_v48, 0.0 }
0x15eb   : > { %v7628_v33 = vpack.c.bf16 %v7478_v23, %v7477_v29 }
0x15ec   : > { %10437 = vrot.lane.b32.xlu0 %v10436_v13, %s11344_s13 }
0x15ed   : > { %8252 = vmatmul.bf16.gmra.mxu3 %v7628_v33 }
0x15f6   : > { %v4985_v24 = vpop.f32.mrf.mxu0 }
0x15f7   : > { %v4986_v2 = vadd.f32 %v11754_v51, %v4985_v24 }
0x15f8   : > { %2695 = vadd.xlane.f32.xlu1 %v2694_v1 }
0x15f9   : > { %v5289_v41 = vmul.f32 %v14336_v60, %v4986_v2 }
0x15fe   : > { %v4987_v52 = vpop.f32.mrf.mxu0 }
0x15ff   : > { %v4988_v40 = vadd.f32 %v11754_v51, %v4987_v52 }
0x1600   : > { %v2681_v18 = vpop.xlane.xlu2 %2680 }
0x1601   : > { %v5290_v35 = vmul.f32 %v14338_v11, %v4988_v40  ;;  %v2977_v37 = vmax.f32 %v2681_v18, 1e-08  ;;  %v9694_v18 = vld [vmem:[%s11536_s17 + $0x3e0] sm:$0xff]  }
0x1602   : > { %v7157_v47 = vpop.f32.mrf.mxu2 }
0x1603   : > { %10934 = vrcp.f32 %v2977_v37  ;;  %v5433_v26 = vpack.c.bf16 %v5290_v35, %v5289_v41  ;;  %v7158_v25 = vadd.f32 %v14471_v44, %v7157_v47  ;;  %v14644_v35 = vunpack.c.l.bf16 %v9694_v18 }
0x1604   : > { %v14646_v37 = vunpack.c.h.bf16 %v9694_v18 }
0x1605   : > { %6085 = vmatmul.bf16.gmra.mxu1 %v5433_v26  ;;  %v2684_v0 = vpop.xlane.xlu0 %2683  ;;  %v7479_v57 = vmax.f32 %v7158_v25, 0.0 }
0x1606   : > { %v2978_v53 = vmax.f32 %v2684_v0, 1e-08  ;;  %v10441_v6 = vpack.i.bf16 %v14646_v37, %v14644_v35 }
0x1608   : > { %10936 = vrcp.f32 %v2978_v53  ;;  %v10428_v55 = vpop.permute.xlu2 %10427 }
0x1609   : > { %v10935_v32 = vpop.eup %10934  ;;  %v10429_v4 = vunpack.i.l.bf16 %v10428_v55 }
0x160a   : > { %v3489_v36 = vmul.f32 %v10935_v32, %v14458_v10  ;;  %v7159_v31 = vpop.f32.mrf.mxu2  ;;  %v2687_v56 = vpop.xlane.xlu1 %2686 }
0x160b   : > { %v7160_v60 = vadd.f32 %v14471_v44, %v7159_v31  ;;  %v2979_v11 = vmax.f32 %v2687_v56, 1e-08  ;;  %v2700_v21 = vsel %vm1973_vm0, %v10429_v4, 0.0 }
0x160c   : > { %v3627_v54 = vpack.c.bf16 %v3489_v36, %v3488_v28 }
0x160d   : > { %v7480_v43 = vmax.f32 %v7160_v60, 0.0  ;;  %10938 = vrcp.f32 %v2979_v11 }
0x160e   : > { %4006 = vrot.lane.b32.xlu2 %v3627_v54, %s11344_s13  ;;  %v10937_v50 = vpop.eup %10936  ;;  %v10430_v54 = vunpack.i.h.bf16 %v10428_v55 }
0x160f   : > { %v7629_v42 = vpack.c.bf16 %v7480_v43, %v7479_v57  ;;  %v3490_v48 = vmul.f32 %v10937_v50, %v14487_v58 }
0x1611   : > { %8257 = vmatmul.bf16.gmra.mxu3 %v7629_v42 }
0x1613   : > { %v10939_v7 = vpop.eup %10938 }
0x1614   : > { %v3491_v13 = vmul.f32 %v10939_v7, %v14489_v34  ;;  %v6071_v29 = vpop.f32.mrf.mxu1  ;;  %v2703_v7 = vsel %vm1973_vm0, %v10430_v54, 0.0 }
0x1615   : > { %v6072_v1 = vadd.f32 %v14637_v15, %v6071_v29  ;;  %v9695_v29 = vld [vmem:[%s11536_s17 + $0x3e8] sm:$0xff]  }
0x1616   : > { %v3628_v23 = vpack.c.bf16 %v3491_v13, %v3490_v48  ;;  %2701 = vadd.xlane.f32.xlu0 %v2700_v21 }
0x1617   : > { %v6384_v52 = vmax.f32 %v6072_v1, 0.0 }
0x1618   : > { %v4003_v33 = vpop.permute.xlu0 %4002  ;;  %4008 = vrot.lane.b32.xlu1 %v3628_v23, %s11344_s13  ;;  %v14664_v23 = vunpack.c.l.bf16 %v9695_v29 }
0x1619   : > { %8919 = vmatmul.msk.bf16.gmra.mxu0 %vm1973_vm0, %v4003_v33  ;;  %v14666_v33 = vunpack.c.h.bf16 %v9695_v29 }
0x161b   : > { %v8243_v24 = vpop.f32.mrf.mxu3  ;;  %v10446_v1 = vpack.i.bf16 %v14666_v33, %v14664_v23 }
0x161c   : > { %v8244_v63 = vadd.f32 %v14552_v38, %v8243_v24  ;;  %v6073_v39 = vpop.f32.mrf.mxu1 }
0x161d   : > { %v6074_v2 = vadd.f32 %v14637_v15, %v6073_v39 }
0x161e   : > { %8574 = vst [vmem:[%s11979_s22 + $0x670] sm:$0xff] %v8244_v63 }
0x161f   : > { %v6385_v40 = vmax.f32 %v6074_v2, 0.0 }
0x1621   : > { %v6531_v41 = vpack.c.bf16 %v6385_v40, %v6384_v52 }
0x1623   : > { %7171 = vmatmul.bf16.gmra.mxu2 %v6531_v41  ;;  %v8245_v47 = vpop.f32.mrf.mxu3 }
0x1624   : > { %v8246_v26 = vadd.f32 %v14552_v38, %v8245_v47  ;;  %v6076_v0 = vpop.f32.mrf.mxu1 }
0x1625   : > { %v6077_v32 = vadd.f32 %v14637_v15, %v6076_v0 }
0x1626   : > { %8575 = vst [vmem:[%s11979_s22 + $0x678] sm:$0xff] %v8246_v26 }
0x1627   : > { %v6386_v36 = vmax.f32 %v6077_v32, 0.0 }
0x162a   : > { %v7162_v53 = vpop.f32.mrf.mxu2  ;;  %10442 = vrot.lane.b32.xlu0 %v10441_v6, %s11344_s13 }
0x162b   : > { %v7163_v56 = vadd.f32 %v14471_v44, %v7162_v53 }
0x162c   : > { %v6078_v25 = vpop.f32.mrf.mxu1 }
0x162d   : > { %v6079_v28 = vadd.f32 %v14637_v15, %v6078_v25  ;;  %v7481_v4 = vmax.f32 %v7163_v56, 0.0 }
0x162f   : > { %v6387_v31 = vmax.f32 %v6079_v28, 0.0 }
0x1631   : > { %v8248_v60 = vpop.f32.mrf.mxu3  ;;  %v6532_v11 = vpack.c.bf16 %v6387_v31, %v6386_v36 }
0x1632   : > { %v8249_v57 = vadd.f32 %v14552_v38, %v8248_v60  ;;  %v7164_v43 = vpop.f32.mrf.mxu2  ;;  %10447 = vrot.lane.b32.xlu0 %v10446_v1, %s11344_s13 }
0x1633   : > { %v7165_v42 = vadd.f32 %v14471_v44, %v7164_v43  ;;  %7176 = vmatmul.bf16.gmra.mxu2 %v6532_v11 }
0x1634   : > { %8576 = vst [vmem:[%s11979_s22 + $0x680] sm:$0xff] %v8249_v57 }
0x1635   : > { %v7482_v50 = vmax.f32 %v7165_v42, 0.0 }
0x1637   : > { %2704 = vadd.xlane.f32.xlu2 %v2703_v7  ;;  %v7630_v21 = vpack.c.bf16 %v7482_v50, %v7481_v4 }
0x1639   : > { %v8250_v48 = vpop.f32.mrf.mxu3  ;;  %8262 = vmatmul.bf16.gmra.mxu3 %v7630_v21 }
0x163a   : > { %v8251_v13 = vadd.f32 %v14552_v38, %v8250_v48 }
0x163c   : > { %8577 = vst [vmem:[%s11979_s22 + $0x688] sm:$0xff] %v8251_v13 }
0x1640   : > { %v4005_v55 = vpop.permute.xlu1 %4004 }
0x1641   : > { %8920 = vmatmul.msk.bf16.gmra.mxu0 %vm1973_vm0, %v4005_v55  ;;  %v2693_v31 = vpop.xlane.xlu2 %2692 }
0x1642   : > { %v2981_v21 = vmax.f32 %v2693_v31, 1e-08  ;;  %v9696_v31 = vld [vmem:[%s11536_s17 + $0x3f0] sm:$0xff]  }
0x1643   : > { %v2690_v52 = vpop.xlane.xlu0 %2689 }
0x1644   : > { %v2980_v55 = vmax.f32 %v2690_v52, 1e-08  ;;  %10940 = vrcp.f32 %v2981_v21 }
0x1645   : > { %v4990_v24 = vpop.f32.mrf.mxu0 }
0x1646   : > { %v4991_v39 = vadd.f32 %v11754_v51, %v4990_v24  ;;  %10942 = vrcp.f32 %v2980_v55 }
0x1647   : > { %v6081_v63 = vpop.f32.mrf.mxu1 }
0x1648   : > { %v6082_v40 = vadd.f32 %v14637_v15, %v6081_v63  ;;  %v5291_v47 = vmul.f32 %v14349_v19, %v4991_v39 }
0x164a   : > { %v6388_v6 = vmax.f32 %v6082_v40, 0.0  ;;  %v10941_v39 = vpop.eup %10940 }
0x164c   : > { %v10943_v40 = vpop.eup %10942 }
0x164d   : > { %v4992_v2 = vpop.f32.mrf.mxu0 }
0x164e   : > { %v4993_v18 = vadd.f32 %v11754_v51, %v4992_v2 }
0x164f   : > { %v6083_v41 = vpop.f32.mrf.mxu1 }
0x1650   : > { %v5292_v26 = vmul.f32 %v14351_v3, %v4993_v18  ;;  %v6084_v0 = vadd.f32 %v14637_v15, %v6083_v41  ;;  %v3492_v41 = vmul.f32 %v10943_v40, %v14502_v45 }
0x1652   : > { %v6389_v53 = vmax.f32 %v6084_v0, 0.0  ;;  %v7167_v32 = vpop.f32.mrf.mxu2  ;;  %v5434_v25 = vpack.c.bf16 %v5292_v26, %v5291_v47 }
0x1653   : > { %v7168_v54 = vadd.f32 %v14471_v44, %v7167_v32 }
0x1654   : > { %6090 = vmatmul.bf16.gmra.mxu1 %v5434_v25  ;;  %v6533_v28 = vpack.c.bf16 %v6389_v53, %v6388_v6 }
0x1655   : > { %v4995_v36 = vpop.f32.mrf.mxu0  ;;  %v7483_v4 = vmax.f32 %v7168_v54, 0.0  ;;  %v14697_v54 = vunpack.c.l.bf16 %v9696_v31 }
0x1656   : > { %7181 = vmatmul.bf16.gmra.mxu2 %v6533_v28  ;;  %v10433_v56 = vpop.permute.xlu0 %10432  ;;  %v4996_v42 = vadd.f32 %v11754_v51, %v4995_v36  ;;  %v2699_v13 = vpop.xlane.xlu2 %2698 }
0x1657   : > { %v10435_v60 = vunpack.i.h.bf16 %v10433_v56  ;;  %v10434_v11 = vunpack.i.l.bf16 %v10433_v56 }
0x1658   : > { %v5293_v1 = vmul.f32 %v14374_v49, %v4996_v42  ;;  %v3493_v49 = vmul.f32 %v10941_v39, %v14504_v16 }
0x1659   : > { %v2709_v19 = vsel %vm1973_vm0, %v10435_v60, 0.0  ;;  %v2706_v3 = vsel %vm1973_vm0, %v10434_v11, 0.0 }
0x165a   : > { %v7169_v57 = vpop.f32.mrf.mxu2  ;;  %2710 = vadd.xlane.f32.xlu2 %v2709_v19  ;;  %2707 = vadd.xlane.f32.xlu1 %v2706_v3  ;;  %v3629_v53 = vpack.c.bf16 %v3493_v49, %v3492_v41  ;;  %v14699_v19 = vunpack.c.h.bf16 %v9696_v31 }
0x165b   : > { %v7170_v43 = vadd.f32 %v14471_v44, %v7169_v57  ;;  %v2983_v44 = vmax.f32 %v2699_v13, 1e-08 }
0x165c   : > { %v10451_v3 = vpack.i.bf16 %v14699_v19, %v14697_v54 }
0x165d   : > { %v7484_v50 = vmax.f32 %v7170_v43, 0.0  ;;  %v4997_v7 = vpop.f32.mrf.mxu0  ;;  %10944 = vrcp.f32 %v2983_v44 }
0x165e   : > { %v4998_v48 = vadd.f32 %v11754_v51, %v4997_v7  ;;  %v10438_v52 = vpop.permute.xlu0 %10437 }
0x165f   : > { %v7631_v29 = vpack.c.bf16 %v7484_v50, %v7483_v4  ;;  %v10439_v47 = vunpack.i.l.bf16 %v10438_v52 }
0x1660   : > { %v5294_v24 = vmul.f32 %v14376_v12, %v4998_v48 }
0x1661   : > { %8267 = vmatmul.bf16.gmra.mxu3 %v7631_v29  ;;  %v2712_v26 = vsel %vm1973_vm0, %v10439_v47, 0.0 }
0x1662   : > { %v5435_v63 = vpack.c.bf16 %v5294_v24, %v5293_v1  ;;  %2713 = vadd.xlane.f32.xlu0 %v2712_v26  ;;  %v10440_v1 = vunpack.i.h.bf16 %v10438_v52 }
0x1663   : > { %v10945_v0 = vpop.eup %10944 }
0x1664   : > { %6095 = vmatmul.bf16.gmra.mxu1 %v5435_v63  ;;  %v3495_v25 = vmul.f32 %v10945_v0, %v14538_v27  ;;  %v2715_v63 = vsel %vm1973_vm0, %v10440_v1, 0.0 }
0x1668   : > { %v4007_v2 = vpop.permute.xlu2 %4006 }
0x1669   : > { %8921 = vmatmul.msk.bf16.gmra.mxu0 %vm1973_vm0, %v4007_v2 }
0x166b   : > { %v2696_v18 = vpop.xlane.xlu1 %2695 }
0x166c   : > { %v2982_v12 = vmax.f32 %v2696_v18, 1e-08 }
0x166e   : > { %10946 = vrcp.f32 %v2982_v12 }
0x1670   : > { %v8253_v6 = vpop.f32.mrf.mxu3 }
0x1671   : > { %v8254_v32 = vadd.f32 %v14552_v38, %v8253_v6 }
0x1672   : > { %4010 = vrot.lane.b32.xlu2 %v3629_v53, %s11344_s13 }
0x1673   : > { %8578 = vst [vmem:[%s11979_s22 + $0x690] sm:$0xff] %v8254_v32 }
0x1674   : > { %v10947_v28 = vpop.eup %10946 }
0x1675   : > { %v3494_v36 = vmul.f32 %v10947_v28, %v14536_v8 }
0x1677   : > { %v3630_v56 = vpack.c.bf16 %v3495_v25, %v3494_v36  ;;  %v9697_v25 = vld [vmem:[%s11536_s17 + $0x3f8] sm:$0xff]   ;;  %s11271_s17 = scalar_lea.hbm %s15013_s8, 4096 }
0x1678   : > { %v8255_v60 = vpop.f32.mrf.mxu3  ;;  %v14720_v31 = vunpack.c.l.bf16 %v9697_v25  ;;  %p11273_p8 = scmp.lt.s32.totalorder %s11271_s17, %s11267_s12 }
0x1679   : > { %v8256_v11 = vadd.f32 %v14552_v38, %v8255_v60  ;;  %4012 = vrot.lane.b32.xlu1 %v3630_v56, %s11344_s13  ;;  %v14722_v56 = vunpack.c.h.bf16 %v9697_v25  ;;  %v14724_v60 = vld [vmem:[#allocation11] ss:$0 sm:$0xff] }
0x167a   : > { %p11274_p7 = por %p11273_p8, %p11272_p12 }
0x167b   : > { %8579 = vst [vmem:[%s11979_s22 + $0x698] sm:$0xff] %v8256_v11 }
0x167c   : > { %p11275_p9 = pnand %p11274_p7, %p11270_p4 }
0x1681   : > { %10452 = vrot.lane.b32.xlu1 %v10451_v3, %s11344_s13  ;;  %v10456_v3 = vpack.i.bf16 %v14722_v56, %v14720_v31 }
0x1682   : > { %v6086_v57 = vpop.f32.mrf.mxu1 }
0x1683   : > { %v6087_v43 = vadd.f32 %v14637_v15, %v6086_v57 }
0x1685   : > { %v6390_v7 = vmax.f32 %v6087_v43, 0.0 }
0x1689   : > { %v2702_v13 = vpop.xlane.xlu0 %2701 }
0x168a   : > { %v6088_v42 = vpop.f32.mrf.mxu1  ;;  %v4009_v4 = vpop.permute.xlu1 %4008  ;;  %v2984_v53 = vmax.f32 %v2702_v13, 1e-08 }
0x168b   : > { %v6089_v50 = vadd.f32 %v14637_v15, %v6088_v42  ;;  %8922 = vmatmul.msk.bf16.gmra.mxu0 %vm1973_vm0, %v4009_v4 }
0x168c   : > { %10948 = vrcp.f32 %v2984_v53 }
0x168d   : > { %v6391_v21 = vmax.f32 %v6089_v50, 0.0 }
0x168f   : > { %v6534_v48 = vpack.c.bf16 %v6391_v21, %v6390_v7 }
0x1691   : > { %7186 = vmatmul.bf16.gmra.mxu2 %v6534_v48 }
0x1692   : > { %v10949_v57 = vpop.eup %10948 }
0x1693   : > { %v3496_v7 = vmul.f32 %v10949_v57, %v14565_v17 }
0x1694   : > { %v8258_v55 = vpop.f32.mrf.mxu3 }
0x1695   : > { %v8259_v29 = vadd.f32 %v14552_v38, %v8258_v55 }
0x1696   : > { %v5000_v24 = vpop.f32.mrf.mxu0 }
0x1697   : > { %8580 = vst [vmem:[%s11979_s22 + $0x6a0] sm:$0xff] %v8259_v29  ;;  %v5001_v2 = vadd.f32 %v11754_v51, %v5000_v24 }
0x1699   : > { %v5295_v52 = vmul.f32 %v14396_v30, %v5001_v2 }
0x169b   : > { %2716 = vadd.xlane.f32.xlu2 %v2715_v63 }
0x169c   : > { %v8260_v44 = vpop.f32.mrf.mxu3  ;;  %v10443_v39 = vpop.permute.xlu0 %10442 }
0x169d   : > { %v8261_v40 = vadd.f32 %v14552_v38, %v8260_v44  ;;  %v10444_v18 = vunpack.i.l.bf16 %v10443_v39  ;;  %v10445_v0 = vunpack.i.h.bf16 %v10443_v39 }
0x169e   : > { %v5002_v41 = vpop.f32.mrf.mxu0 }
0x169f   : > { %8581 = vst [vmem:[%s11979_s22 + $0x6a8] sm:$0xff] %v8261_v40  ;;  %v5003_v49 = vadd.f32 %v11754_v51, %v5002_v41  ;;  %v2718_v12 = vsel %vm1973_vm0, %v10444_v18, 0.0  ;;  %v2721_v32 = vsel %vm1973_vm0, %v10445_v0, 0.0 }
0x16a0   : > { %2719 = vadd.xlane.f32.xlu0 %v2718_v12 }
0x16a1   : > { %v5296_v47 = vmul.f32 %v14398_v62, %v5003_v49 }
0x16a3   : > { %v5436_v26 = vpack.c.bf16 %v5296_v47, %v5295_v52 }
0x16a5   : > { %6100 = vmatmul.bf16.gmra.mxu1 %v5436_v26 }
0x16a6   : > { %v7172_v6 = vpop.f32.mrf.mxu2 }
0x16a7   : > { %v7173_v30 = vadd.f32 %v14724_v60, %v7172_v6 }
0x16a9   : > { %v7485_v43 = vmax.f32 %v7173_v30, 0.0 }
0x16aa   : > { %v2705_v28 = vpop.xlane.xlu2 %2704 }
0x16ab   : > { %v2985_v36 = vmax.f32 %v2705_v28, 1e-08  ;;  %2722 = vadd.xlane.f32.xlu1 %v2721_v32 }
0x16ad   : > { %10950 = vrcp.f32 %v2985_v36  ;;  %v10448_v36 = vpop.permute.xlu0 %10447 }
0x16ae   : > { %v7174_v62 = vpop.f32.mrf.mxu2 }
0x16af   : > { %v7175_v11 = vadd.f32 %v14724_v60, %v7174_v62  ;;  %v10450_v62 = vunpack.i.h.bf16 %v10448_v36 }
0x16b1   : > { %v7486_v42 = vmax.f32 %v7175_v11, 0.0 }
0x16b3   : > { %v10951_v4 = vpop.eup %10950  ;;  %v7632_v50 = vpack.c.bf16 %v7486_v42, %v7485_v43  ;;  %10457 = vrot.lane.b32.xlu2 %v10456_v3, %s11344_s13 }
0x16b4   : > { %v3497_v21 = vmul.f32 %v10951_v4, %v14567_v5  ;;  %v2727_v4 = vsel %vm1973_vm0, %v10450_v62, 0.0 }
0x16b5   : > { %8272 = vmatmul.bf16.gmra.mxu3 %v7632_v50 }
0x16b6   : > { %v7177_v48 = vpop.f32.mrf.mxu2  ;;  %v3631_v13 = vpack.c.bf16 %v3497_v21, %v3496_v7  ;;  %v10449_v21 = vunpack.i.l.bf16 %v10448_v36 }
0x16b7   : > { %v7178_v29 = vadd.f32 %v14724_v60, %v7177_v48 }
0x16b8   : > { %4014 = vrot.lane.b32.xlu0 %v3631_v13, %s11344_s13 }
0x16b9   : > { %v7487_v39 = vmax.f32 %v7178_v29, 0.0  ;;  %v2724_v29 = vsel %vm1973_vm0, %v10449_v21, 0.0 }
0x16bc   : > { %v8263_v55 = vpop.f32.mrf.mxu3 }
0x16bd   : > { %v8264_v1 = vadd.f32 %v14552_v38, %v8263_v55 }
0x16be   : > { %v5005_v24 = vpop.f32.mrf.mxu0  ;;  %v7179_v63 = vpop.f32.mrf.mxu2 }
0x16bf   : > { %8582 = vst [vmem:[%s11979_s22 + $0x6b0] sm:$0xff] %v8264_v1  ;;  %v7180_v44 = vadd.f32 %v14724_v60, %v7179_v63  ;;  %v5006_v41 = vadd.f32 %v11754_v51, %v5005_v24 }
0x16c1   : > { %v7488_v2 = vmax.f32 %v7180_v44, 0.0  ;;  %v5297_v47 = vmul.f32 %v14446_v59, %v5006_v41 }
0x16c3   : > { %v7633_v40 = vpack.c.bf16 %v7488_v2, %v7487_v39 }
0x16c4   : > { %v8265_v18 = vpop.f32.mrf.mxu3 }
0x16c5   : > { %v8266_v49 = vadd.f32 %v14552_v38, %v8265_v18  ;;  %8277 = vmatmul.bf16.gmra.mxu3 %v7633_v40 }
0x16c6   : > { %v5007_v12 = vpop.f32.mrf.mxu0 }
0x16c7   : > { %8583 = vst [vmem:[%s11979_s22 + $0x6b8] sm:$0xff] %v8266_v49  ;;  %v5008_v52 = vadd.f32 %v11754_v51, %v5007_v12 }
0x16c9   : > { %v5298_v26 = vmul.f32 %v14448_v20, %v5008_v52 }
0x16cb   : > { %v5437_v0 = vpack.c.bf16 %v5298_v26, %v5297_v47 }
0x16cd   : > { %6105 = vmatmul.bf16.gmra.mxu1 %v5437_v0  ;;  %v2711_v6 = vpop.xlane.xlu2 %2710  ;;  %v2708_v53 = vpop.xlane.xlu1 %2707 }
0x16ce   : > { %v2987_v32 = vmax.f32 %v2711_v6, 1e-08  ;;  %v2986_v25 = vmax.f32 %v2708_v53, 1e-08 }
0x16d0   : > { %10952 = vrcp.f32 %v2987_v32 }
0x16d1   : > { %10954 = vrcp.f32 %v2986_v25  ;;  %v6091_v28 = vpop.f32.mrf.mxu1 }
0x16d2   : > { %v6092_v57 = vadd.f32 %v14637_v15, %v6091_v28 }
0x16d4   : > { %v6392_v48 = vmax.f32 %v6092_v57, 0.0 }
0x16d5   : > { %v4011_v30 = vpop.permute.xlu2 %4010 }
0x16d6   : > { %v10953_v11 = vpop.eup %10952  ;;  %8923 = vmatmul.msk.bf16.gmra.mxu0 %vm1973_vm0, %v4011_v30 }
0x16d7   : > { %v10955_v3 = vpop.eup %10954  ;;  %v3499_v59 = vmul.f32 %v10953_v11, %v14606_v46 }
0x16d8   : > { %v3498_v20 = vmul.f32 %v10955_v3, %v14604_v14 }
0x16d9   : > { %v7182_v43 = vpop.f32.mrf.mxu2  ;;  %v6093_v42 = vpop.f32.mrf.mxu1 }
0x16da   : > { %v6094_v50 = vadd.f32 %v14637_v15, %v6093_v42  ;;  %v3632_v7 = vpack.c.bf16 %v3499_v59, %v3498_v20  ;;  %v7183_v1 = vadd.f32 %v14724_v60, %v7182_v43  ;;  %v2714_v42 = vpop.xlane.xlu0 %2713 }
0x16dc   : > { %v6393_v13 = vmax.f32 %v6094_v50, 0.0  ;;  %4016 = vrot.lane.b32.xlu1 %v3632_v7, %s11344_s13  ;;  %2728 = vadd.xlane.f32.xlu2 %v2727_v4  ;;  %v7489_v39 = vmax.f32 %v7183_v1, 0.0  ;;  %v2988_v50 = vmax.f32 %v2714_v42, 1e-08 }
0x16de   : > { %v6535_v55 = vpack.c.bf16 %v6393_v13, %v6392_v48  ;;  %10956 = vrcp.f32 %v2988_v50 }
0x16e0   : > { %7191 = vmatmul.bf16.gmra.mxu2 %v6535_v55 }
0x16e1   : > { %v7184_v24 = vpop.f32.mrf.mxu2  ;;  %v6096_v63 = vpop.f32.mrf.mxu1 }
0x16e2   : > { %v7185_v44 = vadd.f32 %v14724_v60, %v7184_v24  ;;  %2725 = vadd.xlane.f32.xlu0 %v2724_v29  ;;  %v6097_v12 = vadd.f32 %v14637_v15, %v6096_v63 }
0x16e4   : > { %v7490_v2 = vmax.f32 %v7185_v44, 0.0  ;;  %v8268_v40 = vpop.f32.mrf.mxu3  ;;  %v6394_v0 = vmax.f32 %v6097_v12, 0.0  ;;  %v10957_v1 = vpop.eup %10956 }
0x16e5   : > { %v8269_v18 = vadd.f32 %v14552_v38, %v8268_v40 }
0x16e6   : > { %v5010_v41 = vpop.f32.mrf.mxu0  ;;  %v7634_v49 = vpack.c.bf16 %v7490_v2, %v7489_v39  ;;  %v3500_v2 = vmul.f32 %v10957_v1, %v14613_v61 }
0x16e7   : > { %8584 = vst [vmem:[%s11979_s22 + $0x6c0] sm:$0xff] %v8269_v18  ;;  %v5011_v32 = vadd.f32 %v11754_v51, %v5010_v41 }
0x16e8   : > { %8282 = vmatmul.bf16.gmra.mxu3 %v7634_v49 }
0x16e9   : > { %v6098_v52 = vpop.f32.mrf.mxu1  ;;  %v5299_v62 = vmul.f32 %v14456_v9, %v5011_v32 }
0x16ea   : > { %v6099_v47 = vadd.f32 %v14637_v15, %v6098_v52 }
0x16eb   : > { %v4013_v26 = vpop.permute.xlu1 %4012 }
0x16ec   : > { %v6395_v6 = vmax.f32 %v6099_v47, 0.0  ;;  %8924 = vmatmul.msk.bf16.gmra.mxu0 %vm1973_vm0, %v4013_v26  ;;  %v8270_v53 = vpop.f32.mrf.mxu3 }
0x16ed   : > { %v8271_v25 = vadd.f32 %v14552_v38, %v8270_v53 }
0x16ee   : > { %v5012_v28 = vpop.f32.mrf.mxu0  ;;  %v6536_v36 = vpack.c.bf16 %v6395_v6, %v6394_v0 }
0x16ef   : > { %8585 = vst [vmem:[%s11979_s22 + $0x6c8] sm:$0xff] %v8271_v25  ;;  %v5013_v30 = vadd.f32 %v11754_v51, %v5012_v28 }
0x16f0   : > { %7196 = vmatmul.bf16.gmra.mxu2 %v6536_v36 }
0x16f1   : > { %v5300_v11 = vmul.f32 %v14458_v10, %v5013_v30 }
0x16f3   : > { %v5438_v3 = vpack.c.bf16 %v5300_v11, %v5299_v62  ;;  %v10453_v59 = vpop.permute.xlu1 %10452 }
0x16f4   : > { %v10454_v20 = vunpack.i.l.bf16 %v10453_v59  ;;  %v10455_v43 = vunpack.i.h.bf16 %v10453_v59 }
0x16f5   : > { %6110 = vmatmul.bf16.gmra.mxu1 %v5438_v3 }
0x16f6   : > { %v2730_v57 = vsel %vm1973_vm0, %v10454_v20, 0.0  ;;  %v2733_v38 = vsel %vm1973_vm0, %v10455_v43, 0.0 }
0x16f7   : > { %2731 = vadd.xlane.f32.xlu0 %v2730_v57 }
0x1706   : > { %2734 = vadd.xlane.f32.xlu1 %v2733_v38 }
0x1708   : > { %v5015_v4 = vpop.f32.mrf.mxu0 }
0x1709   : > { %v5016_v9 = vadd.f32 %v11754_v51, %v5015_v4 }
0x170b   : > { %v5301_v13 = vmul.f32 %v14487_v58, %v5016_v9 }
0x170e   : > { %v2717_v7 = vpop.xlane.xlu2 %2716 }
0x170f   : > { %v2989_v21 = vmax.f32 %v2717_v7, 1e-08  ;;  %v14784_v7 = vld [vmem:[#allocation14] ss:$0 sm:$0xff] }
0x1710   : > { %v5017_v10 = vpop.f32.mrf.mxu0 }
0x1711   : > { %10958 = vrcp.f32 %v2989_v21  ;;  %v5018_v48 = vadd.f32 %v11754_v51, %v5017_v10 }
0x1713   : > { %v5302_v55 = vmul.f32 %v14489_v34, %v5018_v48  ;;  %v2720_v0 = vpop.xlane.xlu0 %2719 }
0x1714   : > { %v7187_v29 = vpop.f32.mrf.mxu2  ;;  %v2990_v6 = vmax.f32 %v2720_v0, 1e-08 }
0x1715   : > { %v5439_v24 = vpack.c.bf16 %v5302_v55, %v5301_v13  ;;  %v7188_v49 = vadd.f32 %v14724_v60, %v7187_v29 }
0x1716   : > { %v10458_v63 = vpop.permute.xlu2 %10457  ;;  %10960 = vrcp.f32 %v2990_v6 }
0x1717   : > { %v10959_v44 = vpop.eup %10958  ;;  %v10459_v39 = vunpack.i.l.bf16 %v10458_v63  ;;  %6115 = vmatmul.bf16.gmra.mxu1 %v5439_v24  ;;  %v10460_v34 = vunpack.i.h.bf16 %v10458_v63  ;;  %v7491_v47 = vmax.f32 %v7188_v49, 0.0 }
0x1718   : > { %v3501_v40 = vmul.f32 %v10959_v44, %v14615_v22 }
0x1719   : > { %v2736_v18 = vsel %vm1973_vm0, %v10459_v39, 0.0  ;;  %v2739_v32 = vsel %vm1973_vm0, %v10460_v34, 0.0 }
0x171a   : > { %2737 = vadd.xlane.f32.xlu0 %v2736_v18  ;;  %v3633_v41 = vpack.c.bf16 %v3501_v40, %v3500_v2 }
0x171c   : > { %v7189_v58 = vpop.f32.mrf.mxu2  ;;  %4018 = vrot.lane.b32.xlu2 %v3633_v41, %s11344_s13  ;;  %v10961_v30 = vpop.eup %10960 }
0x171d   : > { %v7190_v12 = vadd.f32 %v14724_v60, %v7189_v58  ;;  %v3502_v43 = vmul.f32 %v10961_v30, %v14644_v35 }
0x171e   : > { %v2723_v52 = vpop.xlane.xlu1 %2722 }
0x171f   : > { %v7492_v26 = vmax.f32 %v7190_v12, 0.0  ;;  %v2991_v25 = vmax.f32 %v2723_v52, 1e-08 }
0x1721   : > { %v7635_v53 = vpack.c.bf16 %v7492_v26, %v7491_v47  ;;  %10962 = vrcp.f32 %v2991_v25 }
0x1722   : > { %v6101_v28 = vpop.f32.mrf.mxu1  ;;  %2740 = vadd.xlane.f32.xlu0 %v2739_v32 }
0x1723   : > { %8287 = vmatmul.bf16.gmra.mxu3 %v7635_v53  ;;  %v6102_v36 = vadd.f32 %v14637_v15, %v6101_v28 }
0x1725   : > { %v6396_v20 = vmax.f32 %v6102_v36, 0.0 }
0x1727   : > { %v10963_v3 = vpop.eup %10962 }
0x1728   : > { %v3503_v38 = vmul.f32 %v10963_v3, %v14646_v37 }
0x172a   : > { %v6103_v62 = vpop.f32.mrf.mxu1  ;;  %v4015_v11 = vpop.permute.xlu0 %4014  ;;  %v3634_v4 = vpack.c.bf16 %v3503_v38, %v3502_v43 }
0x172b   : > { %v6104_v59 = vadd.f32 %v14637_v15, %v6103_v62  ;;  %8925 = vmatmul.msk.bf16.gmra.mxu0 %vm1973_vm0, %v4015_v11 }
0x172d   : > { %v6397_v57 = vmax.f32 %v6104_v59, 0.0 }
0x172f   : > { %v6537_v42 = vpack.c.bf16 %v6397_v57, %v6396_v20 }
0x1731   : > { %7201 = vmatmul.bf16.gmra.mxu2 %v6537_v42 }
0x1736   : > { %4020 = vrot.lane.b32.xlu0 %v3634_v4, %s11344_s13 }
0x1738   : > { %v8273_v50 = vpop.f32.mrf.mxu3 }
0x1739   : > { %v8274_v9 = vadd.f32 %v14784_v7, %v8273_v50 }
0x173b   : > { %8586 = vst [vmem:[%s11979_s22 + $0x6d0] sm:$0xff] %v8274_v9 }
0x1740   : > { %v8275_v21 = vpop.f32.mrf.mxu3 }
0x1741   : > { %v8276_v10 = vadd.f32 %v14784_v7, %v8275_v21 }
0x1743   : > { %8587 = vst [vmem:[%s11979_s22 + $0x6d8] sm:$0xff] %v8276_v10 }
0x1748   : > { %v8278_v48 = vpop.f32.mrf.mxu3 }
0x1749   : > { %v8279_v13 = vadd.f32 %v14784_v7, %v8278_v48 }
0x174a   : > { %v6106_v55 = vpop.f32.mrf.mxu1 }
0x174b   : > { %8588 = vst [vmem:[%s11979_s22 + $0x6e0] sm:$0xff] %v8279_v13  ;;  %v6107_v44 = vadd.f32 %v14637_v15, %v6106_v55 }
0x174d   : > { %v6398_v41 = vmax.f32 %v6107_v44, 0.0 }
0x174e   : > { %v4017_v29 = vpop.permute.xlu1 %4016 }
0x174f   : > { %8926 = vmatmul.msk.bf16.gmra.mxu0 %vm1973_vm0, %v4017_v29  ;;  %v2729_v1 = vpop.xlane.xlu2 %2728 }
0x1750   : > { %v8280_v24 = vpop.f32.mrf.mxu3  ;;  %v2993_v63 = vmax.f32 %v2729_v1, 1e-08 }
0x1751   : > { %v8281_v39 = vadd.f32 %v14784_v7, %v8280_v24 }
0x1752   : > { %v6108_v2 = vpop.f32.mrf.mxu1  ;;  %10964 = vrcp.f32 %v2993_v63 }
0x1753   : > { %8589 = vst [vmem:[%s11979_s22 + $0x6e8] sm:$0xff] %v8281_v39  ;;  %v6109_v40 = vadd.f32 %v14637_v15, %v6108_v2  ;;  %v5020_v18 = vpop.f32.mrf.mxu0 }
0x1754   : > { %v5021_v47 = vadd.f32 %v11754_v51, %v5020_v18 }
0x1755   : > { %v6399_v49 = vmax.f32 %v6109_v40, 0.0  ;;  %v2726_v58 = vpop.xlane.xlu0 %2725 }
0x1756   : > { %v2992_v34 = vmax.f32 %v2726_v58, 1e-08  ;;  %v5303_v32 = vmul.f32 %v14502_v45, %v5021_v47 }
0x1757   : > { %v6538_v12 = vpack.c.bf16 %v6399_v49, %v6398_v41 }
0x1758   : > { %10966 = vrcp.f32 %v2992_v34  ;;  %v10965_v52 = vpop.eup %10964 }
0x1759   : > { %7206 = vmatmul.bf16.gmra.mxu2 %v6538_v12  ;;  %v3505_v6 = vmul.f32 %v10965_v52, %v14666_v33 }
0x175b   : > { %v5022_v26 = vpop.f32.mrf.mxu0 }
0x175c   : > { %v5023_v0 = vadd.f32 %v11754_v51, %v5022_v26 }
0x175e   : > { %v10967_v53 = vpop.eup %10966  ;;  %v5304_v25 = vmul.f32 %v14504_v16, %v5023_v0 }
0x175f   : > { %v3504_v28 = vmul.f32 %v10967_v53, %v14664_v23 }
0x1760   : > { %v5440_v36 = vpack.c.bf16 %v5304_v25, %v5303_v32 }
0x1761   : > { %v3635_v30 = vpack.c.bf16 %v3505_v6, %v3504_v28 }
0x1762   : > { %6120 = vmatmul.bf16.gmra.mxu1 %v5440_v36 }
0x1763   : > { %v7192_v62 = vpop.f32.mrf.mxu2  ;;  %4022 = vrot.lane.b32.xlu2 %v3635_v30, %s11344_s13 }
0x1764   : > { %v7193_v3 = vadd.f32 %v14724_v60, %v7192_v62 }
0x1766   : > { %v7493_v43 = vmax.f32 %v7193_v3, 0.0 }
0x1769   : > { %v5025_v11 = vpop.f32.mrf.mxu0 }
0x176a   : > { %v5026_v16 = vadd.f32 %v11754_v51, %v5025_v11  ;;  %v2732_v50 = vpop.xlane.xlu0 %2731 }
0x176b   : > { %v8283_v59 = vpop.f32.mrf.mxu3  ;;  %v7194_v20 = vpop.f32.mrf.mxu2  ;;  %v2994_v1 = vmax.f32 %v2732_v50, 1e-08 }
0x176c   : > { %v8284_v57 = vadd.f32 %v14784_v7, %v8283_v59  ;;  %v7195_v45 = vadd.f32 %v14724_v60, %v7194_v20  ;;  %v5305_v9 = vmul.f32 %v14536_v8, %v5026_v16 }
0x176d   : > { %10968 = vrcp.f32 %v2994_v1 }
0x176e   : > { %8590 = vst [vmem:[%s11979_s22 + $0x6f0] sm:$0xff] %v8284_v57  ;;  %v7494_v38 = vmax.f32 %v7195_v45, 0.0 }
0x1770   : > { %v7636_v42 = vpack.c.bf16 %v7494_v38, %v7493_v43 }
0x1771   : > { %v5027_v4 = vpop.f32.mrf.mxu0 }
0x1772   : > { %v5028_v21 = vadd.f32 %v11754_v51, %v5027_v4  ;;  %v6111_v10 = vpop.f32.mrf.mxu1  ;;  %8292 = vmatmul.bf16.gmra.mxu3 %v7636_v42 }
0x1773   : > { %v8285_v48 = vpop.f32.mrf.mxu3  ;;  %v7197_v13 = vpop.f32.mrf.mxu2  ;;  %v6112_v8 = vadd.f32 %v14637_v15, %v6111_v10 }
0x1774   : > { %v5306_v55 = vmul.f32 %v14538_v27, %v5028_v21  ;;  %v8286_v29 = vadd.f32 %v14784_v7, %v8285_v48  ;;  %v7198_v39 = vadd.f32 %v14724_v60, %v7197_v13  ;;  %v10969_v34 = vpop.eup %10968 }
0x1775   : > { %v6400_v49 = vmax.f32 %v6112_v8, 0.0  ;;  %v3506_v0 = vmul.f32 %v10969_v34, %v14697_v54 }
0x1776   : > { %8591 = vst [vmem:[%s11979_s22 + $0x6f8] sm:$0xff] %v8286_v29  ;;  %v4019_v24 = vpop.permute.xlu2 %4018  ;;  %v5441_v63 = vpack.c.bf16 %v5306_v55, %v5305_v9  ;;  %v7495_v12 = vmax.f32 %v7198_v39, 0.0 }
0x1777   : > { %8927 = vmatmul.msk.bf16.gmra.mxu0 %vm1973_vm0, %v4019_v24 }
0x1778   : > { %6125 = vmatmul.bf16.gmra.mxu1 %v5441_v63 }
0x1779   : > { %v2735_v44 = vpop.xlane.xlu1 %2734 }
0x177a   : > { %v2995_v2 = vmax.f32 %v2735_v44, 1e-08  ;;  %v6113_v40 = vpop.f32.mrf.mxu1 }
0x177b   : > { %v6114_v18 = vadd.f32 %v14637_v15, %v6113_v40  ;;  %v7199_v27 = vpop.f32.mrf.mxu2 }
0x177c   : > { %10970 = vrcp.f32 %v2995_v2  ;;  %v7200_v41 = vadd.f32 %v14724_v60, %v7199_v27 }
0x177d   : > { %v6401_v58 = vmax.f32 %v6114_v18, 0.0 }
0x177e   : > { %v7496_v52 = vmax.f32 %v7200_v41, 0.0 }
0x177f   : > { %v6539_v47 = vpack.c.bf16 %v6401_v58, %v6400_v49 }
0x1780   : > { %v7637_v26 = vpack.c.bf16 %v7496_v52, %v7495_v12 }
0x1781   : > { %7211 = vmatmul.bf16.gmra.mxu2 %v6539_v47 }
0x1782   : > { %v10971_v6 = vpop.eup %10970  ;;  %8297 = vmatmul.bf16.gmra.mxu3 %v7637_v26 }
0x1783   : > { %v3507_v53 = vmul.f32 %v10971_v6, %v14699_v19 }
0x1785   : > { %v3636_v32 = vpack.c.bf16 %v3507_v53, %v3506_v0 }
0x1787   : > { %4024 = vrot.lane.b32.xlu2 %v3636_v32, %s11344_s13 }
0x178d   : > { %v2738_v25 = vpop.xlane.xlu0 %2737 }
0x178e   : > { %v2996_v28 = vmax.f32 %v2738_v25, 1e-08 }
0x1790   : > { %10972 = vrcp.f32 %v2996_v28 }
0x1794   : > { %v6116_v36 = vpop.f32.mrf.mxu1 }
0x1795   : > { %v2741_v30 = vpop.xlane.xlu0 %2740  ;;  %v6117_v11 = vadd.f32 %v14637_v15, %v6116_v36 }
0x1796   : > { %v2997_v62 = vmax.f32 %v2741_v30, 1e-08  ;;  %v10973_v3 = vpop.eup %10972 }
0x1797   : > { %v3508_v45 = vmul.f32 %v10973_v3, %v14720_v31  ;;  %v6402_v43 = vmax.f32 %v6117_v11, 0.0 }
0x1798   : > { %10974 = vrcp.f32 %v2997_v62 }
0x179c   : > { %v6118_v59 = vpop.f32.mrf.mxu1 }
0x179d   : > { %v6119_v20 = vadd.f32 %v14637_v15, %v6118_v59 }
0x179e   : > { %v10975_v57 = vpop.eup %10974 }
0x179f   : > { %v3509_v16 = vmul.f32 %v10975_v57, %v14722_v56  ;;  %v6403_v38 = vmax.f32 %v6119_v20, 0.0 }
0x17a1   : > { %v6540_v42 = vpack.c.bf16 %v6403_v38, %v6402_v43  ;;  %v3637_v4 = vpack.c.bf16 %v3509_v16, %v3508_v45 }
0x17a3   : > { %7216 = vmatmul.bf16.gmra.mxu2 %v6540_v42  ;;  %4026 = vrot.lane.b32.xlu0 %v3637_v4, %s11344_s13 }
0x17a6   : > { %v8288_v50 = vpop.f32.mrf.mxu3 }
0x17a7   : > { %v8289_v9 = vadd.f32 %v14784_v7, %v8288_v50 }
0x17a8   : > { %v5030_v21 = vpop.f32.mrf.mxu0  ;;  %v4021_v10 = vpop.permute.xlu0 %4020 }
0x17a9   : > { %8592 = vst [vmem:[%s11979_s22 + $0x700] sm:$0xff] %v8289_v9  ;;  %8928 = vmatmul.msk.bf16.gmra.mxu0 %vm1973_vm0, %v4021_v10  ;;  %v5031_v13 = vadd.f32 %v11754_v51, %v5030_v21  ;;  %v14853_v10 = vld [vmem:[#allocation8] ss:$0 sm:$0xff] }
0x17ab   : > { %v5307_v24 = vmul.f32 %v14565_v17, %v5031_v13 }
0x17ae   : > { %v8290_v48 = vpop.f32.mrf.mxu3 }
0x17af   : > { %v8291_v55 = vadd.f32 %v14784_v7, %v8290_v48 }
0x17b0   : > { %v5032_v29 = vpop.f32.mrf.mxu0 }
0x17b1   : > { %8593 = vst [vmem:[%s11979_s22 + $0x708] sm:$0xff] %v8291_v55  ;;  %v5033_v1 = vadd.f32 %v11754_v51, %v5032_v29 }
0x17b3   : > { %v5308_v63 = vmul.f32 %v14567_v5, %v5033_v1 }
0x17b4   : > { %v7202_v8 = vpop.f32.mrf.mxu2 }
0x17b5   : > { %v5442_v44 = vpack.c.bf16 %v5308_v63, %v5307_v24  ;;  %v7203_v39 = vadd.f32 %v14724_v60, %v7202_v8 }
0x17b7   : > { %6130 = vmatmul.bf16.gmra.mxu1 %v5442_v44  ;;  %v7497_v27 = vmax.f32 %v7203_v39, 0.0 }
0x17bc   : > { %v7204_v2 = vpop.f32.mrf.mxu2 }
0x17bd   : > { %v7205_v40 = vadd.f32 %v14724_v60, %v7204_v2  ;;  %v4023_v18 = vpop.permute.xlu2 %4022 }
0x17be   : > { %8929 = vmatmul.msk.bf16.gmra.mxu0 %vm1973_vm0, %v4023_v18 }
0x17bf   : > { %v7498_v41 = vmax.f32 %v7205_v40, 0.0 }
0x17c1   : > { %v7638_v49 = vpack.c.bf16 %v7498_v41, %v7497_v27 }
0x17c3   : > { %8302 = vmatmul.bf16.gmra.mxu3 %v7638_v49 }
0x17cc   : > { %v5035_v58 = vpop.f32.mrf.mxu0 }
0x17cd   : > { %v5036_v17 = vadd.f32 %v11754_v51, %v5035_v58 }
0x17cf   : > { %v5309_v12 = vmul.f32 %v14604_v14, %v5036_v17 }
0x17d4   : > { %v5037_v34 = vpop.f32.mrf.mxu0 }
0x17d5   : > { %v5038_v5 = vadd.f32 %v11754_v51, %v5037_v34 }
0x17d7   : > { %v5310_v52 = vmul.f32 %v14606_v46, %v5038_v5 }
0x17d9   : > { %v5443_v47 = vpack.c.bf16 %v5310_v52, %v5309_v12 }
0x17db   : > { %6135 = vmatmul.bf16.gmra.mxu1 %v5443_v47 }
0x17dc   : > { %v7207_v26 = vpop.f32.mrf.mxu2 }
0x17dd   : > { %v7208_v53 = vadd.f32 %v14724_v60, %v7207_v26 }
0x17df   : > { %v6121_v0 = vpop.f32.mrf.mxu1  ;;  %v7499_v36 = vmax.f32 %v7208_v53, 0.0 }
0x17e0   : > { %v6122_v28 = vadd.f32 %v14637_v15, %v6121_v0 }
0x17e1   : > { %v4025_v6 = vpop.permute.xlu2 %4024 }
0x17e2   : > { %8930 = vmatmul.msk.bf16.gmra.mxu0 %vm1973_vm0, %v4025_v6  ;;  %v6404_v11 = vmax.f32 %v6122_v28, 0.0 }
0x17e4   : > { %v7209_v32 = vpop.f32.mrf.mxu2 }
0x17e5   : > { %v7210_v25 = vadd.f32 %v14724_v60, %v7209_v32 }
0x17e7   : > { %v7500_v30 = vmax.f32 %v7210_v25, 0.0  ;;  %v6123_v14 = vpop.f32.mrf.mxu1 }
0x17e8   : > { %v6124_v46 = vadd.f32 %v14637_v15, %v6123_v14 }
0x17e9   : > { %v7639_v62 = vpack.c.bf16 %v7500_v30, %v7499_v36 }
0x17ea   : > { %v6405_v3 = vmax.f32 %v6124_v46, 0.0 }
0x17eb   : > { %8307 = vmatmul.bf16.gmra.mxu3 %v7639_v62 }
0x17ec   : > { %v6541_v59 = vpack.c.bf16 %v6405_v3, %v6404_v11 }
0x17ee   : > { %7221 = vmatmul.bf16.gmra.mxu2 %v6541_v59 }
0x17f4   : > { %v5040_v20 = vpop.f32.mrf.mxu0 }
0x17f5   : > { %v6126_v57 = vpop.f32.mrf.mxu1  ;;  %v8293_v45 = vpop.f32.mrf.mxu3  ;;  %v5041_v38 = vadd.f32 %v11754_v51, %v5040_v20 }
0x17f6   : > { %v8294_v43 = vadd.f32 %v14784_v7, %v8293_v45  ;;  %v6127_v16 = vadd.f32 %v14637_v15, %v6126_v57 }
0x17f7   : > { %v5311_v55 = vmul.f32 %v14613_v61, %v5041_v38 }
0x17f8   : > { %8594 = vst [vmem:[%s11979_s22 + $0x710] sm:$0xff] %v8294_v43  ;;  %v6406_v21 = vmax.f32 %v6127_v16, 0.0 }
0x17fc   : > { %v5042_v42 = vpop.f32.mrf.mxu0 }
0x17fd   : > { %v5043_v4 = vadd.f32 %v11754_v51, %v5042_v42  ;;  %v6128_v50 = vpop.f32.mrf.mxu1  ;;  %v8295_v9 = vpop.f32.mrf.mxu3 }
0x17fe   : > { %v6129_v48 = vadd.f32 %v14853_v10, %v6128_v50  ;;  %v8296_v13 = vadd.f32 %v14784_v7, %v8295_v9 }
0x17ff   : > { %v5312_v29 = vmul.f32 %v14615_v22, %v5043_v4 }
0x1800   : > { %v6407_v15 = vmax.f32 %v6129_v48, 0.0  ;;  %8595 = vst [vmem:[%s11979_s22 + $0x718] sm:$0xff] %v8296_v13 }
0x1801   : > { %v5444_v1 = vpack.c.bf16 %v5312_v29, %v5311_v55 }
0x1802   : > { %v6542_v24 = vpack.c.bf16 %v6407_v15, %v6406_v21 }
0x1803   : > { %6140 = vmatmul.bf16.gmra.mxu1 %v5444_v1 }
0x1804   : > { %7226 = vmatmul.bf16.gmra.mxu2 %v6542_v24  ;;  %v7212_v63 = vpop.f32.mrf.mxu2 }
0x1805   : > { %v8298_v8 = vpop.f32.mrf.mxu3  ;;  %v7213_v39 = vadd.f32 %v14724_v60, %v7212_v63 }
0x1806   : > { %v8299_v44 = vadd.f32 %v14784_v7, %v8298_v8 }
0x1807   : > { %v7501_v18 = vmax.f32 %v7213_v39, 0.0 }
0x1808   : > { %8596 = vst [vmem:[%s11979_s22 + $0x720] sm:$0xff] %v8299_v44 }
0x180c   : > { %v7214_v2 = vpop.f32.mrf.mxu2 }
0x180d   : > { %v7215_v40 = vadd.f32 %v14724_v60, %v7214_v2  ;;  %v8300_v61 = vpop.f32.mrf.mxu3 }
0x180e   : > { %v8301_v22 = vadd.f32 %v14784_v7, %v8300_v61 }
0x180f   : > { %v7502_v27 = vmax.f32 %v7215_v40, 0.0 }
0x1810   : > { %8597 = vst [vmem:[%s11979_s22 + $0x728] sm:$0xff] %v8301_v22 }
0x1811   : > { %v7640_v41 = vpack.c.bf16 %v7502_v27, %v7501_v18 }
0x1813   : > { %8312 = vmatmul.bf16.gmra.mxu3 %v7640_v41 }
0x1815   : > { %v4027_v49 = vpop.permute.xlu0 %4026 }
0x1816   : > { %8931 = vmatmul.msk.bf16.gmra.mxu0 %vm1973_vm0, %v4027_v49 }
0x1826   : > { %v5045_v58 = vpop.f32.mrf.mxu0  ;;  %v7217_v17 = vpop.f32.mrf.mxu2 }
0x1827   : > { %v5046_v34 = vadd.f32 %v11754_v51, %v5045_v58  ;;  %v7218_v5 = vadd.f32 %v14724_v60, %v7217_v17 }
0x1829   : > { %v5313_v47 = vmul.f32 %v14644_v35, %v5046_v34  ;;  %v7503_v6 = vmax.f32 %v7218_v5, 0.0 }
0x182e   : > { %v5047_v12 = vpop.f32.mrf.mxu0  ;;  %v7219_v52 = vpop.f32.mrf.mxu2 }
0x182f   : > { %v5048_v26 = vadd.f32 %v11754_v51, %v5047_v12  ;;  %v7220_v0 = vadd.f32 %v14724_v60, %v7219_v52 }
0x1831   : > { %v5314_v53 = vmul.f32 %v14646_v37, %v5048_v26  ;;  %v7504_v32 = vmax.f32 %v7220_v0, 0.0 }
0x1833   : > { %v7641_v25 = vpack.c.bf16 %v7504_v32, %v7503_v6  ;;  %v5445_v28 = vpack.c.bf16 %v5314_v53, %v5313_v47 }
0x1834   : > { %v6131_v36 = vpop.f32.mrf.mxu1 }
0x1835   : > { %6145 = vmatmul.bf16.gmra.mxu1 %v5445_v28  ;;  %8317 = vmatmul.bf16.gmra.mxu3 %v7641_v25  ;;  %v6132_v30 = vadd.f32 %v14853_v10, %v6131_v36 }
0x1837   : > { %v6408_v62 = vmax.f32 %v6132_v30, 0.0 }
0x183b   : > { %v5050_v14 = vpop.f32.mrf.mxu0 }
0x183c   : > { %v6133_v46 = vpop.f32.mrf.mxu1  ;;  %v5051_v3 = vadd.f32 %v11754_v51, %v5050_v14 }
0x183d   : > { %v6134_v35 = vadd.f32 %v14853_v10, %v6133_v46 }
0x183e   : > { %v5315_v20 = vmul.f32 %v14664_v23, %v5051_v3 }
0x183f   : > { %v6409_v11 = vmax.f32 %v6134_v35, 0.0 }
0x1841   : > { %v6543_v59 = vpack.c.bf16 %v6409_v11, %v6408_v62 }
0x1843   : > { %7231 = vmatmul.bf16.gmra.mxu2 %v6543_v59  ;;  %v5052_v37 = vpop.f32.mrf.mxu0 }
0x1844   : > { %v5053_v57 = vadd.f32 %v11754_v51, %v5052_v37 }
0x1846   : > { %v8303_v45 = vpop.f32.mrf.mxu3  ;;  %v5316_v43 = vmul.f32 %v14666_v33, %v5053_v57 }
0x1847   : > { %v8304_v16 = vadd.f32 %v14784_v7, %v8303_v45 }
0x1848   : > { %v5446_v38 = vpack.c.bf16 %v5316_v43, %v5315_v20 }
0x1849   : > { %8598 = vst [vmem:[%s11979_s22 + $0x730] sm:$0xff] %v8304_v16 }
0x184a   : > { %6150 = vmatmul.bf16.gmra.mxu1 %v5446_v38 }
0x184e   : > { %v8305_v42 = vpop.f32.mrf.mxu3 }
0x184f   : > { %v8306_v4 = vadd.f32 %v14784_v7, %v8305_v42 }
0x1851   : > { %8599 = vst [vmem:[%s11979_s22 + $0x738] sm:$0xff] %v8306_v4 }
0x1858   : > { %v6136_v50 = vpop.f32.mrf.mxu1 }
0x1859   : > { %v6137_v9 = vadd.f32 %v14853_v10, %v6136_v50 }
0x185b   : > { %v6410_v13 = vmax.f32 %v6137_v9, 0.0 }
0x185f   : > { %v5055_v21 = vpop.f32.mrf.mxu0 }
0x1860   : > { %v6138_v23 = vpop.f32.mrf.mxu1  ;;  %v5056_v33 = vadd.f32 %v11754_v51, %v5055_v21 }
0x1861   : > { %v6139_v48 = vadd.f32 %v14853_v10, %v6138_v23 }
0x1862   : > { %v5317_v1 = vmul.f32 %v14697_v54, %v5056_v33 }
0x1863   : > { %v6411_v55 = vmax.f32 %v6139_v48, 0.0 }
0x1865   : > { %v6544_v29 = vpack.c.bf16 %v6411_v55, %v6410_v13 }
0x1867   : > { %v5057_v15 = vpop.f32.mrf.mxu0  ;;  %7236 = vmatmul.bf16.gmra.mxu2 %v6544_v29 }
0x1868   : > { %v5058_v24 = vadd.f32 %v11754_v51, %v5057_v15 }
0x186a   : > { %v5318_v63 = vmul.f32 %v14699_v19, %v5058_v24 }
0x186c   : > { %v5447_v8 = vpack.c.bf16 %v5318_v63, %v5317_v1 }
0x186e   : > { %6155 = vmatmul.bf16.gmra.mxu1 %v5447_v8  ;;  %v8308_v44 = vpop.f32.mrf.mxu3 }
0x186f   : > { %v8309_v39 = vadd.f32 %v14784_v7, %v8308_v44 }
0x1871   : > { %8600 = vst [vmem:[%s11979_s22 + $0x740] sm:$0xff] %v8309_v39  ;;  %v7222_v2 = vpop.f32.mrf.mxu2 }
0x1872   : > { %v7223_v22 = vadd.f32 %v14724_v60, %v7222_v2 }
0x1874   : > { %v7505_v27 = vmax.f32 %v7223_v22, 0.0 }
0x1876   : > { %v8310_v40 = vpop.f32.mrf.mxu3 }
0x1877   : > { %v8311_v61 = vadd.f32 %v14784_v7, %v8310_v40 }
0x1879   : > { %8601 = vst [vmem:[%s11979_s22 + $0x748] sm:$0xff] %v8311_v61  ;;  %v7224_v18 = vpop.f32.mrf.mxu2 }
0x187a   : > { %v7225_v54 = vadd.f32 %v14724_v60, %v7224_v18 }
0x187c   : > { %v7506_v41 = vmax.f32 %v7225_v54, 0.0 }
0x187e   : > { %v7642_v49 = vpack.c.bf16 %v7506_v41, %v7505_v27 }
0x1880   : > { %v6141_v19 = vpop.f32.mrf.mxu1  ;;  %8322 = vmatmul.bf16.gmra.mxu3 %v7642_v49 }
0x1881   : > { %v6142_v58 = vadd.f32 %v14853_v10, %v6141_v19 }
0x1883   : > { %v6412_v12 = vmax.f32 %v6142_v58, 0.0 }
0x1887   : > { %v7227_v17 = vpop.f32.mrf.mxu2 }
0x1888   : > { %v6143_v34 = vpop.f32.mrf.mxu1  ;;  %v7228_v47 = vadd.f32 %v14724_v60, %v7227_v17 }
0x1889   : > { %v6144_v5 = vadd.f32 %v14853_v10, %v6143_v34 }
0x188a   : > { %v7507_v6 = vmax.f32 %v7228_v47, 0.0  ;;  %v14925_v47 = vld [vmem:[#allocation11] ss:$0 sm:$0xff] }
0x188b   : > { %v6413_v52 = vmax.f32 %v6144_v5, 0.0 }
0x188d   : > { %v6545_v26 = vpack.c.bf16 %v6413_v52, %v6412_v12 }
0x188f   : > { %v7229_v0 = vpop.f32.mrf.mxu2  ;;  %7241 = vmatmul.bf16.gmra.mxu2 %v6545_v26 }
0x1890   : > { %v7230_v53 = vadd.f32 %v14724_v60, %v7229_v0 }
0x1892   : > { %v7508_v32 = vmax.f32 %v7230_v53, 0.0 }
0x1893   : > { %v5060_v25 = vpop.f32.mrf.mxu0 }
0x1894   : > { %v7643_v28 = vpack.c.bf16 %v7508_v32, %v7507_v6  ;;  %v5061_v14 = vadd.f32 %v11754_v51, %v5060_v25 }
0x1896   : > { %8327 = vmatmul.bf16.gmra.mxu3 %v7643_v28  ;;  %v8313_v36 = vpop.f32.mrf.mxu3  ;;  %v5319_v62 = vmul.f32 %v14720_v31, %v5061_v14 }
0x1897   : > { %v8314_v30 = vadd.f32 %v14784_v7, %v8313_v36 }
0x1899   : > { %8602 = vst [vmem:[%s11979_s22 + $0x750] sm:$0xff] %v8314_v30 }
0x189b   : > { %v5062_v46 = vpop.f32.mrf.mxu0 }
0x189c   : > { %v5063_v35 = vadd.f32 %v11754_v51, %v5062_v46 }
0x189e   : > { %v5320_v11 = vmul.f32 %v14722_v56, %v5063_v35  ;;  %v8315_v3 = vpop.f32.mrf.mxu3 }
0x189f   : > { %v8316_v59 = vadd.f32 %v14784_v7, %v8315_v3 }
0x18a0   : > { %v5448_v37 = vpack.c.bf16 %v5320_v11, %v5319_v62 }
0x18a1   : > { %8603 = vst [vmem:[%s11979_s22 + $0x758] sm:$0xff] %v8316_v59 }
0x18a2   : > { %6160 = vmatmul.bf16.gmra.mxu1 %v5448_v37 }
0x18b2   : > { %v6146_v20 = vpop.f32.mrf.mxu1 }
0x18b3   : > { %v6147_v57 = vadd.f32 %v14853_v10, %v6146_v20 }
0x18b5   : > { %v6414_v38 = vmax.f32 %v6147_v57, 0.0 }
0x18b8   : > { %v8318_v45 = vpop.f32.mrf.mxu3 }
0x18b9   : > { %v8319_v43 = vadd.f32 %v14784_v7, %v8318_v45 }
0x18ba   : > { %v6148_v16 = vpop.f32.mrf.mxu1 }
0x18bb   : > { %8604 = vst [vmem:[%s11979_s22 + $0x760] sm:$0xff] %v8319_v43  ;;  %v6149_v51 = vadd.f32 %v14853_v10, %v6148_v16 }
0x18bd   : > { %v6415_v31 = vmax.f32 %v6149_v51, 0.0 }
0x18bf   : > { %v6546_v56 = vpack.c.bf16 %v6415_v31, %v6414_v38 }
0x18c0   : > { %v8320_v42 = vpop.f32.mrf.mxu3 }
0x18c1   : > { %v8321_v4 = vadd.f32 %v14784_v7, %v8320_v42  ;;  %7246 = vmatmul.bf16.gmra.mxu2 %v6546_v56 }
0x18c3   : > { %8605 = vst [vmem:[%s11979_s22 + $0x768] sm:$0xff] %v8321_v4 }
0x18c6   : > { %v7232_v50 = vpop.f32.mrf.mxu2 }
0x18c7   : > { %v6151_v9 = vpop.f32.mrf.mxu1  ;;  %v7233_v23 = vadd.f32 %v14724_v60, %v7232_v50 }
0x18c8   : > { %v6152_v21 = vadd.f32 %v14853_v10, %v6151_v9 }
0x18c9   : > { %v7509_v15 = vmax.f32 %v7233_v23, 0.0 }
0x18ca   : > { %v6416_v33 = vmax.f32 %v6152_v21, 0.0 }
0x18ce   : > { %v7234_v48 = vpop.f32.mrf.mxu2 }
0x18cf   : > { %v7235_v13 = vadd.f32 %v14724_v60, %v7234_v48  ;;  %v6153_v55 = vpop.f32.mrf.mxu1 }
0x18d0   : > { %v6154_v29 = vadd.f32 %v14853_v10, %v6153_v55 }
0x18d1   : > { %v7510_v1 = vmax.f32 %v7235_v13, 0.0 }
0x18d2   : > { %v6417_v24 = vmax.f32 %v6154_v29, 0.0 }
0x18d3   : > { %v7644_v63 = vpack.c.bf16 %v7510_v1, %v7509_v15 }
0x18d4   : > { %v6547_v8 = vpack.c.bf16 %v6417_v24, %v6416_v33 }
0x18d5   : > { %8332 = vmatmul.bf16.gmra.mxu3 %v7644_v63 }
0x18d6   : > { %7251 = vmatmul.bf16.gmra.mxu2 %v6547_v8 }
0x18ea   : > { %v7237_v44 = vpop.f32.mrf.mxu2 }
0x18eb   : > { %v6156_v39 = vpop.f32.mrf.mxu1  ;;  %v7238_v2 = vadd.f32 %v14724_v60, %v7237_v44 }
0x18ec   : > { %v6157_v40 = vadd.f32 %v14853_v10, %v6156_v39 }
0x18ed   : > { %v7511_v27 = vmax.f32 %v7238_v2, 0.0 }
0x18ee   : > { %v6418_v49 = vmax.f32 %v6157_v40, 0.0 }
0x18f2   : > { %v7239_v61 = vpop.f32.mrf.mxu2 }
0x18f3   : > { %v7240_v22 = vadd.f32 %v14724_v60, %v7239_v61  ;;  %v6158_v18 = vpop.f32.mrf.mxu1 }
0x18f4   : > { %v6159_v54 = vadd.f32 %v14853_v10, %v6158_v18 }
0x18f5   : > { %v7512_v41 = vmax.f32 %v7240_v22, 0.0 }
0x18f6   : > { %v6419_v19 = vmax.f32 %v6159_v54, 0.0 }
0x18f7   : > { %v7645_v58 = vpack.c.bf16 %v7512_v41, %v7511_v27 }
0x18f8   : > { %v6548_v17 = vpack.c.bf16 %v6419_v19, %v6418_v49 }
0x18f9   : > { %8337 = vmatmul.bf16.gmra.mxu3 %v7645_v58 }
0x18fa   : > { %7256 = vmatmul.bf16.gmra.mxu2 %v6548_v17 }
0x1903   : > { %v8323_v34 = vpop.f32.mrf.mxu3 }
0x1904   : > { %v8324_v5 = vadd.f32 %v14784_v7, %v8323_v34 }
0x1906   : > { %8606 = vst [vmem:[%s11979_s22 + $0x770] sm:$0xff] %v8324_v5 }
0x190b   : > { %v8325_v12 = vpop.f32.mrf.mxu3 }
0x190c   : > { %v8326_v60 = vadd.f32 %v14784_v7, %v8325_v12 }
0x190e   : > { %8607 = vst [vmem:[%s11979_s22 + $0x778] sm:$0xff] %v8326_v60 }
0x1912   : > { %v7242_v52 = vpop.f32.mrf.mxu2 }
0x1913   : > { %v7243_v26 = vadd.f32 %v14925_v47, %v7242_v52 }
0x1915   : > { %v7513_v25 = vmax.f32 %v7243_v26, 0.0 }
0x1919   : > { %v8328_v0 = vpop.f32.mrf.mxu3 }
0x191a   : > { %v8329_v6 = vadd.f32 %v14784_v7, %v8328_v0  ;;  %v7244_v53 = vpop.f32.mrf.mxu2 }
0x191b   : > { %v7245_v32 = vadd.f32 %v14925_v47, %v7244_v53 }
0x191c   : > { %8608 = vst [vmem:[%s11979_s22 + $0x780] sm:$0xff] %v8329_v6 }
0x191d   : > { %v7514_v28 = vmax.f32 %v7245_v32, 0.0 }
0x191f   : > { %v7646_v36 = vpack.c.bf16 %v7514_v28, %v7513_v25  ;;  %v6161_v30 = vpop.f32.mrf.mxu1 }
0x1920   : > { %v6162_v35 = vadd.f32 %v14853_v10, %v6161_v30 }
0x1921   : > { %v8330_v14 = vpop.f32.mrf.mxu3  ;;  %8342 = vmatmul.bf16.gmra.mxu3 %v7646_v36 }
0x1922   : > { %v8331_v46 = vadd.f32 %v14784_v7, %v8330_v14  ;;  %v6420_v3 = vmax.f32 %v6162_v35, 0.0 }
0x1924   : > { %8609 = vst [vmem:[%s11979_s22 + $0x788] sm:$0xff] %v8331_v46 }
0x1927   : > { %v6163_v62 = vpop.f32.mrf.mxu1 }
0x1928   : > { %v6164_v11 = vadd.f32 %v14853_v10, %v6163_v62 }
0x192a   : > { %v6421_v59 = vmax.f32 %v6164_v11, 0.0 }
0x192c   : > { %v6549_v37 = vpack.c.bf16 %v6421_v59, %v6420_v3 }
0x192e   : > { %7261 = vmatmul.bf16.gmra.mxu2 %v6549_v37 }
0x1944   : > { %v7247_v20 = vpop.f32.mrf.mxu2 }
0x1945   : > { %v7248_v57 = vadd.f32 %v14925_v47, %v7247_v20 }
0x1947   : > { %v7515_v43 = vmax.f32 %v7248_v57, 0.0 }
0x194c   : > { %v7249_v45 = vpop.f32.mrf.mxu2 }
0x194d   : > { %v7250_v16 = vadd.f32 %v14925_v47, %v7249_v45 }
0x194f   : > { %v7516_v38 = vmax.f32 %v7250_v16, 0.0 }
0x1951   : > { %v7647_v51 = vpack.c.bf16 %v7516_v38, %v7515_v43 }
0x1953   : > { %8347 = vmatmul.bf16.gmra.mxu3 %v7647_v51 }
0x1958   : > { %v8333_v31 = vpop.f32.mrf.mxu3 }
0x1959   : > { %v8334_v56 = vadd.f32 %v14784_v7, %v8333_v31  ;;  %v7252_v10 = vpop.f32.mrf.mxu2 }
0x195a   : > { %v7253_v42 = vadd.f32 %v14925_v47, %v7252_v10 }
0x195b   : > { %8610 = vst [vmem:[%s11979_s22 + $0x790] sm:$0xff] %v8334_v56 }
0x195c   : > { %v7517_v21 = vmax.f32 %v7253_v42, 0.0 }
0x1960   : > { %v8335_v4 = vpop.f32.mrf.mxu3 }
0x1961   : > { %v8336_v50 = vadd.f32 %v14784_v7, %v8335_v4  ;;  %v7254_v9 = vpop.f32.mrf.mxu2 }
0x1962   : > { %v7255_v23 = vadd.f32 %v14925_v47, %v7254_v9 }
0x1963   : > { %8611 = vst [vmem:[%s11979_s22 + $0x798] sm:$0xff] %v8336_v50 }
0x1964   : > { %v7518_v48 = vmax.f32 %v7255_v23, 0.0 }
0x1966   : > { %v7648_v13 = vpack.c.bf16 %v7518_v48, %v7517_v21 }
0x1968   : > { %8352 = vmatmul.bf16.gmra.mxu3 %v7648_v13 }
0x197c   : > { %v8338_v55 = vpop.f32.mrf.mxu3 }
0x197d   : > { %v8339_v33 = vadd.f32 %v14784_v7, %v8338_v55  ;;  %v7257_v29 = vpop.f32.mrf.mxu2 }
0x197e   : > { %v7258_v15 = vadd.f32 %v14925_v47, %v7257_v29 }
0x197f   : > { %8612 = vst [vmem:[%s11979_s22 + $0x7a0] sm:$0xff] %v8339_v33 }
0x1980   : > { %v7519_v44 = vmax.f32 %v7258_v15, 0.0 }
0x1984   : > { %v8340_v1 = vpop.f32.mrf.mxu3 }
0x1985   : > { %v8341_v24 = vadd.f32 %v14784_v7, %v8340_v1  ;;  %v7259_v63 = vpop.f32.mrf.mxu2 }
0x1986   : > { %v7260_v8 = vadd.f32 %v14925_v47, %v7259_v63 }
0x1987   : > { %8613 = vst [vmem:[%s11979_s22 + $0x7a8] sm:$0xff] %v8341_v24 }
0x1988   : > { %v7520_v39 = vmax.f32 %v7260_v8, 0.0 }
0x198a   : > { %v7649_v2 = vpack.c.bf16 %v7520_v39, %v7519_v44 }
0x198c   : > { %8357 = vmatmul.bf16.gmra.mxu3 %v7649_v2 }
0x19a4   : > { %v8343_v40 = vpop.f32.mrf.mxu3 }
0x19a5   : > { %v8344_v61 = vadd.f32 %v14784_v7, %v8343_v40 }
0x19a7   : > { %8614 = vst [vmem:[%s11979_s22 + $0x7b0] sm:$0xff] %v8344_v61 }
0x19ac   : > { %v8345_v22 = vpop.f32.mrf.mxu3 }
0x19ad   : > { %v8346_v18 = vadd.f32 %v14784_v7, %v8345_v22 }
0x19af   : > { %8615 = vst [vmem:[%s11979_s22 + $0x7b8] sm:$0xff] %v8346_v18 }
0x19b1   : > { %v7262_v54 = vpop.f32.mrf.mxu2 }
0x19b2   : > { %v7263_v27 = vadd.f32 %v14925_v47, %v7262_v54 }
0x19b4   : > { %v7521_v19 = vmax.f32 %v7263_v27, 0.0 }
0x19b9   : > { %v7264_v41 = vpop.f32.mrf.mxu2 }
0x19ba   : > { %v7265_v49 = vadd.f32 %v14925_v47, %v7264_v41 }
0x19bc   : > { %v7522_v58 = vmax.f32 %v7265_v49, 0.0 }
0x19be   : > { %v7650_v17 = vpack.c.bf16 %v7522_v58, %v7521_v19 }
0x19c0   : > { %8362 = vmatmul.bf16.gmra.mxu3 %v7650_v17 }
0x19d6   : > { %v8348_v34 = vpop.f32.mrf.mxu3 }
0x19d7   : > { %v8349_v5 = vadd.f32 %v14784_v7, %v8348_v34 }
0x19d9   : > { %8616 = vst [vmem:[%s11979_s22 + $0x7c0] sm:$0xff] %v8349_v5 }
0x19de   : > { %v8350_v12 = vpop.f32.mrf.mxu3 }
0x19df   : > { %v8351_v60 = vadd.f32 %v14784_v7, %v8350_v12 }
0x19e1   : > { %8617 = vst [vmem:[%s11979_s22 + $0x7c8] sm:$0xff] %v8351_v60 }
0x19eb   : > { %v8353_v52 = vpop.f32.mrf.mxu3 }
0x19ec   : > { %v8354_v47 = vadd.f32 %v14784_v7, %v8353_v52 }
0x19ee   : > { %8618 = vst [vmem:[%s11979_s22 + $0x7d0] sm:$0xff] %v8354_v47 }
0x19f3   : > { %v8355_v26 = vpop.f32.mrf.mxu3 }
0x19f4   : > { %v8356_v0 = vadd.f32 %v14784_v7, %v8355_v26 }
0x19f6   : > { %8619 = vst [vmem:[%s11979_s22 + $0x7d8] sm:$0xff] %v8356_v0 }
0x1a0f   : > { %v8358_v6 = vpop.f32.mrf.mxu3 }
0x1a10   : > { %v8359_v53 = vadd.f32 %v14784_v7, %v8358_v6 }
0x1a12   : > { %8620 = vst [vmem:[%s11979_s22 + $0x7e0] sm:$0xff] %v8359_v53 }
0x1a17   : > { %v8360_v32 = vpop.f32.mrf.mxu3 }
0x1a18   : > { %v8361_v25 = vadd.f32 %v14784_v7, %v8360_v32 }
0x1a1a   : > { %8621 = vst [vmem:[%s11979_s22 + $0x7e8] sm:$0xff] %v8361_v25 }
0x1a43   : > { %v8363_v28 = vpop.f32.mrf.mxu3 }
0x1a44   : > { %v8364_v36 = vadd.f32 %v14784_v7, %v8363_v28 }
0x1a46   : > { %8622 = vst [vmem:[%s11979_s22 + $0x7f0] sm:$0xff] %v8364_v36 }
0x1a4b   : > { %v8365_v30 = vpop.f32.mrf.mxu3 }
0x1a4c   : > { %v8366_v14 = vadd.f32 %v14784_v7, %v8365_v30 }
0x1a4e   : > { %8623 = vst [vmem:[%s11979_s22 + $0x7f8] sm:$0xff] %v8366_v14 }
0x1a4f   : > { %11278 = shalt.err (!%p11275_p9)
}
0x1a50   : > { %s11346_s16 = smov 128   ;;  %s11347_s22 = smov 8  }
0x1a51   : > { %9728 = dma.vmem_to_hbm [thread:$0]  (%p11498_p13), %s8638_s11, 32768, %s8640_s15, %s8625_s9, %s11346_s16, %s11346_s16, %s11347_s22  }
0x1a52 PF: > { %s8654_s19 = sand.u32 1, %s11321_s27   ;;  %p15028_p10 = scmp.ge.s32.totalorder %s11333_s30, 2 }
0x1a53   : > { %s8655_s23 = scalar_lea.sflag [#allocation4], %s8654_s19 }
0x1a54   : > { %p9757_p11 = pnand %p15028_p10, %p11503_p5 }
0x1a56   : > { %p9758_p0 = pneg %p9757_p11 }
0x1a58   : > { %11316 = dma.done.wait (%p9758_p0), %s8655_s23, 32768  }
0x1a59   : > { %11318 = vsyncadd (%p9758_p0), %s8655_s23, 4294934528  ;;  %p25_p2 = scmp.ge.s32.totalorder %s11478_s21, 4   ;;  %s15029_s27 = smov %s11325_s28 }
0x1a5a   : > { %s15030_s28 = smov %s11329_s29  ;;  %s15031_s29 = smov %s11490_s25 }
0x1a5b   : > { %s15032_s30 = smov %s11478_s21  ;;  %27 = sbr.rel (!%p25_p2) target bundleno = 12 (0xc), region = 125 }
0x1a60   :  { %8661 = vsyncpa [#allocation3], 1 }
0x1a61   :  { %8663 = vsyncpa [#allocation3 + $0x1], 1 }
0x1a62   :  { %8664 = vsyncpa [#allocation6], 1 }
0x1a63   :  { %8665 = vsyncpa [#allocation9], 1 }
0x1a64   :  { %8666 = vsyncpa [#allocation12], 1 }
0x1a65   :  { %8667 = vsyncpa [#allocation15], 1 }
0x1a66   :  { %8668 = vsyncpa [#allocation4], 1 }
0x1a67   :  { %8670 = vsyncpa [#allocation4 + $0x1], 1 }

</bundles_post_ra>
